<compile_context>
chip_gen: v5e
topology: v5e:2x2
jax: 0.10.0
libtpu: 0.0.40
codegen_flags: <defaults>
</compile_context>

<pallas_src>
import functools

import jax
import jax.numpy as jnp
from jax.experimental import pallas as pl
from jax.experimental.pallas import tpu as pltpu


def _conv_block_kernel(x_ref, w1_ref, b1_ref, w2_ref, b2_ref, mask_ref,
                       o_ref, ypad_ref, acc_ref, *,
                       H, W, negative_slope, eps, use_pn):
    """Fused ConvBlock (2x WSConv2d+LeakyReLU+PixelNorm) for one batch element.

    Flat "padded-row" layout: a padded (H+2, W+2, C) image is stored row-major
    as ((H+2)*(W+2) + 2, C) with one guard element at each end.  For tap
    (dy, dx) of a 3x3 conv, the operand for ALL wide output positions
    r = y*(W+2)+j (y in [0,H), j in [0,W+2)) is the contiguous slice
    starting at dy*(W+2)+dx of length M = H*(W+2).  Columns j=0 and j=W+1 of
    the result are throwaway (masked to zero between layers, sliced off by the
    wrapper at the end).

    x_ref    : (1, (H+2)*(W+2)+2, Cin)  f32  flat padded input (+guards)
    w1_ref   : (9, Cin, Cout)           f32  layer-1 per-tap weights (WS scale folded)
    b1_ref   : (1, Cout)                f32
    w2_ref   : (9, Cout, Cout)          f32  layer-2 per-tap weights
    b2_ref   : (1, Cout)                f32
    mask_ref : (M, 1)                   f32  1.0 on valid columns, 0.0 on pad cols
    o_ref    : (1, M, Cout)                  wide-layout output
    ypad_ref : ((H+2)*(W+2)+2, Cout)    f32  layer-2 flat padded activation
    acc_ref  : (M, Cout)                f32  per-tap matmul accumulator (reused)
    """
    Wp = W + 2
    M = H * Wp
    f32 = jnp.float32

    def conv3x3(load_tap, w_ref):
        # 9 per-tap matmuls (K = C) accumulated in the f32 VMEM accumulator.
        for t in range(9):
            dy, dx = divmod(t, 3)
            tap = load_tap(dy * Wp + dx)                 # (M, C) contiguous slice
            contrib = jax.lax.dot_general(
                tap, w_ref[t], (((1,), (0,)), ((), ())),
                preferred_element_type=f32)
            if t == 0:
                acc_ref[...] = contrib
            else:
                acc_ref[...] += contrib
        return acc_ref[...]

    def act(y, b):
        y = y + b
        y = jnp.maximum(y, negative_slope * y)           # LeakyReLU(0.2)
        if use_pn:                                       # PixelNorm over channels
            y = y * jax.lax.rsqrt(jnp.mean(y * y, axis=-1, keepdims=True) + eps)
        return y

    # ---- layer 1: WSConv2d(Cin -> Cout) + bias + LeakyReLU + PixelNorm ----
    y1 = act(conv3x3(lambda s: x_ref[0, pl.ds(s, M), :], w1_ref), b1_ref[...])
    y1 = y1 * mask_ref[...]          # zero the two pad columns of the wide rows

    # Build the layer-2 flat padded activation: zero top/bottom pad rows
    # (+guards) with two contiguous strips, then drop the masked wide
    # activation straight into padded rows 1..H with one contiguous store.
    cout = acc_ref.shape[-1]
    ypad_ref[pl.ds(0, Wp + 1), :] = jnp.zeros((Wp + 1, cout), f32)
    ypad_ref[pl.ds((H + 1) * Wp + 1, Wp + 1), :] = jnp.zeros((Wp + 1, cout), f32)
    ypad_ref[pl.ds(Wp + 1, M), :] = y1

    # ---- layer 2: WSConv2d(Cout -> Cout) + bias + LeakyReLU + PixelNorm ----
    y2 = act(conv3x3(lambda s: ypad_ref[pl.ds(s, M), :], w2_ref), b2_ref[...])
    o_ref[0] = y2.astype(o_ref.dtype)


def conv_block_forward(x_nchw, params, use_pixelnorm=True):
    """ConvBlock.forward. Input/output are NCHW (PyTorch convention)."""
    # TODO(synk): keep the surrounding model NHWC end-to-end so these
    #             transposes (full HBM copies) disappear.
    x = jnp.transpose(x_nchw, (0, 2, 3, 1)).astype(jnp.float32)   # NCHW -> NHWC
    B, H, W, cin = x.shape
    cout = params["w1"].shape[-1]
    Wp = W + 2
    Lp = (H + 2) * Wp
    M = H * Wp

    # Flat padded input with 1-element guards on the flat axis.  The zero pad
    # and reshape fuse with the transpose above into a single HBM copy; inside
    # the kernel every conv tap is then a plain contiguous slice.
    xflat = jnp.pad(x, ((0, 0), (1, 1), (1, 1), (0, 0))).reshape(B, Lp, cin)
    xflat = jnp.pad(xflat, ((0, 0), (1, 1), (0, 0)))              # (B, Lp+2, Cin)

    # Fold the equalized-LR scale into the weights (the conv is linear) and
    # pre-reshape to the per-tap layout (9, C, Cout).  Kept in f32 (see header).
    w1 = (params["w1"] * params["scale1"]).reshape(9, cin, cout).astype(jnp.float32)
    w2 = (params["w2"] * params["scale2"]).reshape(9, cout, cout).astype(jnp.float32)
    b1 = params["b1"].reshape(1, cout).astype(jnp.float32)
    b2 = params["b2"].reshape(1, cout).astype(jnp.float32)

    # Column-validity mask for the wide (H, W+2) row layout (built once here so
    # the kernel needs no iota/mod work).
    col = jnp.arange(Wp, dtype=jnp.int32)
    mask = jnp.tile(((col >= 1) & (col <= W)).astype(jnp.float32), H).reshape(M, 1)

    kernel = functools.partial(_conv_block_kernel, H=H, W=W,
                               negative_slope=0.2, eps=1e-8,
                               use_pn=use_pixelnorm)

    out = pl.pallas_call(
        kernel,
        out_shape=jax.ShapeDtypeStruct((B, M, cout), jnp.float32),
        grid=(B,),
        in_specs=[
            pl.BlockSpec((1, Lp + 2, cin), lambda b: (b, 0, 0)),   # flat padded x
            pl.BlockSpec((9, cin, cout), lambda b: (0, 0, 0)),     # w1 (constant)
            pl.BlockSpec((1, cout), lambda b: (0, 0)),             # b1
            pl.BlockSpec((9, cout, cout), lambda b: (0, 0, 0)),    # w2 (constant)
            pl.BlockSpec((1, cout), lambda b: (0, 0)),             # b2
            pl.BlockSpec((M, 1), lambda b: (0, 0)),                # column mask
        ],
        out_specs=pl.BlockSpec((1, M, cout), lambda b: (b, 0, 0)),
        scratch_shapes=[
            pltpu.VMEM((Lp + 2, cout), jnp.float32),   # layer-2 flat padded act
            pltpu.VMEM((M, cout), jnp.float32),        # per-tap f32 accumulator
        ],
        compiler_params=pltpu.CompilerParams(
            dimension_semantics=("parallel",),
            # Under v7x's 64 MiB physical VMEM; above v5e/v6e default scoped.
            vmem_limit_bytes=48 * 1024 * 1024),
    )(xflat, w1, b1, w2, b2, mask)

    out = out.reshape(B, H, Wp, cout)[:, :, 1:W + 1, :]   # drop pad columns
    return jnp.transpose(out, (0, 3, 1, 2))                # NHWC -> NCHW


def init_conv_block_params(key, in_channels, out_channels, gain=2):
    """Deterministic parameter init matching WSConv2d.__init__ shapes."""
    k1, k2 = jax.random.split(key)
    # PyTorch conv weight shape (Cout, Cin, 3, 3), normal_(mean=0, std=1).
    w1_oihw = jax.random.normal(k1, (out_channels, in_channels, 3, 3),
                                jnp.float32)
    w2_oihw = jax.random.normal(k2, (out_channels, out_channels, 3, 3),
                                jnp.float32)
    return {
        "w1": jnp.transpose(w1_oihw, (2, 3, 1, 0)),      # HWIO
        "b1": jnp.zeros((out_channels,), jnp.float32),
        "scale1": float((gain / (in_channels * 3 ** 2)) ** 0.5),
        "w2": jnp.transpose(w2_oihw, (2, 3, 1, 0)),      # HWIO
        "b2": jnp.zeros((out_channels,), jnp.float32),
        "scale2": float((gain / (out_channels * 3 ** 2)) ** 0.5),
    }


def _conv_block_reference(x_nchw, params, use_pixelnorm=True):
    """Pure-JAX f32 reference (mirrors the PyTorch forward) for validation."""
    def ws_conv(x, w_hwio, b, scale):
        w_oihw = jnp.transpose(w_hwio, (3, 2, 0, 1))
        y = jax.lax.conv_general_dilated(
            x * scale, w_oihw, (1, 1), ((1, 1), (1, 1)),
            dimension_numbers=("NCHW", "OIHW", "NCHW"),
            precision=jax.lax.Precision.HIGHEST)
        return y + b[None, :, None, None]

    def pixel_norm(x):
        return x / jnp.sqrt(jnp.mean(x * x, axis=1, keepdims=True) + 1e-8)

    def leaky(x):
        return jnp.where(x > 0, x, 0.2 * x)

    x = leaky(ws_conv(x_nchw, params["w1"], params["b1"], params["scale1"]))
    if use_pixelnorm:
        x = pixel_norm(x)
    x = leaky(ws_conv(x, params["w2"], params["b2"], params["scale2"]))
    if use_pixelnorm:
        x = pixel_norm(x)
    return x


if __name__ == "__main__":
    key = jax.random.PRNGKey(0)
    k_x, k_p = jax.random.split(key)

    B, Cin, Cout, H, W = 2, 4, 8, 16, 16
    x = jax.random.normal(k_x, (B, Cin, H, W), jnp.float32)
    params = init_conv_block_params(k_p, Cin, Cout)

    for use_pn in (True, False):
        out = conv_block_forward(x, params, use_pixelnorm=use_pn)
        out = jax.block_until_ready(out)
        ref = _conv_block_reference(x, params, use_pixelnorm=use_pn)
        assert out.shape == (B, Cout, H, W), out.shape
        # f32 operands with f32 accumulation track the f32 reference to ~1e-5;
        # 2e-2 is kept only as headroom for backend matmul-pass differences.
        assert jnp.allclose(out, ref, rtol=2e-2, atol=2e-2), (
            float(jnp.max(jnp.abs(out - ref))))

    print("KERNEL_OK")
</pallas_src>

<mosaic_0001>
module attributes {stable_mosaic.version = 11 : i64} {
  func.func @_conv_block_kernel(%arg0: i32, %arg1: memref<1x326x4xf32, #tpu.memory_space<vmem>>, %arg2: memref<9x4x8xf32, #tpu.memory_space<vmem>>, %arg3: memref<1x8xf32, #tpu.memory_space<vmem>>, %arg4: memref<9x8x8xf32, #tpu.memory_space<vmem>>, %arg5: memref<1x8xf32, #tpu.memory_space<vmem>>, %arg6: memref<288x1xf32, #tpu.memory_space<vmem>>, %arg7: memref<1x288x8xf32, #tpu.memory_space<vmem>>, %arg8: memref<326x8xf32, #tpu.memory_space<vmem>>, %arg9: memref<288x8xf32, #tpu.memory_space<vmem>>) attributes {dimension_semantics = [#tpu.dimension_semantics<parallel>], iteration_bounds = array<i64: 2>, scalar_prefetch = 0 : i64, scratch_operands = 2 : i64, tpu.core_type = #tpu.core_type<tc>, window_params = [{transform_indices = @transform_0, window_bounds = array<i64: 1, 326, 4>}, {pipeline_mode = #tpu.pipeline_mode<synchronous>, transform_indices = @transform_1, window_bounds = array<i64: 9, 4, 8>}, {pipeline_mode = #tpu.pipeline_mode<synchronous>, transform_indices = @transform_2, window_bounds = array<i64: 1, 8>}, {pipeline_mode = #tpu.pipeline_mode<synchronous>, transform_indices = @transform_3, window_bounds = array<i64: 9, 8, 8>}, {pipeline_mode = #tpu.pipeline_mode<synchronous>, transform_indices = @transform_4, window_bounds = array<i64: 1, 8>}, {pipeline_mode = #tpu.pipeline_mode<synchronous>, transform_indices = @transform_5, window_bounds = array<i64: 288, 1>}, {transform_indices = @transform_6, window_bounds = array<i64: 1, 288, 8>}]} {
    %c0 = arith.constant 0 : index
    %c0_0 = arith.constant 0 : index
    %c0_1 = arith.constant 0 : index
    %0 = vector.load %arg1[%c0, %c0_0, %c0_1] : memref<1x326x4xf32, #tpu.memory_space<vmem>>, vector<1x288x4xf32>
    %1 = vector.shape_cast %0 : vector<1x288x4xf32> to vector<288x4xf32>
    %c0_2 = arith.constant 0 : index
    %c0_3 = arith.constant 0 : index
    %c0_4 = arith.constant 0 : index
    %2 = vector.load %arg2[%c0_2, %c0_3, %c0_4] : memref<9x4x8xf32, #tpu.memory_space<vmem>>, vector<1x4x8xf32>
    %3 = vector.shape_cast %2 : vector<1x4x8xf32> to vector<4x8xf32>
    %cst = arith.constant dense<0.000000e+00> : vector<288x8xf32>
    %4 = tpu.matmul %1, %3, %cst {dimension_numbers = #tpu.dot_dimension_numbers<[1], [0], [0], [1], [0, 0, 1, 1], [], []>} : vector<288x4xf32>, vector<4x8xf32>, vector<288x8xf32> -> vector<288x8xf32>
    %c0_5 = arith.constant 0 : index
    %c0_6 = arith.constant 0 : index
    %5 = vector.load %arg9[%c0_5, %c0_6] : memref<288x8xf32, #tpu.memory_space<vmem>>, vector<288x8xf32>
    tpu.vector_store %arg9[%c0_5, %c0_6], %4 {strides = array<i32>} : memref<288x8xf32, #tpu.memory_space<vmem>>, vector<288x8xf32>,
    %c0_7 = arith.constant 0 : index
    %c1 = arith.constant 1 : index
    %c0_8 = arith.constant 0 : index
    %6 = vector.load %arg1[%c0_7, %c1, %c0_8] : memref<1x326x4xf32, #tpu.memory_space<vmem>>, vector<1x288x4xf32>
    %7 = vector.shape_cast %6 : vector<1x288x4xf32> to vector<288x4xf32>
    %c1_9 = arith.constant 1 : index
    %c0_10 = arith.constant 0 : index
    %c0_11 = arith.constant 0 : index
    %8 = vector.load %arg2[%c1_9, %c0_10, %c0_11] : memref<9x4x8xf32, #tpu.memory_space<vmem>>, vector<1x4x8xf32>
    %9 = vector.shape_cast %8 : vector<1x4x8xf32> to vector<4x8xf32>
    %cst_12 = arith.constant dense<0.000000e+00> : vector<288x8xf32>
    %10 = tpu.matmul %7, %9, %cst_12 {dimension_numbers = #tpu.dot_dimension_numbers<[1], [0], [0], [1], [0, 0, 1, 1], [], []>} : vector<288x4xf32>, vector<4x8xf32>, vector<288x8xf32> -> vector<288x8xf32>
    %c0_13 = arith.constant 0 : index
    %c0_14 = arith.constant 0 : index
    %11 = vector.load %arg9[%c0_13, %c0_14] : memref<288x8xf32, #tpu.memory_space<vmem>>, vector<288x8xf32>
    %12 = arith.addf %11, %10 : vector<288x8xf32>
    %c0_15 = arith.constant 0 : index
    %c0_16 = arith.constant 0 : index
    %13 = vector.load %arg9[%c0_15, %c0_16] : memref<288x8xf32, #tpu.memory_space<vmem>>, vector<288x8xf32>
    tpu.vector_store %arg9[%c0_15, %c0_16], %12 {strides = array<i32>} : memref<288x8xf32, #tpu.memory_space<vmem>>, vector<288x8xf32>,
    %c0_17 = arith.constant 0 : index
    %c2 = arith.constant 2 : index
    %c0_18 = arith.constant 0 : index
    %14 = vector.load %arg1[%c0_17, %c2, %c0_18] : memref<1x326x4xf32, #tpu.memory_space<vmem>>, vector<1x288x4xf32>
    %15 = vector.shape_cast %14 : vector<1x288x4xf32> to vector<288x4xf32>
    %c2_19 = arith.constant 2 : index
    %c0_20 = arith.constant 0 : index
    %c0_21 = arith.constant 0 : index
    %16 = vector.load %arg2[%c2_19, %c0_20, %c0_21] : memref<9x4x8xf32, #tpu.memory_space<vmem>>, vector<1x4x8xf32>
    %17 = vector.shape_cast %16 : vector<1x4x8xf32> to vector<4x8xf32>
    %cst_22 = arith.constant dense<0.000000e+00> : vector<288x8xf32>
    %18 = tpu.matmul %15, %17, %cst_22 {dimension_numbers = #tpu.dot_dimension_numbers<[1], [0], [0], [1], [0, 0, 1, 1], [], []>} : vector<288x4xf32>, vector<4x8xf32>, vector<288x8xf32> -> vector<288x8xf32>
    %c0_23 = arith.constant 0 : index
    %c0_24 = arith.constant 0 : index
    %19 = vector.load %arg9[%c0_23, %c0_24] : memref<288x8xf32, #tpu.memory_space<vmem>>, vector<288x8xf32>
    %20 = arith.addf %19, %18 : vector<288x8xf32>
    %c0_25 = arith.constant 0 : index
    %c0_26 = arith.constant 0 : index
    %21 = vector.load %arg9[%c0_25, %c0_26] : memref<288x8xf32, #tpu.memory_space<vmem>>, vector<288x8xf32>
    tpu.vector_store %arg9[%c0_25, %c0_26], %20 {strides = array<i32>} : memref<288x8xf32, #tpu.memory_space<vmem>>, vector<288x8xf32>,
    %c0_27 = arith.constant 0 : index
    %c18 = arith.constant 18 : index
    %c0_28 = arith.constant 0 : index
    %22 = vector.load %arg1[%c0_27, %c18, %c0_28] : memref<1x326x4xf32, #tpu.memory_space<vmem>>, vector<1x288x4xf32>
    %23 = vector.shape_cast %22 : vector<1x288x4xf32> to vector<288x4xf32>
    %c3 = arith.constant 3 : index
    %c0_29 = arith.constant 0 : index
    %c0_30 = arith.constant 0 : index
    %24 = vector.load %arg2[%c3, %c0_29, %c0_30] : memref<9x4x8xf32, #tpu.memory_space<vmem>>, vector<1x4x8xf32>
    %25 = vector.shape_cast %24 : vector<1x4x8xf32> to vector<4x8xf32>
    %cst_31 = arith.constant dense<0.000000e+00> : vector<288x8xf32>
    %26 = tpu.matmul %23, %25, %cst_31 {dimension_numbers = #tpu.dot_dimension_numbers<[1], [0], [0], [1], [0, 0, 1, 1], [], []>} : vector<288x4xf32>, vector<4x8xf32>, vector<288x8xf32> -> vector<288x8xf32>
    %c0_32 = arith.constant 0 : index
    %c0_33 = arith.constant 0 : index
    %27 = vector.load %arg9[%c0_32, %c0_33] : memref<288x8xf32, #tpu.memory_space<vmem>>, vector<288x8xf32>
    %28 = arith.addf %27, %26 : vector<288x8xf32>
    %c0_34 = arith.constant 0 : index
    %c0_35 = arith.constant 0 : index
    %29 = vector.load %arg9[%c0_34, %c0_35] : memref<288x8xf32, #tpu.memory_space<vmem>>, vector<288x8xf32>
    tpu.vector_store %arg9[%c0_34, %c0_35], %28 {strides = array<i32>} : memref<288x8xf32, #tpu.memory_space<vmem>>, vector<288x8xf32>,
    %c0_36 = arith.constant 0 : index
    %c19 = arith.constant 19 : index
    %c0_37 = arith.constant 0 : index
    %30 = vector.load %arg1[%c0_36, %c19, %c0_37] : memref<1x326x4xf32, #tpu.memory_space<vmem>>, vector<1x288x4xf32>
    %31 = vector.shape_cast %30 : vector<1x288x4xf32> to vector<288x4xf32>
    %c4 = arith.constant 4 : index
    %c0_38 = arith.constant 0 : index
    %c0_39 = arith.constant 0 : index
    %32 = vector.load %arg2[%c4, %c0_38, %c0_39] : memref<9x4x8xf32, #tpu.memory_space<vmem>>, vector<1x4x8xf32>
    %33 = vector.shape_cast %32 : vector<1x4x8xf32> to vector<4x8xf32>
    %cst_40 = arith.constant dense<0.000000e+00> : vector<288x8xf32>
    %34 = tpu.matmul %31, %33, %cst_40 {dimension_numbers = #tpu.dot_dimension_numbers<[1], [0], [0], [1], [0, 0, 1, 1], [], []>} : vector<288x4xf32>, vector<4x8xf32>, vector<288x8xf32> -> vector<288x8xf32>
    %c0_41 = arith.constant 0 : index
    %c0_42 = arith.constant 0 : index
    %35 = vector.load %arg9[%c0_41, %c0_42] : memref<288x8xf32, #tpu.memory_space<vmem>>, vector<288x8xf32>
    %36 = arith.addf %35, %34 : vector<288x8xf32>
    %c0_43 = arith.constant 0 : index
    %c0_44 = arith.constant 0 : index
    %37 = vector.load %arg9[%c0_43, %c0_44] : memref<288x8xf32, #tpu.memory_space<vmem>>, vector<288x8xf32>
    tpu.vector_store %arg9[%c0_43, %c0_44], %36 {strides = array<i32>} : memref<288x8xf32, #tpu.memory_space<vmem>>, vector<288x8xf32>,
    %c0_45 = arith.constant 0 : index
    %c20 = arith.constant 20 : index
    %c0_46 = arith.constant 0 : index
    %38 = vector.load %arg1[%c0_45, %c20, %c0_46] : memref<1x326x4xf32, #tpu.memory_space<vmem>>, vector<1x288x4xf32>
    %39 = vector.shape_cast %38 : vector<1x288x4xf32> to vector<288x4xf32>
    %c5 = arith.constant 5 : index
    %c0_47 = arith.constant 0 : index
    %c0_48 = arith.constant 0 : index
    %40 = vector.load %arg2[%c5, %c0_47, %c0_48] : memref<9x4x8xf32, #tpu.memory_space<vmem>>, vector<1x4x8xf32>
    %41 = vector.shape_cast %40 : vector<1x4x8xf32> to vector<4x8xf32>
    %cst_49 = arith.constant dense<0.000000e+00> : vector<288x8xf32>
    %42 = tpu.matmul %39, %41, %cst_49 {dimension_numbers = #tpu.dot_dimension_numbers<[1], [0], [0], [1], [0, 0, 1, 1], [], []>} : vector<288x4xf32>, vector<4x8xf32>, vector<288x8xf32> -> vector<288x8xf32>
    %c0_50 = arith.constant 0 : index
    %c0_51 = arith.constant 0 : index
    %43 = vector.load %arg9[%c0_50, %c0_51] : memref<288x8xf32, #tpu.memory_space<vmem>>, vector<288x8xf32>
    %44 = arith.addf %43, %42 : vector<288x8xf32>
    %c0_52 = arith.constant 0 : index
    %c0_53 = arith.constant 0 : index
    %45 = vector.load %arg9[%c0_52, %c0_53] : memref<288x8xf32, #tpu.memory_space<vmem>>, vector<288x8xf32>
    tpu.vector_store %arg9[%c0_52, %c0_53], %44 {strides = array<i32>} : memref<288x8xf32, #tpu.memory_space<vmem>>, vector<288x8xf32>,
    %c0_54 = arith.constant 0 : index
    %c36 = arith.constant 36 : index
    %c0_55 = arith.constant 0 : index
    %46 = vector.load %arg1[%c0_54, %c36, %c0_55] : memref<1x326x4xf32, #tpu.memory_space<vmem>>, vector<1x288x4xf32>
    %47 = vector.shape_cast %46 : vector<1x288x4xf32> to vector<288x4xf32>
    %c6 = arith.constant 6 : index
    %c0_56 = arith.constant 0 : index
    %c0_57 = arith.constant 0 : index
    %48 = vector.load %arg2[%c6, %c0_56, %c0_57] : memref<9x4x8xf32, #tpu.memory_space<vmem>>, vector<1x4x8xf32>
    %49 = vector.shape_cast %48 : vector<1x4x8xf32> to vector<4x8xf32>
    %cst_58 = arith.constant dense<0.000000e+00> : vector<288x8xf32>
    %50 = tpu.matmul %47, %49, %cst_58 {dimension_numbers = #tpu.dot_dimension_numbers<[1], [0], [0], [1], [0, 0, 1, 1], [], []>} : vector<288x4xf32>, vector<4x8xf32>, vector<288x8xf32> -> vector<288x8xf32>
    %c0_59 = arith.constant 0 : index
    %c0_60 = arith.constant 0 : index
    %51 = vector.load %arg9[%c0_59, %c0_60] : memref<288x8xf32, #tpu.memory_space<vmem>>, vector<288x8xf32>
    %52 = arith.addf %51, %50 : vector<288x8xf32>
    %c0_61 = arith.constant 0 : index
    %c0_62 = arith.constant 0 : index
    %53 = vector.load %arg9[%c0_61, %c0_62] : memref<288x8xf32, #tpu.memory_space<vmem>>, vector<288x8xf32>
    tpu.vector_store %arg9[%c0_61, %c0_62], %52 {strides = array<i32>} : memref<288x8xf32, #tpu.memory_space<vmem>>, vector<288x8xf32>,
    %c0_63 = arith.constant 0 : index
    %c37 = arith.constant 37 : index
    %c0_64 = arith.constant 0 : index
    %54 = vector.load %arg1[%c0_63, %c37, %c0_64] : memref<1x326x4xf32, #tpu.memory_space<vmem>>, vector<1x288x4xf32>
    %55 = vector.shape_cast %54 : vector<1x288x4xf32> to vector<288x4xf32>
    %c7 = arith.constant 7 : index
    %c0_65 = arith.constant 0 : index
    %c0_66 = arith.constant 0 : index
    %56 = vector.load %arg2[%c7, %c0_65, %c0_66] : memref<9x4x8xf32, #tpu.memory_space<vmem>>, vector<1x4x8xf32>
    %57 = vector.shape_cast %56 : vector<1x4x8xf32> to vector<4x8xf32>
    %cst_67 = arith.constant dense<0.000000e+00> : vector<288x8xf32>
    %58 = tpu.matmul %55, %57, %cst_67 {dimension_numbers = #tpu.dot_dimension_numbers<[1], [0], [0], [1], [0, 0, 1, 1], [], []>} : vector<288x4xf32>, vector<4x8xf32>, vector<288x8xf32> -> vector<288x8xf32>
    %c0_68 = arith.constant 0 : index
    %c0_69 = arith.constant 0 : index
    %59 = vector.load %arg9[%c0_68, %c0_69] : memref<288x8xf32, #tpu.memory_space<vmem>>, vector<288x8xf32>
    %60 = arith.addf %59, %58 : vector<288x8xf32>
    %c0_70 = arith.constant 0 : index
    %c0_71 = arith.constant 0 : index
    %61 = vector.load %arg9[%c0_70, %c0_71] : memref<288x8xf32, #tpu.memory_space<vmem>>, vector<288x8xf32>
    tpu.vector_store %arg9[%c0_70, %c0_71], %60 {strides = array<i32>} : memref<288x8xf32, #tpu.memory_space<vmem>>, vector<288x8xf32>,
    %c0_72 = arith.constant 0 : index
    %c38 = arith.constant 38 : index
    %c0_73 = arith.constant 0 : index
    %62 = vector.load %arg1[%c0_72, %c38, %c0_73] : memref<1x326x4xf32, #tpu.memory_space<vmem>>, vector<1x288x4xf32>
    %63 = vector.shape_cast %62 : vector<1x288x4xf32> to vector<288x4xf32>
    %c8 = arith.constant 8 : index
    %c0_74 = arith.constant 0 : index
    %c0_75 = arith.constant 0 : index
    %64 = vector.load %arg2[%c8, %c0_74, %c0_75] : memref<9x4x8xf32, #tpu.memory_space<vmem>>, vector<1x4x8xf32>
    %65 = vector.shape_cast %64 : vector<1x4x8xf32> to vector<4x8xf32>
    %cst_76 = arith.constant dense<0.000000e+00> : vector<288x8xf32>
    %66 = tpu.matmul %63, %65, %cst_76 {dimension_numbers = #tpu.dot_dimension_numbers<[1], [0], [0], [1], [0, 0, 1, 1], [], []>} : vector<288x4xf32>, vector<4x8xf32>, vector<288x8xf32> -> vector<288x8xf32>
    %c0_77 = arith.constant 0 : index
    %c0_78 = arith.constant 0 : index
    %67 = vector.load %arg9[%c0_77, %c0_78] : memref<288x8xf32, #tpu.memory_space<vmem>>, vector<288x8xf32>
    %68 = arith.addf %67, %66 : vector<288x8xf32>
    %c0_79 = arith.constant 0 : index
    %c0_80 = arith.constant 0 : index
    %69 = vector.load %arg9[%c0_79, %c0_80] : memref<288x8xf32, #tpu.memory_space<vmem>>, vector<288x8xf32>
    tpu.vector_store %arg9[%c0_79, %c0_80], %68 {strides = array<i32>} : memref<288x8xf32, #tpu.memory_space<vmem>>, vector<288x8xf32>,
    %c0_81 = arith.constant 0 : index
    %c0_82 = arith.constant 0 : index
    %70 = vector.load %arg9[%c0_81, %c0_82] : memref<288x8xf32, #tpu.memory_space<vmem>>, vector<288x8xf32>
    %c0_83 = arith.constant 0 : index
    %c0_84 = arith.constant 0 : index
    %71 = vector.load %arg3[%c0_83, %c0_84] : memref<1x8xf32, #tpu.memory_space<vmem>>, vector<1x8xf32>
    %72 = vector.broadcast %71 : vector<1x8xf32> to vector<288x8xf32>
    %73 = arith.addf %70, %72 : vector<288x8xf32>
    %cst_85 = arith.constant 2.000000e-01 : f32
    %74 = vector.broadcast %cst_85 : f32 to vector<288x8xf32>
    %75 = arith.mulf %74, %73 : vector<288x8xf32>
    %76 = arith.maximumf %73, %75 : vector<288x8xf32>
    %77 = arith.mulf %76, %76 : vector<288x8xf32>
    %cst_86 = arith.constant dense<0.000000e+00> : vector<288xf32>
    %78 = vector.multi_reduction <add>, %77, %cst_86 [1] : vector<288x8xf32> to vector<288xf32>
    %79 = vector.shape_cast %78 : vector<288xf32> to vector<288x1xf32>
    %cst_87 = arith.constant 8.000000e+00 : f32
    %80 = vector.broadcast %cst_87 : f32 to vector<288x1xf32>
    %81 = arith.divf %79, %80 : vector<288x1xf32>
    %cst_88 = arith.constant 9.99999993E-9 : f32
    %82 = vector.broadcast %cst_88 : f32 to vector<288x1xf32>
    %83 = arith.addf %81, %82 : vector<288x1xf32>
    %84 = math.rsqrt %83 : vector<288x1xf32>
    %85 = vector.broadcast %84 : vector<288x1xf32> to vector<288x8xf32>
    %86 = arith.mulf %76, %85 : vector<288x8xf32>
    %c0_89 = arith.constant 0 : index
    %c0_90 = arith.constant 0 : index
    %87 = vector.load %arg6[%c0_89, %c0_90] : memref<288x1xf32, #tpu.memory_space<vmem>>, vector<288x1xf32>
    %88 = vector.broadcast %87 : vector<288x1xf32> to vector<288x8xf32>
    %89 = arith.mulf %86, %88 : vector<288x8xf32>
    %cst_91 = arith.constant 0.000000e+00 : f32
    %90 = vector.broadcast %cst_91 : f32 to vector<19x8xf32>
    %c0_92 = arith.constant 0 : index
    %c0_93 = arith.constant 0 : index
    %91 = vector.load %arg8[%c0_92, %c0_93] : memref<326x8xf32, #tpu.memory_space<vmem>>, vector<19x8xf32>
    tpu.vector_store %arg8[%c0_92, %c0_93], %90 {strides = array<i32>} : memref<326x8xf32, #tpu.memory_space<vmem>>, vector<19x8xf32>,
    %cst_94 = arith.constant 0.000000e+00 : f32
    %92 = vector.broadcast %cst_94 : f32 to vector<19x8xf32>
    %c307 = arith.constant 307 : index
    %c0_95 = arith.constant 0 : index
    %93 = vector.load %arg8[%c307, %c0_95] : memref<326x8xf32, #tpu.memory_space<vmem>>, vector<19x8xf32>
    tpu.vector_store %arg8[%c307, %c0_95], %92 {strides = array<i32>} : memref<326x8xf32, #tpu.memory_space<vmem>>, vector<19x8xf32>,
    %c19_96 = arith.constant 19 : index
    %c0_97 = arith.constant 0 : index
    %94 = vector.load %arg8[%c19_96, %c0_97] : memref<326x8xf32, #tpu.memory_space<vmem>>, vector<288x8xf32>
    tpu.vector_store %arg8[%c19_96, %c0_97], %89 {strides = array<i32>} : memref<326x8xf32, #tpu.memory_space<vmem>>, vector<288x8xf32>,
    %c0_98 = arith.constant 0 : index
    %c0_99 = arith.constant 0 : index
    %95 = vector.load %arg8[%c0_98, %c0_99] : memref<326x8xf32, #tpu.memory_space<vmem>>, vector<288x8xf32>
    %c0_100 = arith.constant 0 : index
    %c0_101 = arith.constant 0 : index
    %c0_102 = arith.constant 0 : index
    %96 = vector.load %arg4[%c0_100, %c0_101, %c0_102] : memref<9x8x8xf32, #tpu.memory_space<vmem>>, vector<1x8x8xf32>
    %97 = vector.shape_cast %96 : vector<1x8x8xf32> to vector<8x8xf32>
    %cst_103 = arith.constant dense<0.000000e+00> : vector<288x8xf32>
    %98 = tpu.matmul %95, %97, %cst_103 {dimension_numbers = #tpu.dot_dimension_numbers<[1], [0], [0], [1], [0, 0, 1, 1], [], []>} : vector<288x8xf32>, vector<8x8xf32>, vector<288x8xf32> -> vector<288x8xf32>
    %c0_104 = arith.constant 0 : index
    %c0_105 = arith.constant 0 : index
    %99 = vector.load %arg9[%c0_104, %c0_105] : memref<288x8xf32, #tpu.memory_space<vmem>>, vector<288x8xf32>
    tpu.vector_store %arg9[%c0_104, %c0_105], %98 {strides = array<i32>} : memref<288x8xf32, #tpu.memory_space<vmem>>, vector<288x8xf32>,
    %c1_106 = arith.constant 1 : index
    %c0_107 = arith.constant 0 : index
    %100 = vector.load %arg8[%c1_106, %c0_107] : memref<326x8xf32, #tpu.memory_space<vmem>>, vector<288x8xf32>
    %c1_108 = arith.constant 1 : index
    %c0_109 = arith.constant 0 : index
    %c0_110 = arith.constant 0 : index
    %101 = vector.load %arg4[%c1_108, %c0_109, %c0_110] : memref<9x8x8xf32, #tpu.memory_space<vmem>>, vector<1x8x8xf32>
    %102 = vector.shape_cast %101 : vector<1x8x8xf32> to vector<8x8xf32>
    %cst_111 = arith.constant dense<0.000000e+00> : vector<288x8xf32>
    %103 = tpu.matmul %100, %102, %cst_111 {dimension_numbers = #tpu.dot_dimension_numbers<[1], [0], [0], [1], [0, 0, 1, 1], [], []>} : vector<288x8xf32>, vector<8x8xf32>, vector<288x8xf32> -> vector<288x8xf32>
    %c0_112 = arith.constant 0 : index
    %c0_113 = arith.constant 0 : index
    %104 = vector.load %arg9[%c0_112, %c0_113] : memref<288x8xf32, #tpu.memory_space<vmem>>, vector<288x8xf32>
    %105 = arith.addf %104, %103 : vector<288x8xf32>
    %c0_114 = arith.constant 0 : index
    %c0_115 = arith.constant 0 : index
    %106 = vector.load %arg9[%c0_114, %c0_115] : memref<288x8xf32, #tpu.memory_space<vmem>>, vector<288x8xf32>
    tpu.vector_store %arg9[%c0_114, %c0_115], %105 {strides = array<i32>} : memref<288x8xf32, #tpu.memory_space<vmem>>, vector<288x8xf32>,
    %c2_116 = arith.constant 2 : index
    %c0_117 = arith.constant 0 : index
    %107 = vector.load %arg8[%c2_116, %c0_117] : memref<326x8xf32, #tpu.memory_space<vmem>>, vector<288x8xf32>
    %c2_118 = arith.constant 2 : index
    %c0_119 = arith.constant 0 : index
    %c0_120 = arith.constant 0 : index
    %108 = vector.load %arg4[%c2_118, %c0_119, %c0_120] : memref<9x8x8xf32, #tpu.memory_space<vmem>>, vector<1x8x8xf32>
    %109 = vector.shape_cast %108 : vector<1x8x8xf32> to vector<8x8xf32>
    %cst_121 = arith.constant dense<0.000000e+00> : vector<288x8xf32>
    %110 = tpu.matmul %107, %109, %cst_121 {dimension_numbers = #tpu.dot_dimension_numbers<[1], [0], [0], [1], [0, 0, 1, 1], [], []>} : vector<288x8xf32>, vector<8x8xf32>, vector<288x8xf32> -> vector<288x8xf32>
    %c0_122 = arith.constant 0 : index
    %c0_123 = arith.constant 0 : index
    %111 = vector.load %arg9[%c0_122, %c0_123] : memref<288x8xf32, #tpu.memory_space<vmem>>, vector<288x8xf32>
    %112 = arith.addf %111, %110 : vector<288x8xf32>
    %c0_124 = arith.constant 0 : index
    %c0_125 = arith.constant 0 : index
    %113 = vector.load %arg9[%c0_124, %c0_125] : memref<288x8xf32, #tpu.memory_space<vmem>>, vector<288x8xf32>
    tpu.vector_store %arg9[%c0_124, %c0_125], %112 {strides = array<i32>} : memref<288x8xf32, #tpu.memory_space<vmem>>, vector<288x8xf32>,
    %c18_126 = arith.constant 18 : index
    %c0_127 = arith.constant 0 : index
    %114 = vector.load %arg8[%c18_126, %c0_127] : memref<326x8xf32, #tpu.memory_space<vmem>>, vector<288x8xf32>
    %c3_128 = arith.constant 3 : index
    %c0_129 = arith.constant 0 : index
    %c0_130 = arith.constant 0 : index
    %115 = vector.load %arg4[%c3_128, %c0_129, %c0_130] : memref<9x8x8xf32, #tpu.memory_space<vmem>>, vector<1x8x8xf32>
    %116 = vector.shape_cast %115 : vector<1x8x8xf32> to vector<8x8xf32>
    %cst_131 = arith.constant dense<0.000000e+00> : vector<288x8xf32>
    %117 = tpu.matmul %114, %116, %cst_131 {dimension_numbers = #tpu.dot_dimension_numbers<[1], [0], [0], [1], [0, 0, 1, 1], [], []>} : vector<288x8xf32>, vector<8x8xf32>, vector<288x8xf32> -> vector<288x8xf32>
    %c0_132 = arith.constant 0 : index
    %c0_133 = arith.constant 0 : index
    %118 = vector.load %arg9[%c0_132, %c0_133] : memref<288x8xf32, #tpu.memory_space<vmem>>, vector<288x8xf32>
    %119 = arith.addf %118, %117 : vector<288x8xf32>
    %c0_134 = arith.constant 0 : index
    %c0_135 = arith.constant 0 : index
    %120 = vector.load %arg9[%c0_134, %c0_135] : memref<288x8xf32, #tpu.memory_space<vmem>>, vector<288x8xf32>
    tpu.vector_store %arg9[%c0_134, %c0_135], %119 {strides = array<i32>} : memref<288x8xf32, #tpu.memory_space<vmem>>, vector<288x8xf32>,
    %c19_136 = arith.constant 19 : index
    %c0_137 = arith.constant 0 : index
    %121 = vector.load %arg8[%c19_136, %c0_137] : memref<326x8xf32, #tpu.memory_space<vmem>>, vector<288x8xf32>
    %c4_138 = arith.constant 4 : index
    %c0_139 = arith.constant 0 : index
    %c0_140 = arith.constant 0 : index
    %122 = vector.load %arg4[%c4_138, %c0_139, %c0_140] : memref<9x8x8xf32, #tpu.memory_space<vmem>>, vector<1x8x8xf32>
    %123 = vector.shape_cast %122 : vector<1x8x8xf32> to vector<8x8xf32>
    %cst_141 = arith.constant dense<0.000000e+00> : vector<288x8xf32>
    %124 = tpu.matmul %121, %123, %cst_141 {dimension_numbers = #tpu.dot_dimension_numbers<[1], [0], [0], [1], [0, 0, 1, 1], [], []>} : vector<288x8xf32>, vector<8x8xf32>, vector<288x8xf32> -> vector<288x8xf32>
    %c0_142 = arith.constant 0 : index
    %c0_143 = arith.constant 0 : index
    %125 = vector.load %arg9[%c0_142, %c0_143] : memref<288x8xf32, #tpu.memory_space<vmem>>, vector<288x8xf32>
    %126 = arith.addf %125, %124 : vector<288x8xf32>
    %c0_144 = arith.constant 0 : index
    %c0_145 = arith.constant 0 : index
    %127 = vector.load %arg9[%c0_144, %c0_145] : memref<288x8xf32, #tpu.memory_space<vmem>>, vector<288x8xf32>
    tpu.vector_store %arg9[%c0_144, %c0_145], %126 {strides = array<i32>} : memref<288x8xf32, #tpu.memory_space<vmem>>, vector<288x8xf32>,
    %c20_146 = arith.constant 20 : index
    %c0_147 = arith.constant 0 : index
    %128 = vector.load %arg8[%c20_146, %c0_147] : memref<326x8xf32, #tpu.memory_space<vmem>>, vector<288x8xf32>
    %c5_148 = arith.constant 5 : index
    %c0_149 = arith.constant 0 : index
    %c0_150 = arith.constant 0 : index
    %129 = vector.load %arg4[%c5_148, %c0_149, %c0_150] : memref<9x8x8xf32, #tpu.memory_space<vmem>>, vector<1x8x8xf32>
    %130 = vector.shape_cast %129 : vector<1x8x8xf32> to vector<8x8xf32>
    %cst_151 = arith.constant dense<0.000000e+00> : vector<288x8xf32>
    %131 = tpu.matmul %128, %130, %cst_151 {dimension_numbers = #tpu.dot_dimension_numbers<[1], [0], [0], [1], [0, 0, 1, 1], [], []>} : vector<288x8xf32>, vector<8x8xf32>, vector<288x8xf32> -> vector<288x8xf32>
    %c0_152 = arith.constant 0 : index
    %c0_153 = arith.constant 0 : index
    %132 = vector.load %arg9[%c0_152, %c0_153] : memref<288x8xf32, #tpu.memory_space<vmem>>, vector<288x8xf32>
    %133 = arith.addf %132, %131 : vector<288x8xf32>
    %c0_154 = arith.constant 0 : index
    %c0_155 = arith.constant 0 : index
    %134 = vector.load %arg9[%c0_154, %c0_155] : memref<288x8xf32, #tpu.memory_space<vmem>>, vector<288x8xf32>
    tpu.vector_store %arg9[%c0_154, %c0_155], %133 {strides = array<i32>} : memref<288x8xf32, #tpu.memory_space<vmem>>, vector<288x8xf32>,
    %c36_156 = arith.constant 36 : index
    %c0_157 = arith.constant 0 : index
    %135 = vector.load %arg8[%c36_156, %c0_157] : memref<326x8xf32, #tpu.memory_space<vmem>>, vector<288x8xf32>
    %c6_158 = arith.constant 6 : index
    %c0_159 = arith.constant 0 : index
    %c0_160 = arith.constant 0 : index
    %136 = vector.load %arg4[%c6_158, %c0_159, %c0_160] : memref<9x8x8xf32, #tpu.memory_space<vmem>>, vector<1x8x8xf32>
    %137 = vector.shape_cast %136 : vector<1x8x8xf32> to vector<8x8xf32>
    %cst_161 = arith.constant dense<0.000000e+00> : vector<288x8xf32>
    %138 = tpu.matmul %135, %137, %cst_161 {dimension_numbers = #tpu.dot_dimension_numbers<[1], [0], [0], [1], [0, 0, 1, 1], [], []>} : vector<288x8xf32>, vector<8x8xf32>, vector<288x8xf32> -> vector<288x8xf32>
    %c0_162 = arith.constant 0 : index
    %c0_163 = arith.constant 0 : index
    %139 = vector.load %arg9[%c0_162, %c0_163] : memref<288x8xf32, #tpu.memory_space<vmem>>, vector<288x8xf32>
    %140 = arith.addf %139, %138 : vector<288x8xf32>
    %c0_164 = arith.constant 0 : index
    %c0_165 = arith.constant 0 : index
    %141 = vector.load %arg9[%c0_164, %c0_165] : memref<288x8xf32, #tpu.memory_space<vmem>>, vector<288x8xf32>
    tpu.vector_store %arg9[%c0_164, %c0_165], %140 {strides = array<i32>} : memref<288x8xf32, #tpu.memory_space<vmem>>, vector<288x8xf32>,
    %c37_166 = arith.constant 37 : index
    %c0_167 = arith.constant 0 : index
    %142 = vector.load %arg8[%c37_166, %c0_167] : memref<326x8xf32, #tpu.memory_space<vmem>>, vector<288x8xf32>
    %c7_168 = arith.constant 7 : index
    %c0_169 = arith.constant 0 : index
    %c0_170 = arith.constant 0 : index
    %143 = vector.load %arg4[%c7_168, %c0_169, %c0_170] : memref<9x8x8xf32, #tpu.memory_space<vmem>>, vector<1x8x8xf32>
    %144 = vector.shape_cast %143 : vector<1x8x8xf32> to vector<8x8xf32>
    %cst_171 = arith.constant dense<0.000000e+00> : vector<288x8xf32>
    %145 = tpu.matmul %142, %144, %cst_171 {dimension_numbers = #tpu.dot_dimension_numbers<[1], [0], [0], [1], [0, 0, 1, 1], [], []>} : vector<288x8xf32>, vector<8x8xf32>, vector<288x8xf32> -> vector<288x8xf32>
    %c0_172 = arith.constant 0 : index
    %c0_173 = arith.constant 0 : index
    %146 = vector.load %arg9[%c0_172, %c0_173] : memref<288x8xf32, #tpu.memory_space<vmem>>, vector<288x8xf32>
    %147 = arith.addf %146, %145 : vector<288x8xf32>
    %c0_174 = arith.constant 0 : index
    %c0_175 = arith.constant 0 : index
    %148 = vector.load %arg9[%c0_174, %c0_175] : memref<288x8xf32, #tpu.memory_space<vmem>>, vector<288x8xf32>
    tpu.vector_store %arg9[%c0_174, %c0_175], %147 {strides = array<i32>} : memref<288x8xf32, #tpu.memory_space<vmem>>, vector<288x8xf32>,
    %c38_176 = arith.constant 38 : index
    %c0_177 = arith.constant 0 : index
    %149 = vector.load %arg8[%c38_176, %c0_177] : memref<326x8xf32, #tpu.memory_space<vmem>>, vector<288x8xf32>
    %c8_178 = arith.constant 8 : index
    %c0_179 = arith.constant 0 : index
    %c0_180 = arith.constant 0 : index
    %150 = vector.load %arg4[%c8_178, %c0_179, %c0_180] : memref<9x8x8xf32, #tpu.memory_space<vmem>>, vector<1x8x8xf32>
    %151 = vector.shape_cast %150 : vector<1x8x8xf32> to vector<8x8xf32>
    %cst_181 = arith.constant dense<0.000000e+00> : vector<288x8xf32>
    %152 = tpu.matmul %149, %151, %cst_181 {dimension_numbers = #tpu.dot_dimension_numbers<[1], [0], [0], [1], [0, 0, 1, 1], [], []>} : vector<288x8xf32>, vector<8x8xf32>, vector<288x8xf32> -> vector<288x8xf32>
    %c0_182 = arith.constant 0 : index
    %c0_183 = arith.constant 0 : index
    %153 = vector.load %arg9[%c0_182, %c0_183] : memref<288x8xf32, #tpu.memory_space<vmem>>, vector<288x8xf32>
    %154 = arith.addf %153, %152 : vector<288x8xf32>
    %c0_184 = arith.constant 0 : index
    %c0_185 = arith.constant 0 : index
    %155 = vector.load %arg9[%c0_184, %c0_185] : memref<288x8xf32, #tpu.memory_space<vmem>>, vector<288x8xf32>
    tpu.vector_store %arg9[%c0_184, %c0_185], %154 {strides = array<i32>} : memref<288x8xf32, #tpu.memory_space<vmem>>, vector<288x8xf32>,
    %c0_186 = arith.constant 0 : index
    %c0_187 = arith.constant 0 : index
    %156 = vector.load %arg9[%c0_186, %c0_187] : memref<288x8xf32, #tpu.memory_space<vmem>>, vector<288x8xf32>
    %c0_188 = arith.constant 0 : index
    %c0_189 = arith.constant 0 : index
    %157 = vector.load %arg5[%c0_188, %c0_189] : memref<1x8xf32, #tpu.memory_space<vmem>>, vector<1x8xf32>
    %158 = vector.broadcast %157 : vector<1x8xf32> to vector<288x8xf32>
    %159 = arith.addf %156, %158 : vector<288x8xf32>
    %cst_190 = arith.constant 2.000000e-01 : f32
    %160 = vector.broadcast %cst_190 : f32 to vector<288x8xf32>
    %161 = arith.mulf %160, %159 : vector<288x8xf32>
    %162 = arith.maximumf %159, %161 : vector<288x8xf32>
    %163 = arith.mulf %162, %162 : vector<288x8xf32>
    %cst_191 = arith.constant dense<0.000000e+00> : vector<288xf32>
    %164 = vector.multi_reduction <add>, %163, %cst_191 [1] : vector<288x8xf32> to vector<288xf32>
    %165 = vector.shape_cast %164 : vector<288xf32> to vector<288x1xf32>
    %cst_192 = arith.constant 8.000000e+00 : f32
    %166 = vector.broadcast %cst_192 : f32 to vector<288x1xf32>
    %167 = arith.divf %165, %166 : vector<288x1xf32>
    %cst_193 = arith.constant 9.99999993E-9 : f32
    %168 = vector.broadcast %cst_193 : f32 to vector<288x1xf32>
    %169 = arith.addf %167, %168 : vector<288x1xf32>
    %170 = math.rsqrt %169 : vector<288x1xf32>
    %171 = vector.broadcast %170 : vector<288x1xf32> to vector<288x8xf32>
    %172 = arith.mulf %162, %171 : vector<288x8xf32>
    %c0_194 = arith.constant 0 : index
    %c0_195 = arith.constant 0 : index
    %c0_196 = arith.constant 0 : index
    %173 = vector.load %arg7[%c0_194, %c0_195, %c0_196] : memref<1x288x8xf32, #tpu.memory_space<vmem>>, vector<1x288x8xf32>
    %174 = vector.shape_cast %173 : vector<1x288x8xf32> to vector<288x8xf32>
    %175 = vector.shape_cast %172 : vector<288x8xf32> to vector<1x288x8xf32>
    tpu.vector_store %arg7[%c0_194, %c0_195, %c0_196], %175 {strides = array<i32>} : memref<1x288x8xf32, #tpu.memory_space<vmem>>, vector<1x288x8xf32>,
    return
  }
  func.func @transform_0(%arg0: i32) -> (i32, i32, i32) {
    %c0_i32 = arith.constant 0 : i32
    %c0_i32_0 = arith.constant 0 : i32
    %c0_i32_1 = arith.constant 0 : i32
    return %arg0, %c0_i32, %c0_i32_0 : i32, i32, i32
  }
  func.func @transform_1(%arg0: i32) -> (i32, i32, i32) {
    %c0_i32 = arith.constant 0 : i32
    %c0_i32_0 = arith.constant 0 : i32
    %c0_i32_1 = arith.constant 0 : i32
    %c0_i32_2 = arith.constant 0 : i32
    return %c0_i32, %c0_i32_0, %c0_i32_1 : i32, i32, i32
  }
  func.func @transform_2(%arg0: i32) -> (i32, i32) {
    %c0_i32 = arith.constant 0 : i32
    %c0_i32_0 = arith.constant 0 : i32
    %c0_i32_1 = arith.constant 0 : i32
    return %c0_i32, %c0_i32_0 : i32, i32
  }
  func.func @transform_3(%arg0: i32) -> (i32, i32, i32) {
    %c0_i32 = arith.constant 0 : i32
    %c0_i32_0 = arith.constant 0 : i32
    %c0_i32_1 = arith.constant 0 : i32
    %c0_i32_2 = arith.constant 0 : i32
    return %c0_i32, %c0_i32_0, %c0_i32_1 : i32, i32, i32
  }
  func.func @transform_4(%arg0: i32) -> (i32, i32) {
    %c0_i32 = arith.constant 0 : i32
    %c0_i32_0 = arith.constant 0 : i32
    %c0_i32_1 = arith.constant 0 : i32
    return %c0_i32, %c0_i32_0 : i32, i32
  }
  func.func @transform_5(%arg0: i32) -> (i32, i32) {
    %c0_i32 = arith.constant 0 : i32
    %c0_i32_0 = arith.constant 0 : i32
    %c0_i32_1 = arith.constant 0 : i32
    return %c0_i32, %c0_i32_0 : i32, i32
  }
  func.func @transform_6(%arg0: i32) -> (i32, i32, i32) {
    %c0_i32 = arith.constant 0 : i32
    %c0_i32_0 = arith.constant 0 : i32
    %c0_i32_1 = arith.constant 0 : i32
    return %arg0, %c0_i32, %c0_i32_0 : i32, i32, i32
  }
}

</mosaic_0001>

<bundles_post_ra>
// kernel: tpu_custom_call.1
= control target key start
LH: loop header
LB: loop body
LE: loop exit
PB: predicated region body
PF: predicated region fallthrough
CT: control target
= control target key end

     0   :  { %s9768_s21 = smov 0   ;;  %s12969_s0 = inlined_call_operand.vmem [shape: f32[2,326,4], index: 0, kind: input, shape index: {}]   ;;  %s12970_s1 = inlined_call_operand.vmem [shape: f32[9,4,8], index: 1, kind: input, shape index: {}]   ;;  %s12971_s2 = inlined_call_operand.vmem [shape: f32[1,8], index: 2, kind: input, shape index: {}]   ;;  %s12972_s3 = inlined_call_operand.vmem [shape: f32[9,8,8], index: 3, kind: input, shape index: {}]   ;;  %s12973_s4 = inlined_call_operand.vmem [shape: f32[1,8], index: 4, kind: input, shape index: {}]   ;;  %s12974_s5 = inlined_call_operand.vmem [shape: f32[288,1], index: 5, kind: input, shape index: {}]   ;;  %s12975_s6 = inlined_call_operand.vmem [shape: f32[2,288,8], index: 6, kind: output, shape index: {}]  }
   0x1 LB: > { %s8871_s22 = sadd.s32 4294967295, %s9728_s21   ;;  %p8875_p0 = scmp.ge.s32.totalorder %s9728_s21, 1  ;;  %s9728_s21 = sphi %s9768_s21, %s16_s21  }
   0x2   : > { %p212_p1 = scmp.lt.s32.totalorder %s9728_s21, 3 }
   0x4   : > { %p213_p2 = pnand %p8875_p0, %p212_p1 }
   0x5   : > { %p242_p3 = scmp.lt.s32.totalorder (!%p213_p2), %s8871_s22, 1 }
   0x6   : > { %216 = sbr.rel (%p213_p2) target bundleno = 1988 (0x7c4), region = 44 }
   0xb   : > { %v288_v0 = vld [vmem:[%s12970_s1] sm:$0xf]  ;;  %vm398_vm0 = vcmask 1043456   ;;  %v8953_v1 = vld [vmem:[%s12970_s1 + $0x8] sm:$0xf]  ;;  %s12983_s22 = smov (!%p242_p3, %s8871_s22), 1 }
   0xc   : > { %9553 = vmatpush.msk.msra.mxu2 %vm398_vm0, %v288_v0  ;;  %v8915_v2 = vld [vmem:[%s12970_s1 + $0x4] sm:$0xf]  ;;  %v8991_v3 = vld [vmem:[%s12970_s1 + $0xc] sm:$0xf]  ;;  %8878 = vmatpush.msk.msra.mxu0 %vm398_vm0, %v288_v0  ;;  %v9029_v4 = vld [vmem:[%s12970_s1 + $0x10] sm:$0xf] }
   0xd   : > { %9554 = vmatpush.msk.msra.mxu3 %vm398_vm0, %v8915_v2  ;;  %s9555_s9 = smul.u32 328, %s12983_s22  ;;  %8916 = vmatpush.msk.msra.mxu1 %vm398_vm0, %v8915_v2  ;;  %vm289_vm1 = vcmask 31744   ;;  %v9105_v0 = vld [vmem:[%s12970_s1 + $0x18] sm:$0xf]  ;;  %vm527_vm2 = vcmask 64512   ;;  %vm4641_vm3 = vcmask 59392  }
   0xe   : > { %8954 = vmatpush.msk.msrb.mxu2 %vm398_vm0, %v8953_v1  ;;  %9030 = vmatpush.msk.msrb.mxu0 %vm398_vm0, %v9029_v4  ;;  %s9556_s10 = smul.u32 288, %s12983_s22 }
   0xf   : > { %8992 = vmatpush.msk.msrb.mxu3 %vm398_vm0, %v8991_v3  ;;  %s9804_s12 = scalar_lea.vmem %s12969_s0, %s9555_s9 }
  0x10   : > { %v270_v5 = vld [vmem:[%s9804_s12 + $0x90] sm:$0xff]  ;;  %v252_v7 = vld [vmem:[%s9804_s12] sm:$0xff]  ;;  %v271_v9 = vld [vmem:[%s9804_s12 + $0x98] sm:$0xff]  ;;  %s12682_s13 = scalar_lea.vmem %s12975_s6, %s9556_s10 }
  0x11   : > { %v582_v6 = vld [vmem:[%s9804_s12 + $0x91] sm:$0xff]  ;;  %8897 = vmatmul.msk.f32.vlgmr.msra.gmra.mxu2 %vm289_vm1, %v270_v5  ;;  %8879 = vmatmul.msk.f32.vlgmr.msra.gmra.mxu0 %vm289_vm1, %v252_v7  ;;  %v564_v8 = vld [vmem:[%s9804_s12 + $0x1] sm:$0xff]  ;;  %v583_v10 = vld [vmem:[%s9804_s12 + $0x99] sm:$0xff] }
  0x12   : > { %8935 = vmatmul.msk.f32.vlgmr.msra.gmra.mxu3 %vm289_vm1, %v582_v6  ;;  %8917 = vmatmul.msk.f32.vlgmr.msra.gmra.mxu1 %vm289_vm1, %v564_v8  ;;  %v253_v11 = vld [vmem:[%s9804_s12 + $0x8] sm:$0xff]  ;;  %v272_v13 = vld [vmem:[%s9804_s12 + $0xa0] sm:$0xff]  ;;  %v254_v15 = vld [vmem:[%s9804_s12 + $0x10] sm:$0xff] }
  0x13   : > { %v565_v12 = vld [vmem:[%s9804_s12 + $0x9] sm:$0xff]  ;;  %v584_v14 = vld [vmem:[%s9804_s12 + $0xa1] sm:$0xff]  ;;  %v566_v16 = vld [vmem:[%s9804_s12 + $0x11] sm:$0xff]  ;;  %9106 = vmatpush.msk.msra.mxu2 %vm398_vm0, %v9105_v0 }
  0x14   : > { %v273_v17 = vld [vmem:[%s9804_s12 + $0xa8] sm:$0xff]  ;;  %v255_v19 = vld [vmem:[%s9804_s12 + $0x18] sm:$0xff]  ;;  %v274_v21 = vld [vmem:[%s9804_s12 + $0xb0] sm:$0xff] }
  0x15   : > { %v585_v18 = vld [vmem:[%s9804_s12 + $0xa9] sm:$0xff]  ;;  %v567_v20 = vld [vmem:[%s9804_s12 + $0x19] sm:$0xff]  ;;  %v586_v22 = vld [vmem:[%s9804_s12 + $0xb1] sm:$0xff] }
  0x16   : > { %v256_v23 = vld [vmem:[%s9804_s12 + $0x20] sm:$0xff]  ;;  %v275_v25 = vld [vmem:[%s9804_s12 + $0xb8] sm:$0xff]  ;;  %v257_v27 = vld [vmem:[%s9804_s12 + $0x28] sm:$0xff] }
  0x17   : > { %v568_v24 = vld [vmem:[%s9804_s12 + $0x21] sm:$0xff]  ;;  %v587_v26 = vld [vmem:[%s9804_s12 + $0xb9] sm:$0xff]  ;;  %v569_v28 = vld [vmem:[%s9804_s12 + $0x29] sm:$0xff] }
  0x18   : > { %v276_v29 = vld [vmem:[%s9804_s12 + $0xc0] sm:$0xff]  ;;  %v258_v31 = vld [vmem:[%s9804_s12 + $0x30] sm:$0xff]  ;;  %v277_v33 = vld [vmem:[%s9804_s12 + $0xc8] sm:$0xff] }
  0x19   : > { %8898 = vmatmul.msk.f32.gmra.mxu2 %vm289_vm1, %v271_v9  ;;  %8880 = vmatmul.msk.f32.gmra.mxu0 %vm289_vm1, %v253_v11  ;;  %v588_v30 = vld [vmem:[%s9804_s12 + $0xc1] sm:$0xff]  ;;  %v570_v32 = vld [vmem:[%s9804_s12 + $0x31] sm:$0xff]  ;;  %v589_v34 = vld [vmem:[%s9804_s12 + $0xc9] sm:$0xff] }
  0x1a   : > { %8936 = vmatmul.msk.f32.gmra.mxu3 %vm289_vm1, %v583_v10  ;;  %8918 = vmatmul.msk.f32.gmra.mxu1 %vm289_vm1, %v565_v12  ;;  %v259_v35 = vld [vmem:[%s9804_s12 + $0x38] sm:$0xff]  ;;  %v278_v37 = vld [vmem:[%s9804_s12 + $0xd0] sm:$0xff]  ;;  %v260_v39 = vld [vmem:[%s9804_s12 + $0x40] sm:$0xff] }
  0x1b   : > { %v571_v36 = vld [vmem:[%s9804_s12 + $0x39] sm:$0xff]  ;;  %v590_v38 = vld [vmem:[%s9804_s12 + $0xd1] sm:$0xff]  ;;  %v572_v40 = vld [vmem:[%s9804_s12 + $0x41] sm:$0xff] }
  0x1c   : > { %v279_v41 = vld [vmem:[%s9804_s12 + $0xd8] sm:$0xff]  ;;  %v261_v43 = vld [vmem:[%s9804_s12 + $0x48] sm:$0xff]  ;;  %v280_v45 = vld [vmem:[%s9804_s12 + $0xe0] sm:$0xff] }
  0x1d   : > { %v591_v42 = vld [vmem:[%s9804_s12 + $0xd9] sm:$0xff]  ;;  %v573_v44 = vld [vmem:[%s9804_s12 + $0x49] sm:$0xff]  ;;  %v592_v46 = vld [vmem:[%s9804_s12 + $0xe1] sm:$0xff] }
  0x1e   : > { %v262_v47 = vld [vmem:[%s9804_s12 + $0x50] sm:$0xff]  ;;  %v281_v49 = vld [vmem:[%s9804_s12 + $0xe8] sm:$0xff]  ;;  %v263_v51 = vld [vmem:[%s9804_s12 + $0x58] sm:$0xff] }
  0x1f   : > { %v574_v48 = vld [vmem:[%s9804_s12 + $0x51] sm:$0xff]  ;;  %v593_v50 = vld [vmem:[%s9804_s12 + $0xe9] sm:$0xff]  ;;  %v575_v52 = vld [vmem:[%s9804_s12 + $0x59] sm:$0xff] }
  0x20   : > { %v282_v53 = vld [vmem:[%s9804_s12 + $0xf0] sm:$0xff]  ;;  %v264_v55 = vld [vmem:[%s9804_s12 + $0x60] sm:$0xff]  ;;  %v283_v57 = vld [vmem:[%s9804_s12 + $0xf8] sm:$0xff] }
  0x21   : > { %8899 = vmatmul.msk.f32.gmra.mxu2 %vm289_vm1, %v272_v13  ;;  %8881 = vmatmul.msk.f32.gmra.mxu0 %vm289_vm1, %v254_v15  ;;  %v594_v54 = vld [vmem:[%s9804_s12 + $0xf1] sm:$0xff]  ;;  %v576_v56 = vld [vmem:[%s9804_s12 + $0x61] sm:$0xff]  ;;  %v595_v58 = vld [vmem:[%s9804_s12 + $0xf9] sm:$0xff] }
  0x22   : > { %8937 = vmatmul.msk.f32.gmra.mxu3 %vm289_vm1, %v584_v14  ;;  %8919 = vmatmul.msk.f32.gmra.mxu1 %vm289_vm1, %v566_v16  ;;  %v265_v59 = vld [vmem:[%s9804_s12 + $0x68] sm:$0xff]  ;;  %v284_v61 = vld [vmem:[%s9804_s12 + $0x100] sm:$0xff]  ;;  %v266_v63 = vld [vmem:[%s9804_s12 + $0x70] sm:$0xff] }
  0x23   : > { %v577_v60 = vld [vmem:[%s9804_s12 + $0x69] sm:$0xff]  ;;  %v596_v62 = vld [vmem:[%s9804_s12 + $0x101] sm:$0xff]  ;;  %v578_v1 = vld [vmem:[%s9804_s12 + $0x71] sm:$0xff] }
  0x24   : > { %v285_v2 = vld [vmem:[%s9804_s12 + $0x108] sm:$0xff]  ;;  %v267_v4 = vld [vmem:[%s9804_s12 + $0x78] sm:$0xff]  ;;  %v286_v7 = vld [vmem:[%s9804_s12 + $0x110] sm:$0xff] }
  0x25   : > { %v597_v3 = vld [vmem:[%s9804_s12 + $0x109] sm:$0xff]  ;;  %v579_v5 = vld [vmem:[%s9804_s12 + $0x79] sm:$0xff]  ;;  %v598_v8 = vld [vmem:[%s9804_s12 + $0x111] sm:$0xff] }
  0x26   : > { %v9143_v6 = vld [vmem:[%s12970_s1 + $0x1c] sm:$0xf]  ;;  %v268_v10 = vld [vmem:[%s9804_s12 + $0x80] sm:$0xff]  ;;  %v1331_v0 = vld [vmem:[%s9804_s12 + $0x2a] sm:$0xff] }
  0x27   : > { %9144 = vmatpush.msk.msra.mxu3 %vm398_vm0, %v9143_v6  ;;  %v580_v12 = vld [vmem:[%s9804_s12 + $0x81] sm:$0xff]  ;;  %v287_v15 = vld [vmem:[%s9804_s12 + $0x118] sm:$0xff] }
  0x28   : > { %v599_v16 = vld [vmem:[%s9804_s12 + $0x119] sm:$0xff] }
  0x29   : > { %8900 = vmatmul.msk.f32.gmra.mxu2 %vm289_vm1, %v273_v17  ;;  %8882 = vmatmul.msk.f32.gmra.mxu0 %vm289_vm1, %v255_v19  ;;  %v269_v19 = vld [vmem:[%s9804_s12 + $0x88] sm:$0xff] }
  0x2a   : > { %8938 = vmatmul.msk.f32.gmra.mxu3 %vm289_vm1, %v585_v18  ;;  %8920 = vmatmul.msk.f32.gmra.mxu1 %vm289_vm1, %v567_v20 }
  0x31   : > { %8901 = vmatmul.msk.f32.gmra.mxu2 %vm289_vm1, %v274_v21  ;;  %8883 = vmatmul.msk.f32.gmra.mxu0 %vm289_vm1, %v256_v23  ;;  %v9181_v23 = vld [vmem:[%s12970_s1 + $0x20] sm:$0xf] }
  0x32   : > { %8939 = vmatmul.msk.f32.gmra.mxu3 %vm289_vm1, %v586_v22  ;;  %8921 = vmatmul.msk.f32.gmra.mxu1 %vm289_vm1, %v568_v24  ;;  %v581_v22 = vld [vmem:[%s9804_s12 + $0x89] sm:$0xff] }
  0x33   : > { %9182 = vmatpush.msk.msra.mxu0 %vm398_vm0, %v9181_v23 }
  0x39   : > { %8902 = vmatmul.msk.f32.gmra.mxu2 %vm289_vm1, %v275_v25  ;;  %8884 = vmatmul.msk.f32.gmra.mxu0 %vm289_vm1, %v257_v27 }
  0x3a   : > { %8940 = vmatmul.msk.f32.gmra.mxu3 %vm289_vm1, %v587_v26  ;;  %8922 = vmatmul.msk.f32.gmra.mxu1 %vm289_vm1, %v569_v28  ;;  %v946_v28 = vld [vmem:[%s9804_s12 + $0x2] sm:$0xff] }
  0x41   : > { %8903 = vmatmul.msk.f32.gmra.mxu2 %vm289_vm1, %v276_v29  ;;  %8885 = vmatmul.msk.f32.gmra.mxu0 %vm289_vm1, %v258_v31  ;;  %v1328_v29 = vld [vmem:[%s9804_s12 + $0x12] sm:$0xff] }
  0x42   : > { %8941 = vmatmul.msk.f32.gmra.mxu3 %vm289_vm1, %v588_v30  ;;  %8923 = vmatmul.msk.f32.gmra.mxu1 %vm289_vm1, %v570_v32  ;;  %v1710_v32 = vld [vmem:[%s9804_s12 + $0x13] sm:$0xff] }
  0x49   : > { %8904 = vmatmul.msk.f32.gmra.mxu2 %vm289_vm1, %v277_v33  ;;  %8886 = vmatmul.msk.f32.gmra.mxu0 %vm289_vm1, %v259_v35  ;;  %v9067_v35 = vld [vmem:[%s12970_s1 + $0x14] sm:$0xf] }
  0x4a   : > { %8942 = vmatmul.msk.f32.gmra.mxu3 %vm289_vm1, %v589_v34  ;;  %8924 = vmatmul.msk.f32.gmra.mxu1 %vm289_vm1, %v571_v36 }
  0x4b   : > { %9068 = vmatpush.msk.msrb.mxu1 %vm398_vm0, %v9067_v35 }
  0x51   : > { %8905 = vmatmul.msk.f32.gmra.mxu2 %vm289_vm1, %v278_v37  ;;  %8887 = vmatmul.msk.f32.gmra.mxu0 %vm289_vm1, %v260_v39  ;;  %v2092_v39 = vld [vmem:[%s9804_s12 + $0x14] sm:$0xff] }
  0x52   : > { %8943 = vmatmul.msk.f32.gmra.mxu3 %vm289_vm1, %v590_v38  ;;  %8925 = vmatmul.msk.f32.gmra.mxu1 %vm289_vm1, %v572_v40 }
  0x59   : > { %8906 = vmatmul.msk.f32.gmra.mxu2 %vm289_vm1, %v279_v41  ;;  %8888 = vmatmul.msk.f32.gmra.mxu0 %vm289_vm1, %v261_v43  ;;  %v947_v41 = vld [vmem:[%s9804_s12 + $0xa] sm:$0xff] }
  0x5a   : > { %8944 = vmatmul.msk.f32.gmra.mxu3 %vm289_vm1, %v591_v42  ;;  %8926 = vmatmul.msk.f32.gmra.mxu1 %vm289_vm1, %v573_v44  ;;  %v1329_v42 = vld [vmem:[%s9804_s12 + $0x1a] sm:$0xff] }
  0x61   : > { %8907 = vmatmul.msk.f32.gmra.mxu2 %vm289_vm1, %v280_v45  ;;  %8889 = vmatmul.msk.f32.gmra.mxu0 %vm289_vm1, %v262_v47  ;;  %v1711_v45 = vld [vmem:[%s9804_s12 + $0x1b] sm:$0xff] }
  0x62   : > { %8945 = vmatmul.msk.f32.gmra.mxu3 %vm289_vm1, %v592_v46  ;;  %8927 = vmatmul.msk.f32.gmra.mxu1 %vm289_vm1, %v574_v48 }
  0x69   : > { %8908 = vmatmul.msk.f32.gmra.mxu2 %vm289_vm1, %v281_v49  ;;  %8890 = vmatmul.msk.f32.gmra.mxu0 %vm289_vm1, %v263_v51  ;;  %v2093_v51 = vld [vmem:[%s9804_s12 + $0x1c] sm:$0xff] }
  0x6a   : > { %8946 = vmatmul.msk.f32.gmra.mxu3 %vm289_vm1, %v593_v50  ;;  %8928 = vmatmul.msk.f32.gmra.mxu1 %vm289_vm1, %v575_v52 }
  0x71   : > { %8909 = vmatmul.msk.f32.gmra.mxu2 %vm289_vm1, %v282_v53  ;;  %8891 = vmatmul.msk.f32.gmra.mxu0 %vm289_vm1, %v264_v55  ;;  %v1330_v53 = vld [vmem:[%s9804_s12 + $0x22] sm:$0xff] }
  0x72   : > { %8947 = vmatmul.msk.f32.gmra.mxu3 %vm289_vm1, %v594_v54  ;;  %8929 = vmatmul.msk.f32.gmra.mxu1 %vm289_vm1, %v576_v56  ;;  %v1712_v56 = vld [vmem:[%s9804_s12 + $0x23] sm:$0xff] }
  0x79   : > { %8910 = vmatmul.msk.f32.gmra.mxu2 %vm289_vm1, %v283_v57  ;;  %8892 = vmatmul.msk.f32.gmra.mxu0 %vm289_vm1, %v265_v59 }
  0x7a   : > { %8948 = vmatmul.msk.f32.gmra.mxu3 %vm289_vm1, %v595_v58  ;;  %8930 = vmatmul.msk.f32.gmra.mxu1 %vm289_vm1, %v577_v60 }
  0x81   : > { %8911 = vmatmul.msk.f32.gmra.mxu2 %vm289_vm1, %v284_v61  ;;  %8893 = vmatmul.msk.f32.gmra.mxu0 %vm289_vm1, %v266_v63 }
  0x82   : > { %8949 = vmatmul.msk.f32.gmra.mxu3 %vm289_vm1, %v596_v62  ;;  %8931 = vmatmul.msk.f32.gmra.mxu1 %vm289_vm1, %v578_v1  ;;  %v2094_v62 = vld [vmem:[%s9804_s12 + $0x24] sm:$0xff] }
  0x89   : > { %8912 = vmatmul.msk.f32.gmra.mxu2 %vm289_vm1, %v285_v2  ;;  %8894 = vmatmul.msk.f32.gmra.mxu0 %vm289_vm1, %v267_v4 }
  0x8a   : > { %8950 = vmatmul.msk.f32.gmra.mxu3 %vm289_vm1, %v597_v3  ;;  %8932 = vmatmul.msk.f32.gmra.mxu1 %vm289_vm1, %v579_v5  ;;  %v1713_v3 = vld [vmem:[%s9804_s12 + $0x2b] sm:$0xff] }
  0x8e   : > { %v419_v9 = vpop.f32.mrf.mxu0 }
  0x8f   : > { %528 = vst.msk [vmem:[#allocation3] sm:$0xff] %vm527_vm2, %v419_v9  ;;  %v730_v11 = vpop.f32.mrf.mxu1  ;;  %v2095_v9 = vld [vmem:[%s9804_s12 + $0x2c] sm:$0xff] }
  0x91   : > { %8913 = vmatmul.msk.f32.gmra.mxu2 %vm289_vm1, %v286_v7  ;;  %8895 = vmatmul.msk.f32.gmra.mxu0 %vm289_vm1, %v268_v10 }
  0x92   : > { %8951 = vmatmul.msk.f32.gmra.mxu3 %vm289_vm1, %v598_v8  ;;  %8933 = vmatmul.msk.f32.gmra.mxu1 %vm289_vm1, %v580_v12 }
  0x94   : > { %v473_v13 = vpop.f32.mrf.mxu2 }
  0x95   : > { %v784_v14 = vpop.f32.mrf.mxu3  ;;  %546 = vst.msk [vmem:[#allocation3 + $0x90] sm:$0xff] %vm527_vm2, %v473_v13 }
  0x96   : > { %v422_v17 = vpop.f32.mrf.mxu0  ;;  %v838_v18 = vld [vmem:[#allocation3] sm:$0xff] }
  0x97   : > { %529 = vst.msk [vmem:[#allocation3 + $0x8] sm:$0xff] %vm527_vm2, %v422_v17  ;;  %v874_v20 = vadd.f32 %v838_v18, %v730_v11  ;;  %v733_v21 = vpop.f32.mrf.mxu1  ;;  %v1332_v11 = vld [vmem:[%s9804_s12 + $0x32] sm:$0xff] }
  0x99   : > { %8914 = vmatmul.msk.f32.gmra.mxu2 %vm289_vm1, %v287_v15  ;;  %910 = vst.msk [vmem:[#allocation3] sm:$0xff] %vm527_vm2, %v874_v20  ;;  %8896 = vmatmul.msk.f32.gmra.mxu0 %vm289_vm1, %v269_v19  ;;  %v2096_v20 = vld [vmem:[%s9804_s12 + $0x34] sm:$0xff] }
  0x9a   : > { %8952 = vmatmul.msk.f32.gmra.mxu3 %vm289_vm1, %v599_v16  ;;  %8934 = vmatmul.msk.f32.gmra.mxu1 %vm289_vm1, %v581_v22  ;;  %v1333_v22 = vld [vmem:[%s9804_s12 + $0x3a] sm:$0xff] }
  0x9c   : > { %v476_v24 = vpop.f32.mrf.mxu2  ;;  %v856_v25 = vld [vmem:[#allocation3 + $0x90] sm:$0xff] }
  0x9d   : > { %v787_v26 = vpop.f32.mrf.mxu3  ;;  %547 = vst.msk [vmem:[#allocation3 + $0x98] sm:$0xff] %vm527_vm2, %v476_v24  ;;  %v892_v27 = vadd.f32 %v856_v25, %v784_v14  ;;  %v1714_v14 = vld [vmem:[%s9804_s12 + $0x33] sm:$0xff]  ;;  %v1715_v25 = vld [vmem:[%s9804_s12 + $0x3b] sm:$0xff] }
  0x9e   : > { %v425_v30 = vpop.f32.mrf.mxu0  ;;  %v839_v31 = vld [vmem:[#allocation3 + $0x8] sm:$0xff] }
  0x9f   : > { %928 = vst.msk [vmem:[#allocation3 + $0x90] sm:$0xff] %vm527_vm2, %v892_v27  ;;  %v875_v33 = vadd.f32 %v839_v31, %v733_v21  ;;  %v736_v34 = vpop.f32.mrf.mxu1  ;;  %v2097_v31 = vld [vmem:[%s9804_s12 + $0x3c] sm:$0xff] }
  0xa0   : > { %530 = vst.msk [vmem:[#allocation3 + $0x10] sm:$0xff] %vm527_vm2, %v425_v30 }
  0xa1   : > { %8955 = vmatmul.msk.f32.vlgmr.msrb.gmra.mxu2 %vm289_vm1, %v946_v28  ;;  %911 = vst.msk [vmem:[#allocation3 + $0x8] sm:$0xff] %vm527_vm2, %v875_v33  ;;  %9031 = vmatmul.msk.f32.vlgmr.msrb.gmra.mxu0 %vm289_vm1, %v1710_v32  ;;  %v1334_v33 = vld [vmem:[%s9804_s12 + $0x42] sm:$0xff] }
  0xa2   : > { %8993 = vmatmul.msk.f32.vlgmr.msrb.gmra.mxu3 %vm289_vm1, %v1328_v29  ;;  %9069 = vmatmul.msk.f32.vlgmr.msrb.gmra.mxu1 %vm289_vm1, %v2092_v39 }
  0xa4   : > { %v479_v36 = vpop.f32.mrf.mxu2  ;;  %v857_v37 = vld [vmem:[#allocation3 + $0x98] sm:$0xff] }
  0xa5   : > { %v790_v38 = vpop.f32.mrf.mxu3  ;;  %548 = vst.msk [vmem:[#allocation3 + $0xa0] sm:$0xff] %vm527_vm2, %v479_v36  ;;  %v893_v40 = vadd.f32 %v857_v37, %v787_v26  ;;  %v1716_v36 = vld [vmem:[%s9804_s12 + $0x43] sm:$0xff] }
  0xa6   : > { %v428_v43 = vpop.f32.mrf.mxu0 }
  0xa7   : > { %929 = vst.msk [vmem:[#allocation3 + $0x98] sm:$0xff] %vm527_vm2, %v893_v40  ;;  %v840_v44 = vld [vmem:[#allocation3 + $0x10] sm:$0xff]  ;;  %v739_v47 = vpop.f32.mrf.mxu1 }
  0xa8   : > { %531 = vst.msk [vmem:[#allocation3 + $0x18] sm:$0xff] %vm527_vm2, %v428_v43  ;;  %v876_v46 = vadd.f32 %v840_v44, %v736_v34  ;;  %v1335_v44 = vld [vmem:[%s9804_s12 + $0x4a] sm:$0xff] }
  0xa9   : > { %8956 = vmatmul.msk.f32.gmra.mxu2 %vm289_vm1, %v947_v41  ;;  %9032 = vmatmul.msk.f32.gmra.mxu0 %vm289_vm1, %v1711_v45 }
  0xaa   : > { %8994 = vmatmul.msk.f32.gmra.mxu3 %vm289_vm1, %v1329_v42  ;;  %912 = vst.msk [vmem:[#allocation3 + $0x10] sm:$0xff] %vm527_vm2, %v876_v46  ;;  %9070 = vmatmul.msk.f32.gmra.mxu1 %vm289_vm1, %v2093_v51 }
  0xac   : > { %v482_v48 = vpop.f32.mrf.mxu2  ;;  %v858_v49 = vld [vmem:[#allocation3 + $0xa0] sm:$0xff] }
  0xad   : > { %v793_v50 = vpop.f32.mrf.mxu3  ;;  %549 = vst.msk [vmem:[#allocation3 + $0xa8] sm:$0xff] %vm527_vm2, %v482_v48  ;;  %v894_v52 = vadd.f32 %v858_v49, %v790_v38 }
  0xae   : > { %v431_v54 = vpop.f32.mrf.mxu0 }
  0xaf   : > { %930 = vst.msk [vmem:[#allocation3 + $0xa0] sm:$0xff] %vm527_vm2, %v894_v52  ;;  %v841_v55 = vld [vmem:[#allocation3 + $0x18] sm:$0xff]  ;;  %v742_v58 = vpop.f32.mrf.mxu1 }
  0xb0   : > { %532 = vst.msk [vmem:[#allocation3 + $0x20] sm:$0xff] %vm527_vm2, %v431_v54  ;;  %v877_v57 = vadd.f32 %v841_v55, %v739_v47  ;;  %v1717_v47 = vld [vmem:[%s9804_s12 + $0x4b] sm:$0xff] }
  0xb1   : > { %8957 = vmatmul.msk.f32.gmra.mxu2 %vm289_vm1, %v1328_v29  ;;  %9033 = vmatmul.msk.f32.gmra.mxu0 %vm289_vm1, %v1712_v56  ;;  %v1336_v55 = vld [vmem:[%s9804_s12 + $0x52] sm:$0xff] }
  0xb2   : > { %8995 = vmatmul.msk.f32.gmra.mxu3 %vm289_vm1, %v1330_v53  ;;  %913 = vst.msk [vmem:[#allocation3 + $0x18] sm:$0xff] %vm527_vm2, %v877_v57  ;;  %9071 = vmatmul.msk.f32.gmra.mxu1 %vm289_vm1, %v2094_v62 }
  0xb4   : > { %v485_v59 = vpop.f32.mrf.mxu2  ;;  %v859_v60 = vld [vmem:[#allocation3 + $0xa8] sm:$0xff] }
  0xb5   : > { %v796_v61 = vpop.f32.mrf.mxu3  ;;  %550 = vst.msk [vmem:[#allocation3 + $0xb0] sm:$0xff] %vm527_vm2, %v485_v59  ;;  %v895_v63 = vadd.f32 %v859_v60, %v793_v50 }
  0xb6   : > { %v434_v1 = vpop.f32.mrf.mxu0 }
  0xb7   : > { %931 = vst.msk [vmem:[#allocation3 + $0xa8] sm:$0xff] %vm527_vm2, %v895_v63  ;;  %v842_v2 = vld [vmem:[#allocation3 + $0x20] sm:$0xff]  ;;  %v745_v5 = vpop.f32.mrf.mxu1 }
  0xb8   : > { %533 = vst.msk [vmem:[#allocation3 + $0x28] sm:$0xff] %vm527_vm2, %v434_v1  ;;  %v878_v4 = vadd.f32 %v842_v2, %v742_v58  ;;  %v1718_v58 = vld [vmem:[%s9804_s12 + $0x53] sm:$0xff] }
  0xb9   : > { %8958 = vmatmul.msk.f32.gmra.mxu2 %vm289_vm1, %v1329_v42  ;;  %9034 = vmatmul.msk.f32.gmra.mxu0 %vm289_vm1, %v1713_v3  ;;  %v2098_v42 = vld [vmem:[%s9804_s12 + $0x44] sm:$0xff]  ;;  %v1337_v2 = vld [vmem:[%s9804_s12 + $0x5a] sm:$0xff] }
  0xba   : > { %8996 = vmatmul.msk.f32.gmra.mxu3 %vm289_vm1, %v1331_v0  ;;  %914 = vst.msk [vmem:[#allocation3 + $0x20] sm:$0xff] %vm527_vm2, %v878_v4  ;;  %9072 = vmatmul.msk.f32.gmra.mxu1 %vm289_vm1, %v2095_v9 }
  0xbc   : > { %v488_v6 = vpop.f32.mrf.mxu2  ;;  %v860_v7 = vld [vmem:[#allocation3 + $0xb0] sm:$0xff] }
  0xbd   : > { %v799_v8 = vpop.f32.mrf.mxu3  ;;  %551 = vst.msk [vmem:[#allocation3 + $0xb8] sm:$0xff] %vm527_vm2, %v488_v6  ;;  %v896_v10 = vadd.f32 %v860_v7, %v796_v61 }
  0xbe   : > { %v437_v12 = vpop.f32.mrf.mxu0 }
  0xbf   : > { %932 = vst.msk [vmem:[#allocation3 + $0xb0] sm:$0xff] %vm527_vm2, %v896_v10  ;;  %v843_v13 = vld [vmem:[#allocation3 + $0x28] sm:$0xff]  ;;  %v748_v16 = vpop.f32.mrf.mxu1 }
  0xc0   : > { %534 = vst.msk [vmem:[#allocation3 + $0x30] sm:$0xff] %vm527_vm2, %v437_v12  ;;  %v879_v15 = vadd.f32 %v843_v13, %v745_v5  ;;  %v1719_v5 = vld [vmem:[%s9804_s12 + $0x5b] sm:$0xff] }
  0xc1   : > { %8959 = vmatmul.msk.f32.gmra.mxu2 %vm289_vm1, %v1330_v53  ;;  %9035 = vmatmul.msk.f32.gmra.mxu0 %vm289_vm1, %v1714_v14  ;;  %v2099_v53 = vld [vmem:[%s9804_s12 + $0x4c] sm:$0xff]  ;;  %v1338_v13 = vld [vmem:[%s9804_s12 + $0x62] sm:$0xff] }
  0xc2   : > { %8997 = vmatmul.msk.f32.gmra.mxu3 %vm289_vm1, %v1332_v11  ;;  %915 = vst.msk [vmem:[#allocation3 + $0x28] sm:$0xff] %vm527_vm2, %v879_v15  ;;  %9073 = vmatmul.msk.f32.gmra.mxu1 %vm289_vm1, %v2096_v20 }
  0xc4   : > { %v491_v17 = vpop.f32.mrf.mxu2  ;;  %v861_v18 = vld [vmem:[#allocation3 + $0xb8] sm:$0xff] }
  0xc5   : > { %v802_v19 = vpop.f32.mrf.mxu3  ;;  %552 = vst.msk [vmem:[#allocation3 + $0xc0] sm:$0xff] %vm527_vm2, %v491_v17  ;;  %v897_v21 = vadd.f32 %v861_v18, %v799_v8 }
  0xc6   : > { %v440_v23 = vpop.f32.mrf.mxu0 }
  0xc7   : > { %933 = vst.msk [vmem:[#allocation3 + $0xb8] sm:$0xff] %vm527_vm2, %v897_v21  ;;  %v844_v24 = vld [vmem:[#allocation3 + $0x30] sm:$0xff]  ;;  %v751_v27 = vpop.f32.mrf.mxu1 }
  0xc8   : > { %535 = vst.msk [vmem:[#allocation3 + $0x38] sm:$0xff] %vm527_vm2, %v440_v23  ;;  %v880_v26 = vadd.f32 %v844_v24, %v748_v16  ;;  %v1720_v16 = vld [vmem:[%s9804_s12 + $0x63] sm:$0xff] }
  0xc9   : > { %8960 = vmatmul.msk.f32.gmra.mxu2 %vm289_vm1, %v1331_v0  ;;  %9036 = vmatmul.msk.f32.gmra.mxu0 %vm289_vm1, %v1715_v25  ;;  %v2100_v0 = vld [vmem:[%s9804_s12 + $0x54] sm:$0xff]  ;;  %v1339_v24 = vld [vmem:[%s9804_s12 + $0x6a] sm:$0xff] }
  0xca   : > { %8998 = vmatmul.msk.f32.gmra.mxu3 %vm289_vm1, %v1333_v22  ;;  %916 = vst.msk [vmem:[#allocation3 + $0x30] sm:$0xff] %vm527_vm2, %v880_v26  ;;  %9074 = vmatmul.msk.f32.gmra.mxu1 %vm289_vm1, %v2097_v31 }
  0xcc   : > { %v494_v28 = vpop.f32.mrf.mxu2  ;;  %v862_v29 = vld [vmem:[#allocation3 + $0xc0] sm:$0xff] }
  0xcd   : > { %v805_v30 = vpop.f32.mrf.mxu3  ;;  %553 = vst.msk [vmem:[#allocation3 + $0xc8] sm:$0xff] %vm527_vm2, %v494_v28  ;;  %v898_v32 = vadd.f32 %v862_v29, %v802_v19 }
  0xce   : > { %v443_v34 = vpop.f32.mrf.mxu0 }
  0xcf   : > { %934 = vst.msk [vmem:[#allocation3 + $0xc0] sm:$0xff] %vm527_vm2, %v898_v32  ;;  %v845_v35 = vld [vmem:[#allocation3 + $0x38] sm:$0xff]  ;;  %v754_v38 = vpop.f32.mrf.mxu1 }
  0xd0   : > { %536 = vst.msk [vmem:[#allocation3 + $0x40] sm:$0xff] %vm527_vm2, %v443_v34  ;;  %v881_v37 = vadd.f32 %v845_v35, %v751_v27  ;;  %v1721_v27 = vld [vmem:[%s9804_s12 + $0x6b] sm:$0xff] }
  0xd1   : > { %8961 = vmatmul.msk.f32.gmra.mxu2 %vm289_vm1, %v1332_v11  ;;  %9037 = vmatmul.msk.f32.gmra.mxu0 %vm289_vm1, %v1716_v36  ;;  %v2101_v11 = vld [vmem:[%s9804_s12 + $0x5c] sm:$0xff]  ;;  %v1340_v35 = vld [vmem:[%s9804_s12 + $0x72] sm:$0xff] }
  0xd2   : > { %8999 = vmatmul.msk.f32.gmra.mxu3 %vm289_vm1, %v1334_v33  ;;  %917 = vst.msk [vmem:[#allocation3 + $0x38] sm:$0xff] %vm527_vm2, %v881_v37  ;;  %9075 = vmatmul.msk.f32.gmra.mxu1 %vm289_vm1, %v2098_v42 }
  0xd4   : > { %v497_v39 = vpop.f32.mrf.mxu2  ;;  %v863_v40 = vld [vmem:[#allocation3 + $0xc8] sm:$0xff] }
  0xd5   : > { %v808_v41 = vpop.f32.mrf.mxu3  ;;  %554 = vst.msk [vmem:[#allocation3 + $0xd0] sm:$0xff] %vm527_vm2, %v497_v39  ;;  %v899_v43 = vadd.f32 %v863_v40, %v805_v30 }
  0xd6   : > { %v446_v45 = vpop.f32.mrf.mxu0 }
  0xd7   : > { %935 = vst.msk [vmem:[#allocation3 + $0xc8] sm:$0xff] %vm527_vm2, %v899_v43  ;;  %v846_v46 = vld [vmem:[#allocation3 + $0x40] sm:$0xff]  ;;  %v757_v49 = vpop.f32.mrf.mxu1 }
  0xd8   : > { %537 = vst.msk [vmem:[#allocation3 + $0x48] sm:$0xff] %vm527_vm2, %v446_v45  ;;  %v882_v48 = vadd.f32 %v846_v46, %v754_v38  ;;  %v1722_v38 = vld [vmem:[%s9804_s12 + $0x73] sm:$0xff] }
  0xd9   : > { %8962 = vmatmul.msk.f32.gmra.mxu2 %vm289_vm1, %v1333_v22  ;;  %9038 = vmatmul.msk.f32.gmra.mxu0 %vm289_vm1, %v1717_v47  ;;  %v2102_v22 = vld [vmem:[%s9804_s12 + $0x64] sm:$0xff]  ;;  %v2104_v45 = vld [vmem:[%s9804_s12 + $0x74] sm:$0xff] }
  0xda   : > { %9000 = vmatmul.msk.f32.gmra.mxu3 %vm289_vm1, %v1335_v44  ;;  %918 = vst.msk [vmem:[#allocation3 + $0x40] sm:$0xff] %vm527_vm2, %v882_v48  ;;  %9076 = vmatmul.msk.f32.gmra.mxu1 %vm289_vm1, %v2099_v53  ;;  %v1341_v46 = vld [vmem:[%s9804_s12 + $0x7a] sm:$0xff] }
  0xdc   : > { %v500_v50 = vpop.f32.mrf.mxu2  ;;  %v864_v51 = vld [vmem:[#allocation3 + $0xd0] sm:$0xff] }
  0xdd   : > { %v811_v52 = vpop.f32.mrf.mxu3  ;;  %555 = vst.msk [vmem:[#allocation3 + $0xd8] sm:$0xff] %vm527_vm2, %v500_v50  ;;  %v900_v54 = vadd.f32 %v864_v51, %v808_v41 }
  0xde   : > { %v449_v56 = vpop.f32.mrf.mxu0 }
  0xdf   : > { %936 = vst.msk [vmem:[#allocation3 + $0xd0] sm:$0xff] %vm527_vm2, %v900_v54  ;;  %v847_v57 = vld [vmem:[#allocation3 + $0x48] sm:$0xff]  ;;  %v760_v60 = vpop.f32.mrf.mxu1 }
  0xe0   : > { %538 = vst.msk [vmem:[#allocation3 + $0x50] sm:$0xff] %vm527_vm2, %v449_v56  ;;  %v883_v59 = vadd.f32 %v847_v57, %v757_v49  ;;  %v1723_v49 = vld [vmem:[%s9804_s12 + $0x7b] sm:$0xff] }
  0xe1   : > { %8963 = vmatmul.msk.f32.gmra.mxu2 %vm289_vm1, %v1334_v33  ;;  %9039 = vmatmul.msk.f32.gmra.mxu0 %vm289_vm1, %v1718_v58  ;;  %v2103_v33 = vld [vmem:[%s9804_s12 + $0x6c] sm:$0xff]  ;;  %v2105_v56 = vld [vmem:[%s9804_s12 + $0x7c] sm:$0xff] }
  0xe2   : > { %9001 = vmatmul.msk.f32.gmra.mxu3 %vm289_vm1, %v1336_v55  ;;  %919 = vst.msk [vmem:[#allocation3 + $0x48] sm:$0xff] %vm527_vm2, %v883_v59  ;;  %9077 = vmatmul.msk.f32.gmra.mxu1 %vm289_vm1, %v2100_v0  ;;  %v1342_v57 = vld [vmem:[%s9804_s12 + $0x82] sm:$0xff] }
  0xe4   : > { %v503_v61 = vpop.f32.mrf.mxu2  ;;  %v865_v62 = vld [vmem:[#allocation3 + $0xd8] sm:$0xff] }
  0xe5   : > { %v814_v63 = vpop.f32.mrf.mxu3  ;;  %556 = vst.msk [vmem:[#allocation3 + $0xe0] sm:$0xff] %vm527_vm2, %v503_v61  ;;  %v901_v1 = vadd.f32 %v865_v62, %v811_v52 }
  0xe6   : > { %v452_v3 = vpop.f32.mrf.mxu0 }
  0xe7   : > { %937 = vst.msk [vmem:[#allocation3 + $0xd8] sm:$0xff] %vm527_vm2, %v901_v1  ;;  %v848_v4 = vld [vmem:[#allocation3 + $0x50] sm:$0xff]  ;;  %v763_v7 = vpop.f32.mrf.mxu1 }
  0xe8   : > { %539 = vst.msk [vmem:[#allocation3 + $0x58] sm:$0xff] %vm527_vm2, %v452_v3  ;;  %v884_v6 = vadd.f32 %v848_v4, %v760_v60  ;;  %v1724_v60 = vld [vmem:[%s9804_s12 + $0x83] sm:$0xff] }
  0xe9   : > { %8964 = vmatmul.msk.f32.gmra.mxu2 %vm289_vm1, %v1335_v44  ;;  %9040 = vmatmul.msk.f32.gmra.mxu0 %vm289_vm1, %v1719_v5  ;;  %v2106_v3 = vld [vmem:[%s9804_s12 + $0x84] sm:$0xff] }
  0xea   : > { %9002 = vmatmul.msk.f32.gmra.mxu3 %vm289_vm1, %v1337_v2  ;;  %920 = vst.msk [vmem:[#allocation3 + $0x50] sm:$0xff] %vm527_vm2, %v884_v6  ;;  %9078 = vmatmul.msk.f32.gmra.mxu1 %vm289_vm1, %v2101_v11  ;;  %v1343_v4 = vld [vmem:[%s9804_s12 + $0x8a] sm:$0xff] }
  0xec   : > { %v506_v8 = vpop.f32.mrf.mxu2  ;;  %v866_v9 = vld [vmem:[#allocation3 + $0xe0] sm:$0xff] }
  0xed   : > { %v817_v10 = vpop.f32.mrf.mxu3  ;;  %557 = vst.msk [vmem:[#allocation3 + $0xe8] sm:$0xff] %vm527_vm2, %v506_v8  ;;  %v902_v12 = vadd.f32 %v866_v9, %v814_v63 }
  0xee   : > { %v455_v14 = vpop.f32.mrf.mxu0 }
  0xef   : > { %938 = vst.msk [vmem:[#allocation3 + $0xe0] sm:$0xff] %vm527_vm2, %v902_v12  ;;  %v849_v15 = vld [vmem:[#allocation3 + $0x58] sm:$0xff]  ;;  %v766_v18 = vpop.f32.mrf.mxu1 }
  0xf0   : > { %540 = vst.msk [vmem:[#allocation3 + $0x60] sm:$0xff] %vm527_vm2, %v455_v14  ;;  %v885_v17 = vadd.f32 %v849_v15, %v763_v7  ;;  %v1725_v7 = vld [vmem:[%s9804_s12 + $0x8b] sm:$0xff] }
  0xf1   : > { %8965 = vmatmul.msk.f32.gmra.mxu2 %vm289_vm1, %v1336_v55  ;;  %9041 = vmatmul.msk.f32.gmra.mxu0 %vm289_vm1, %v1720_v16  ;;  %v2107_v14 = vld [vmem:[%s9804_s12 + $0x8c] sm:$0xff] }
  0xf2   : > { %9003 = vmatmul.msk.f32.gmra.mxu3 %vm289_vm1, %v1338_v13  ;;  %921 = vst.msk [vmem:[#allocation3 + $0x58] sm:$0xff] %vm527_vm2, %v885_v17  ;;  %9079 = vmatmul.msk.f32.gmra.mxu1 %vm289_vm1, %v2102_v22  ;;  %v1344_v15 = vld [vmem:[%s9804_s12 + $0x92] sm:$0xff] }
  0xf4   : > { %v509_v19 = vpop.f32.mrf.mxu2  ;;  %v867_v20 = vld [vmem:[#allocation3 + $0xe8] sm:$0xff] }
  0xf5   : > { %v820_v21 = vpop.f32.mrf.mxu3  ;;  %558 = vst.msk [vmem:[#allocation3 + $0xf0] sm:$0xff] %vm527_vm2, %v509_v19  ;;  %v903_v23 = vadd.f32 %v867_v20, %v817_v10 }
  0xf6   : > { %v458_v25 = vpop.f32.mrf.mxu0 }
  0xf7   : > { %939 = vst.msk [vmem:[#allocation3 + $0xe8] sm:$0xff] %vm527_vm2, %v903_v23  ;;  %v850_v26 = vld [vmem:[#allocation3 + $0x60] sm:$0xff]  ;;  %v769_v29 = vpop.f32.mrf.mxu1 }
  0xf8   : > { %541 = vst.msk [vmem:[#allocation3 + $0x68] sm:$0xff] %vm527_vm2, %v458_v25  ;;  %v886_v28 = vadd.f32 %v850_v26, %v766_v18  ;;  %v1726_v18 = vld [vmem:[%s9804_s12 + $0x93] sm:$0xff]  ;;  %v1220_v23 = vld [vmem:[#allocation3] sm:$0xff] }
  0xf9   : > { %8966 = vmatmul.msk.f32.gmra.mxu2 %vm289_vm1, %v1337_v2  ;;  %9042 = vmatmul.msk.f32.gmra.mxu0 %vm289_vm1, %v1721_v27  ;;  %v2108_v27 = vld [vmem:[%s9804_s12 + $0x94] sm:$0xff] }
  0xfa   : > { %9004 = vmatmul.msk.f32.gmra.mxu3 %vm289_vm1, %v1339_v24  ;;  %922 = vst.msk [vmem:[#allocation3 + $0x60] sm:$0xff] %vm527_vm2, %v886_v28  ;;  %9080 = vmatmul.msk.f32.gmra.mxu1 %vm289_vm1, %v2103_v33  ;;  %v1345_v28 = vld [vmem:[%s9804_s12 + $0x9a] sm:$0xff]  ;;  %v1221_v33 = vld [vmem:[#allocation3 + $0x8] sm:$0xff] }
  0xfc   : > { %v512_v30 = vpop.f32.mrf.mxu2  ;;  %v868_v31 = vld [vmem:[#allocation3 + $0xf0] sm:$0xff] }
  0xfd   : > { %v823_v32 = vpop.f32.mrf.mxu3  ;;  %559 = vst.msk [vmem:[#allocation3 + $0xf8] sm:$0xff] %vm527_vm2, %v512_v30  ;;  %v904_v34 = vadd.f32 %v868_v31, %v820_v21  ;;  %v1727_v30 = vld [vmem:[%s9804_s12 + $0x9b] sm:$0xff] }
  0xfe   : > { %v461_v36 = vpop.f32.mrf.mxu0 }
  0xff   : > { %940 = vst.msk [vmem:[#allocation3 + $0xf0] sm:$0xff] %vm527_vm2, %v904_v34  ;;  %v851_v37 = vld [vmem:[#allocation3 + $0x68] sm:$0xff]  ;;  %v772_v40 = vpop.f32.mrf.mxu1 }
 0x100   : > { %542 = vst.msk [vmem:[#allocation3 + $0x70] sm:$0xff] %vm527_vm2, %v461_v36  ;;  %v887_v39 = vadd.f32 %v851_v37, %v769_v29  ;;  %v2109_v36 = vld [vmem:[%s9804_s12 + $0x9c] sm:$0xff] }
 0x101   : > { %8967 = vmatmul.msk.f32.gmra.mxu2 %vm289_vm1, %v1338_v13  ;;  %9043 = vmatmul.msk.f32.gmra.mxu0 %vm289_vm1, %v1722_v38  ;;  %v1346_v37 = vld [vmem:[%s9804_s12 + $0xa2] sm:$0xff] }
 0x102   : > { %9005 = vmatmul.msk.f32.gmra.mxu3 %vm289_vm1, %v1340_v35  ;;  %923 = vst.msk [vmem:[#allocation3 + $0x68] sm:$0xff] %vm527_vm2, %v887_v39  ;;  %9081 = vmatmul.msk.f32.gmra.mxu1 %vm289_vm1, %v2104_v45 }
 0x104   : > { %v515_v41 = vpop.f32.mrf.mxu2  ;;  %v869_v42 = vld [vmem:[#allocation3 + $0xf8] sm:$0xff] }
 0x105   : > { %v826_v43 = vpop.f32.mrf.mxu3  ;;  %560 = vst.msk [vmem:[#allocation3 + $0x100] sm:$0xff] %vm527_vm2, %v515_v41  ;;  %v905_v44 = vadd.f32 %v869_v42, %v823_v32  ;;  %v1728_v41 = vld [vmem:[%s9804_s12 + $0xa3] sm:$0xff] }
 0x106   : > { %v464_v47 = vpop.f32.mrf.mxu0 }
 0x107   : > { %941 = vst.msk [vmem:[#allocation3 + $0xf8] sm:$0xff] %vm527_vm2, %v905_v44  ;;  %v852_v48 = vld [vmem:[#allocation3 + $0x70] sm:$0xff]  ;;  %v775_v51 = vpop.f32.mrf.mxu1 }
 0x108   : > { %543 = vst.msk [vmem:[#allocation3 + $0x78] sm:$0xff] %vm527_vm2, %v464_v47  ;;  %v888_v50 = vadd.f32 %v852_v48, %v772_v40  ;;  %v1222_v44 = vld [vmem:[#allocation3 + $0x10] sm:$0xff]  ;;  %v2110_v47 = vld [vmem:[%s9804_s12 + $0xa4] sm:$0xff] }
 0x109   : > { %8968 = vmatmul.msk.f32.gmra.mxu2 %vm289_vm1, %v1339_v24  ;;  %9044 = vmatmul.msk.f32.gmra.mxu0 %vm289_vm1, %v1723_v49  ;;  %v1347_v49 = vld [vmem:[%s9804_s12 + $0xaa] sm:$0xff] }
 0x10a   : > { %9006 = vmatmul.msk.f32.gmra.mxu3 %vm289_vm1, %v1341_v46  ;;  %924 = vst.msk [vmem:[#allocation3 + $0x70] sm:$0xff] %vm527_vm2, %v888_v50  ;;  %9082 = vmatmul.msk.f32.gmra.mxu1 %vm289_vm1, %v2105_v56 }
 0x10c   : > { %v518_v52 = vpop.f32.mrf.mxu2  ;;  %v870_v53 = vld [vmem:[#allocation3 + $0x100] sm:$0xff] }
 0x10d   : > { %v829_v54 = vpop.f32.mrf.mxu3  ;;  %561 = vst.msk [vmem:[#allocation3 + $0x108] sm:$0xff] %vm527_vm2, %v518_v52  ;;  %v906_v55 = vadd.f32 %v870_v53, %v826_v43  ;;  %v1729_v52 = vld [vmem:[%s9804_s12 + $0xab] sm:$0xff] }
 0x10e   : > { %v467_v58 = vpop.f32.mrf.mxu0 }
 0x10f   : > { %942 = vst.msk [vmem:[#allocation3 + $0x100] sm:$0xff] %vm527_vm2, %v906_v55  ;;  %v853_v59 = vld [vmem:[#allocation3 + $0x78] sm:$0xff]  ;;  %v778_v62 = vpop.f32.mrf.mxu1 }
 0x110   : > { %544 = vst.msk [vmem:[#allocation3 + $0x80] sm:$0xff] %vm527_vm2, %v467_v58  ;;  %v889_v61 = vadd.f32 %v853_v59, %v775_v51 }
 0x111   : > { %8969 = vmatmul.msk.f32.gmra.mxu2 %vm289_vm1, %v1340_v35  ;;  %9045 = vmatmul.msk.f32.gmra.mxu0 %vm289_vm1, %v1724_v60  ;;  %v2111_v60 = vld [vmem:[%s9804_s12 + $0xac] sm:$0xff] }
 0x112   : > { %9007 = vmatmul.msk.f32.gmra.mxu3 %vm289_vm1, %v1342_v57  ;;  %925 = vst.msk [vmem:[#allocation3 + $0x78] sm:$0xff] %vm527_vm2, %v889_v61  ;;  %9083 = vmatmul.msk.f32.gmra.mxu1 %vm289_vm1, %v2106_v3 }
 0x114   : > { %v521_v63 = vpop.f32.mrf.mxu2  ;;  %v871_v0 = vld [vmem:[#allocation3 + $0x108] sm:$0xff] }
 0x115   : > { %v832_v1 = vpop.f32.mrf.mxu3  ;;  %562 = vst.msk [vmem:[#allocation3 + $0x110] sm:$0xff] %vm527_vm2, %v521_v63  ;;  %v907_v2 = vadd.f32 %v871_v0, %v829_v54 }
 0x116   : > { %v470_v5 = vpop.f32.mrf.mxu0 }
 0x117   : > { %943 = vst.msk [vmem:[#allocation3 + $0x108] sm:$0xff] %vm527_vm2, %v907_v2  ;;  %v854_v6 = vld [vmem:[#allocation3 + $0x80] sm:$0xff]  ;;  %v781_v9 = vpop.f32.mrf.mxu1  ;;  %v1730_v2 = vld [vmem:[%s9804_s12 + $0xb3] sm:$0xff] }
 0x118   : > { %545 = vst.msk [vmem:[#allocation3 + $0x88] sm:$0xff] %vm527_vm2, %v470_v5  ;;  %v890_v8 = vadd.f32 %v854_v6, %v778_v62  ;;  %v1348_v62 = vld [vmem:[%s9804_s12 + $0xb2] sm:$0xff] }
 0x119   : > { %8970 = vmatmul.msk.f32.gmra.mxu2 %vm289_vm1, %v1341_v46  ;;  %9046 = vmatmul.msk.f32.gmra.mxu0 %vm289_vm1, %v1725_v7 }
 0x11a   : > { %9008 = vmatmul.msk.f32.gmra.mxu3 %vm289_vm1, %v1343_v4  ;;  %926 = vst.msk [vmem:[#allocation3 + $0x80] sm:$0xff] %vm527_vm2, %v890_v8  ;;  %9084 = vmatmul.msk.f32.gmra.mxu1 %vm289_vm1, %v2107_v14  ;;  %v1224_v8 = vld [vmem:[#allocation3 + $0x20] sm:$0xff] }
 0x11c   : > { %v524_v10 = vpop.f32.mrf.mxu2  ;;  %v872_v11 = vld [vmem:[#allocation3 + $0x110] sm:$0xff] }
 0x11d   : > { %v835_v12 = vpop.f32.mrf.mxu3  ;;  %563 = vst.msk [vmem:[#allocation3 + $0x118] sm:$0xff] %vm527_vm2, %v524_v10  ;;  %v908_v13 = vadd.f32 %v872_v11, %v832_v1  ;;  %v2112_v11 = vld [vmem:[%s9804_s12 + $0xb4] sm:$0xff] }
 0x11e   : > { %v1876_v17 = vpop.f32.mrf.mxu0 }
 0x11f   : > { %944 = vst.msk [vmem:[#allocation3 + $0x110] sm:$0xff] %vm527_vm2, %v908_v13  ;;  %v855_v16 = vld [vmem:[#allocation3 + $0x88] sm:$0xff]  ;;  %v10156_v20 = vpop.f32.mrf.mxu1  ;;  %v1349_v13 = vld [vmem:[%s9804_s12 + $0xba] sm:$0xff] }
 0x120   : > { %v891_v19 = vadd.f32 %v855_v16, %v781_v9 }
 0x121   : > { %8971 = vmatmul.msk.f32.gmra.mxu2 %vm289_vm1, %v1342_v57  ;;  %9047 = vmatmul.msk.f32.gmra.mxu0 %vm289_vm1, %v1726_v18  ;;  %v1223_v57 = vld [vmem:[#allocation3 + $0x18] sm:$0xff] }
 0x122   : > { %9009 = vmatmul.msk.f32.gmra.mxu3 %vm289_vm1, %v1344_v15  ;;  %927 = vst.msk [vmem:[#allocation3 + $0x88] sm:$0xff] %vm527_vm2, %v891_v19  ;;  %9085 = vmatmul.msk.f32.gmra.mxu1 %vm289_vm1, %v2108_v27 }
 0x124   : > { %v873_v21 = vld [vmem:[#allocation3 + $0x118] sm:$0xff]  ;;  %v1112_v22 = vpop.f32.mrf.mxu2 }
 0x125   : > { %v1494_v24 = vpop.f32.mrf.mxu3  ;;  %v909_v25 = vadd.f32 %v873_v21, %v835_v12  ;;  %v1256_v26 = vadd.f32 %v1220_v23, %v1112_v22  ;;  %v1225_v23 = vld [vmem:[#allocation3 + $0x28] sm:$0xff] }
 0x126   : > { %v1879_v29 = vpop.f32.mrf.mxu0 }
 0x127   : > { %945 = vst.msk [vmem:[#allocation3 + $0x118] sm:$0xff] %vm527_vm2, %v909_v25  ;;  %v10167_v31 = vpop.f32.mrf.mxu1 }
 0x128   : > { %1292 = vst.msk [vmem:[#allocation3] sm:$0xff] %vm527_vm2, %v1256_v26  ;;  %v2113_v26 = vld [vmem:[%s9804_s12 + $0xbc] sm:$0xff] }
 0x129   : > { %8972 = vmatmul.msk.f32.gmra.mxu2 %vm289_vm1, %v1343_v4  ;;  %9048 = vmatmul.msk.f32.gmra.mxu0 %vm289_vm1, %v1727_v30 }
 0x12a   : > { %9010 = vmatmul.msk.f32.gmra.mxu3 %vm289_vm1, %v1345_v28  ;;  %9086 = vmatmul.msk.f32.gmra.mxu1 %vm289_vm1, %v2109_v36 }
 0x12c   : > { %v1115_v32 = vpop.f32.mrf.mxu2 }
 0x12d   : > { %v1497_v34 = vpop.f32.mrf.mxu3  ;;  %v1257_v35 = vadd.f32 %v1221_v33, %v1115_v32  ;;  %v1732_v32 = vld [vmem:[%s9804_s12 + $0xc3] sm:$0xff] }
 0x12e   : > { %v10173_v40 = vpop.f32.mrf.mxu0 }
 0x12f   : > { %1293 = vst.msk [vmem:[#allocation3 + $0x8] sm:$0xff] %vm527_vm2, %v1257_v35  ;;  %v1602_v38 = vld [vmem:[#allocation3] sm:$0xff]  ;;  %v10180_v42 = vpop.f32.mrf.mxu1 }
 0x130   : > { %v1638_v39 = vadd.f32 %v1602_v38, %v1494_v24  ;;  %v1226_v38 = vld [vmem:[#allocation3 + $0x30] sm:$0xff] }
 0x131   : > { %8973 = vmatmul.msk.f32.gmra.mxu2 %vm289_vm1, %v1344_v15  ;;  %9049 = vmatmul.msk.f32.gmra.mxu0 %vm289_vm1, %v1728_v41  ;;  %v2114_v41 = vld [vmem:[%s9804_s12 + $0xc4] sm:$0xff] }
 0x132   : > { %9011 = vmatmul.msk.f32.gmra.mxu3 %vm289_vm1, %v1346_v37  ;;  %1674 = vst.msk [vmem:[#allocation3] sm:$0xff] %vm527_vm2, %v1638_v39  ;;  %9087 = vmatmul.msk.f32.gmra.mxu1 %vm289_vm1, %v2110_v47  ;;  %v1733_v47 = vld [vmem:[%s9804_s12 + $0xcb] sm:$0xff] }
 0x134   : > { %v1118_v43 = vpop.f32.mrf.mxu2 }
 0x135   : > { %v1500_v45 = vpop.f32.mrf.mxu3  ;;  %v1258_v46 = vadd.f32 %v1222_v44, %v1118_v43  ;;  %v1351_v44 = vld [vmem:[%s9804_s12 + $0xca] sm:$0xff] }
 0x136   : > { %v1603_v48 = vld [vmem:[#allocation3 + $0x8] sm:$0xff]  ;;  %v10186_v51 = vpop.f32.mrf.mxu0 }
 0x137   : > { %1294 = vst.msk [vmem:[#allocation3 + $0x10] sm:$0xff] %vm527_vm2, %v1258_v46  ;;  %v1639_v50 = vadd.f32 %v1603_v48, %v1497_v34  ;;  %v10193_v55 = vpop.f32.mrf.mxu1 }
 0x139   : > { %1675 = vst.msk [vmem:[#allocation3 + $0x8] sm:$0xff] %vm527_vm2, %v1639_v50  ;;  %v1984_v53 = vld [vmem:[#allocation3] sm:$0xff]  ;;  %8974 = vmatmul.msk.f32.gmra.mxu2 %vm289_vm1, %v1345_v28  ;;  %9050 = vmatmul.msk.f32.gmra.mxu0 %vm289_vm1, %v1729_v52 }
 0x13a   : > { %9012 = vmatmul.msk.f32.gmra.mxu3 %vm289_vm1, %v1347_v49  ;;  %v2020_v54 = vadd.f32 %v1984_v53, %v1876_v17  ;;  %9088 = vmatmul.msk.f32.gmra.mxu1 %vm289_vm1, %v2111_v60  ;;  %v1731_v17 = vld [vmem:[%s9804_s12 + $0xbb] sm:$0xff] }
 0x13b   : > { %v1350_v28 = vld [vmem:[%s9804_s12 + $0xc2] sm:$0xff] }
 0x13c   : > { %2056 = vst.msk [vmem:[#allocation3] sm:$0xff] %vm527_vm2, %v2020_v54  ;;  %v1121_v56 = vpop.f32.mrf.mxu2  ;;  %v1227_v53 = vld [vmem:[#allocation3 + $0x38] sm:$0xff] }
 0x13d   : > { %v1503_v58 = vpop.f32.mrf.mxu3  ;;  %v1259_v59 = vadd.f32 %v1223_v57, %v1121_v56  ;;  %v2115_v57 = vld [vmem:[%s9804_s12 + $0xcc] sm:$0xff] }
 0x13e   : > { %v1604_v61 = vld [vmem:[#allocation3 + $0x10] sm:$0xff]  ;;  %v10200_v1 = vpop.f32.mrf.mxu0 }
 0x13f   : > { %1295 = vst.msk [vmem:[#allocation3 + $0x18] sm:$0xff] %vm527_vm2, %v1259_v59  ;;  %v1640_v63 = vadd.f32 %v1604_v61, %v1500_v45  ;;  %v10208_v5 = vpop.f32.mrf.mxu1  ;;  %v1352_v59 = vld [vmem:[%s9804_s12 + $0xd2] sm:$0xff] }
 0x140   : > { %v1985_v0 = vld [vmem:[#allocation3 + $0x8] sm:$0xff] }
 0x141   : > { %1676 = vst.msk [vmem:[#allocation3 + $0x10] sm:$0xff] %vm527_vm2, %v1640_v63  ;;  %v2021_v3 = vadd.f32 %v1985_v0, %v1879_v29  ;;  %8975 = vmatmul.msk.f32.gmra.mxu2 %vm289_vm1, %v1346_v37  ;;  %9051 = vmatmul.msk.f32.gmra.mxu0 %vm289_vm1, %v1730_v2 }
 0x142   : > { %9013 = vmatmul.msk.f32.gmra.mxu3 %vm289_vm1, %v1348_v62  ;;  %9089 = vmatmul.msk.f32.gmra.mxu1 %vm289_vm1, %v2112_v11 }
 0x143   : > { %2057 = vst.msk [vmem:[#allocation3 + $0x8] sm:$0xff] %vm527_vm2, %v2021_v3  ;;  %v2366_v4 = vld [vmem:[#allocation3] sm:$0xff] }
 0x144   : > { %v2402_v6 = vadd.f32 %v2366_v4, %v10156_v20  ;;  %v1124_v7 = vpop.f32.mrf.mxu2  ;;  %v1228_v4 = vld [vmem:[#allocation3 + $0x40] sm:$0xff] }
 0x145   : > { %v1506_v9 = vpop.f32.mrf.mxu3  ;;  %v1260_v10 = vadd.f32 %v1224_v8, %v1124_v7  ;;  %v2116_v8 = vld [vmem:[%s9804_s12 + $0xd4] sm:$0xff] }
 0x146   : > { %2438 = vst.msk [vmem:[#allocation3] sm:$0xff] %vm527_vm2, %v2402_v6  ;;  %v1605_v12 = vld [vmem:[#allocation3 + $0x18] sm:$0xff]  ;;  %v10216_v16 = vpop.f32.mrf.mxu0 }
 0x147   : > { %1296 = vst.msk [vmem:[#allocation3 + $0x20] sm:$0xff] %vm527_vm2, %v1260_v10  ;;  %v1641_v14 = vadd.f32 %v1605_v12, %v1503_v58  ;;  %v10226_v21 = vpop.f32.mrf.mxu1  ;;  %v1353_v10 = vld [vmem:[%s9804_s12 + $0xda] sm:$0xff] }
 0x148   : > { %v1986_v15 = vld [vmem:[#allocation3 + $0x10] sm:$0xff] }
 0x149   : > { %1677 = vst.msk [vmem:[#allocation3 + $0x18] sm:$0xff] %vm527_vm2, %v1641_v14  ;;  %v2022_v18 = vadd.f32 %v1986_v15, %v10173_v40  ;;  %8976 = vmatmul.msk.f32.gmra.mxu2 %vm289_vm1, %v1347_v49  ;;  %9052 = vmatmul.msk.f32.gmra.mxu0 %vm289_vm1, %v1731_v17 }
 0x14a   : > { %9014 = vmatmul.msk.f32.gmra.mxu3 %vm289_vm1, %v1349_v13  ;;  %v2367_v19 = vld [vmem:[#allocation3 + $0x8] sm:$0xff]  ;;  %9090 = vmatmul.msk.f32.gmra.mxu1 %vm289_vm1, %v2113_v26 }
 0x14b   : > { %2058 = vst.msk [vmem:[#allocation3 + $0x10] sm:$0xff] %vm527_vm2, %v2022_v18  ;;  %v2403_v20 = vadd.f32 %v2367_v19, %v10167_v31  ;;  %v1229_v19 = vld [vmem:[#allocation3 + $0x48] sm:$0xff] }
 0x14c   : > { %v1127_v22 = vpop.f32.mrf.mxu2 }
 0x14d   : > { %v1509_v24 = vpop.f32.mrf.mxu3  ;;  %2439 = vst.msk [vmem:[#allocation3 + $0x8] sm:$0xff] %vm527_vm2, %v2403_v20  ;;  %v1261_v25 = vadd.f32 %v1225_v23, %v1127_v22  ;;  %v2117_v23 = vld [vmem:[%s9804_s12 + $0xdc] sm:$0xff] }
 0x14e   : > { %v1606_v27 = vld [vmem:[#allocation3 + $0x20] sm:$0xff]  ;;  %v10233_v31 = vpop.f32.mrf.mxu0 }
 0x14f   : > { %1297 = vst.msk [vmem:[#allocation3 + $0x28] sm:$0xff] %vm527_vm2, %v1261_v25  ;;  %v1642_v29 = vadd.f32 %v1606_v27, %v1506_v9  ;;  %v10243_v36 = vpop.f32.mrf.mxu1  ;;  %v1354_v25 = vld [vmem:[%s9804_s12 + $0xe2] sm:$0xff] }
 0x150   : > { %v1987_v30 = vld [vmem:[#allocation3 + $0x18] sm:$0xff] }
 0x151   : > { %1678 = vst.msk [vmem:[#allocation3 + $0x20] sm:$0xff] %vm527_vm2, %v1642_v29  ;;  %v2023_v33 = vadd.f32 %v1987_v30, %v10186_v51  ;;  %8977 = vmatmul.msk.f32.gmra.mxu2 %vm289_vm1, %v1348_v62  ;;  %9053 = vmatmul.msk.f32.gmra.mxu0 %vm289_vm1, %v1732_v32  ;;  %v1734_v62 = vld [vmem:[%s9804_s12 + $0xd3] sm:$0xff] }
 0x152   : > { %9015 = vmatmul.msk.f32.gmra.mxu3 %vm289_vm1, %v1350_v28  ;;  %v2368_v34 = vld [vmem:[#allocation3 + $0x10] sm:$0xff]  ;;  %9091 = vmatmul.msk.f32.gmra.mxu1 %vm289_vm1, %v2114_v41 }
 0x153   : > { %2059 = vst.msk [vmem:[#allocation3 + $0x18] sm:$0xff] %vm527_vm2, %v2023_v33  ;;  %v2404_v35 = vadd.f32 %v2368_v34, %v10180_v42  ;;  %v1230_v34 = vld [vmem:[#allocation3 + $0x50] sm:$0xff] }
 0x154   : > { %v1130_v37 = vpop.f32.mrf.mxu2 }
 0x155   : > { %v1512_v39 = vpop.f32.mrf.mxu3  ;;  %2440 = vst.msk [vmem:[#allocation3 + $0x10] sm:$0xff] %vm527_vm2, %v2404_v35  ;;  %v1262_v40 = vadd.f32 %v1226_v38, %v1130_v37  ;;  %v2118_v38 = vld [vmem:[%s9804_s12 + $0xe4] sm:$0xff] }
 0x156   : > { %v1607_v43 = vld [vmem:[#allocation3 + $0x28] sm:$0xff]  ;;  %v10250_v46 = vpop.f32.mrf.mxu0 }
 0x157   : > { %1298 = vst.msk [vmem:[#allocation3 + $0x30] sm:$0xff] %vm527_vm2, %v1262_v40  ;;  %v1643_v45 = vadd.f32 %v1607_v43, %v1509_v24  ;;  %v10260_v51 = vpop.f32.mrf.mxu1  ;;  %v1355_v40 = vld [vmem:[%s9804_s12 + $0xea] sm:$0xff] }
 0x158   : > { %v1988_v42 = vld [vmem:[#allocation3 + $0x20] sm:$0xff] }
 0x159   : > { %1679 = vst.msk [vmem:[#allocation3 + $0x28] sm:$0xff] %vm527_vm2, %v1643_v45  ;;  %v2024_v48 = vadd.f32 %v1988_v42, %v10200_v1  ;;  %8978 = vmatmul.msk.f32.gmra.mxu2 %vm289_vm1, %v1349_v13  ;;  %9054 = vmatmul.msk.f32.gmra.mxu0 %vm289_vm1, %v1733_v47  ;;  %v1735_v13 = vld [vmem:[%s9804_s12 + $0xdb] sm:$0xff] }
 0x15a   : > { %9016 = vmatmul.msk.f32.gmra.mxu3 %vm289_vm1, %v1351_v44  ;;  %v2369_v49 = vld [vmem:[#allocation3 + $0x18] sm:$0xff]  ;;  %9092 = vmatmul.msk.f32.gmra.mxu1 %vm289_vm1, %v2115_v57 }
 0x15b   : > { %2060 = vst.msk [vmem:[#allocation3 + $0x20] sm:$0xff] %vm527_vm2, %v2024_v48  ;;  %v2405_v50 = vadd.f32 %v2369_v49, %v10193_v55  ;;  %v1231_v49 = vld [vmem:[#allocation3 + $0x58] sm:$0xff] }
 0x15c   : > { %v1133_v52 = vpop.f32.mrf.mxu2 }
 0x15d   : > { %v1515_v54 = vpop.f32.mrf.mxu3  ;;  %2441 = vst.msk [vmem:[#allocation3 + $0x18] sm:$0xff] %vm527_vm2, %v2405_v50  ;;  %v1263_v56 = vadd.f32 %v1227_v53, %v1133_v52  ;;  %v2119_v53 = vld [vmem:[%s9804_s12 + $0xec] sm:$0xff] }
 0x15e   : > { %v1608_v58 = vld [vmem:[#allocation3 + $0x30] sm:$0xff]  ;;  %v10267_v61 = vpop.f32.mrf.mxu0 }
 0x15f   : > { %1299 = vst.msk [vmem:[#allocation3 + $0x38] sm:$0xff] %vm527_vm2, %v1263_v56  ;;  %v1644_v60 = vadd.f32 %v1608_v58, %v1512_v39  ;;  %v10277_v2 = vpop.f32.mrf.mxu1  ;;  %v1356_v56 = vld [vmem:[%s9804_s12 + $0xf2] sm:$0xff] }
 0x160   : > { %v1989_v55 = vld [vmem:[#allocation3 + $0x28] sm:$0xff] }
 0x161   : > { %1680 = vst.msk [vmem:[#allocation3 + $0x30] sm:$0xff] %vm527_vm2, %v1644_v60  ;;  %v2025_v63 = vadd.f32 %v1989_v55, %v10216_v16  ;;  %8979 = vmatmul.msk.f32.gmra.mxu2 %vm289_vm1, %v1350_v28  ;;  %9055 = vmatmul.msk.f32.gmra.mxu0 %vm289_vm1, %v1734_v62  ;;  %v1736_v28 = vld [vmem:[%s9804_s12 + $0xe3] sm:$0xff] }
 0x162   : > { %9017 = vmatmul.msk.f32.gmra.mxu3 %vm289_vm1, %v1352_v59  ;;  %v2370_v0 = vld [vmem:[#allocation3 + $0x20] sm:$0xff]  ;;  %9093 = vmatmul.msk.f32.gmra.mxu1 %vm289_vm1, %v2116_v8 }
 0x163   : > { %2061 = vst.msk [vmem:[#allocation3 + $0x28] sm:$0xff] %vm527_vm2, %v2025_v63  ;;  %v2406_v1 = vadd.f32 %v2370_v0, %v10208_v5  ;;  %v1232_v0 = vld [vmem:[#allocation3 + $0x60] sm:$0xff] }
 0x164   : > { %v1136_v3 = vpop.f32.mrf.mxu2 }
 0x165   : > { %v1518_v6 = vpop.f32.mrf.mxu3  ;;  %2442 = vst.msk [vmem:[#allocation3 + $0x20] sm:$0xff] %vm527_vm2, %v2406_v1  ;;  %v1264_v7 = vadd.f32 %v1228_v4, %v1136_v3  ;;  %v2120_v4 = vld [vmem:[%s9804_s12 + $0xf4] sm:$0xff] }
 0x166   : > { %v1609_v9 = vld [vmem:[#allocation3 + $0x38] sm:$0xff]  ;;  %v10284_v12 = vpop.f32.mrf.mxu0 }
 0x167   : > { %1300 = vst.msk [vmem:[#allocation3 + $0x40] sm:$0xff] %vm527_vm2, %v1264_v7  ;;  %v1645_v11 = vadd.f32 %v1609_v9, %v1515_v54  ;;  %v10294_v17 = vpop.f32.mrf.mxu1  ;;  %v1357_v7 = vld [vmem:[%s9804_s12 + $0xfa] sm:$0xff] }
 0x168   : > { %v1990_v5 = vld [vmem:[#allocation3 + $0x30] sm:$0xff] }
 0x169   : > { %1681 = vst.msk [vmem:[#allocation3 + $0x38] sm:$0xff] %vm527_vm2, %v1645_v11  ;;  %v2026_v14 = vadd.f32 %v1990_v5, %v10233_v31  ;;  %8980 = vmatmul.msk.f32.gmra.mxu2 %vm289_vm1, %v1351_v44  ;;  %9056 = vmatmul.msk.f32.gmra.mxu0 %vm289_vm1, %v1735_v13  ;;  %v1737_v44 = vld [vmem:[%s9804_s12 + $0xeb] sm:$0xff] }
 0x16a   : > { %9018 = vmatmul.msk.f32.gmra.mxu3 %vm289_vm1, %v1353_v10  ;;  %v2371_v15 = vld [vmem:[#allocation3 + $0x28] sm:$0xff]  ;;  %9094 = vmatmul.msk.f32.gmra.mxu1 %vm289_vm1, %v2117_v23 }
 0x16b   : > { %2062 = vst.msk [vmem:[#allocation3 + $0x30] sm:$0xff] %vm527_vm2, %v2026_v14  ;;  %v2407_v16 = vadd.f32 %v2371_v15, %v10226_v21  ;;  %v1233_v15 = vld [vmem:[#allocation3 + $0x68] sm:$0xff] }
 0x16c   : > { %v1139_v18 = vpop.f32.mrf.mxu2 }
 0x16d   : > { %v1521_v20 = vpop.f32.mrf.mxu3  ;;  %2443 = vst.msk [vmem:[#allocation3 + $0x28] sm:$0xff] %vm527_vm2, %v2407_v16  ;;  %v1265_v22 = vadd.f32 %v1229_v19, %v1139_v18  ;;  %v2121_v19 = vld [vmem:[%s9804_s12 + $0xfc] sm:$0xff] }
 0x16e   : > { %v1610_v24 = vld [vmem:[#allocation3 + $0x40] sm:$0xff]  ;;  %v10301_v27 = vpop.f32.mrf.mxu0 }
 0x16f   : > { %1301 = vst.msk [vmem:[#allocation3 + $0x48] sm:$0xff] %vm527_vm2, %v1265_v22  ;;  %v1646_v26 = vadd.f32 %v1610_v24, %v1518_v6  ;;  %v10311_v32 = vpop.f32.mrf.mxu1  ;;  %v1358_v22 = vld [vmem:[%s9804_s12 + $0x102] sm:$0xff] }
 0x170   : > { %v1991_v21 = vld [vmem:[#allocation3 + $0x38] sm:$0xff] }
 0x171   : > { %1682 = vst.msk [vmem:[#allocation3 + $0x40] sm:$0xff] %vm527_vm2, %v1646_v26  ;;  %v2027_v29 = vadd.f32 %v1991_v21, %v10250_v46  ;;  %8981 = vmatmul.msk.f32.gmra.mxu2 %vm289_vm1, %v1352_v59  ;;  %9057 = vmatmul.msk.f32.gmra.mxu0 %vm289_vm1, %v1736_v28  ;;  %v1738_v59 = vld [vmem:[%s9804_s12 + $0xf3] sm:$0xff] }
 0x172   : > { %9019 = vmatmul.msk.f32.gmra.mxu3 %vm289_vm1, %v1354_v25  ;;  %v2372_v30 = vld [vmem:[#allocation3 + $0x30] sm:$0xff]  ;;  %9095 = vmatmul.msk.f32.gmra.mxu1 %vm289_vm1, %v2118_v38 }
 0x173   : > { %2063 = vst.msk [vmem:[#allocation3 + $0x38] sm:$0xff] %vm527_vm2, %v2027_v29  ;;  %v2408_v31 = vadd.f32 %v2372_v30, %v10243_v36  ;;  %v1234_v30 = vld [vmem:[#allocation3 + $0x70] sm:$0xff] }
 0x174   : > { %v1142_v33 = vpop.f32.mrf.mxu2 }
 0x175   : > { %v1524_v35 = vpop.f32.mrf.mxu3  ;;  %2444 = vst.msk [vmem:[#allocation3 + $0x30] sm:$0xff] %vm527_vm2, %v2408_v31  ;;  %v1266_v37 = vadd.f32 %v1230_v34, %v1142_v33  ;;  %v2122_v34 = vld [vmem:[%s9804_s12 + $0x104] sm:$0xff] }
 0x176   : > { %v1611_v39 = vld [vmem:[#allocation3 + $0x48] sm:$0xff]  ;;  %v10318_v43 = vpop.f32.mrf.mxu0 }
 0x177   : > { %1302 = vst.msk [vmem:[#allocation3 + $0x50] sm:$0xff] %vm527_vm2, %v1266_v37  ;;  %v1647_v41 = vadd.f32 %v1611_v39, %v1521_v20  ;;  %v10328_v47 = vpop.f32.mrf.mxu1  ;;  %v1359_v37 = vld [vmem:[%s9804_s12 + $0x10a] sm:$0xff] }
 0x178   : > { %v1992_v36 = vld [vmem:[#allocation3 + $0x40] sm:$0xff] }
 0x179   : > { %1683 = vst.msk [vmem:[#allocation3 + $0x48] sm:$0xff] %vm527_vm2, %v1647_v41  ;;  %v2028_v45 = vadd.f32 %v1992_v36, %v10267_v61  ;;  %8982 = vmatmul.msk.f32.gmra.mxu2 %vm289_vm1, %v1353_v10  ;;  %9058 = vmatmul.msk.f32.gmra.mxu0 %vm289_vm1, %v1737_v44  ;;  %v1739_v10 = vld [vmem:[%s9804_s12 + $0xfb] sm:$0xff] }
 0x17a   : > { %9020 = vmatmul.msk.f32.gmra.mxu3 %vm289_vm1, %v1355_v40  ;;  %v2373_v42 = vld [vmem:[#allocation3 + $0x38] sm:$0xff]  ;;  %9096 = vmatmul.msk.f32.gmra.mxu1 %vm289_vm1, %v2119_v53 }
 0x17b   : > { %2064 = vst.msk [vmem:[#allocation3 + $0x40] sm:$0xff] %vm527_vm2, %v2028_v45  ;;  %v2409_v46 = vadd.f32 %v2373_v42, %v10260_v51  ;;  %v1235_v42 = vld [vmem:[#allocation3 + $0x78] sm:$0xff] }
 0x17c   : > { %v1145_v48 = vpop.f32.mrf.mxu2 }
 0x17d   : > { %v1527_v50 = vpop.f32.mrf.mxu3  ;;  %2445 = vst.msk [vmem:[#allocation3 + $0x38] sm:$0xff] %vm527_vm2, %v2409_v46  ;;  %v1267_v52 = vadd.f32 %v1231_v49, %v1145_v48  ;;  %v2123_v49 = vld [vmem:[%s9804_s12 + $0x10c] sm:$0xff] }
 0x17e   : > { %v1612_v54 = vld [vmem:[#allocation3 + $0x50] sm:$0xff]  ;;  %v10335_v58 = vpop.f32.mrf.mxu0 }
 0x17f   : > { %1303 = vst.msk [vmem:[#allocation3 + $0x58] sm:$0xff] %vm527_vm2, %v1267_v52  ;;  %v1648_v57 = vadd.f32 %v1612_v54, %v1524_v35  ;;  %v10345_v62 = vpop.f32.mrf.mxu1  ;;  %v1360_v52 = vld [vmem:[%s9804_s12 + $0x112] sm:$0xff] }
 0x180   : > { %v1993_v51 = vld [vmem:[#allocation3 + $0x48] sm:$0xff] }
 0x181   : > { %1684 = vst.msk [vmem:[#allocation3 + $0x50] sm:$0xff] %vm527_vm2, %v1648_v57  ;;  %v2029_v60 = vadd.f32 %v1993_v51, %v10284_v12  ;;  %8983 = vmatmul.msk.f32.gmra.mxu2 %vm289_vm1, %v1354_v25  ;;  %9059 = vmatmul.msk.f32.gmra.mxu0 %vm289_vm1, %v1738_v59  ;;  %v1740_v25 = vld [vmem:[%s9804_s12 + $0x103] sm:$0xff] }
 0x182   : > { %9021 = vmatmul.msk.f32.gmra.mxu3 %vm289_vm1, %v1356_v56  ;;  %v2374_v55 = vld [vmem:[#allocation3 + $0x40] sm:$0xff]  ;;  %9097 = vmatmul.msk.f32.gmra.mxu1 %vm289_vm1, %v2120_v4 }
 0x183   : > { %2065 = vst.msk [vmem:[#allocation3 + $0x48] sm:$0xff] %vm527_vm2, %v2029_v60  ;;  %v2410_v61 = vadd.f32 %v2374_v55, %v10277_v2  ;;  %v1236_v55 = vld [vmem:[#allocation3 + $0x80] sm:$0xff] }
 0x184   : > { %v1148_v63 = vpop.f32.mrf.mxu2 }
 0x185   : > { %v1530_v1 = vpop.f32.mrf.mxu3  ;;  %2446 = vst.msk [vmem:[#allocation3 + $0x40] sm:$0xff] %vm527_vm2, %v2410_v61  ;;  %v1268_v3 = vadd.f32 %v1232_v0, %v1148_v63  ;;  %v2124_v0 = vld [vmem:[%s9804_s12 + $0x114] sm:$0xff] }
 0x186   : > { %v1613_v6 = vld [vmem:[#allocation3 + $0x58] sm:$0xff]  ;;  %v10352_v9 = vpop.f32.mrf.mxu0 }
 0x187   : > { %1304 = vst.msk [vmem:[#allocation3 + $0x60] sm:$0xff] %vm527_vm2, %v1268_v3  ;;  %v1649_v8 = vadd.f32 %v1613_v6, %v1527_v50  ;;  %v10362_v13 = vpop.f32.mrf.mxu1  ;;  %v1361_v3 = vld [vmem:[%s9804_s12 + $0x11a] sm:$0xff] }
 0x188   : > { %v1994_v2 = vld [vmem:[#allocation3 + $0x50] sm:$0xff] }
 0x189   : > { %1685 = vst.msk [vmem:[#allocation3 + $0x58] sm:$0xff] %vm527_vm2, %v1649_v8  ;;  %v2030_v11 = vadd.f32 %v1994_v2, %v10301_v27  ;;  %8984 = vmatmul.msk.f32.gmra.mxu2 %vm289_vm1, %v1355_v40  ;;  %9060 = vmatmul.msk.f32.gmra.mxu0 %vm289_vm1, %v1739_v10  ;;  %v1741_v40 = vld [vmem:[%s9804_s12 + $0x10b] sm:$0xff] }
 0x18a   : > { %9022 = vmatmul.msk.f32.gmra.mxu3 %vm289_vm1, %v1357_v7  ;;  %v2375_v5 = vld [vmem:[#allocation3 + $0x48] sm:$0xff]  ;;  %9098 = vmatmul.msk.f32.gmra.mxu1 %vm289_vm1, %v2121_v19 }
 0x18b   : > { %2066 = vst.msk [vmem:[#allocation3 + $0x50] sm:$0xff] %vm527_vm2, %v2030_v11  ;;  %v2411_v12 = vadd.f32 %v2375_v5, %v10294_v17  ;;  %v1237_v5 = vld [vmem:[#allocation3 + $0x88] sm:$0xff] }
 0x18c   : > { %v1151_v14 = vpop.f32.mrf.mxu2 }
 0x18d   : > { %v1533_v16 = vpop.f32.mrf.mxu3  ;;  %2447 = vst.msk [vmem:[#allocation3 + $0x48] sm:$0xff] %vm527_vm2, %v2411_v12  ;;  %v1269_v18 = vadd.f32 %v1233_v15, %v1151_v14  ;;  %v2125_v15 = vld [vmem:[%s9804_s12 + $0x11c] sm:$0xff] }
 0x18e   : > { %v1614_v20 = vld [vmem:[#allocation3 + $0x60] sm:$0xff]  ;;  %v10369_v24 = vpop.f32.mrf.mxu0 }
 0x18f   : > { %1305 = vst.msk [vmem:[#allocation3 + $0x68] sm:$0xff] %vm527_vm2, %v1269_v18  ;;  %v1650_v23 = vadd.f32 %v1614_v20, %v1530_v1  ;;  %v10379_v28 = vpop.f32.mrf.mxu1  ;;  %v1362_v18 = vld [vmem:[%s9804_s12 + $0x122] sm:$0xff] }
 0x190   : > { %v1995_v17 = vld [vmem:[#allocation3 + $0x58] sm:$0xff] }
 0x191   : > { %1686 = vst.msk [vmem:[#allocation3 + $0x60] sm:$0xff] %vm527_vm2, %v1650_v23  ;;  %v2031_v26 = vadd.f32 %v1995_v17, %v10318_v43  ;;  %8985 = vmatmul.msk.f32.gmra.mxu2 %vm289_vm1, %v1356_v56  ;;  %9061 = vmatmul.msk.f32.gmra.mxu0 %vm289_vm1, %v1740_v25  ;;  %v1742_v56 = vld [vmem:[%s9804_s12 + $0x113] sm:$0xff] }
 0x192   : > { %9023 = vmatmul.msk.f32.gmra.mxu3 %vm289_vm1, %v1358_v22  ;;  %v2376_v21 = vld [vmem:[#allocation3 + $0x50] sm:$0xff]  ;;  %9099 = vmatmul.msk.f32.gmra.mxu1 %vm289_vm1, %v2122_v34 }
 0x193   : > { %2067 = vst.msk [vmem:[#allocation3 + $0x58] sm:$0xff] %vm527_vm2, %v2031_v26  ;;  %v2412_v27 = vadd.f32 %v2376_v21, %v10311_v32  ;;  %v1238_v21 = vld [vmem:[#allocation3 + $0x90] sm:$0xff] }
 0x194   : > { %v1154_v29 = vpop.f32.mrf.mxu2 }
 0x195   : > { %v1536_v31 = vpop.f32.mrf.mxu3  ;;  %2448 = vst.msk [vmem:[#allocation3 + $0x50] sm:$0xff] %vm527_vm2, %v2412_v27  ;;  %v1270_v33 = vadd.f32 %v1234_v30, %v1154_v29  ;;  %v2126_v30 = vld [vmem:[%s9804_s12 + $0x124] sm:$0xff] }
 0x196   : > { %v1615_v35 = vld [vmem:[#allocation3 + $0x68] sm:$0xff]  ;;  %v10386_v39 = vpop.f32.mrf.mxu0 }
 0x197   : > { %1306 = vst.msk [vmem:[#allocation3 + $0x70] sm:$0xff] %vm527_vm2, %v1270_v33  ;;  %v1651_v38 = vadd.f32 %v1615_v35, %v1533_v16  ;;  %v10396_v44 = vpop.f32.mrf.mxu1  ;;  %v1363_v33 = vld [vmem:[%s9804_s12 + $0x12a] sm:$0xff] }
 0x198   : > { %v1996_v32 = vld [vmem:[#allocation3 + $0x60] sm:$0xff] }
 0x199   : > { %1687 = vst.msk [vmem:[#allocation3 + $0x68] sm:$0xff] %vm527_vm2, %v1651_v38  ;;  %v2032_v41 = vadd.f32 %v1996_v32, %v10335_v58  ;;  %8986 = vmatmul.msk.f32.gmra.mxu2 %vm289_vm1, %v1357_v7  ;;  %9062 = vmatmul.msk.f32.gmra.mxu0 %vm289_vm1, %v1741_v40  ;;  %v1743_v7 = vld [vmem:[%s9804_s12 + $0x11b] sm:$0xff] }
 0x19a   : > { %9024 = vmatmul.msk.f32.gmra.mxu3 %vm289_vm1, %v1359_v37  ;;  %v2377_v36 = vld [vmem:[#allocation3 + $0x58] sm:$0xff]  ;;  %9100 = vmatmul.msk.f32.gmra.mxu1 %vm289_vm1, %v2123_v49 }
 0x19b   : > { %2068 = vst.msk [vmem:[#allocation3 + $0x60] sm:$0xff] %vm527_vm2, %v2032_v41  ;;  %v2413_v43 = vadd.f32 %v2377_v36, %v10328_v47  ;;  %v1239_v36 = vld [vmem:[#allocation3 + $0x98] sm:$0xff] }
 0x19c   : > { %v1157_v45 = vpop.f32.mrf.mxu2  ;;  %v2856_v49 = vld [vmem:[%s9804_s12 + $0x25] sm:$0xff] }
 0x19d   : > { %v1539_v46 = vpop.f32.mrf.mxu3  ;;  %2449 = vst.msk [vmem:[#allocation3 + $0x58] sm:$0xff] %vm527_vm2, %v2413_v43  ;;  %v1271_v48 = vadd.f32 %v1235_v42, %v1157_v45  ;;  %v2127_v42 = vld [vmem:[%s9804_s12 + $0x12c] sm:$0xff] }
 0x19e   : > { %v1616_v50 = vld [vmem:[#allocation3 + $0x70] sm:$0xff]  ;;  %v10403_v54 = vpop.f32.mrf.mxu0 }
 0x19f   : > { %1307 = vst.msk [vmem:[#allocation3 + $0x78] sm:$0xff] %vm527_vm2, %v1271_v48  ;;  %v1652_v53 = vadd.f32 %v1616_v50, %v1536_v31  ;;  %v10413_v59 = vpop.f32.mrf.mxu1  ;;  %v2474_v48 = vld [vmem:[%s9804_s12 + $0x24] sm:$0xff] }
 0x1a0   : > { %v1997_v47 = vld [vmem:[#allocation3 + $0x68] sm:$0xff] }
 0x1a1   : > { %1688 = vst.msk [vmem:[#allocation3 + $0x70] sm:$0xff] %vm527_vm2, %v1652_v53  ;;  %v2033_v57 = vadd.f32 %v1997_v47, %v10352_v9  ;;  %8987 = vmatmul.msk.f32.gmra.mxu2 %vm289_vm1, %v1358_v22  ;;  %9063 = vmatmul.msk.f32.gmra.mxu0 %vm289_vm1, %v1742_v56  ;;  %v1744_v22 = vld [vmem:[%s9804_s12 + $0x123] sm:$0xff] }
 0x1a2   : > { %9025 = vmatmul.msk.f32.gmra.mxu3 %vm289_vm1, %v1360_v52  ;;  %v2378_v51 = vld [vmem:[#allocation3 + $0x60] sm:$0xff]  ;;  %9101 = vmatmul.msk.f32.gmra.mxu1 %vm289_vm1, %v2124_v0 }
 0x1a3   : > { %2069 = vst.msk [vmem:[#allocation3 + $0x68] sm:$0xff] %vm527_vm2, %v2033_v57  ;;  %v2414_v58 = vadd.f32 %v2378_v51, %v10345_v62  ;;  %v3238_v53 = vld [vmem:[%s9804_s12 + $0x26] sm:$0xff] }
 0x1a4   : > { %v1160_v60 = vpop.f32.mrf.mxu2  ;;  %v2857_v0 = vld [vmem:[%s9804_s12 + $0x2d] sm:$0xff] }
 0x1a5   : > { %v1542_v61 = vpop.f32.mrf.mxu3  ;;  %2450 = vst.msk [vmem:[#allocation3 + $0x60] sm:$0xff] %vm527_vm2, %v2414_v58  ;;  %v1272_v63 = vadd.f32 %v1236_v55, %v1160_v60  ;;  %v1240_v58 = vld [vmem:[#allocation3 + $0xa0] sm:$0xff] }
 0x1a6   : > { %v1617_v1 = vld [vmem:[#allocation3 + $0x78] sm:$0xff]  ;;  %v10420_v6 = vpop.f32.mrf.mxu0 }
 0x1a7   : > { %1308 = vst.msk [vmem:[#allocation3 + $0x80] sm:$0xff] %vm527_vm2, %v1272_v63  ;;  %v1653_v4 = vadd.f32 %v1617_v1, %v1539_v46  ;;  %v10430_v10 = vpop.f32.mrf.mxu1  ;;  %v2475_v63 = vld [vmem:[%s9804_s12 + $0x2c] sm:$0xff] }
 0x1a8   : > { %v1998_v62 = vld [vmem:[#allocation3 + $0x70] sm:$0xff] }
 0x1a9   : > { %1689 = vst.msk [vmem:[#allocation3 + $0x78] sm:$0xff] %vm527_vm2, %v1653_v4  ;;  %v2034_v8 = vadd.f32 %v1998_v62, %v10369_v24  ;;  %8988 = vmatmul.msk.f32.gmra.mxu2 %vm289_vm1, %v1359_v37  ;;  %9064 = vmatmul.msk.f32.gmra.mxu0 %vm289_vm1, %v1743_v7  ;;  %v1745_v37 = vld [vmem:[%s9804_s12 + $0x12b] sm:$0xff] }
 0x1aa   : > { %9026 = vmatmul.msk.f32.gmra.mxu3 %vm289_vm1, %v1361_v3  ;;  %v2379_v2 = vld [vmem:[#allocation3 + $0x68] sm:$0xff]  ;;  %9102 = vmatmul.msk.f32.gmra.mxu1 %vm289_vm1, %v2125_v15 }
 0x1ab   : > { %2070 = vst.msk [vmem:[#allocation3 + $0x70] sm:$0xff] %vm527_vm2, %v2034_v8  ;;  %v2415_v9 = vadd.f32 %v2379_v2, %v10362_v13  ;;  %v2858_v15 = vld [vmem:[%s9804_s12 + $0x35] sm:$0xff] }
 0x1ac   : > { %v1163_v11 = vpop.f32.mrf.mxu2 }
 0x1ad   : > { %v1545_v12 = vpop.f32.mrf.mxu3  ;;  %2451 = vst.msk [vmem:[#allocation3 + $0x68] sm:$0xff] %vm527_vm2, %v2415_v9  ;;  %v1273_v14 = vadd.f32 %v1237_v5, %v1163_v11  ;;  %v1241_v9 = vld [vmem:[#allocation3 + $0xa8] sm:$0xff] }
 0x1ae   : > { %v1618_v16 = vld [vmem:[#allocation3 + $0x80] sm:$0xff]  ;;  %v10437_v20 = vpop.f32.mrf.mxu0 }
 0x1af   : > { %1309 = vst.msk [vmem:[#allocation3 + $0x88] sm:$0xff] %vm527_vm2, %v1273_v14  ;;  %v1654_v19 = vadd.f32 %v1618_v16, %v1542_v61  ;;  %v10447_v25 = vpop.f32.mrf.mxu1  ;;  %v2476_v14 = vld [vmem:[%s9804_s12 + $0x34] sm:$0xff] }
 0x1b0   : > { %v1999_v13 = vld [vmem:[#allocation3 + $0x78] sm:$0xff] }
 0x1b1   : > { %1690 = vst.msk [vmem:[#allocation3 + $0x80] sm:$0xff] %vm527_vm2, %v1654_v19  ;;  %v2035_v23 = vadd.f32 %v1999_v13, %v10386_v39  ;;  %8989 = vmatmul.msk.f32.gmra.mxu2 %vm289_vm1, %v1360_v52  ;;  %9065 = vmatmul.msk.f32.gmra.mxu0 %vm289_vm1, %v1744_v22 }
 0x1b2   : > { %9027 = vmatmul.msk.f32.gmra.mxu3 %vm289_vm1, %v1362_v18  ;;  %v2380_v17 = vld [vmem:[#allocation3 + $0x70] sm:$0xff]  ;;  %9103 = vmatmul.msk.f32.gmra.mxu1 %vm289_vm1, %v2126_v30 }
 0x1b3   : > { %2071 = vst.msk [vmem:[#allocation3 + $0x78] sm:$0xff] %vm527_vm2, %v2035_v23  ;;  %v2416_v24 = vadd.f32 %v2380_v17, %v10379_v28  ;;  %v1242_v17 = vld [vmem:[#allocation3 + $0xb0] sm:$0xff] }
 0x1b4   : > { %v1166_v26 = vpop.f32.mrf.mxu2  ;;  %v2859_v30 = vld [vmem:[%s9804_s12 + $0x3d] sm:$0xff] }
 0x1b5   : > { %v1548_v27 = vpop.f32.mrf.mxu3  ;;  %2452 = vst.msk [vmem:[#allocation3 + $0x70] sm:$0xff] %vm527_vm2, %v2416_v24  ;;  %v1274_v29 = vadd.f32 %v1238_v21, %v1166_v26 }
 0x1b6   : > { %v1619_v31 = vld [vmem:[#allocation3 + $0x88] sm:$0xff]  ;;  %v10454_v35 = vpop.f32.mrf.mxu0 }
 0x1b7   : > { %1310 = vst.msk [vmem:[#allocation3 + $0x90] sm:$0xff] %vm527_vm2, %v1274_v29  ;;  %v1655_v34 = vadd.f32 %v1619_v31, %v1545_v12  ;;  %v10464_v40 = vpop.f32.mrf.mxu1  ;;  %v2477_v29 = vld [vmem:[%s9804_s12 + $0x3c] sm:$0xff] }
 0x1b8   : > { %v2000_v28 = vld [vmem:[#allocation3 + $0x80] sm:$0xff] }
 0x1b9   : > { %1691 = vst.msk [vmem:[#allocation3 + $0x88] sm:$0xff] %vm527_vm2, %v1655_v34  ;;  %v2036_v38 = vadd.f32 %v2000_v28, %v10403_v54  ;;  %8990 = vmatmul.msk.f32.gmra.mxu2 %vm289_vm1, %v1361_v3  ;;  %9066 = vmatmul.msk.f32.gmra.mxu0 %vm289_vm1, %v1745_v37 }
 0x1ba   : > { %9028 = vmatmul.msk.f32.gmra.mxu3 %vm289_vm1, %v1363_v33  ;;  %v2381_v32 = vld [vmem:[#allocation3 + $0x78] sm:$0xff]  ;;  %9104 = vmatmul.msk.f32.gmra.mxu1 %vm289_vm1, %v2127_v42 }
 0x1bb   : > { %2072 = vst.msk [vmem:[#allocation3 + $0x80] sm:$0xff] %vm527_vm2, %v2036_v38  ;;  %v2417_v39 = vadd.f32 %v2381_v32, %v10396_v44  ;;  %v1243_v32 = vld [vmem:[#allocation3 + $0xb8] sm:$0xff] }
 0x1bc   : > { %v1169_v41 = vpop.f32.mrf.mxu2 }
 0x1bd   : > { %v1551_v43 = vpop.f32.mrf.mxu3  ;;  %2453 = vst.msk [vmem:[#allocation3 + $0x78] sm:$0xff] %vm527_vm2, %v2417_v39  ;;  %v1275_v45 = vadd.f32 %v1239_v36, %v1169_v41 }
 0x1be   : > { %v1620_v46 = vld [vmem:[#allocation3 + $0x90] sm:$0xff]  ;;  %v10472_v52 = vpop.f32.mrf.mxu0 }
 0x1bf   : > { %1311 = vst.msk [vmem:[#allocation3 + $0x98] sm:$0xff] %vm527_vm2, %v1275_v45  ;;  %v1656_v44 = vadd.f32 %v1620_v46, %v1548_v27  ;;  %v10482_v57 = vpop.f32.mrf.mxu1  ;;  %v2860_v45 = vld [vmem:[%s9804_s12 + $0x45] sm:$0xff] }
 0x1c0   : > { %v2001_v50 = vld [vmem:[#allocation3 + $0x88] sm:$0xff] }
 0x1c1   : > { %1692 = vst.msk [vmem:[#allocation3 + $0x90] sm:$0xff] %vm527_vm2, %v1656_v44  ;;  %v2037_v47 = vadd.f32 %v2001_v50, %v10420_v6  ;;  %9107 = vmatmul.msk.f32.vlgmr.msra.gmra.mxu2 %vm289_vm1, %v2474_v48  ;;  %9183 = vmatmul.msk.f32.vlgmr.msra.gmra.mxu0 %vm289_vm1, %v3238_v53 }
 0x1c2   : > { %9145 = vmatmul.msk.f32.vlgmr.msra.gmra.mxu3 %vm289_vm1, %v2856_v49  ;;  %v2382_v54 = vld [vmem:[#allocation3 + $0x80] sm:$0xff] }
 0x1c3   : > { %2073 = vst.msk [vmem:[#allocation3 + $0x88] sm:$0xff] %vm527_vm2, %v2037_v47  ;;  %v2418_v56 = vadd.f32 %v2382_v54, %v10413_v59  ;;  %v3239_v59 = vld [vmem:[%s9804_s12 + $0x2e] sm:$0xff] }
 0x1c4   : > { %v1172_v51 = vpop.f32.mrf.mxu2  ;;  %v1244_v47 = vld [vmem:[#allocation3 + $0xc0] sm:$0xff] }
 0x1c5   : > { %v1554_v60 = vpop.f32.mrf.mxu3  ;;  %2454 = vst.msk [vmem:[#allocation3 + $0x80] sm:$0xff] %vm527_vm2, %v2418_v56  ;;  %v1276_v55 = vadd.f32 %v1240_v58, %v1172_v51  ;;  %v2479_v58 = vld [vmem:[%s9804_s12 + $0x4c] sm:$0xff] }
 0x1c6   : > { %v1621_v61 = vld [vmem:[#allocation3 + $0x98] sm:$0xff]  ;;  %v10488_v4 = vpop.f32.mrf.mxu0 }
 0x1c7   : > { %1312 = vst.msk [vmem:[#allocation3 + $0xa0] sm:$0xff] %vm527_vm2, %v1276_v55  ;;  %v1657_v1 = vadd.f32 %v1621_v61, %v1551_v43  ;;  %v10498_v8 = vpop.f32.mrf.mxu1  ;;  %v2478_v43 = vld [vmem:[%s9804_s12 + $0x44] sm:$0xff] }
 0x1c8   : > { %v2002_v3 = vld [vmem:[#allocation3 + $0x90] sm:$0xff] }
 0x1c9   : > { %1693 = vst.msk [vmem:[#allocation3 + $0x98] sm:$0xff] %vm527_vm2, %v1657_v1  ;;  %v2038_v62 = vadd.f32 %v2002_v3, %v10437_v20  ;;  %9108 = vmatmul.msk.f32.gmra.mxu2 %vm289_vm1, %v2475_v63  ;;  %9184 = vmatmul.msk.f32.gmra.mxu0 %vm289_vm1, %v3239_v59 }
 0x1ca   : > { %9146 = vmatmul.msk.f32.gmra.mxu3 %vm289_vm1, %v2857_v0  ;;  %v2383_v6 = vld [vmem:[#allocation3 + $0x88] sm:$0xff] }
 0x1cb   : > { %2074 = vst.msk [vmem:[#allocation3 + $0x90] sm:$0xff] %vm527_vm2, %v2038_v62  ;;  %v2419_v7 = vadd.f32 %v2383_v6, %v10430_v10  ;;  %v3240_v10 = vld [vmem:[%s9804_s12 + $0x36] sm:$0xff]  ;;  %v3243_v0 = vld [vmem:[%s9804_s12 + $0x4e] sm:$0xff] }
 0x1cc   : > { %v1175_v2 = vpop.f32.mrf.mxu2  ;;  %v1245_v62 = vld [vmem:[#allocation3 + $0xc8] sm:$0xff] }
 0x1cd   : > { %v1557_v11 = vpop.f32.mrf.mxu3  ;;  %2455 = vst.msk [vmem:[#allocation3 + $0x88] sm:$0xff] %vm527_vm2, %v2419_v7  ;;  %v1277_v5 = vadd.f32 %v1241_v9, %v1175_v2  ;;  %v2480_v9 = vld [vmem:[%s9804_s12 + $0x54] sm:$0xff] }
 0x1ce   : > { %v1622_v12 = vld [vmem:[#allocation3 + $0xa0] sm:$0xff]  ;;  %v10504_v19 = vpop.f32.mrf.mxu0 }
 0x1cf   : > { %1313 = vst.msk [vmem:[#allocation3 + $0xa8] sm:$0xff] %vm527_vm2, %v1277_v5  ;;  %v1658_v16 = vadd.f32 %v1622_v12, %v1554_v60  ;;  %v10515_v21 = vpop.f32.mrf.mxu1  ;;  %v2861_v60 = vld [vmem:[%s9804_s12 + $0x4d] sm:$0xff] }
 0x1d0   : > { %v2003_v18 = vld [vmem:[#allocation3 + $0x98] sm:$0xff] }
 0x1d1   : > { %1694 = vst.msk [vmem:[#allocation3 + $0xa0] sm:$0xff] %vm527_vm2, %v1658_v16  ;;  %v2039_v13 = vadd.f32 %v2003_v18, %v10454_v35  ;;  %9109 = vmatmul.msk.f32.gmra.mxu2 %vm289_vm1, %v2476_v14  ;;  %9185 = vmatmul.msk.f32.gmra.mxu0 %vm289_vm1, %v3240_v10 }
 0x1d2   : > { %9147 = vmatmul.msk.f32.gmra.mxu3 %vm289_vm1, %v2858_v15  ;;  %v2384_v20 = vld [vmem:[#allocation3 + $0x90] sm:$0xff] }
 0x1d3   : > { %2075 = vst.msk [vmem:[#allocation3 + $0x98] sm:$0xff] %vm527_vm2, %v2039_v13  ;;  %v2420_v22 = vadd.f32 %v2384_v20, %v10447_v25  ;;  %v3241_v25 = vld [vmem:[%s9804_s12 + $0x3e] sm:$0xff]  ;;  %v3244_v15 = vld [vmem:[%s9804_s12 + $0x56] sm:$0xff] }
 0x1d4   : > { %v1178_v23 = vpop.f32.mrf.mxu2  ;;  %v1246_v13 = vld [vmem:[#allocation3 + $0xd0] sm:$0xff] }
 0x1d5   : > { %v1560_v24 = vpop.f32.mrf.mxu3  ;;  %2456 = vst.msk [vmem:[#allocation3 + $0x90] sm:$0xff] %vm527_vm2, %v2420_v22  ;;  %v1278_v26 = vadd.f32 %v1242_v17, %v1178_v23  ;;  %v2481_v17 = vld [vmem:[%s9804_s12 + $0x5c] sm:$0xff] }
 0x1d6   : > { %v1623_v27 = vld [vmem:[#allocation3 + $0xa8] sm:$0xff]  ;;  %v10520_v34 = vpop.f32.mrf.mxu0 }
 0x1d7   : > { %1314 = vst.msk [vmem:[#allocation3 + $0xb0] sm:$0xff] %vm527_vm2, %v1278_v26  ;;  %v1659_v31 = vadd.f32 %v1623_v27, %v1557_v11  ;;  %v10534_v46 = vpop.f32.mrf.mxu1  ;;  %v2862_v11 = vld [vmem:[%s9804_s12 + $0x55] sm:$0xff] }
 0x1d8   : > { %v2004_v33 = vld [vmem:[#allocation3 + $0xa0] sm:$0xff] }
 0x1d9   : > { %1695 = vst.msk [vmem:[#allocation3 + $0xa8] sm:$0xff] %vm527_vm2, %v1659_v31  ;;  %v2040_v28 = vadd.f32 %v2004_v33, %v10472_v52  ;;  %9110 = vmatmul.msk.f32.gmra.mxu2 %vm289_vm1, %v2477_v29  ;;  %9186 = vmatmul.msk.f32.gmra.mxu0 %vm289_vm1, %v3241_v25  ;;  %v1247_v25 = vld [vmem:[#allocation3 + $0xd8] sm:$0xff] }
 0x1da   : > { %9148 = vmatmul.msk.f32.gmra.mxu3 %vm289_vm1, %v2859_v30  ;;  %v2385_v35 = vld [vmem:[#allocation3 + $0x98] sm:$0xff] }
 0x1db   : > { %2076 = vst.msk [vmem:[#allocation3 + $0xa0] sm:$0xff] %vm527_vm2, %v2040_v28  ;;  %v2421_v37 = vadd.f32 %v2385_v35, %v10464_v40  ;;  %v3242_v40 = vld [vmem:[%s9804_s12 + $0x46] sm:$0xff] }
 0x1dc   : > { %v1181_v38 = vpop.f32.mrf.mxu2 }
 0x1dd   : > { %v1563_v39 = vpop.f32.mrf.mxu3  ;;  %2457 = vst.msk [vmem:[#allocation3 + $0x98] sm:$0xff] %vm527_vm2, %v2421_v37  ;;  %v1279_v41 = vadd.f32 %v1243_v32, %v1181_v38  ;;  %v2482_v37 = vld [vmem:[%s9804_s12 + $0x64] sm:$0xff] }
 0x1de   : > { %v1624_v36 = vld [vmem:[#allocation3 + $0xb0] sm:$0xff]  ;;  %v10536_v49 = vpop.f32.mrf.mxu0 }
 0x1df   : > { %1315 = vst.msk [vmem:[#allocation3 + $0xb8] sm:$0xff] %vm527_vm2, %v1279_v41  ;;  %v1660_v42 = vadd.f32 %v1624_v36, %v1560_v24  ;;  %v10557_v1 = vpop.f32.mrf.mxu1  ;;  %v2863_v24 = vld [vmem:[%s9804_s12 + $0x5d] sm:$0xff]  ;;  %v9730_v41 = vmov 0  }
 0x1e0   : > { %v2005_v48 = vld [vmem:[#allocation3 + $0xa8] sm:$0xff]  ;;  %9568 = vset.pattern.permute.xlu2 %v9730_v41  ;;  %v4387_v36 = vld [vmem:[%s12974_s5] sm:$0xff]  ;;  %9569 = vset.pattern.permute.xlu0 %v9730_v41 }
 0x1e1   : > { %1696 = vst.msk [vmem:[#allocation3 + $0xb0] sm:$0xff] %vm527_vm2, %v1660_v42  ;;  %v2041_v44 = vadd.f32 %v2005_v48, %v10488_v4  ;;  %9111 = vmatmul.msk.f32.gmra.mxu2 %vm289_vm1, %v2478_v43  ;;  %9187 = vmatmul.msk.f32.gmra.mxu0 %vm289_vm1, %v3242_v40 }
 0x1e2   : > { %9149 = vmatmul.msk.f32.gmra.mxu3 %vm289_vm1, %v2860_v45  ;;  %v2386_v50 = vld [vmem:[#allocation3 + $0xa0] sm:$0xff]  ;;  %4425 = vperm.xlu2 %9568, %v4387_v36  }
 0x1e3   : > { %2077 = vst.msk [vmem:[#allocation3 + $0xa8] sm:$0xff] %vm527_vm2, %v2041_v44  ;;  %v2422_v52 = vadd.f32 %v2386_v50, %v10482_v57  ;;  %9570 = vset.pattern.permute.xlu1 %v9730_v41  ;;  %v1248_v50 = vld [vmem:[#allocation3 + $0xe0] sm:$0xff] }
 0x1e4   : > { %v1184_v53 = vpop.f32.mrf.mxu2 }
 0x1e5   : > { %v1566_v54 = vpop.f32.mrf.mxu3  ;;  %2458 = vst.msk [vmem:[#allocation3 + $0xa0] sm:$0xff] %vm527_vm2, %v2422_v52  ;;  %v1280_v56 = vadd.f32 %v1244_v47, %v1184_v53  ;;  %v2483_v47 = vld [vmem:[%s9804_s12 + $0x6c] sm:$0xff] }
 0x1e6   : > { %v1625_v51 = vld [vmem:[#allocation3 + $0xb8] sm:$0xff]  ;;  %v10550_v63 = vpop.f32.mrf.mxu0 }
 0x1e7   : > { %1316 = vst.msk [vmem:[#allocation3 + $0xc0] sm:$0xff] %vm527_vm2, %v1280_v56  ;;  %v1661_v55 = vadd.f32 %v1625_v51, %v1563_v39  ;;  %v2864_v39 = vld [vmem:[%s9804_s12 + $0x65] sm:$0xff]  ;;  %v2865_v56 = vld [vmem:[%s9804_s12 + $0x6d] sm:$0xff]  ;;  %v4390_v51 = vld [vmem:[%s12974_s5 + $0x18] sm:$0xff] }
 0x1e8   : > { %v2006_v61 = vld [vmem:[#allocation3 + $0xb0] sm:$0xff] }
 0x1e9   : > { %1697 = vst.msk [vmem:[#allocation3 + $0xb8] sm:$0xff] %vm527_vm2, %v1661_v55  ;;  %v2042_v57 = vadd.f32 %v2006_v61, %v10504_v19  ;;  %9112 = vmatmul.msk.f32.gmra.mxu2 %vm289_vm1, %v2479_v58  ;;  %9188 = vmatmul.msk.f32.gmra.mxu0 %vm289_vm1, %v3243_v0  ;;  %v10575_v19 = vpop.f32.mrf.mxu1 }
 0x1ea   : > { %9150 = vmatmul.msk.f32.gmra.mxu3 %vm289_vm1, %v2861_v60  ;;  %v2387_v3 = vld [vmem:[#allocation3 + $0xa8] sm:$0xff]  ;;  %4440 = vperm.xlu2 %9568, %v4390_v51   ;;  %v1252_v51 = vld [vmem:[#allocation3 + $0x100] sm:$0xff] }
 0x1eb   : > { %2078 = vst.msk [vmem:[#allocation3 + $0xb0] sm:$0xff] %vm527_vm2, %v2042_v57  ;;  %v2423_v4 = vadd.f32 %v2387_v3, %v10498_v8 }
 0x1ec   : > { %v1187_v59 = vpop.f32.mrf.mxu2 }
 0x1ed   : > { %v1569_v6 = vpop.f32.mrf.mxu3  ;;  %2459 = vst.msk [vmem:[#allocation3 + $0xa8] sm:$0xff] %vm527_vm2, %v2423_v4  ;;  %v1281_v7 = vadd.f32 %v1245_v62, %v1187_v59  ;;  %v1249_v59 = vld [vmem:[#allocation3 + $0xe8] sm:$0xff] }
 0x1ee   : > { %v1626_v2 = vld [vmem:[#allocation3 + $0xc0] sm:$0xff]  ;;  %v10566_v14 = vpop.f32.mrf.mxu0 }
 0x1ef   : > { %1317 = vst.msk [vmem:[#allocation3 + $0xc8] sm:$0xff] %vm527_vm2, %v1281_v7  ;;  %v1662_v5 = vadd.f32 %v1626_v2, %v1566_v54  ;;  %v2484_v7 = vld [vmem:[%s9804_s12 + $0x74] sm:$0xff] }
 0x1f0   : > { %v2007_v12 = vld [vmem:[#allocation3 + $0xb8] sm:$0xff] }
 0x1f1   : > { %1698 = vst.msk [vmem:[#allocation3 + $0xc0] sm:$0xff] %vm527_vm2, %v1662_v5  ;;  %v2043_v8 = vadd.f32 %v2007_v12, %v10520_v34  ;;  %9113 = vmatmul.msk.f32.gmra.mxu2 %vm289_vm1, %v2480_v9  ;;  %9189 = vmatmul.msk.f32.gmra.mxu0 %vm289_vm1, %v3244_v15  ;;  %v10594_v38 = vpop.f32.mrf.mxu1  ;;  %v2866_v9 = vld [vmem:[%s9804_s12 + $0x75] sm:$0xff] }
 0x1f2   : > { %9151 = vmatmul.msk.f32.gmra.mxu3 %vm289_vm1, %v2862_v11  ;;  %v2388_v16 = vld [vmem:[#allocation3 + $0xb0] sm:$0xff]  ;;  %v4391_v11 = vld [vmem:[%s12974_s5 + $0x20] sm:$0xff] }
 0x1f3   : > { %2079 = vst.msk [vmem:[#allocation3 + $0xb8] sm:$0xff] %vm527_vm2, %v2043_v8  ;;  %v2424_v18 = vadd.f32 %v2388_v16, %v10515_v21  ;;  %v3245_v21 = vld [vmem:[%s9804_s12 + $0x5e] sm:$0xff]  ;;  %4445 = vperm.xlu2 %9568, %v4391_v11   ;;  %v3248_v15 = vld [vmem:[%s9804_s12 + $0x76] sm:$0xff] }
 0x1f4   : > { %v1190_v10 = vpop.f32.mrf.mxu2  ;;  %v1253_v11 = vld [vmem:[#allocation3 + $0x108] sm:$0xff] }
 0x1f5   : > { %v1572_v20 = vpop.f32.mrf.mxu3  ;;  %2460 = vst.msk [vmem:[#allocation3 + $0xb0] sm:$0xff] %vm527_vm2, %v2424_v18  ;;  %v1282_v22 = vadd.f32 %v1246_v13, %v1190_v10  ;;  %v4718_v18 = vld [vmem:[%s12972_s3] sm:$0xff]  ;;  %v4393_v10 = vld [vmem:[%s12974_s5 + $0x30] sm:$0xff] }
 0x1f6   : > { %v1627_v23 = vld [vmem:[#allocation3 + $0xc8] sm:$0xff]  ;;  %v10582_v29 = vpop.f32.mrf.mxu0  ;;  %4842 = vmatpush.msra.mxu1 %v4718_v18 }
 0x1f7   : > { %1318 = vst.msk [vmem:[#allocation3 + $0xd0] sm:$0xff] %vm527_vm2, %v1282_v22  ;;  %v1663_v26 = vadd.f32 %v1627_v23, %v1569_v6  ;;  %v1250_v22 = vld [vmem:[#allocation3 + $0xf0] sm:$0xff] }
 0x1f8   : > { %v2008_v27 = vld [vmem:[#allocation3 + $0xc0] sm:$0xff] }
 0x1f9   : > { %1699 = vst.msk [vmem:[#allocation3 + $0xc8] sm:$0xff] %vm527_vm2, %v1663_v26  ;;  %v2044_v30 = vadd.f32 %v2008_v27, %v10536_v49  ;;  %9114 = vmatmul.msk.f32.gmra.mxu2 %vm289_vm1, %v2481_v17  ;;  %9190 = vmatmul.msk.f32.gmra.mxu0 %vm289_vm1, %v3245_v21  ;;  %v10618_v60 = vpop.f32.mrf.mxu1  ;;  %v2867_v27 = vld [vmem:[%s9804_s12 + $0x7d] sm:$0xff] }
 0x1fa   : > { %9152 = vmatmul.msk.f32.gmra.mxu3 %vm289_vm1, %v2863_v24  ;;  %v2389_v31 = vld [vmem:[#allocation3 + $0xb8] sm:$0xff] }
 0x1fb   : > { %2080 = vst.msk [vmem:[#allocation3 + $0xc0] sm:$0xff] %vm527_vm2, %v2044_v30  ;;  %v2425_v33 = vadd.f32 %v2389_v31, %v10534_v46  ;;  %v3246_v46 = vld [vmem:[%s9804_s12 + $0x66] sm:$0xff]  ;;  %v2485_v24 = vld [vmem:[%s9804_s12 + $0x7c] sm:$0xff] }
 0x1fc   : > { %v1193_v34 = vpop.f32.mrf.mxu2 }
 0x1fd   : > { %v1575_v28 = vpop.f32.mrf.mxu3  ;;  %2461 = vst.msk [vmem:[#allocation3 + $0xb8] sm:$0xff] %vm527_vm2, %v2425_v33  ;;  %v1283_v35 = vadd.f32 %v1247_v25, %v1193_v34  ;;  %v3249_v33 = vld [vmem:[%s9804_s12 + $0x7e] sm:$0xff] }
 0x1fe   : > { %v1628_v32 = vld [vmem:[#allocation3 + $0xd0] sm:$0xff]  ;;  %v10601_v42 = vpop.f32.mrf.mxu0 }
 0x1ff   : > { %1319 = vst.msk [vmem:[#allocation3 + $0xd8] sm:$0xff] %vm527_vm2, %v1283_v35  ;;  %v1664_v43 = vadd.f32 %v1628_v32, %v1572_v20  ;;  %v4397_v35 = vld [vmem:[%s12974_s5 + $0x50] sm:$0xff] }
 0x200   : > { %v2009_v45 = vld [vmem:[#allocation3 + $0xc8] sm:$0xff] }
 0x201   : > { %1700 = vst.msk [vmem:[#allocation3 + $0xd0] sm:$0xff] %vm527_vm2, %v1664_v43  ;;  %v2045_v48 = vadd.f32 %v2009_v45, %v10550_v63  ;;  %9115 = vmatmul.msk.f32.gmra.mxu2 %vm289_vm1, %v2482_v37  ;;  %9191 = vmatmul.msk.f32.gmra.mxu0 %vm289_vm1, %v3246_v46  ;;  %v3247_v63 = vld [vmem:[%s9804_s12 + $0x6e] sm:$0xff]  ;;  %v2342_v16 = vpop.f32.mrf.mxu1  ;;  %v2486_v43 = vld [vmem:[%s9804_s12 + $0x84] sm:$0xff] }
 0x202   : > { %9153 = vmatmul.msk.f32.gmra.mxu3 %vm289_vm1, %v2864_v39  ;;  %v2390_v49 = vld [vmem:[#allocation3 + $0xc0] sm:$0xff]  ;;  %v1251_v39 = vld [vmem:[#allocation3 + $0xf8] sm:$0xff] }
 0x203   : > { %2081 = vst.msk [vmem:[#allocation3 + $0xc8] sm:$0xff] %vm527_vm2, %v2045_v48  ;;  %v2426_v40 = vadd.f32 %v2390_v49, %v10557_v1  ;;  %v4388_v1 = vld [vmem:[%s12974_s5 + $0x8] sm:$0xff]  ;;  %v4395_v46 = vld [vmem:[%s12974_s5 + $0x40] sm:$0xff] }
 0x204   : > { %v1196_v44 = vpop.f32.mrf.mxu2  ;;  %4430 = vperm.xlu0 %9569, %v4388_v1  }
 0x205   : > { %v1578_v52 = vpop.f32.mrf.mxu3  ;;  %2462 = vst.msk [vmem:[#allocation3 + $0xc0] sm:$0xff] %vm527_vm2, %v2426_v40  ;;  %v1284_v53 = vadd.f32 %v1248_v50, %v1196_v44  ;;  %v3250_v44 = vld [vmem:[%s9804_s12 + $0x86] sm:$0xff] }
 0x206   : > { %v1629_v54 = vld [vmem:[#allocation3 + $0xd8] sm:$0xff]  ;;  %v10620_v61 = vpop.f32.mrf.mxu0 }
 0x207   : > { %1320 = vst.msk [vmem:[#allocation3 + $0xe0] sm:$0xff] %vm527_vm2, %v1284_v53  ;;  %v1665_v58 = vadd.f32 %v1629_v54, %v1575_v28  ;;  %v4389_v28 = vld [vmem:[%s12974_s5 + $0x10] sm:$0xff]  ;;  %v4392_v53 = vld [vmem:[%s12974_s5 + $0x28] sm:$0xff] }
 0x208   : > { %v2010_v55 = vld [vmem:[#allocation3 + $0xd0] sm:$0xff]  ;;  %4435 = vperm.xlu1 %9570, %v4389_v28  }
 0x209   : > { %1701 = vst.msk [vmem:[#allocation3 + $0xd8] sm:$0xff] %vm527_vm2, %v1665_v58  ;;  %v2046_v0 = vadd.f32 %v2010_v55, %v10566_v14  ;;  %9116 = vmatmul.msk.f32.gmra.mxu2 %vm289_vm1, %v2483_v47  ;;  %9192 = vmatmul.msk.f32.gmra.mxu0 %vm289_vm1, %v3247_v63  ;;  %v4403_v47 = vld [vmem:[%s12974_s5 + $0x80] sm:$0xff]  ;;  %v2487_v55 = vld [vmem:[%s9804_s12 + $0x8c] sm:$0xff] }
 0x20a   : > { %9154 = vmatmul.msk.f32.gmra.mxu3 %vm289_vm1, %v2865_v56  ;;  %v2391_v57 = vld [vmem:[#allocation3 + $0xc8] sm:$0xff] }
 0x20b   : > { %2082 = vst.msk [vmem:[#allocation3 + $0xd0] sm:$0xff] %vm527_vm2, %v2046_v0  ;;  %v2427_v3 = vadd.f32 %v2391_v57, %v10575_v19  ;;  %v2869_v0 = vld [vmem:[%s9804_s12 + $0x8d] sm:$0xff]  ;;  %v4398_v57 = vld [vmem:[%s12974_s5 + $0x58] sm:$0xff] }
 0x20c   : > { %v1199_v4 = vpop.f32.mrf.mxu2  ;;  %4455 = vperm.xlu0 %9569, %v4393_v10  }
 0x20d   : > { %v1581_v62 = vpop.f32.mrf.mxu3  ;;  %2463 = vst.msk [vmem:[#allocation3 + $0xc8] sm:$0xff] %vm527_vm2, %v2427_v3  ;;  %v1285_v6 = vadd.f32 %v1249_v59, %v1199_v4  ;;  %v3251_v59 = vld [vmem:[%s9804_s12 + $0x8e] sm:$0xff] }
 0x20e   : > { %v1630_v2 = vld [vmem:[#allocation3 + $0xe0] sm:$0xff]  ;;  %v10640_v14 = vpop.f32.mrf.mxu0 }
 0x20f   : > { %1321 = vst.msk [vmem:[#allocation3 + $0xe8] sm:$0xff] %vm527_vm2, %v1285_v6  ;;  %v1666_v5 = vadd.f32 %v1630_v2, %v1578_v52 }
 0x210   : > { %v2011_v12 = vld [vmem:[#allocation3 + $0xd8] sm:$0xff]  ;;  %4450 = vperm.xlu1 %9570, %v4392_v53  }
 0x211   : > { %1702 = vst.msk [vmem:[#allocation3 + $0xe0] sm:$0xff] %vm527_vm2, %v1666_v5  ;;  %v2047_v8 = vadd.f32 %v2011_v12, %v10582_v29  ;;  %9117 = vmatmul.msk.f32.gmra.mxu2 %vm289_vm1, %v2484_v7  ;;  %9193 = vmatmul.msk.f32.gmra.mxu0 %vm289_vm1, %v3248_v15  ;;  %v4394_v29 = vld [vmem:[%s12974_s5 + $0x38] sm:$0xff]  ;;  %v4396_v7 = vld [vmem:[%s12974_s5 + $0x48] sm:$0xff] }
 0x212   : > { %9155 = vmatmul.msk.f32.gmra.mxu3 %vm289_vm1, %v2866_v9  ;;  %v2392_v19 = vld [vmem:[#allocation3 + $0xd0] sm:$0xff]  ;;  %4460 = vperm.xlu2 %9568, %v4394_v29   ;;  %v3254_v53 = vld [vmem:[%s9804_s12 + $0xa6] sm:$0xff] }
 0x213   : > { %2083 = vst.msk [vmem:[#allocation3 + $0xd8] sm:$0xff] %vm527_vm2, %v2047_v8  ;;  %v2428_v13 = vadd.f32 %v2392_v19, %v10594_v38  ;;  %v2345_v38 = vpop.f32.mrf.mxu1  ;;  %v2870_v8 = vld [vmem:[%s9804_s12 + $0x95] sm:$0xff] }
 0x214   : > { %v1202_v20 = vpop.f32.mrf.mxu2  ;;  %4475 = vperm.xlu0 %9569, %v4397_v35  }
 0x215   : > { %v1584_v23 = vpop.f32.mrf.mxu3  ;;  %2464 = vst.msk [vmem:[#allocation3 + $0xd0] sm:$0xff] %vm527_vm2, %v2428_v13  ;;  %v1286_v17 = vadd.f32 %v1250_v22, %v1202_v20  ;;  %v3252_v20 = vld [vmem:[%s9804_s12 + $0x96] sm:$0xff] }
 0x216   : > { %v1631_v26 = vld [vmem:[#allocation3 + $0xe8] sm:$0xff]  ;;  %v10663_v31 = vpop.f32.mrf.mxu0 }
 0x217   : > { %1322 = vst.msk [vmem:[#allocation3 + $0xf0] sm:$0xff] %vm527_vm2, %v1286_v17  ;;  %v1667_v21 = vadd.f32 %v1631_v26, %v1581_v62  ;;  %v4402_v17 = vld [vmem:[%s12974_s5 + $0x78] sm:$0xff] }
 0x218   : > { %v2012_v30 = vld [vmem:[#allocation3 + $0xe0] sm:$0xff]  ;;  %4470 = vperm.xlu1 %9570, %v4396_v7  }
 0x219   : > { %1703 = vst.msk [vmem:[#allocation3 + $0xe8] sm:$0xff] %vm527_vm2, %v1667_v21  ;;  %v2048_v34 = vadd.f32 %v2012_v30, %v10601_v42  ;;  %9118 = vmatmul.msk.f32.gmra.mxu2 %vm289_vm1, %v2485_v24  ;;  %9194 = vmatmul.msk.f32.gmra.mxu0 %vm289_vm1, %v3249_v33  ;;  %v2868_v42 = vld [vmem:[%s9804_s12 + $0x85] sm:$0xff]  ;;  %v2489_v30 = vld [vmem:[%s9804_s12 + $0x9c] sm:$0xff] }
 0x21a   : > { %9156 = vmatmul.msk.f32.gmra.mxu3 %vm289_vm1, %v2867_v27  ;;  %v2393_v25 = vld [vmem:[#allocation3 + $0xd8] sm:$0xff]  ;;  %4465 = vperm.xlu2 %9568, %v4395_v46   ;;  %v1254_v27 = vld [vmem:[#allocation3 + $0x110] sm:$0xff] }
 0x21b   : > { %2084 = vst.msk [vmem:[#allocation3 + $0xe0] sm:$0xff] %vm527_vm2, %v2048_v34  ;;  %v2429_v37 = vadd.f32 %v2393_v25, %v10618_v60  ;;  %v2871_v33 = vld [vmem:[%s9804_s12 + $0x9d] sm:$0xff]  ;;  %v4400_v34 = vld [vmem:[%s12974_s5 + $0x68] sm:$0xff] }
 0x21c   : > { %v1205_v32 = vpop.f32.mrf.mxu2  ;;  %4505 = vperm.xlu0 %9569, %v4403_v47   ;;  %v2490_v46 = vld [vmem:[%s9804_s12 + $0xa4] sm:$0xff] }
 0x21d   : > { %v1587_v41 = vpop.f32.mrf.mxu3  ;;  %2465 = vst.msk [vmem:[#allocation3 + $0xd8] sm:$0xff] %vm527_vm2, %v2429_v37  ;;  %v1287_v36 = vadd.f32 %v1251_v39, %v1205_v32  ;;  %v3253_v37 = vld [vmem:[%s9804_s12 + $0x9e] sm:$0xff] }
 0x21e   : > { %v1632_v45 = vld [vmem:[#allocation3 + $0xf0] sm:$0xff]  ;;  %v10686_v40 = vpop.f32.mrf.mxu0 }
 0x21f   : > { %1323 = vst.msk [vmem:[#allocation3 + $0xf8] sm:$0xff] %vm527_vm2, %v1287_v36  ;;  %v1668_v48 = vadd.f32 %v1632_v45, %v1584_v23 }
 0x220   : > { %v2013_v49 = vld [vmem:[#allocation3 + $0xe8] sm:$0xff]  ;;  %4500 = vperm.xlu1 %9570, %v4402_v17   ;;  %v2750_v17 = vld [vmem:[#allocation3 + $0x10] sm:$0xff] }
 0x221   : > { %1704 = vst.msk [vmem:[#allocation3 + $0xf0] sm:$0xff] %vm527_vm2, %v1668_v48  ;;  %v2049_v50 = vadd.f32 %v2013_v49, %v10620_v61  ;;  %9119 = vmatmul.msk.f32.gmra.mxu2 %vm289_vm1, %v2486_v43  ;;  %9195 = vmatmul.msk.f32.gmra.mxu0 %vm289_vm1, %v3250_v44  ;;  %v2348_v61 = vpop.f32.mrf.mxu1  ;;  %v1255_v43 = vld [vmem:[#allocation3 + $0x118] sm:$0xff] }
 0x222   : > { %9157 = vmatmul.msk.f32.gmra.mxu3 %vm289_vm1, %v2868_v42  ;;  %v2394_v52 = vld [vmem:[#allocation3 + $0xe0] sm:$0xff]  ;;  %4480 = vperm.xlu2 %9568, %v4398_v57  }
 0x223   : > { %2085 = vst.msk [vmem:[#allocation3 + $0xe8] sm:$0xff] %vm527_vm2, %v2049_v50  ;;  %v2430_v54 = vadd.f32 %v2394_v52, %v2342_v16  ;;  %v4399_v16 = vld [vmem:[%s12974_s5 + $0x60] sm:$0xff]  ;;  %v2873_v57 = vld [vmem:[%s9804_s12 + $0xad] sm:$0xff] }
 0x224   : > { %v1208_v56 = vpop.f32.mrf.mxu2  ;;  %v2872_v49 = vld [vmem:[%s9804_s12 + $0xa5] sm:$0xff] }
 0x225   : > { %v1590_v58 = vpop.f32.mrf.mxu3  ;;  %2466 = vst.msk [vmem:[#allocation3 + $0xe0] sm:$0xff] %vm527_vm2, %v2430_v54  ;;  %v1288_v60 = vadd.f32 %v1252_v51, %v1208_v56 }
 0x226   : > { %v1633_v63 = vld [vmem:[#allocation3 + $0xf8] sm:$0xff]  ;;  %v10708_v4 = vpop.f32.mrf.mxu0 }
 0x227   : > { %1324 = vst.msk [vmem:[#allocation3 + $0x100] sm:$0xff] %vm527_vm2, %v1288_v60  ;;  %v1669_v1 = vadd.f32 %v1633_v63, %v1587_v41  ;;  %v2748_v60 = vld [vmem:[#allocation3] sm:$0xff] }
 0x228   : > { %v2014_v3 = vld [vmem:[#allocation3 + $0xf0] sm:$0xff] }
 0x229   : > { %1705 = vst.msk [vmem:[#allocation3 + $0xf8] sm:$0xff] %vm527_vm2, %v1669_v1  ;;  %v2050_v62 = vadd.f32 %v2014_v3, %v10640_v14  ;;  %9120 = vmatmul.msk.f32.gmra.mxu2 %vm289_vm1, %v2487_v55  ;;  %9196 = vmatmul.msk.f32.gmra.mxu0 %vm289_vm1, %v3251_v59  ;;  %v2488_v14 = vld [vmem:[%s9804_s12 + $0x94] sm:$0xff]  ;;  %v2351_v19 = vpop.f32.mrf.mxu1 }
 0x22a   : > { %9158 = vmatmul.msk.f32.gmra.mxu3 %vm289_vm1, %v2869_v0  ;;  %v2395_v6 = vld [vmem:[#allocation3 + $0xe8] sm:$0xff]  ;;  %4485 = vperm.xlu2 %9568, %v4399_v16  }
 0x22b   : > { %2086 = vst.msk [vmem:[#allocation3 + $0xf0] sm:$0xff] %vm527_vm2, %v2050_v62  ;;  %v2431_v2 = vadd.f32 %v2395_v6, %v2345_v38  ;;  %v2491_v0 = vld [vmem:[%s9804_s12 + $0xac] sm:$0xff] }
 0x22c   : > { %v1211_v9 = vpop.f32.mrf.mxu2  ;;  %v3255_v59 = vld [vmem:[%s9804_s12 + $0xae] sm:$0xff] }
 0x22d   : > { %v1593_v5 = vpop.f32.mrf.mxu3  ;;  %2467 = vst.msk [vmem:[#allocation3 + $0xe8] sm:$0xff] %vm527_vm2, %v2431_v2  ;;  %v1289_v12 = vadd.f32 %v1253_v11, %v1211_v9  ;;  %v2749_v9 = vld [vmem:[#allocation3 + $0x8] sm:$0xff] }
 0x22e   : > { %v1634_v15 = vld [vmem:[#allocation3 + $0x100] sm:$0xff]  ;;  %v10727_v13 = vpop.f32.mrf.mxu0 }
 0x22f   : > { %1325 = vst.msk [vmem:[#allocation3 + $0x108] sm:$0xff] %vm527_vm2, %v1289_v12  ;;  %v1670_v18 = vadd.f32 %v1634_v15, %v1590_v58 }
 0x230   : > { %v2015_v10 = vld [vmem:[#allocation3 + $0xf8] sm:$0xff] }
 0x231   : > { %1706 = vst.msk [vmem:[#allocation3 + $0x100] sm:$0xff] %vm527_vm2, %v1670_v18  ;;  %v2051_v22 = vadd.f32 %v2015_v10, %v10663_v31  ;;  %9121 = vmatmul.msk.f32.gmra.mxu2 %vm289_vm1, %v2488_v14  ;;  %9197 = vmatmul.msk.f32.gmra.mxu0 %vm289_vm1, %v3252_v20  ;;  %v2354_v32 = vpop.f32.mrf.mxu1  ;;  %v2492_v14 = vld [vmem:[%s9804_s12 + $0xb4] sm:$0xff] }
 0x232   : > { %9159 = vmatmul.msk.f32.gmra.mxu3 %vm289_vm1, %v2870_v8  ;;  %v2396_v23 = vld [vmem:[#allocation3 + $0xf0] sm:$0xff]  ;;  %4490 = vperm.xlu2 %9568, %v4400_v34  }
 0x233   : > { %2087 = vst.msk [vmem:[#allocation3 + $0xf8] sm:$0xff] %vm527_vm2, %v2051_v22  ;;  %v2432_v24 = vadd.f32 %v2396_v23, %v2348_v61  ;;  %v2874_v8 = vld [vmem:[%s9804_s12 + $0xb5] sm:$0xff] }
 0x234   : > { %v1214_v26 = vpop.f32.mrf.mxu2  ;;  %v3256_v10 = vld [vmem:[%s9804_s12 + $0xb6] sm:$0xff] }
 0x235   : > { %v1596_v29 = vpop.f32.mrf.mxu3  ;;  %2468 = vst.msk [vmem:[#allocation3 + $0xf0] sm:$0xff] %vm527_vm2, %v2432_v24  ;;  %v1290_v21 = vadd.f32 %v1254_v27, %v1214_v26 }
 0x236   : > { %v1635_v31 = vld [vmem:[#allocation3 + $0x108] sm:$0xff]  ;;  %v10746_v35 = vpop.f32.mrf.mxu0 }
 0x237   : > { %1326 = vst.msk [vmem:[#allocation3 + $0x110] sm:$0xff] %vm527_vm2, %v1290_v21  ;;  %v1671_v25 = vadd.f32 %v1635_v31, %v1593_v5  ;;  %v2875_v21 = vld [vmem:[%s9804_s12 + $0xbd] sm:$0xff] }
 0x238   : > { %v2016_v28 = vld [vmem:[#allocation3 + $0x100] sm:$0xff] }
 0x239   : > { %1707 = vst.msk [vmem:[#allocation3 + $0x108] sm:$0xff] %vm527_vm2, %v1671_v25  ;;  %v2052_v38 = vadd.f32 %v2016_v28, %v10686_v40  ;;  %9122 = vmatmul.msk.f32.gmra.mxu2 %vm289_vm1, %v2489_v30  ;;  %9198 = vmatmul.msk.f32.gmra.mxu0 %vm289_vm1, %v3253_v37  ;;  %v4401_v40 = vld [vmem:[%s12974_s5 + $0x70] sm:$0xff]  ;;  %v2357_v51 = vpop.f32.mrf.mxu1  ;;  %v3257_v25 = vld [vmem:[%s9804_s12 + $0xbe] sm:$0xff] }
 0x23a   : > { %9160 = vmatmul.msk.f32.gmra.mxu3 %vm289_vm1, %v2871_v33  ;;  %v2397_v39 = vld [vmem:[#allocation3 + $0xf8] sm:$0xff]  ;;  %4495 = vperm.xlu2 %9568, %v4401_v40  }
 0x23b   : > { %2088 = vst.msk [vmem:[#allocation3 + $0x100] sm:$0xff] %vm527_vm2, %v2052_v38  ;;  %v2433_v41 = vadd.f32 %v2397_v39, %v2351_v19  ;;  %v3258_v40 = vld [vmem:[%s9804_s12 + $0xc6] sm:$0xff] }
 0x23c   : > { %v1217_v36 = vpop.f32.mrf.mxu2 }
 0x23d   : > { %v1599_v45 = vpop.f32.mrf.mxu3  ;;  %2469 = vst.msk [vmem:[#allocation3 + $0xf8] sm:$0xff] %vm527_vm2, %v2433_v41  ;;  %v1291_v42 = vadd.f32 %v1255_v43, %v1217_v36  ;;  %v2494_v43 = vld [vmem:[%s9804_s12 + $0xc4] sm:$0xff] }
 0x23e   : > { %v1636_v48 = vld [vmem:[#allocation3 + $0x110] sm:$0xff]  ;;  %v10762_v52 = vpop.f32.mrf.mxu0 }
 0x23f   : > { %1327 = vst.msk [vmem:[#allocation3 + $0x118] sm:$0xff] %vm527_vm2, %v1291_v42  ;;  %v1672_v44 = vadd.f32 %v1636_v48, %v1596_v29  ;;  %v2493_v29 = vld [vmem:[%s9804_s12 + $0xbc] sm:$0xff] }
 0x240   : > { %v2017_v50 = vld [vmem:[#allocation3 + $0x108] sm:$0xff] }
 0x241   : > { %1708 = vst.msk [vmem:[#allocation3 + $0x110] sm:$0xff] %vm527_vm2, %v1672_v44  ;;  %v2053_v47 = vadd.f32 %v2017_v50, %v10708_v4  ;;  %9123 = vmatmul.msk.f32.gmra.mxu2 %vm289_vm1, %v2490_v46  ;;  %9199 = vmatmul.msk.f32.gmra.mxu0 %vm289_vm1, %v3254_v53  ;;  %v2360_v15 = vpop.f32.mrf.mxu1  ;;  %v10817_v46 = vld [vmem:[%s12971_s2] ss:$0 sm:$0xff] }
 0x242   : > { %9161 = vmatmul.msk.f32.gmra.mxu3 %vm289_vm1, %v2872_v49  ;;  %v2398_v54 = vld [vmem:[#allocation3 + $0x100] sm:$0xff] }
 0x243   : > { %2089 = vst.msk [vmem:[#allocation3 + $0x108] sm:$0xff] %vm527_vm2, %v2053_v47  ;;  %v2434_v56 = vadd.f32 %v2398_v54, %v2354_v32  ;;  %v2751_v32 = vld [vmem:[#allocation3 + $0x18] sm:$0xff]  ;;  %v2752_v47 = vld [vmem:[#allocation3 + $0x20] sm:$0xff] }
 0x244   : > { %v2640_v58 = vpop.f32.mrf.mxu2 }
 0x245   : > { %v3022_v55 = vpop.f32.mrf.mxu3  ;;  %2470 = vst.msk [vmem:[#allocation3 + $0x100] sm:$0xff] %vm527_vm2, %v2434_v56  ;;  %v2784_v61 = vadd.f32 %v2748_v60, %v2640_v58  ;;  %v2495_v60 = vld [vmem:[%s9804_s12 + $0xcc] sm:$0xff] }
 0x246   : > { %v1637_v63 = vld [vmem:[#allocation3 + $0x118] sm:$0xff]  ;;  %v10775_v4 = vpop.f32.mrf.mxu0 }
 0x247   : > { %2820 = vst.msk [vmem:[#allocation3] sm:$0xff] %vm527_vm2, %v2784_v61  ;;  %v1673_v1 = vadd.f32 %v1637_v63, %v1599_v45  ;;  %v2876_v45 = vld [vmem:[%s9804_s12 + $0xc5] sm:$0xff] }
 0x248   : > { %v2018_v3 = vld [vmem:[#allocation3 + $0x110] sm:$0xff] }
 0x249   : > { %1709 = vst.msk [vmem:[#allocation3 + $0x118] sm:$0xff] %vm527_vm2, %v1673_v1  ;;  %v2054_v62 = vadd.f32 %v2018_v3, %v10727_v13  ;;  %9124 = vmatmul.msk.f32.gmra.mxu2 %vm289_vm1, %v2491_v0  ;;  %9200 = vmatmul.msk.f32.gmra.mxu0 %vm289_vm1, %v3255_v59  ;;  %v2363_v33 = vpop.f32.mrf.mxu1  ;;  %v3259_v1 = vld [vmem:[%s9804_s12 + $0xce] sm:$0xff] }
 0x24a   : > { %9162 = vmatmul.msk.f32.gmra.mxu3 %vm289_vm1, %v2873_v57  ;;  %v2399_v6 = vld [vmem:[#allocation3 + $0x108] sm:$0xff] }
 0x24b   : > { %2090 = vst.msk [vmem:[#allocation3 + $0x110] sm:$0xff] %vm527_vm2, %v2054_v62  ;;  %v2435_v7 = vadd.f32 %v2399_v6, %v2357_v51 }
 0x24c   : > { %v2643_v2 = vpop.f32.mrf.mxu2 }
 0x24d   : > { %v3025_v11 = vpop.f32.mrf.mxu3  ;;  %2471 = vst.msk [vmem:[#allocation3 + $0x108] sm:$0xff] %vm527_vm2, %v2435_v7  ;;  %v2785_v5 = vadd.f32 %v2749_v9, %v2643_v2  ;;  %v2753_v2 = vld [vmem:[#allocation3 + $0x28] sm:$0xff] }
 0x24e   : > { %v3130_v12 = vld [vmem:[#allocation3] sm:$0xff]  ;;  %v10788_v19 = vpop.f32.mrf.mxu0 }
 0x24f   : > { %2821 = vst.msk [vmem:[#allocation3 + $0x8] sm:$0xff] %vm527_vm2, %v2785_v5  ;;  %v3166_v16 = vadd.f32 %v3130_v12, %v3022_v55  ;;  %v2877_v55 = vld [vmem:[%s9804_s12 + $0xcd] sm:$0xff] }
 0x250   : > { %v2019_v18 = vld [vmem:[#allocation3 + $0x118] sm:$0xff] }
 0x251   : > { %3202 = vst.msk [vmem:[#allocation3] sm:$0xff] %vm527_vm2, %v3166_v16  ;;  %v2055_v13 = vadd.f32 %v2019_v18, %v10746_v35  ;;  %9125 = vmatmul.msk.f32.gmra.mxu2 %vm289_vm1, %v2492_v14  ;;  %9201 = vmatmul.msk.f32.gmra.mxu0 %vm289_vm1, %v3256_v10  ;;  %v2496_v14 = vld [vmem:[%s9804_s12 + $0xd4] sm:$0xff] }
 0x252   : > { %9163 = vmatmul.msk.f32.gmra.mxu3 %vm289_vm1, %v2874_v8  ;;  %v2400_v20 = vld [vmem:[#allocation3 + $0x110] sm:$0xff] }
 0x253   : > { %2091 = vst.msk [vmem:[#allocation3 + $0x118] sm:$0xff] %vm527_vm2, %v2055_v13  ;;  %v2436_v22 = vadd.f32 %v2400_v20, %v2360_v15  ;;  %v2878_v15 = vld [vmem:[%s9804_s12 + $0xd5] sm:$0xff] }
 0x254   : > { %v2646_v23 = vpop.f32.mrf.mxu2  ;;  %v3260_v10 = vld [vmem:[%s9804_s12 + $0xd6] sm:$0xff] }
 0x255   : > { %v3028_v24 = vpop.f32.mrf.mxu3  ;;  %2472 = vst.msk [vmem:[#allocation3 + $0x110] sm:$0xff] %vm527_vm2, %v2436_v22  ;;  %v2786_v26 = vadd.f32 %v2750_v17, %v2646_v23 }
 0x256   : > { %v3131_v27 = vld [vmem:[#allocation3 + $0x8] sm:$0xff]  ;;  %v10801_v34 = vpop.f32.mrf.mxu0 }
 0x257   : > { %2822 = vst.msk [vmem:[#allocation3 + $0x10] sm:$0xff] %vm527_vm2, %v2786_v26  ;;  %v3167_v30 = vadd.f32 %v3131_v27, %v3025_v11  ;;  %v2754_v26 = vld [vmem:[#allocation3 + $0x30] sm:$0xff] }
 0x258   : > { %v3512_v31 = vld [vmem:[#allocation3] sm:$0xff] }
 0x259   : > { %3203 = vst.msk [vmem:[#allocation3 + $0x8] sm:$0xff] %vm527_vm2, %v3167_v30  ;;  %v3548_v28 = vadd.f32 %v3512_v31, %v10762_v52  ;;  %9126 = vmatmul.msk.f32.gmra.mxu2 %vm289_vm1, %v2493_v29  ;;  %9202 = vmatmul.msk.f32.gmra.mxu0 %vm289_vm1, %v3257_v25  ;;  %v2497_v31 = vld [vmem:[%s9804_s12 + $0xdc] sm:$0xff] }
 0x25a   : > { %9164 = vmatmul.msk.f32.gmra.mxu3 %vm289_vm1, %v2875_v21  ;;  %v2401_v35 = vld [vmem:[#allocation3 + $0x118] sm:$0xff] }
 0x25b   : > { %3584 = vst.msk [vmem:[#allocation3] sm:$0xff] %vm527_vm2, %v3548_v28  ;;  %v2437_v37 = vadd.f32 %v2401_v35, %v2363_v33  ;;  %v2879_v33 = vld [vmem:[%s9804_s12 + $0xdd] sm:$0xff] }
 0x25c   : > { %v2649_v38 = vpop.f32.mrf.mxu2 }
 0x25d   : > { %v3031_v39 = vpop.f32.mrf.mxu3  ;;  %2473 = vst.msk [vmem:[#allocation3 + $0x118] sm:$0xff] %vm527_vm2, %v2437_v37  ;;  %v2787_v41 = vadd.f32 %v2751_v32, %v2649_v38  ;;  %v3261_v37 = vld [vmem:[%s9804_s12 + $0xde] sm:$0xff] }
 0x25e   : > { %v3132_v36 = vld [vmem:[#allocation3 + $0x10] sm:$0xff]  ;;  %v10819_v49 = vpop.f32.mrf.mxu0 }
 0x25f   : > { %2823 = vst.msk [vmem:[#allocation3 + $0x18] sm:$0xff] %vm527_vm2, %v2787_v41  ;;  %v3168_v42 = vadd.f32 %v3132_v36, %v3028_v24 }
 0x260   : > { %v3513_v48 = vld [vmem:[#allocation3 + $0x8] sm:$0xff] }
 0x261   : > { %3204 = vst.msk [vmem:[#allocation3 + $0x10] sm:$0xff] %vm527_vm2, %v3168_v42  ;;  %v3549_v44 = vadd.f32 %v3513_v48, %v10775_v4  ;;  %9127 = vmatmul.msk.f32.gmra.mxu2 %vm289_vm1, %v2494_v43  ;;  %9203 = vmatmul.msk.f32.gmra.mxu0 %vm289_vm1, %v3258_v40 }
 0x262   : > { %9165 = vmatmul.msk.f32.gmra.mxu3 %vm289_vm1, %v2876_v45  ;;  %v3620_v50 = vld [vmem:[#allocation3] sm:$0xff]  ;;  %v2755_v45 = vld [vmem:[#allocation3 + $0x38] sm:$0xff] }
 0x263   : > { %3585 = vst.msk [vmem:[#allocation3 + $0x8] sm:$0xff] %vm527_vm2, %v3549_v44  ;;  %v3660_v52 = vadd.f32 %v10817_v46, %v3620_v50  ;;  %v2498_v44 = vld [vmem:[%s9804_s12 + $0xe4] sm:$0xff] }
 0x264   : > { %v2652_v53 = vpop.f32.mrf.mxu2  ;;  %v2880_v50 = vld [vmem:[%s9804_s12 + $0xe5] sm:$0xff] }
 0x265   : > { %v3034_v54 = vpop.f32.mrf.mxu3  ;;  %v2788_v56 = vadd.f32 %v2752_v47, %v2652_v53  ;;  %v3696_v51 = vmul.f32 0.2, %v3660_v52 }
 0x266   : > { %v3133_v58 = vld [vmem:[#allocation3 + $0x18] sm:$0xff]  ;;  %v10834_v57 = vpop.f32.mrf.mxu0 }
 0x267   : > { %2824 = vst.msk [vmem:[#allocation3 + $0x20] sm:$0xff] %vm527_vm2, %v2788_v56  ;;  %v3169_v61 = vadd.f32 %v3133_v58, %v3031_v39  ;;  %v10832_v63 = vmax.f32 %v3660_v52, %v3696_v51  ;;  %v3262_v56 = vld [vmem:[%s9804_s12 + $0xe6] sm:$0xff] }
 0x268   : > { %v3514_v0 = vld [vmem:[#allocation3 + $0x10] sm:$0xff] }
 0x269   : > { %3205 = vst.msk [vmem:[#allocation3 + $0x18] sm:$0xff] %vm527_vm2, %v3169_v61  ;;  %v3550_v3 = vadd.f32 %v3514_v0, %v10788_v19  ;;  %9128 = vmatmul.msk.f32.gmra.mxu2 %vm289_vm1, %v2495_v60  ;;  %v3768_v4 = vmul.f32 %v10832_v63, %v10832_v63  ;;  %9204 = vmatmul.msk.f32.gmra.mxu0 %vm289_vm1, %v3259_v1 }
 0x26a   : > { %9166 = vmatmul.msk.f32.gmra.mxu3 %vm289_vm1, %v2877_v55  ;;  %v3621_v59 = vld [vmem:[#allocation3 + $0x8] sm:$0xff] }
 0x26b   : > { %3586 = vst.msk [vmem:[#allocation3 + $0x10] sm:$0xff] %vm527_vm2, %v3550_v3  ;;  %v3804_v62 = vsel %vm527_vm2, %v3768_v4, 0.0  ;;  %v3661_v6 = vadd.f32 %v10817_v46, %v3621_v59 }
 0x26c   : > { %v2655_v7 = vpop.f32.mrf.mxu2  ;;  %3805 = vadd.xlane.f32.xlu0 %v3804_v62  ;;  %v2499_v62 = vld [vmem:[%s9804_s12 + $0xec] sm:$0xff] }
 0x26d   : > { %v3037_v9 = vpop.f32.mrf.mxu3  ;;  %v2789_v11 = vadd.f32 %v2753_v2, %v2655_v7  ;;  %v3697_v5 = vmul.f32 0.2, %v3661_v6 }
 0x26e   : > { %v3134_v12 = vld [vmem:[#allocation3 + $0x20] sm:$0xff]  ;;  %v10852_v19 = vpop.f32.mrf.mxu0 }
 0x26f   : > { %2825 = vst.msk [vmem:[#allocation3 + $0x28] sm:$0xff] %vm527_vm2, %v2789_v11  ;;  %v3170_v8 = vadd.f32 %v3134_v12, %v3034_v54  ;;  %v10850_v16 = vmax.f32 %v3661_v6, %v3697_v5  ;;  %v2881_v6 = vld [vmem:[%s9804_s12 + $0xed] sm:$0xff] }
 0x270   : > { %v3515_v18 = vld [vmem:[#allocation3 + $0x18] sm:$0xff]  ;;  %v3263_v5 = vld [vmem:[%s9804_s12 + $0xee] sm:$0xff] }
 0x271   : > { %3206 = vst.msk [vmem:[#allocation3 + $0x20] sm:$0xff] %vm527_vm2, %v3170_v8  ;;  %v3551_v13 = vadd.f32 %v3515_v18, %v10801_v34  ;;  %9129 = vmatmul.msk.f32.gmra.mxu2 %vm289_vm1, %v2496_v14  ;;  %v3769_v20 = vmul.f32 %v10850_v16, %v10850_v16  ;;  %9205 = vmatmul.msk.f32.gmra.mxu0 %vm289_vm1, %v3260_v10  ;;  %v2757_v10 = vld [vmem:[#allocation3 + $0x48] sm:$0xff] }
 0x272   : > { %9167 = vmatmul.msk.f32.gmra.mxu3 %vm289_vm1, %v2878_v15  ;;  %v3622_v22 = vld [vmem:[#allocation3 + $0x10] sm:$0xff] }
 0x273   : > { %3587 = vst.msk [vmem:[#allocation3 + $0x18] sm:$0xff] %vm527_vm2, %v3551_v13  ;;  %v3807_v23 = vsel %vm527_vm2, %v3769_v20, 0.0  ;;  %v3662_v17 = vadd.f32 %v10817_v46, %v3622_v22 }
 0x274   : > { %v2658_v24 = vpop.f32.mrf.mxu2  ;;  %3808 = vadd.xlane.f32.xlu0 %v3807_v23 }
 0x275   : > { %v3040_v27 = vpop.f32.mrf.mxu3  ;;  %v2790_v29 = vadd.f32 %v2754_v26, %v2658_v24  ;;  %v3698_v21 = vmul.f32 0.2, %v3662_v17  ;;  %v2882_v24 = vld [vmem:[%s9804_s12 + $0xf5] sm:$0xff] }
 0x276   : > { %v3135_v30 = vld [vmem:[#allocation3 + $0x28] sm:$0xff]  ;;  %v10870_v35 = vpop.f32.mrf.mxu0 }
 0x277   : > { %2826 = vst.msk [vmem:[#allocation3 + $0x30] sm:$0xff] %vm527_vm2, %v2790_v29  ;;  %v3171_v34 = vadd.f32 %v3135_v30, %v3037_v9  ;;  %v10868_v25 = vmax.f32 %v3662_v17, %v3698_v21  ;;  %v2500_v17 = vld [vmem:[%s9804_s12 + $0xf4] sm:$0xff] }
 0x278   : > { %v3516_v28 = vld [vmem:[#allocation3 + $0x20] sm:$0xff]  ;;  %v3264_v30 = vld [vmem:[%s9804_s12 + $0xf6] sm:$0xff] }
 0x279   : > { %3207 = vst.msk [vmem:[#allocation3 + $0x28] sm:$0xff] %vm527_vm2, %v3171_v34  ;;  %v3552_v38 = vadd.f32 %v3516_v28, %v10819_v49  ;;  %9130 = vmatmul.msk.f32.gmra.mxu2 %vm289_vm1, %v2497_v31  ;;  %v3770_v32 = vmul.f32 %v10868_v25, %v10868_v25  ;;  %9206 = vmatmul.msk.f32.gmra.mxu0 %vm289_vm1, %v3261_v37 }
 0x27a   : > { %9168 = vmatmul.msk.f32.gmra.mxu3 %vm289_vm1, %v2879_v33  ;;  %v3623_v39 = vld [vmem:[#allocation3 + $0x18] sm:$0xff] }
 0x27b   : > { %3588 = vst.msk [vmem:[#allocation3 + $0x20] sm:$0xff] %vm527_vm2, %v3552_v38  ;;  %v3810_v41 = vsel %vm527_vm2, %v3770_v32, 0.0  ;;  %v3663_v36 = vadd.f32 %v10817_v46, %v3623_v39  ;;  %v2758_v38 = vld [vmem:[#allocation3 + $0x50] sm:$0xff] }
 0x27c   : > { %v2661_v43 = vpop.f32.mrf.mxu2  ;;  %3811 = vadd.xlane.f32.xlu1 %v3810_v41 }
 0x27d   : > { %v3043_v42 = vpop.f32.mrf.mxu3  ;;  %v2791_v48 = vadd.f32 %v2755_v45, %v2661_v43  ;;  %v3699_v49 = vmul.f32 0.2, %v3663_v36  ;;  %v2501_v43 = vld [vmem:[%s9804_s12 + $0xfc] sm:$0xff] }
 0x27e   : > { %v3136_v40 = vld [vmem:[#allocation3 + $0x30] sm:$0xff]  ;;  %v10888_v54 = vpop.f32.mrf.mxu0 }
 0x27f   : > { %2827 = vst.msk [vmem:[#allocation3 + $0x38] sm:$0xff] %vm527_vm2, %v2791_v48  ;;  %v3172_v52 = vadd.f32 %v3136_v40, %v3040_v27  ;;  %v10886_v53 = vmax.f32 %v3663_v36, %v3699_v49  ;;  %v2883_v45 = vld [vmem:[%s9804_s12 + $0xfd] sm:$0xff] }
 0x280   : > { %v3517_v47 = vld [vmem:[#allocation3 + $0x28] sm:$0xff] }
 0x281   : > { %3208 = vst.msk [vmem:[#allocation3 + $0x30] sm:$0xff] %vm527_vm2, %v3172_v52  ;;  %v3553_v51 = vadd.f32 %v3517_v47, %v10834_v57  ;;  %9131 = vmatmul.msk.f32.gmra.mxu2 %vm289_vm1, %v2498_v44  ;;  %v3771_v58 = vmul.f32 %v10886_v53, %v10886_v53  ;;  %9207 = vmatmul.msk.f32.gmra.mxu0 %vm289_vm1, %v3262_v56  ;;  %v2756_v57 = vld [vmem:[#allocation3 + $0x40] sm:$0xff]  ;;  %v3265_v44 = vld [vmem:[%s9804_s12 + $0xfe] sm:$0xff] }
 0x282   : > { %9169 = vmatmul.msk.f32.gmra.mxu3 %vm289_vm1, %v2880_v50  ;;  %v3624_v60 = vld [vmem:[#allocation3 + $0x20] sm:$0xff] }
 0x283   : > { %3589 = vst.msk [vmem:[#allocation3 + $0x28] sm:$0xff] %vm527_vm2, %v3553_v51  ;;  %v3813_v55 = vsel %vm527_vm2, %v3771_v58, 0.0  ;;  %v3664_v61 = vadd.f32 %v10817_v46, %v3624_v60  ;;  %v2759_v58 = vld [vmem:[#allocation3 + $0x58] sm:$0xff] }
 0x284   : > { %v2664_v0 = vpop.f32.mrf.mxu2  ;;  %3814 = vadd.xlane.f32.xlu1 %v3813_v55 }
 0x285   : > { %v3046_v1 = vpop.f32.mrf.mxu3  ;;  %v2792_v3 = vadd.f32 %v2756_v57, %v2664_v0  ;;  %v3700_v4 = vmul.f32 0.2, %v3664_v61  ;;  %v2502_v57 = vld [vmem:[%s9804_s12 + $0x104] sm:$0xff] }
 0x286   : > { %v3137_v59 = vld [vmem:[#allocation3 + $0x38] sm:$0xff]  ;;  %v10906_v11 = vpop.f32.mrf.mxu0 }
 0x287   : > { %2828 = vst.msk [vmem:[#allocation3 + $0x40] sm:$0xff] %vm527_vm2, %v2792_v3  ;;  %v3173_v7 = vadd.f32 %v3137_v59, %v3043_v42  ;;  %v10904_v2 = vmax.f32 %v3664_v61, %v3700_v4 }
 0x288   : > { %v3518_v9 = vld [vmem:[#allocation3 + $0x30] sm:$0xff] }
 0x289   : > { %3209 = vst.msk [vmem:[#allocation3 + $0x38] sm:$0xff] %vm527_vm2, %v3173_v7  ;;  %v3554_v12 = vadd.f32 %v3518_v9, %v10852_v19  ;;  %9132 = vmatmul.msk.f32.gmra.mxu2 %vm289_vm1, %v2499_v62  ;;  %v3772_v14 = vmul.f32 %v10904_v2, %v10904_v2  ;;  %9208 = vmatmul.msk.f32.gmra.mxu0 %vm289_vm1, %v3263_v5  ;;  %v4405_v9 = vld [vmem:[%s12974_s5 + $0x90] sm:$0xff] }
 0x28a   : > { %9170 = vmatmul.msk.f32.gmra.mxu3 %vm289_vm1, %v2881_v6  ;;  %v3625_v15 = vld [vmem:[#allocation3 + $0x28] sm:$0xff]  ;;  %v3266_v6 = vld [vmem:[%s9804_s12 + $0x106] sm:$0xff] }
 0x28b   : > { %3590 = vst.msk [vmem:[#allocation3 + $0x30] sm:$0xff] %vm527_vm2, %v3554_v12  ;;  %v3816_v8 = vsel %vm527_vm2, %v3772_v14, 0.0  ;;  %v3665_v18 = vadd.f32 %v10817_v46, %v3625_v15  ;;  %v2760_v14 = vld [vmem:[#allocation3 + $0x60] sm:$0xff] }
 0x28c   : > { %v2667_v19 = vpop.f32.mrf.mxu2  ;;  %3817 = vadd.xlane.f32.xlu2 %v3816_v8 }
 0x28d   : > { %v3049_v13 = vpop.f32.mrf.mxu3  ;;  %v2793_v20 = vadd.f32 %v2757_v10, %v2667_v19  ;;  %v3701_v22 = vmul.f32 0.2, %v3665_v18  ;;  %v2503_v19 = vld [vmem:[%s9804_s12 + $0x10c] sm:$0xff] }
 0x28e   : > { %v3138_v23 = vld [vmem:[#allocation3 + $0x40] sm:$0xff]  ;;  %v10924_v21 = vpop.f32.mrf.mxu0 }
 0x28f   : > { %2829 = vst.msk [vmem:[#allocation3 + $0x48] sm:$0xff] %vm527_vm2, %v2793_v20  ;;  %v3174_v26 = vadd.f32 %v3138_v23, %v3046_v1  ;;  %v10922_v27 = vmax.f32 %v3665_v18, %v3701_v22  ;;  %v2884_v1 = vld [vmem:[%s9804_s12 + $0x105] sm:$0xff]  ;;  %v2885_v10 = vld [vmem:[%s9804_s12 + $0x10d] sm:$0xff] }
 0x290   : > { %v3519_v29 = vld [vmem:[#allocation3 + $0x38] sm:$0xff] }
 0x291   : > { %3210 = vst.msk [vmem:[#allocation3 + $0x40] sm:$0xff] %vm527_vm2, %v3174_v26  ;;  %v3555_v31 = vadd.f32 %v3519_v29, %v10870_v35  ;;  %9133 = vmatmul.msk.f32.gmra.mxu2 %vm289_vm1, %v2500_v17  ;;  %v3773_v33 = vmul.f32 %v10922_v27, %v10922_v27  ;;  %9209 = vmatmul.msk.f32.gmra.mxu0 %vm289_vm1, %v3264_v30  ;;  %v3267_v17 = vld [vmem:[%s9804_s12 + $0x10e] sm:$0xff] }
 0x292   : > { %9171 = vmatmul.msk.f32.gmra.mxu3 %vm289_vm1, %v2882_v24  ;;  %v3626_v34 = vld [vmem:[#allocation3 + $0x30] sm:$0xff] }
 0x293   : > { %3591 = vst.msk [vmem:[#allocation3 + $0x38] sm:$0xff] %vm527_vm2, %v3555_v31  ;;  %v3819_v28 = vsel %vm527_vm2, %v3773_v33, 0.0  ;;  %v3666_v37 = vadd.f32 %v10817_v46, %v3626_v34  ;;  %v2761_v31 = vld [vmem:[#allocation3 + $0x68] sm:$0xff] }
 0x294   : > { %v2670_v35 = vpop.f32.mrf.mxu2  ;;  %3820 = vadd.xlane.f32.xlu1 %v3819_v28 }
 0x295   : > { %v3052_v32 = vpop.f32.mrf.mxu3  ;;  %v2794_v39 = vadd.f32 %v2758_v38, %v2670_v35  ;;  %v3702_v41 = vmul.f32 0.2, %v3666_v37  ;;  %v2504_v35 = vld [vmem:[%s9804_s12 + $0x114] sm:$0xff] }
 0x296   : > { %v3139_v36 = vld [vmem:[#allocation3 + $0x48] sm:$0xff]  ;;  %v10942_v40 = vpop.f32.mrf.mxu0 }
 0x297   : > { %2830 = vst.msk [vmem:[#allocation3 + $0x50] sm:$0xff] %vm527_vm2, %v2794_v39  ;;  %v3175_v42 = vadd.f32 %v3139_v36, %v3049_v13  ;;  %v10940_v48 = vmax.f32 %v3666_v37, %v3702_v41  ;;  %v10977_v13 = vpop.permute.xlu2 %4425  ;;  %v3268_v36 = vld [vmem:[%s9804_s12 + $0x116] sm:$0xff] }
 0x298   : > { %v3520_v49 = vld [vmem:[#allocation3 + $0x40] sm:$0xff] }
 0x299   : > { %3211 = vst.msk [vmem:[#allocation3 + $0x48] sm:$0xff] %vm527_vm2, %v3175_v42  ;;  %v3556_v50 = vadd.f32 %v3520_v49, %v10888_v54  ;;  %9134 = vmatmul.msk.f32.gmra.mxu2 %vm289_vm1, %v2501_v43  ;;  %v3774_v52 = vmul.f32 %v10940_v48, %v10940_v48  ;;  %9210 = vmatmul.msk.f32.gmra.mxu0 %vm289_vm1, %v3265_v44  ;;  %v4404_v49 = vld [vmem:[%s12974_s5 + $0x88] sm:$0xff] }
 0x29a   : > { %9172 = vmatmul.msk.f32.gmra.mxu3 %vm289_vm1, %v2883_v45  ;;  %v3627_v47 = vld [vmem:[#allocation3 + $0x38] sm:$0xff] }
 0x29b   : > { %3592 = vst.msk [vmem:[#allocation3 + $0x40] sm:$0xff] %vm527_vm2, %v3556_v50  ;;  %v3822_v56 = vsel %vm527_vm2, %v3774_v52, 0.0  ;;  %v3667_v51 = vadd.f32 %v10817_v46, %v3627_v47  ;;  %v2762_v50 = vld [vmem:[#allocation3 + $0x70] sm:$0xff] }
 0x29c   : > { %v2673_v54 = vpop.f32.mrf.mxu2  ;;  %3823 = vadd.xlane.f32.xlu1 %v3822_v56 }
 0x29d   : > { %v3055_v60 = vpop.f32.mrf.mxu3  ;;  %v2795_v55 = vadd.f32 %v2759_v58, %v2673_v54  ;;  %v3703_v61 = vmul.f32 0.2, %v3667_v51  ;;  %v2887_v54 = vld [vmem:[%s9804_s12 + $0x11d] sm:$0xff] }
 0x29e   : > { %v3140_v0 = vld [vmem:[#allocation3 + $0x50] sm:$0xff]  ;;  %v10960_v62 = vpop.f32.mrf.mxu0 }
 0x29f   : > { %2831 = vst.msk [vmem:[#allocation3 + $0x58] sm:$0xff] %vm527_vm2, %v2795_v55  ;;  %v3176_v3 = vadd.f32 %v3140_v0, %v3052_v32  ;;  %v10958_v4 = vmax.f32 %v3667_v51, %v3703_v61  ;;  %v10998_v43 = vpop.permute.xlu2 %4440  ;;  %v2505_v51 = vld [vmem:[%s9804_s12 + $0x11c] sm:$0xff] }
 0x2a0   : > { %v3521_v59 = vld [vmem:[#allocation3 + $0x48] sm:$0xff]  ;;  %v3269_v0 = vld [vmem:[%s9804_s12 + $0x11e] sm:$0xff] }
 0x2a1   : > { %3212 = vst.msk [vmem:[#allocation3 + $0x50] sm:$0xff] %vm527_vm2, %v3176_v3  ;;  %v3557_v7 = vadd.f32 %v3521_v59, %v10906_v11  ;;  %9135 = vmatmul.msk.f32.gmra.mxu2 %vm289_vm1, %v2502_v57  ;;  %v3775_v5 = vmul.f32 %v10958_v4, %v10958_v4  ;;  %9211 = vmatmul.msk.f32.gmra.mxu0 %vm289_vm1, %v3266_v6 }
 0x2a2   : > { %9173 = vmatmul.msk.f32.gmra.mxu3 %vm289_vm1, %v2884_v1  ;;  %v3628_v1 = vld [vmem:[#allocation3 + $0x40] sm:$0xff] }
 0x2a3   : > { %3593 = vst.msk [vmem:[#allocation3 + $0x48] sm:$0xff] %vm527_vm2, %v3557_v7  ;;  %v3825_v12 = vsel %vm527_vm2, %v3775_v5, 0.0  ;;  %v3668_v5 = vadd.f32 %v10817_v46, %v3628_v1 }
 0x2a4   : > { %v2676_v11 = vpop.f32.mrf.mxu2  ;;  %4515 = vperm.xlu2 %9568, %v4405_v9   ;;  %3826 = vadd.xlane.f32.xlu0 %v3825_v12  ;;  %v2763_v9 = vld [vmem:[#allocation3 + $0x78] sm:$0xff] }
 0x2a5   : > { %v3058_v15 = vpop.f32.mrf.mxu3  ;;  %v2796_v8 = vadd.f32 %v2760_v14, %v2676_v11 }
 0x2a6   : > { %v3141_v18 = vld [vmem:[#allocation3 + $0x58] sm:$0xff]  ;;  %v10980_v23 = vpop.f32.mrf.mxu0 }
 0x2a7   : > { %2832 = vst.msk [vmem:[#allocation3 + $0x60] sm:$0xff] %vm527_vm2, %v2796_v8  ;;  %v3177_v20 = vadd.f32 %v3141_v18, %v3055_v60  ;;  %v11015_v60 = vpop.permute.xlu0 %4430  ;;  %v11024_v59 = vpop.permute.xlu2 %4445  ;;  %v2888_v8 = vld [vmem:[%s9804_s12 + $0x125] sm:$0xff] }
 0x2a8   : > { %v3522_v22 = vld [vmem:[#allocation3 + $0x50] sm:$0xff] }
 0x2a9   : > { %3213 = vst.msk [vmem:[#allocation3 + $0x58] sm:$0xff] %vm527_vm2, %v3177_v20  ;;  %v3558_v24 = vadd.f32 %v3522_v22, %v10924_v21  ;;  %9136 = vmatmul.msk.f32.gmra.mxu2 %vm289_vm1, %v2503_v19  ;;  %9212 = vmatmul.msk.f32.gmra.mxu0 %vm289_vm1, %v3267_v17  ;;  %v2886_v21 = vld [vmem:[%s9804_s12 + $0x115] sm:$0xff]  ;;  %v3704_v20 = vmul.f32 0.2, %v3668_v5  ;;  %v3270_v17 = vld [vmem:[%s9804_s12 + $0x126] sm:$0xff] }
 0x2aa   : > { %9174 = vmatmul.msk.f32.gmra.mxu3 %vm289_vm1, %v2885_v10  ;;  %v3629_v26 = vld [vmem:[#allocation3 + $0x48] sm:$0xff] }
 0x2ab   : > { %3594 = vst.msk [vmem:[#allocation3 + $0x50] sm:$0xff] %vm527_vm2, %v3558_v24  ;;  %v3669_v29 = vadd.f32 %v10817_v46, %v3629_v26  ;;  %v9731_v24 = vmov 0.0  }
 0x2ac   : > { %v2679_v30 = vpop.f32.mrf.mxu2  ;;  %4639 = vst.msk [vmem:[#allocation2] sm:$0xff] %vm527_vm2, %v9731_v24 }
 0x2ad   : > { %v3061_v33 = vpop.f32.mrf.mxu3  ;;  %v2797_v34 = vadd.f32 %v2761_v31, %v2679_v30  ;;  %v3705_v28 = vmul.f32 0.2, %v3669_v29  ;;  %4640 = vst.msk [vmem:[#allocation2 + $0x8] sm:$0xff] %vm527_vm2, %v9731_v24 }
 0x2ae   : > { %v3142_v37 = vld [vmem:[#allocation3 + $0x60] sm:$0xff]  ;;  %v10995_v41 = vpop.f32.mrf.mxu0  ;;  %4643 = vst.msk [vmem:[#allocation2 + $0x133] sm:$0xff] %vm527_vm2, %v9731_v24 }
 0x2af   : > { %2833 = vst.msk [vmem:[#allocation3 + $0x68] sm:$0xff] %vm527_vm2, %v2797_v34  ;;  %v3178_v38 = vadd.f32 %v3142_v37, %v3058_v15  ;;  %v10993_v32 = vmax.f32 %v3669_v29, %v3705_v28  ;;  %v2506_v15 = vld [vmem:[%s9804_s12 + $0x124] sm:$0xff]  ;;  %v11044_v30 = vpop.permute.xlu0 %4455  ;;  %v11051_v28 = vmax.f32 %v3668_v5, %v3704_v20 }
 0x2b0   : > { %v3523_v39 = vld [vmem:[#allocation3 + $0x58] sm:$0xff]  ;;  %v2764_v34 = vld [vmem:[#allocation3 + $0x80] sm:$0xff]  ;;  %4644 = vst.msk [vmem:[#allocation2 + $0x13b] sm:$0xff] %vm527_vm2, %v9731_v24 }
 0x2b1   : > { %3214 = vst.msk [vmem:[#allocation3 + $0x60] sm:$0xff] %vm527_vm2, %v3178_v38  ;;  %v3559_v45 = vadd.f32 %v3523_v39, %v10942_v40  ;;  %9137 = vmatmul.msk.f32.gmra.mxu2 %vm289_vm1, %v2504_v35  ;;  %v3777_v42 = vmul.f32 %v10993_v32, %v10993_v32  ;;  %9213 = vmatmul.msk.f32.gmra.mxu0 %vm289_vm1, %v3268_v36  ;;  %v11055_v38 = vpop.permute.xlu2 %4460 }
 0x2b2   : > { %9175 = vmatmul.msk.f32.gmra.mxu3 %vm289_vm1, %v2886_v21  ;;  %v9732_v21 = vmov 8.0   ;;  %4642 = vst.msk [vmem:[#allocation2 + $0x10] sm:$0x7] %vm4641_vm3, %v9731_v24 }
 0x2b3   : > { %3595 = vst.msk [vmem:[#allocation3 + $0x58] sm:$0xff] %vm527_vm2, %v3559_v45  ;;  %v3831_v44 = vsel %vm527_vm2, %v3777_v42, 0.0  ;;  %9573 = vrcp.f32 %v9732_v21  ;;  %v2507_v45 = vld [vmem:[%s9804_s12 + $0x12c] sm:$0xff] }
 0x2b4   : > { %v2682_v40 = vpop.f32.mrf.mxu2  ;;  %3832 = vadd.xlane.f32.xlu0 %v3831_v44  ;;  %v2889_v42 = vld [vmem:[%s9804_s12 + $0x12d] sm:$0xff]  ;;  %v4682_v44 = vld [vmem:[#allocation2] sm:$0xff]  ;;  %4645 = vst.msk [vmem:[#allocation2 + $0x143] sm:$0x7] %vm4641_vm3, %v9731_v24 }
 0x2b5   : > { %v3064_v52 = vpop.f32.mrf.mxu3  ;;  %v2798_v47 = vadd.f32 %v2762_v50, %v2682_v40  ;;  %4510 = vperm.xlu1 %9570, %v4404_v49   ;;  %v9255_v40 = vld [vmem:[%s12972_s3 + $0x8] sm:$0xff]  ;;  %9219 = vmatmul.msk.f32.vlgmr.msra.gmra.mxu1 %vm527_vm2, %v4682_v44 }
 0x2b6   : > { %v3143_v56 = vld [vmem:[#allocation3 + $0x68] sm:$0xff]  ;;  %v11017_v61 = vpop.f32.mrf.mxu0  ;;  %5149 = vmatpush.msrb.mxu2 %v9255_v40 }
 0x2b7   : > { %2834 = vst.msk [vmem:[#allocation3 + $0x70] sm:$0xff] %vm527_vm2, %v2798_v47  ;;  %v3179_v58 = vadd.f32 %v3143_v56, %v3061_v33 }
 0x2b8   : > { %v3524_v55 = vld [vmem:[#allocation3 + $0x60] sm:$0xff] }
 0x2b9   : > { %3215 = vst.msk [vmem:[#allocation3 + $0x68] sm:$0xff] %vm527_vm2, %v3179_v58  ;;  %v3560_v57 = vadd.f32 %v3524_v55, %v10960_v62  ;;  %9138 = vmatmul.msk.f32.gmra.mxu2 %vm289_vm1, %v2505_v51  ;;  %9214 = vmatmul.msk.f32.gmra.mxu0 %vm289_vm1, %v3269_v0  ;;  %v3271_v51 = vld [vmem:[%s9804_s12 + $0x12e] sm:$0xff]  ;;  %v11076_v55 = vpop.eup %9573  ;;  %v11092_v20 = vpop.permute.xlu2 %4465 }
 0x2ba   : > { %9176 = vmatmul.msk.f32.gmra.mxu3 %vm289_vm1, %v2887_v54  ;;  %v3631_v3 = vld [vmem:[#allocation3 + $0x58] sm:$0xff]  ;;  %v11071_v54 = vpop.permute.xlu1 %4435  ;;  %vm3917_vm4 = vweird.f32 %v11076_v55 }
 0x2bb   : > { %3596 = vst.msk [vmem:[#allocation3 + $0x60] sm:$0xff] %vm527_vm2, %v3560_v57  ;;  %v3671_v6 = vadd.f32 %v10817_v46, %v3631_v3  ;;  %v11080_v57 = vpop.permute.xlu0 %4475  ;;  %v3630_v3 = vld [vmem:[#allocation3 + $0x50] sm:$0xff] }
 0x2bc   : > { %v2685_v7 = vpop.f32.mrf.mxu2 }
 0x2bd   : > { %v3067_v62 = vpop.f32.mrf.mxu3  ;;  %v2799_v12 = vadd.f32 %v2763_v9, %v2685_v7  ;;  %v3707_v11 = vmul.f32 0.2, %v3671_v6 }
 0x2be   : > { %v3144_v14 = vld [vmem:[#allocation3 + $0x70] sm:$0xff]  ;;  %v11035_v22 = vpop.f32.mrf.mxu0 }
 0x2bf   : > { %2835 = vst.msk [vmem:[#allocation3 + $0x78] sm:$0xff] %vm527_vm2, %v2799_v12  ;;  %v3180_v18 = vadd.f32 %v3144_v14, %v3064_v52  ;;  %v11033_v19 = vmax.f32 %v3671_v6, %v3707_v11  ;;  %v3776_v52 = vmul.f32 %v11051_v28, %v11051_v28  ;;  %v2765_v6 = vld [vmem:[#allocation3 + $0x88] sm:$0xff]  ;;  %v3913_v14 = vmul.f32 8.0, %v11076_v55 }
 0x2c0   : > { %v3525_v10 = vld [vmem:[#allocation3 + $0x68] sm:$0xff] }
 0x2c1   : > { %3216 = vst.msk [vmem:[#allocation3 + $0x70] sm:$0xff] %vm527_vm2, %v3180_v18  ;;  %v3561_v26 = vadd.f32 %v3525_v10, %v10980_v23  ;;  %9139 = vmatmul.msk.f32.gmra.mxu2 %vm289_vm1, %v2506_v15  ;;  %v3779_v29 = vmul.f32 %v11033_v19, %v11033_v19  ;;  %9215 = vmatmul.msk.f32.gmra.mxu0 %vm289_vm1, %v3270_v17  ;;  %v3828_v7 = vsel %vm527_vm2, %v3776_v52, 0.0  ;;  %v2508_v12 = vld [vmem:[%s9804_s12 + $0x134] sm:$0xff]  ;;  %v4683_v10 = vld [vmem:[#allocation2 + $0x8] sm:$0xff] }
 0x2c2   : > { %9177 = vmatmul.msk.f32.gmra.mxu3 %vm289_vm1, %v2888_v8  ;;  %v3632_v31 = vld [vmem:[#allocation3 + $0x60] sm:$0xff]  ;;  %v2890_v8 = vld [vmem:[%s9804_s12 + $0x135] sm:$0xff]  ;;  %v3670_v18 = vadd.f32 %v10817_v46, %v3630_v3  ;;  %9220 = vmatmul.msk.f32.gmra.mxu1 %vm527_vm2, %v4683_v10 }
 0x2c3   : > { %3597 = vst.msk [vmem:[#allocation3 + $0x68] sm:$0xff] %vm527_vm2, %v3561_v26  ;;  %v3837_v33 = vsel %vm527_vm2, %v3779_v29, 0.0  ;;  %v3672_v35 = vadd.f32 %v10817_v46, %v3632_v31 }
 0x2c4   : > { %v2688_v23 = vpop.f32.mrf.mxu2  ;;  %3838 = vadd.xlane.f32.xlu0 %v3837_v33  ;;  %v3272_v33 = vld [vmem:[%s9804_s12 + $0x136] sm:$0xff]  ;;  %v3706_v21 = vmul.f32 0.2, %v3670_v18 }
 0x2c5   : > { %v3070_v37 = vpop.f32.mrf.mxu3  ;;  %v2800_v39 = vadd.f32 %v2764_v34, %v2688_v23  ;;  %v3708_v47 = vmul.f32 0.2, %v3672_v35 }
 0x2c6   : > { %v3145_v36 = vld [vmem:[#allocation3 + $0x78] sm:$0xff]  ;;  %v11066_v56 = vpop.f32.mrf.mxu0 }
 0x2c7   : > { %2836 = vst.msk [vmem:[#allocation3 + $0x80] sm:$0xff] %vm527_vm2, %v2800_v39  ;;  %v3181_v49 = vadd.f32 %v3145_v36, %v3067_v62  ;;  %v11085_v9 = vmax.f32 %v3672_v35, %v3708_v47  ;;  %v9292_v35 = vld [vmem:[%s12972_s3 + $0x10] sm:$0xff]  ;;  %v11112_v39 = vpop.permute.xlu1 %4450 }
 0x2c8   : > { %v3526_v50 = vld [vmem:[#allocation3 + $0x70] sm:$0xff]  ;;  %5528 = vmatpush.msrb.mxu3 %v9292_v35  ;;  %v4988_v35 = vld [vmem:[#allocation2 + $0x1] sm:$0xff] }
 0x2c9   : > { %3217 = vst.msk [vmem:[#allocation3 + $0x78] sm:$0xff] %vm527_vm2, %v3181_v49  ;;  %v3562_v58 = vadd.f32 %v3526_v50, %v10995_v41  ;;  %9140 = vmatmul.msk.f32.gmra.mxu2 %vm289_vm1, %v2507_v45  ;;  %9216 = vmatmul.msk.f32.gmra.mxu0 %vm289_vm1, %v3271_v51  ;;  %v3780_v29 = vmul.f32 %v11085_v9, %v11085_v9  ;;  %v11118_v50 = vpop.permute.xlu0 %4505  ;;  %v2509_v51 = vld [vmem:[%s9804_s12 + $0x13c] sm:$0xff] }
 0x2ca   : > { %9178 = vmatmul.msk.f32.gmra.mxu3 %vm289_vm1, %v2889_v42  ;;  %v3633_v0 = vld [vmem:[#allocation3 + $0x68] sm:$0xff]  ;;  %v2766_v42 = vld [vmem:[#allocation3 + $0x90] sm:$0xff] }
 0x2cb   : > { %3598 = vst.msk [vmem:[#allocation3 + $0x70] sm:$0xff] %vm527_vm2, %v3562_v58  ;;  %v3673_v1 = vadd.f32 %v10817_v46, %v3633_v0  ;;  %v3840_v49 = vsel %vm527_vm2, %v3780_v29, 0.0  ;;  %v11122_v58 = vmax.f32 %v3670_v18, %v3706_v21  ;;  %v2891_v0 = vld [vmem:[%s9804_s12 + $0x13d] sm:$0xff] }
 0x2cc   : > { %v2691_v41 = vpop.f32.mrf.mxu2  ;;  %v2767_v18 = vld [vmem:[#allocation3 + $0x98] sm:$0xff] }
 0x2cd   : > { %v3073_v62 = vpop.f32.mrf.mxu3  ;;  %v2801_v5 = vadd.f32 %v2765_v6, %v2691_v41  ;;  %3829 = vadd.xlane.f32.xlu2 %v3828_v7  ;;  %v3709_v11 = vmul.f32 0.2, %v3673_v1  ;;  %v3273_v7 = vld [vmem:[%s9804_s12 + $0x13e] sm:$0xff] }
 0x2ce   : > { %v3146_v15 = vld [vmem:[#allocation3 + $0x80] sm:$0xff]  ;;  %v11099_v31 = vpop.f32.mrf.mxu0 }
 0x2cf   : > { %2837 = vst.msk [vmem:[#allocation3 + $0x88] sm:$0xff] %vm527_vm2, %v2801_v5  ;;  %v3182_v17 = vadd.f32 %v3146_v15, %v3070_v37  ;;  %v11095_v26 = vmax.f32 %v3673_v1, %v3709_v11  ;;  %v3914_v37 = vsub.f32 1.0, %v3913_v14  ;;  %v11130_v5 = vpop.permute.xlu2 %4480  ;;  %v5367_v21 = vld [vmem:[#allocation2 + $0x2] sm:$0xff] }
 0x2d0   : > { %v3527_v24 = vld [vmem:[#allocation3 + $0x78] sm:$0xff] }
 0x2d1   : > { %3218 = vst.msk [vmem:[#allocation3 + $0x80] sm:$0xff] %vm527_vm2, %v3182_v17  ;;  %v3563_v23 = vadd.f32 %v3527_v24, %v11017_v61  ;;  %9141 = vmatmul.msk.f32.gmra.mxu2 %vm289_vm1, %v2508_v12  ;;  %v3781_v34 = vmul.f32 %v11095_v26, %v11095_v26  ;;  %9217 = vmatmul.msk.f32.gmra.mxu0 %vm289_vm1, %v3272_v33  ;;  %v11143_v17 = vpop.permute.xlu1 %4470 }
 0x2d2   : > { %9179 = vmatmul.msk.f32.gmra.mxu3 %vm289_vm1, %v2890_v8  ;;  %v3634_v36 = vld [vmem:[#allocation3 + $0x70] sm:$0xff]  ;;  %v3915_v52 = vmul.f32 %v11076_v55, %v3914_v37 }
 0x2d3   : > { %3599 = vst.msk [vmem:[#allocation3 + $0x78] sm:$0xff] %vm527_vm2, %v3563_v23  ;;  %v3843_v61 = vsel %vm527_vm2, %v3781_v34, 0.0  ;;  %v3674_v1 = vadd.f32 %v10817_v46, %v3634_v36 }
 0x2d4   : > { %v2694_v45 = vpop.f32.mrf.mxu2  ;;  %3844 = vadd.xlane.f32.xlu0 %v3843_v61  ;;  %v3916_v11 = vadd.f32 %v11076_v55, %v3915_v52 }
 0x2d5   : > { %v3076_v44 = vpop.f32.mrf.mxu3  ;;  %v2802_v40 = vadd.f32 %v2766_v42, %v2694_v45  ;;  %3841 = vadd.xlane.f32.xlu2 %v3840_v49  ;;  %v3710_v15 = vmul.f32 0.2, %v3674_v1 }
 0x2d6   : > { %v3147_v47 = vld [vmem:[#allocation3 + $0x88] sm:$0xff]  ;;  %v11127_v6 = vpop.f32.mrf.mxu0  ;;  %v11146_v29 = vsel %vm3917_vm4, %v11076_v55, %v3916_v11 }
 0x2d7   : > { %2838 = vst.msk [vmem:[#allocation3 + $0x90] sm:$0xff] %vm527_vm2, %v2802_v40  ;;  %v3183_v3 = vadd.f32 %v3147_v47, %v3073_v62  ;;  %v3778_v62 = vmul.f32 %v11122_v58, %v11122_v58  ;;  %v11149_v37 = vmax.f32 %v3674_v1, %v3710_v15  ;;  %v11170_v1 = vpop.permute.xlu2 %4485 }
 0x2d8   : > { %v3528_v41 = vld [vmem:[#allocation3 + $0x80] sm:$0xff] }
 0x2d9   : > { %3219 = vst.msk [vmem:[#allocation3 + $0x88] sm:$0xff] %vm527_vm2, %v3183_v3  ;;  %v3564_v12 = vadd.f32 %v3528_v41, %v11035_v22  ;;  %9142 = vmatmul.msk.f32.gmra.mxu2 %vm289_vm1, %v2509_v51  ;;  %9218 = vmatmul.msk.f32.gmra.mxu0 %vm289_vm1, %v3273_v7  ;;  %v3834_v34 = vsel %vm527_vm2, %v3778_v62, 0.0  ;;  %v3782_v51 = vmul.f32 %v11149_v37, %v11149_v37  ;;  %v2768_v7 = vld [vmem:[#allocation3 + $0xa0] sm:$0xff] }
 0x2da   : > { %9180 = vmatmul.msk.f32.gmra.mxu3 %vm289_vm1, %v2891_v0  ;;  %v3635_v14 = vld [vmem:[#allocation3 + $0x78] sm:$0xff] }
 0x2db   : > { %3600 = vst.msk [vmem:[#allocation3 + $0x80] sm:$0xff] %vm527_vm2, %v3564_v12  ;;  %v3675_v8 = vadd.f32 %v10817_v46, %v3635_v14  ;;  %v3846_v15 = vsel %vm527_vm2, %v3782_v51, 0.0  ;;  %v2769_v51 = vld [vmem:[#allocation3 + $0xa8] sm:$0xff] }
 0x2dc   : > { %v2697_v22 = vpop.f32.mrf.mxu2 }
 0x2dd   : > { %v3079_v10 = vpop.f32.mrf.mxu3  ;;  %v2803_v24 = vadd.f32 %v2767_v18, %v2697_v22  ;;  %v3711_v33 = vmul.f32 0.2, %v3675_v8  ;;  %v5368_v22 = vld [vmem:[#allocation2 + $0xa] sm:$0xff]  ;;  %v11177_v18 = vpop.permute.xlu1 %4500 }
 0x2de   : > { %v3148_v23 = vld [vmem:[#allocation3 + $0x90] sm:$0xff]  ;;  %v11155_v55 = vpop.f32.mrf.mxu0 }
 0x2df   : > { %2839 = vst.msk [vmem:[#allocation3 + $0x98] sm:$0xff] %vm527_vm2, %v2803_v24  ;;  %v3184_v61 = vadd.f32 %v3148_v23, %v3076_v44  ;;  %v3806_v36 = vpop.xlane.xlu0 %3805  ;;  %3835 = vadd.xlane.f32.xlu1 %v3834_v34  ;;  %v11152_v45 = vmax.f32 %v3675_v8, %v3711_v33  ;;  %v9329_v44 = vld [vmem:[%s12972_s3 + $0x18] sm:$0xff]  ;;  %v4989_v8 = vld [vmem:[#allocation2 + $0x9] sm:$0xff] }
 0x2e0   : > { %v3919_v42 = vmul.f32 %v11146_v29, %v3806_v36  ;;  %v3529_v49 = vld [vmem:[#allocation3 + $0x88] sm:$0xff]  ;;  %5907 = vmatpush.msrb.mxu0 %v9329_v44 }
 0x2e1   : > { %3220 = vst.msk [vmem:[#allocation3 + $0x90] sm:$0xff] %vm527_vm2, %v3184_v61  ;;  %v3565_v40 = vadd.f32 %v3529_v49, %v11066_v56  ;;  %v3783_v52 = vmul.f32 %v11152_v45, %v11152_v45  ;;  %9256 = vmatmul.msk.f32.vlgmr.msrb.gmra.mxu2 %vm527_vm2, %v4988_v35 }
 0x2e2   : > { %9293 = vmatmul.msk.f32.vlgmr.msrb.gmra.mxu3 %vm527_vm2, %v5367_v21  ;;  %v11166_v47 = vadd.f32 1e-08, %v3919_v42  ;;  %v3636_v0 = vld [vmem:[#allocation3 + $0x80] sm:$0xff] }
 0x2e3   : > { %3601 = vst.msk [vmem:[#allocation3 + $0x88] sm:$0xff] %vm527_vm2, %v3565_v40  ;;  %v3849_v56 = vsel %vm527_vm2, %v3783_v52, 0.0  ;;  %v3676_v3 = vadd.f32 %v10817_v46, %v3636_v0 }
 0x2e4   : > { %9575 = vrsqrt.f32 %v11166_v47  ;;  %v2700_v41 = vpop.f32.mrf.mxu2  ;;  %3850 = vadd.xlane.f32.xlu0 %v3849_v56  ;;  %v11200_v56 = vpop.permute.xlu2 %4490  ;;  %vm3997_vm6 = vweird.f32 %v11166_v47 }
 0x2e5   : > { %v3082_v12 = vpop.f32.mrf.mxu3  ;;  %v2804_v11 = vadd.f32 %v2768_v7, %v2700_v41  ;;  %v3712_v62 = vmul.f32 0.2, %v3676_v3 }
 0x2e6   : > { %v3149_v14 = vld [vmem:[#allocation3 + $0x98] sm:$0xff]  ;;  %v11183_v21 = vpop.f32.mrf.mxu0 }
 0x2e7   : > { %2840 = vst.msk [vmem:[#allocation3 + $0xa0] sm:$0xff] %vm527_vm2, %v2804_v11  ;;  %v3185_v24 = vadd.f32 %v3149_v14, %v3079_v10  ;;  %v3809_v33 = vpop.xlane.xlu0 %3808  ;;  %3847 = vadd.xlane.f32.xlu1 %v3846_v15  ;;  %v11180_v23 = vmax.f32 %v3676_v3, %v3712_v62  ;;  %v4406_v10 = vld [vmem:[%s12974_s5 + $0x98] sm:$0xff] }
 0x2e8   : > { %v3920_v34 = vmul.f32 %v11146_v29, %v3809_v33  ;;  %v3530_v35 = vld [vmem:[#allocation3 + $0x90] sm:$0xff] }
 0x2e9   : > { %3221 = vst.msk [vmem:[#allocation3 + $0x98] sm:$0xff] %vm527_vm2, %v3185_v24  ;;  %v3566_v61 = vadd.f32 %v3530_v35, %v11099_v31  ;;  %9257 = vmatmul.msk.f32.gmra.mxu2 %vm527_vm2, %v4989_v8  ;;  %v3784_v49 = vmul.f32 %v11180_v23, %v11180_v23 }
 0x2ea   : > { %9294 = vmatmul.msk.f32.gmra.mxu3 %vm527_vm2, %v5368_v22  ;;  %v9576_v36 = vpop.eup %9575  ;;  %v11189_v42 = vadd.f32 1e-08, %v3920_v34  ;;  %v3637_v40 = vld [vmem:[#allocation3 + $0x88] sm:$0xff] }
 0x2eb   : > { %v3992_v52 = vmul.f32 %v9576_v36, %v11166_v47  ;;  %3602 = vst.msk [vmem:[#allocation3 + $0x90] sm:$0xff] %vm527_vm2, %v3566_v61  ;;  %v3677_v31 = vadd.f32 %v10817_v46, %v3637_v40  ;;  %v3852_v62 = vsel %vm527_vm2, %v3784_v49, 0.0  ;;  %vm3998_vm5 = vweird.f32 %v9576_v36 }
 0x2ec   : > { %9577 = vrsqrt.f32 %v11189_v42  ;;  %v2703_v44 = vpop.f32.mrf.mxu2  ;;  %vm3999_vm7 = vmor %vm3997_vm6, %vm3998_vm5  ;;  %vm4007_vm9 = vweird.f32 %v11189_v42 }
 0x2ed   : > { %v3085_v0 = vpop.f32.mrf.mxu3  ;;  %v3993_v3 = vmul.f32 %v9576_v36, %v3992_v52  ;;  %v2805_v41 = vadd.f32 %v2769_v51, %v2703_v44  ;;  %4520 = vperm.xlu2 %9568, %v4406_v10   ;;  %v3713_v7 = vmul.f32 0.2, %v3677_v31 }
 0x2ee   : > { %v3150_v11 = vld [vmem:[#allocation3 + $0xa0] sm:$0xff]  ;;  %v11207_v33 = vpop.f32.mrf.mxu0 }
 0x2ef   : > { %v3994_v14 = vmul.f32 0.5, %v3993_v3  ;;  %2841 = vst.msk [vmem:[#allocation3 + $0xa8] sm:$0xff] %vm527_vm2, %v2805_v41  ;;  %v3186_v15 = vadd.f32 %v3150_v11, %v3082_v12  ;;  %v3812_v8 = vpop.xlane.xlu1 %3811  ;;  %3853 = vadd.xlane.f32.xlu1 %v3852_v62  ;;  %v11204_v46 = vmax.f32 %v3677_v31, %v3713_v7  ;;  %v2770_v31 = vld [vmem:[#allocation3 + $0xb0] sm:$0xff]  ;;  %v4408_v41 = vld [vmem:[%s12974_s5 + $0xa8] sm:$0xff]  ;;  %v11224_v62 = vpop.permute.xlu2 %4495 }
 0x2f0   : > { %v3921_v22 = vmul.f32 %v11146_v29, %v3812_v8  ;;  %v3531_v24 = vld [vmem:[#allocation3 + $0x98] sm:$0xff] }
 0x2f1   : > { %v3995_v34 = vsub.f32 1.5, %v3994_v14  ;;  %3222 = vst.msk [vmem:[#allocation3 + $0xa0] sm:$0xff] %vm527_vm2, %v3186_v15  ;;  %v3567_v35 = vadd.f32 %v3531_v24, %v11127_v6  ;;  %v3785_v12 = vmul.f32 %v11204_v46, %v11204_v46 }
 0x2f2   : > { %v9578_v61 = vpop.eup %9577  ;;  %v11211_v10 = vadd.f32 1e-08, %v3921_v22 }
 0x2f3   : > { %v3996_v49 = vmul.f32 %v9576_v36, %v3995_v34  ;;  %v4002_v40 = vmul.f32 %v9578_v61, %v11189_v42  ;;  %3603 = vst.msk [vmem:[#allocation3 + $0x98] sm:$0xff] %vm527_vm2, %v3567_v35  ;;  %v3855_v11 = vsel %vm527_vm2, %v3785_v12, 0.0  ;;  %vm4008_vm8 = vweird.f32 %v9578_v61 }
 0x2f4   : > { %9579 = vrsqrt.f32 %v11211_v10  ;;  %v2706_v52 = vpop.f32.mrf.mxu2  ;;  %vm4009_vm10 = vmor %vm4007_vm9, %vm4008_vm8  ;;  %vm4017_vm12 = vweird.f32 %v11211_v10 }
 0x2f5   : > { %v3088_v44 = vpop.f32.mrf.mxu3  ;;  %v4000_v6 = vsel %vm3999_vm7, %v9576_v36, %v3996_v49  ;;  %v4003_v51 = vmul.f32 %v9578_v61, %v4002_v40  ;;  %v2806_v3 = vadd.f32 %v2770_v31, %v2706_v52  ;;  %v2771_v52 = vld [vmem:[#allocation3 + $0xb8] sm:$0xff] }
 0x2f6   : > { %v4351_v7 = vmul.f32 %v4000_v6, %v10832_v63  ;;  %v3151_v47 = vld [vmem:[#allocation3 + $0xa8] sm:$0xff]  ;;  %v11229_v34 = vpop.f32.mrf.mxu0 }
 0x2f7   : > { %v4004_v14 = vmul.f32 0.5, %v4003_v51  ;;  %2842 = vst.msk [vmem:[#allocation3 + $0xb0] sm:$0xff] %vm527_vm2, %v2806_v3  ;;  %v3187_v15 = vadd.f32 %v3151_v47, %v3085_v0  ;;  %v3815_v8 = vpop.xlane.xlu1 %3814  ;;  %3856 = vadd.xlane.f32.xlu1 %v3855_v11  ;;  %v4409_v3 = vld [vmem:[%s12974_s5 + $0xb0] sm:$0xff] }
 0x2f8   : > { %v4603_v36 = vmul.f32 %v10977_v13, %v4351_v7  ;;  %v3922_v22 = vmul.f32 %v11146_v29, %v3815_v8  ;;  %4530 = vperm.xlu0 %9569, %v4408_v41   ;;  %v3532_v24 = vld [vmem:[#allocation3 + $0xa0] sm:$0xff] }
 0x2f9   : > { %v4005_v63 = vsub.f32 1.5, %v4004_v14  ;;  %3223 = vst.msk [vmem:[#allocation3 + $0xa8] sm:$0xff] %vm527_vm2, %v3187_v15  ;;  %v3568_v35 = vadd.f32 %v3532_v24, %v11155_v55 }
 0x2fa   : > { %v9580_v12 = vpop.eup %9579  ;;  %4646 = vst.msk [vmem:[#allocation2 + $0x13] sm:$0xff] %vm527_vm2, %v4603_v36  ;;  %v11234_v0 = vadd.f32 1e-08, %v3922_v22  ;;  %v3639_v8 = vld [vmem:[#allocation3 + $0x98] sm:$0xff] }
 0x2fb   : > { %v4006_v49 = vmul.f32 %v9578_v61, %v4005_v63  ;;  %v4012_v13 = vmul.f32 %v9580_v12, %v11211_v10  ;;  %3604 = vst.msk [vmem:[#allocation3 + $0xa0] sm:$0xff] %vm527_vm2, %v3568_v35  ;;  %vm4018_vm11 = vweird.f32 %v9580_v12 }
 0x2fc   : > { %9581 = vrsqrt.f32 %v11234_v0  ;;  %v2709_v40 = vpop.f32.mrf.mxu2  ;;  %vm4019_vm13 = vmor %vm4017_vm12, %vm4018_vm11  ;;  %vm4027_vm15 = vweird.f32 %v11234_v0 }
 0x2fd   : > { %v3091_v31 = vpop.f32.mrf.mxu3  ;;  %v4010_v6 = vsel %vm4009_vm10, %v9578_v61, %v4006_v49  ;;  %v4013_v55 = vmul.f32 %v9580_v12, %v4012_v13  ;;  %v2807_v51 = vadd.f32 %v2771_v52, %v2709_v40  ;;  %v2772_v40 = vld [vmem:[#allocation3 + $0xc0] sm:$0xff] }
 0x2fe   : > { %v4352_v41 = vmul.f32 %v4010_v6, %v10850_v16  ;;  %v3152_v42 = vld [vmem:[#allocation3 + $0xb0] sm:$0xff]  ;;  %v11247_v36 = vpop.f32.mrf.mxu0  ;;  %v11266_v6 = vld [vmem:[%s12971_s2] ss:$0 sm:$0xff] }
 0x2ff   : > { %v4014_v7 = vmul.f32 0.5, %v4013_v55  ;;  %2843 = vst.msk [vmem:[#allocation3 + $0xb8] sm:$0xff] %vm527_vm2, %v2807_v51  ;;  %v3188_v47 = vadd.f32 %v3152_v42, %v3088_v44  ;;  %v3818_v11 = vpop.xlane.xlu2 %3817  ;;  %v3679_v10 = vadd.f32 %v11266_v6, %v3639_v8 }
 0x300   : > { %v4604_v14 = vmul.f32 %v11015_v60, %v4352_v41  ;;  %v3923_v15 = vmul.f32 %v11146_v29, %v3818_v11  ;;  %4535 = vperm.xlu0 %9569, %v4409_v3   ;;  %v3533_v61 = vld [vmem:[#allocation3 + $0xa8] sm:$0xff] }
 0x301   : > { %v4015_v22 = vsub.f32 1.5, %v4014_v7  ;;  %3224 = vst.msk [vmem:[#allocation3 + $0xb0] sm:$0xff] %vm527_vm2, %v3188_v47  ;;  %v3569_v16 = vadd.f32 %v3533_v61, %v11183_v21  ;;  %v4684_v24 = vld [vmem:[#allocation2 + $0x10] sm:$0xff] }
 0x302   : > { %v4990_v63 = vld [vmem:[#allocation2 + $0x11] sm:$0xff]  ;;  %v9582_v44 = vpop.eup %9581  ;;  %4647 = vst.msk [vmem:[#allocation2 + $0x1b] sm:$0xff] %vm527_vm2, %v4604_v14  ;;  %v11252_v60 = vadd.f32 1e-08, %v3923_v15  ;;  %9221 = vmatmul.msk.f32.gmra.mxu1 %vm527_vm2, %v4684_v24 }
 0x303   : > { %v5369_v35 = vld [vmem:[#allocation2 + $0x12] sm:$0xff]  ;;  %9258 = vmatmul.msk.f32.gmra.mxu2 %vm527_vm2, %v4990_v63  ;;  %v4016_v49 = vmul.f32 %v9580_v12, %v4015_v22  ;;  %v4022_v13 = vmul.f32 %v9582_v44, %v11234_v0  ;;  %3605 = vst.msk [vmem:[#allocation3 + $0xa8] sm:$0xff] %vm527_vm2, %v3569_v16  ;;  %v3715_v22 = vmul.f32 0.2, %v3679_v10  ;;  %vm4028_vm14 = vweird.f32 %v9582_v44  ;;  %v4407_v0 = vld [vmem:[%s12974_s5 + $0xa0] sm:$0xff] }
 0x304   : > { %9295 = vmatmul.msk.f32.gmra.mxu3 %vm527_vm2, %v5369_v35  ;;  %9330 = vmatmul.msk.f32.vlgmr.msrb.gmra.mxu0 %vm527_vm2, %v5369_v35  ;;  %9583 = vrsqrt.f32 %v11252_v60  ;;  %v2712_v21 = vpop.f32.mrf.mxu2  ;;  %vm4029_vm0 = vmor %vm4027_vm15, %vm4028_vm14  ;;  %vm4037_vm3 = vweird.f32 %v11252_v60 }
 0x305   : > { %v3094_v52 = vpop.f32.mrf.mxu3  ;;  %v4020_v55 = vsel %vm4019_vm13, %v9580_v12, %v4016_v49  ;;  %v4023_v51 = vmul.f32 %v9582_v44, %v4022_v13  ;;  %v2808_v3 = vadd.f32 %v2772_v40, %v2712_v21  ;;  %v2773_v13 = vld [vmem:[#allocation3 + $0xc8] sm:$0xff] }
 0x306   : > { %v4353_v41 = vmul.f32 %v4020_v55, %v10868_v25  ;;  %v3153_v42 = vld [vmem:[#allocation3 + $0xb8] sm:$0xff]  ;;  %v11275_v63 = vpop.f32.mrf.mxu0 }
 0x307   : > { %v4024_v7 = vmul.f32 0.5, %v4023_v51  ;;  %2844 = vst.msk [vmem:[#allocation3 + $0xc0] sm:$0xff] %vm527_vm2, %v2808_v3  ;;  %v3189_v47 = vadd.f32 %v3153_v42, %v3091_v31  ;;  %v3821_v11 = vpop.xlane.xlu1 %3820  ;;  %v11292_v3 = vmax.f32 %v3679_v10, %v3715_v22 }
 0x308   : > { %v4605_v14 = vmul.f32 %v11071_v54, %v4353_v41  ;;  %v3924_v15 = vmul.f32 %v11146_v29, %v3821_v11  ;;  %v3534_v61 = vld [vmem:[#allocation3 + $0xb0] sm:$0xff] }
 0x309   : > { %v4025_v16 = vsub.f32 1.5, %v4024_v7  ;;  %3225 = vst.msk [vmem:[#allocation3 + $0xb8] sm:$0xff] %vm527_vm2, %v3189_v47  ;;  %v3570_v12 = vadd.f32 %v3534_v61, %v11207_v33  ;;  %v4685_v8 = vld [vmem:[#allocation2 + $0x18] sm:$0xff] }
 0x30a   : > { %v4991_v25 = vld [vmem:[#allocation2 + $0x19] sm:$0xff]  ;;  %v9584_v35 = vpop.eup %9583  ;;  %4648 = vst.msk [vmem:[#allocation2 + $0x23] sm:$0xff] %vm527_vm2, %v4605_v14  ;;  %v11278_v31 = vadd.f32 1e-08, %v3924_v15  ;;  %9222 = vmatmul.msk.f32.gmra.mxu1 %vm527_vm2, %v4685_v8 }
 0x30b   : > { %v5370_v24 = vld [vmem:[#allocation2 + $0x1a] sm:$0xff]  ;;  %9259 = vmatmul.msk.f32.gmra.mxu2 %vm527_vm2, %v4991_v25  ;;  %v4026_v54 = vmul.f32 %v9582_v44, %v4025_v16  ;;  %v4032_v49 = vmul.f32 %v9584_v35, %v11252_v60  ;;  %3606 = vst.msk [vmem:[#allocation3 + $0xb0] sm:$0xff] %vm527_vm2, %v3570_v12  ;;  %vm4038_vm1 = vweird.f32 %v9584_v35  ;;  %v3787_v12 = vmul.f32 %v11292_v3, %v11292_v3 }
 0x30c   : > { %9296 = vmatmul.msk.f32.gmra.mxu3 %vm527_vm2, %v5370_v24  ;;  %9331 = vmatmul.msk.f32.gmra.mxu0 %vm527_vm2, %v5370_v24  ;;  %9585 = vrsqrt.f32 %v11278_v31  ;;  %v2715_v33 = vpop.f32.mrf.mxu2  ;;  %vm4039_vm4 = vmor %vm4037_vm3, %vm4038_vm1  ;;  %vm4047_vm6 = vweird.f32 %v11278_v31 }
 0x30d   : > { %v3097_v21 = vpop.f32.mrf.mxu3  ;;  %v4030_v40 = vsel %vm4029_vm0, %v9582_v44, %v4026_v54  ;;  %v4033_v55 = vmul.f32 %v9584_v35, %v4032_v49  ;;  %v2809_v51 = vadd.f32 %v2773_v13, %v2715_v33  ;;  %v2774_v54 = vld [vmem:[#allocation3 + $0xd0] sm:$0xff] }
 0x30e   : > { %v4354_v41 = vmul.f32 %v4030_v40, %v10886_v53  ;;  %v3154_v42 = vld [vmem:[#allocation3 + $0xc0] sm:$0xff]  ;;  %v11312_v25 = vpop.f32.mrf.mxu0  ;;  %v3861_v40 = vsel %vm527_vm2, %v3787_v12, 0.0 }
 0x30f   : > { %v4034_v7 = vmul.f32 0.5, %v4033_v55  ;;  %2845 = vst.msk [vmem:[#allocation3 + $0xc8] sm:$0xff] %vm527_vm2, %v2809_v51  ;;  %v3190_v47 = vadd.f32 %v3154_v42, %v3094_v52  ;;  %v3824_v11 = vpop.xlane.xlu1 %3823 }
 0x310   : > { %v4606_v14 = vmul.f32 %v10998_v43, %v4354_v41  ;;  %v3925_v44 = vmul.f32 %v11146_v29, %v3824_v11  ;;  %v3535_v15 = vld [vmem:[#allocation3 + $0xb8] sm:$0xff]  ;;  %4525 = vperm.xlu1 %9570, %v4407_v0  }
 0x311   : > { %v4035_v61 = vsub.f32 1.5, %v4034_v7  ;;  %3226 = vst.msk [vmem:[#allocation3 + $0xc0] sm:$0xff] %vm527_vm2, %v3190_v47  ;;  %v3571_v10 = vadd.f32 %v3535_v15, %v11229_v34  ;;  %v4686_v22 = vld [vmem:[#allocation2 + $0x20] sm:$0xff]  ;;  %v3638_v7 = vld [vmem:[#allocation3 + $0x90] sm:$0xff] }
 0x312   : > { %v4992_v53 = vld [vmem:[#allocation2 + $0x21] sm:$0xff]  ;;  %v9586_v52 = vpop.eup %9585  ;;  %4649 = vst.msk [vmem:[#allocation2 + $0x2b] sm:$0xff] %vm527_vm2, %v4606_v14  ;;  %v11303_v43 = vadd.f32 1e-08, %v3925_v44  ;;  %9223 = vmatmul.msk.f32.gmra.mxu1 %vm527_vm2, %v4686_v22 }
 0x313   : > { %v5371_v16 = vld [vmem:[#allocation2 + $0x22] sm:$0xff]  ;;  %9260 = vmatmul.msk.f32.gmra.mxu2 %vm527_vm2, %v4992_v53  ;;  %v4036_v8 = vmul.f32 %v9584_v35, %v4035_v61  ;;  %v4042_v34 = vmul.f32 %v9586_v52, %v11278_v31  ;;  %3607 = vst.msk [vmem:[#allocation3 + $0xb8] sm:$0xff] %vm527_vm2, %v3571_v10  ;;  %vm4048_vm5 = vweird.f32 %v9586_v52 }
 0x314   : > { %9297 = vmatmul.msk.f32.gmra.mxu3 %vm527_vm2, %v5371_v16  ;;  %9332 = vmatmul.msk.f32.gmra.mxu0 %vm527_vm2, %v5371_v16  ;;  %9587 = vrsqrt.f32 %v11303_v43  ;;  %v2718_v24 = vpop.f32.mrf.mxu2  ;;  %vm4049_vm7 = vmor %vm4047_vm6, %vm4048_vm5  ;;  %v2775_v16 = vld [vmem:[#allocation3 + $0xd8] sm:$0xff]  ;;  %vm4057_vm9 = vweird.f32 %v11303_v43 }
 0x315   : > { %v3100_v49 = vpop.f32.mrf.mxu3  ;;  %v4040_v33 = vsel %vm4039_vm4, %v9584_v35, %v4036_v8  ;;  %v4043_v13 = vmul.f32 %v9586_v52, %v4042_v34  ;;  %v2810_v60 = vadd.f32 %v2774_v54, %v2718_v24 }
 0x316   : > { %v4355_v55 = vmul.f32 %v4040_v33, %v10904_v2  ;;  %v3155_v51 = vld [vmem:[#allocation3 + $0xc8] sm:$0xff]  ;;  %3862 = vadd.xlane.f32.xlu2 %v3861_v40  ;;  %v11336_v54 = vpop.f32.mrf.mxu0 }
 0x317   : > { %v4044_v0 = vmul.f32 0.5, %v4043_v13  ;;  %2846 = vst.msk [vmem:[#allocation3 + $0xd0] sm:$0xff] %vm527_vm2, %v2810_v60  ;;  %v3191_v41 = vadd.f32 %v3155_v51, %v3097_v21  ;;  %v3827_v42 = vpop.xlane.xlu0 %3826  ;;  %v3640_v60 = vld [vmem:[#allocation3 + $0xa0] sm:$0xff] }
 0x318   : > { %v4607_v47 = vmul.f32 %v11024_v59, %v4355_v55  ;;  %v3926_v11 = vmul.f32 %v11146_v29, %v3827_v42  ;;  %v3536_v14 = vld [vmem:[#allocation3 + $0xc0] sm:$0xff]  ;;  %v3678_v59 = vadd.f32 %v11266_v6, %v3638_v7 }
 0x319   : > { %v4045_v35 = vsub.f32 1.5, %v4044_v0  ;;  %3227 = vst.msk [vmem:[#allocation3 + $0xc8] sm:$0xff] %vm527_vm2, %v3191_v41  ;;  %v3572_v44 = vadd.f32 %v3536_v14, %v11247_v36  ;;  %v4687_v2 = vld [vmem:[#allocation2 + $0x28] sm:$0xff] }
 0x31a   : > { %v4993_v15 = vld [vmem:[#allocation2 + $0x29] sm:$0xff]  ;;  %v9588_v10 = vpop.eup %9587  ;;  %4650 = vst.msk [vmem:[#allocation2 + $0x33] sm:$0xff] %vm527_vm2, %v4607_v47  ;;  %v11324_v21 = vadd.f32 1e-08, %v3926_v11  ;;  %9224 = vmatmul.msk.f32.gmra.mxu1 %vm527_vm2, %v4687_v2  ;;  %v3714_v13 = vmul.f32 0.2, %v3678_v59 }
 0x31b   : > { %v5372_v61 = vld [vmem:[#allocation2 + $0x2a] sm:$0xff]  ;;  %9261 = vmatmul.msk.f32.gmra.mxu2 %vm527_vm2, %v4993_v15  ;;  %v4046_v22 = vmul.f32 %v9586_v52, %v4045_v35  ;;  %v4052_v53 = vmul.f32 %v9588_v10, %v11303_v43  ;;  %3608 = vst.msk [vmem:[#allocation3 + $0xc0] sm:$0xff] %vm527_vm2, %v3572_v44  ;;  %vm4058_vm8 = vweird.f32 %v9588_v10 }
 0x31c   : > { %9298 = vmatmul.msk.f32.gmra.mxu3 %vm527_vm2, %v5372_v61  ;;  %9333 = vmatmul.msk.f32.gmra.mxu0 %vm527_vm2, %v5372_v61  ;;  %9589 = vrsqrt.f32 %v11324_v21  ;;  %v2721_v36 = vpop.f32.mrf.mxu2  ;;  %vm4059_vm10 = vmor %vm4057_vm9, %vm4058_vm8  ;;  %v2776_v44 = vld [vmem:[#allocation3 + $0xe0] sm:$0xff]  ;;  %vm4067_vm12 = vweird.f32 %v11324_v21 }
 0x31d   : > { %v3103_v12 = vpop.f32.mrf.mxu3  ;;  %v4050_v8 = vsel %vm4049_vm7, %v9586_v52, %v4046_v22  ;;  %v4053_v34 = vmul.f32 %v9588_v10, %v4052_v53  ;;  %v2811_v24 = vadd.f32 %v2775_v16, %v2721_v36 }
 0x31e   : > { %v4356_v31 = vmul.f32 %v4050_v8, %v10922_v27  ;;  %v3156_v33 = vld [vmem:[#allocation3 + $0xd0] sm:$0xff]  ;;  %v3680_v27 = vadd.f32 %v11266_v6, %v3640_v60 }
 0x31f   : > { %v4054_v40 = vmul.f32 0.5, %v4053_v34  ;;  %2847 = vst.msk [vmem:[#allocation3 + $0xd8] sm:$0xff] %vm527_vm2, %v2811_v24  ;;  %v3192_v55 = vadd.f32 %v3156_v33, %v3100_v49  ;;  %v11364_v33 = vpop.f32.mrf.mxu0 }
 0x320   : > { %v4608_v51 = vmul.f32 %v11112_v39, %v4356_v31  ;;  %v3537_v0 = vld [vmem:[#allocation3 + $0xc8] sm:$0xff]  ;;  %v11349_v39 = vmax.f32 %v3678_v59, %v3714_v13  ;;  %v3716_v22 = vmul.f32 0.2, %v3680_v27 }
 0x321   : > { %v4055_v41 = vsub.f32 1.5, %v4054_v40  ;;  %3228 = vst.msk [vmem:[#allocation3 + $0xd0] sm:$0xff] %vm527_vm2, %v3192_v55  ;;  %v3573_v52 = vadd.f32 %v3537_v0, %v11275_v63  ;;  %v4688_v42 = vld [vmem:[#allocation2 + $0x30] sm:$0xff] }
 0x322   : > { %v4994_v7 = vld [vmem:[#allocation2 + $0x31] sm:$0xff]  ;;  %v11344_v11 = vpop.eup %9589  ;;  %4651 = vst.msk [vmem:[#allocation2 + $0x3b] sm:$0xff] %vm527_vm2, %v4608_v51  ;;  %9225 = vmatmul.msk.f32.gmra.mxu1 %vm527_vm2, %v4688_v42  ;;  %v3644_v49 = vld [vmem:[#allocation3 + $0xc0] sm:$0xff]  ;;  %v3786_v31 = vmul.f32 %v11349_v39, %v11349_v39  ;;  %v11373_v42 = vmax.f32 %v3680_v27, %v3716_v22 }
 0x323   : > { %v5373_v47 = vld [vmem:[#allocation2 + $0x32] sm:$0xff]  ;;  %9262 = vmatmul.msk.f32.gmra.mxu2 %vm527_vm2, %v4994_v7  ;;  %v4056_v14 = vmul.f32 %v9588_v10, %v4055_v41  ;;  %v4062_v63 = vmul.f32 %v11344_v11, %v11324_v21  ;;  %3609 = vst.msk [vmem:[#allocation3 + $0xc8] sm:$0xff] %vm527_vm2, %v3573_v52  ;;  %v3684_v2 = vadd.f32 %v11266_v6, %v3644_v49  ;;  %vm4068_vm11 = vweird.f32 %v11344_v11 }
 0x324   : > { %9299 = vmatmul.msk.f32.gmra.mxu3 %vm527_vm2, %v5373_v47  ;;  %9334 = vmatmul.msk.f32.gmra.mxu0 %vm527_vm2, %v5373_v47  ;;  %v2724_v35 = vpop.f32.mrf.mxu2  ;;  %v3641_v13 = vld [vmem:[#allocation3 + $0xa8] sm:$0xff]  ;;  %v3858_v27 = vsel %vm527_vm2, %v3786_v31, 0.0  ;;  %vm4069_vm13 = vmor %vm4067_vm12, %vm4068_vm11 }
 0x325   : > { %v3106_v15 = vpop.f32.mrf.mxu3  ;;  %v4060_v61 = vsel %vm4059_vm10, %v9588_v10, %v4056_v14  ;;  %v4063_v59 = vmul.f32 %v11344_v11, %v4062_v63  ;;  %v2812_v43 = vadd.f32 %v2776_v44, %v2724_v35  ;;  %v3720_v16 = vmul.f32 0.2, %v3684_v2  ;;  %v2777_v63 = vld [vmem:[#allocation3 + $0xe8] sm:$0xff] }
 0x326   : > { %v4357_v53 = vmul.f32 %v4060_v61, %v10940_v48  ;;  %v3157_v36 = vld [vmem:[#allocation3 + $0xd8] sm:$0xff]  ;;  %v3642_v48 = vld [vmem:[#allocation3 + $0xb0] sm:$0xff]  ;;  %v3681_v47 = vadd.f32 %v11266_v6, %v3641_v13 }
 0x327   : > { %v4064_v8 = vmul.f32 0.5, %v4063_v59  ;;  %2848 = vst.msk [vmem:[#allocation3 + $0xe0] sm:$0xff] %vm527_vm2, %v2812_v43  ;;  %v3193_v34 = vadd.f32 %v3157_v36, %v3103_v12  ;;  %v3833_v24 = vpop.xlane.xlu0 %3832  ;;  %v11368_v55 = vmax.f32 %v3684_v2, %v3720_v16  ;;  %v3682_v49 = vadd.f32 %v11266_v6, %v3642_v48  ;;  %v3643_v16 = vld [vmem:[#allocation3 + $0xb8] sm:$0xff] }
 0x328   : > { %v4609_v10 = vmul.f32 %v11044_v30, %v4357_v53  ;;  %v3928_v60 = vmul.f32 %v11146_v29, %v3833_v24  ;;  %v3538_v40 = vld [vmem:[#allocation3 + $0xd0] sm:$0xff]  ;;  %v3788_v43 = vmul.f32 %v11373_v42, %v11373_v42  ;;  %v3717_v22 = vmul.f32 0.2, %v3681_v47 }
 0x329   : > { %v4065_v51 = vsub.f32 1.5, %v4064_v8  ;;  %3229 = vst.msk [vmem:[#allocation3 + $0xd8] sm:$0xff] %vm527_vm2, %v3193_v34  ;;  %v3574_v12 = vadd.f32 %v3538_v40, %v11312_v25  ;;  %v4689_v0 = vld [vmem:[#allocation2 + $0x38] sm:$0xff]  ;;  %v3792_v7 = vmul.f32 %v11368_v55, %v11368_v55  ;;  %v3718_v36 = vmul.f32 0.2, %v3682_v49 }
 0x32a   : > { %v4995_v41 = vld [vmem:[#allocation2 + $0x39] sm:$0xff]  ;;  %4652 = vst.msk [vmem:[#allocation2 + $0x43] sm:$0xff] %vm527_vm2, %v4609_v10  ;;  %v11376_v30 = vadd.f32 1e-08, %v3928_v60  ;;  %9226 = vmatmul.msk.f32.gmra.mxu1 %vm527_vm2, %v4689_v0  ;;  %3859 = vadd.xlane.f32.xlu0 %v3858_v27  ;;  %v3645_v24 = vld [vmem:[#allocation3 + $0xc8] sm:$0xff]  ;;  %v11402_v10 = vpop.f32.mrf.mxu0  ;;  %v3683_v40 = vadd.f32 %v11266_v6, %v3643_v16 }
 0x32b   : > { %v5374_v52 = vld [vmem:[#allocation2 + $0x3a] sm:$0xff]  ;;  %9263 = vmatmul.msk.f32.gmra.mxu2 %vm527_vm2, %v4995_v41  ;;  %v4066_v25 = vmul.f32 %v11344_v11, %v4065_v51  ;;  %3610 = vst.msk [vmem:[#allocation3 + $0xd0] sm:$0xff] %vm527_vm2, %v3574_v12  ;;  %v3876_v21 = vsel %vm527_vm2, %v3792_v7, 0.0  ;;  %v11415_v48 = vmax.f32 %v3682_v49, %v3718_v36  ;;  %v3685_v51 = vadd.f32 %v11266_v6, %v3645_v24 }
 0x32c   : > { %9300 = vmatmul.msk.f32.gmra.mxu3 %vm527_vm2, %v5374_v52  ;;  %9335 = vmatmul.msk.f32.gmra.mxu0 %vm527_vm2, %v5374_v52  ;;  %9591 = vrsqrt.f32 %v11376_v30  ;;  %v2727_v14 = vpop.f32.mrf.mxu2  ;;  %v2778_v0 = vld [vmem:[#allocation3 + $0xf0] sm:$0xff]  ;;  %v3719_v27 = vmul.f32 0.2, %v3683_v40  ;;  %vm4087_vm15 = vweird.f32 %v11376_v30 }
 0x32d   : > { %v3109_v35 = vpop.f32.mrf.mxu3  ;;  %v4070_v44 = vsel %vm4069_vm13, %v11344_v11, %v4066_v25  ;;  %v2813_v2 = vadd.f32 %v2777_v63, %v2727_v14  ;;  %3877 = vadd.xlane.f32.xlu2 %v3876_v21  ;;  %v3790_v49 = vmul.f32 %v11415_v48, %v11415_v48 }
 0x32e   : > { %v4358_v61 = vmul.f32 %v4070_v44, %v10958_v4  ;;  %v3158_v59 = vld [vmem:[#allocation3 + $0xe0] sm:$0xff]  ;;  %v3721_v44 = vmul.f32 0.2, %v3685_v51 }
 0x32f   : > { %2849 = vst.msk [vmem:[#allocation3 + $0xe8] sm:$0xff] %vm527_vm2, %v2813_v2  ;;  %v3194_v53 = vadd.f32 %v3158_v59, %v3106_v15  ;;  %v11408_v15 = vmax.f32 %v3681_v47, %v3717_v22  ;;  %v11423_v2 = vpop.permute.xlu2 %4515 }
 0x330   : > { %v4610_v8 = vmul.f32 %v11055_v38, %v4358_v61  ;;  %v3539_v34 = vld [vmem:[#allocation3 + $0xd8] sm:$0xff]  ;;  %v3864_v38 = vsel %vm527_vm2, %v3788_v43, 0.0 }
 0x331   : > { %3230 = vst.msk [vmem:[#allocation3 + $0xe0] sm:$0xff] %vm527_vm2, %v3194_v53  ;;  %v3575_v11 = vadd.f32 %v3539_v34, %v11336_v54  ;;  %v4690_v31 = vld [vmem:[#allocation2 + $0x40] sm:$0xff]  ;;  %v3789_v25 = vmul.f32 %v11408_v15, %v11408_v15  ;;  %v11433_v34 = vmax.f32 %v3683_v40, %v3719_v27 }
 0x332   : > { %v4996_v4 = vld [vmem:[#allocation2 + $0x41] sm:$0xff]  ;;  %v9592_v60 = vpop.eup %9591  ;;  %4653 = vst.msk [vmem:[#allocation2 + $0x4b] sm:$0xff] %vm527_vm2, %v4610_v8  ;;  %9227 = vmatmul.msk.f32.gmra.mxu1 %vm527_vm2, %v4690_v31  ;;  %3865 = vadd.xlane.f32.xlu0 %v3864_v38  ;;  %v3494_v31 = vpop.f32.mrf.mxu0 }
 0x333   : > { %v5375_v13 = vld [vmem:[#allocation2 + $0x42] sm:$0xff]  ;;  %9264 = vmatmul.msk.f32.gmra.mxu2 %vm527_vm2, %v4996_v4  ;;  %v4082_v54 = vmul.f32 %v9592_v60, %v11376_v30  ;;  %3611 = vst.msk [vmem:[#allocation3 + $0xd8] sm:$0xff] %vm527_vm2, %v3575_v11  ;;  %vm4088_vm14 = vweird.f32 %v9592_v60  ;;  %v3867_v8 = vsel %vm527_vm2, %v3789_v25, 0.0  ;;  %v11440_v11 = vmax.f32 %v3685_v51, %v3721_v44 }
 0x334   : > { %9301 = vmatmul.msk.f32.gmra.mxu3 %vm527_vm2, %v5375_v13  ;;  %9336 = vmatmul.msk.f32.gmra.mxu0 %vm527_vm2, %v5375_v13  ;;  %v2730_v12 = vpop.f32.mrf.mxu2  ;;  %vm4089_vm0 = vmor %vm4087_vm15, %vm4088_vm14  ;;  %v2779_v13 = vld [vmem:[#allocation3 + $0xf8] sm:$0xff]  ;;  %v3791_v51 = vmul.f32 %v11433_v34, %v11433_v34  ;;  %v2780_v44 = vld [vmem:[#allocation3 + $0x100] sm:$0xff] }
 0x335   : > { %v3112_v41 = vpop.f32.mrf.mxu3  ;;  %v4083_v52 = vmul.f32 %v9592_v60, %v4082_v54  ;;  %v2814_v7 = vadd.f32 %v2778_v0, %v2730_v12 }
 0x336   : > { %v3159_v47 = vld [vmem:[#allocation3 + $0xe8] sm:$0xff] }
 0x337   : > { %v4084_v14 = vmul.f32 0.5, %v4083_v52  ;;  %2850 = vst.msk [vmem:[#allocation3 + $0xf0] sm:$0xff] %vm527_vm2, %v2814_v7  ;;  %v3195_v63 = vadd.f32 %v3159_v47, %v3109_v35  ;;  %v3839_v21 = vpop.xlane.xlu0 %3838  ;;  %v3793_v52 = vmul.f32 %v11440_v11, %v11440_v11 }
 0x338   : > { %v3930_v61 = vmul.f32 %v11146_v29, %v3839_v21  ;;  %v3540_v59 = vld [vmem:[#allocation3 + $0xe0] sm:$0xff] }
 0x339   : > { %v4085_v43 = vsub.f32 1.5, %v4084_v14  ;;  %3231 = vst.msk [vmem:[#allocation3 + $0xe8] sm:$0xff] %vm527_vm2, %v3195_v63  ;;  %v3576_v22 = vadd.f32 %v3540_v59, %v11364_v33  ;;  %v4691_v53 = vld [vmem:[#allocation2 + $0x48] sm:$0xff]  ;;  %v3870_v33 = vsel %vm527_vm2, %v3790_v49, 0.0  ;;  %v3879_v21 = vsel %vm527_vm2, %v3793_v52, 0.0 }
 0x33a   : > { %v4997_v36 = vld [vmem:[#allocation2 + $0x49] sm:$0xff]  ;;  %v11428_v35 = vadd.f32 1e-08, %v3930_v61  ;;  %9228 = vmatmul.msk.f32.gmra.mxu1 %vm527_vm2, %v4691_v53  ;;  %3871 = vadd.xlane.f32.xlu0 %v3870_v33 }
 0x33b   : > { %v5376_v16 = vld [vmem:[#allocation2 + $0x4a] sm:$0xff]  ;;  %9265 = vmatmul.msk.f32.gmra.mxu2 %vm527_vm2, %v4997_v36  ;;  %v4086_v24 = vmul.f32 %v9592_v60, %v4085_v43  ;;  %3612 = vst.msk [vmem:[#allocation3 + $0xe0] sm:$0xff] %vm527_vm2, %v3576_v22  ;;  %3868 = vadd.xlane.f32.xlu1 %v3867_v8  ;;  %v4844_v22 = vpop.f32.mrf.mxu1  ;;  %v3497_v36 = vpop.f32.mrf.mxu0 }
 0x33c   : > { %9302 = vmatmul.msk.f32.gmra.mxu3 %vm527_vm2, %v5376_v16  ;;  %9337 = vmatmul.msk.f32.gmra.mxu0 %vm527_vm2, %v5376_v16  ;;  %9593 = vrsqrt.f32 %v11428_v35  ;;  %v2733_v4 = vpop.f32.mrf.mxu2  ;;  %4952 = vst.msk [vmem:[#allocation3] sm:$0xff] %vm527_vm2, %v4844_v22  ;;  %vm4107_vm3 = vweird.f32 %v11428_v35 }
 0x33d   : > { %v3115_v30 = vpop.f32.mrf.mxu3  ;;  %v4090_v38 = vsel %vm4089_vm0, %v9592_v60, %v4086_v24  ;;  %v2815_v40 = vadd.f32 %v2779_v13, %v2733_v4 }
 0x33e   : > { %v4360_v54 = vmul.f32 %v4090_v38, %v10993_v32  ;;  %v3160_v12 = vld [vmem:[#allocation3 + $0xf0] sm:$0xff] }
 0x33f   : > { %2851 = vst.msk [vmem:[#allocation3 + $0xf8] sm:$0xff] %vm527_vm2, %v2815_v40  ;;  %v3196_v0 = vadd.f32 %v3160_v12, %v3112_v41  ;;  %v4410_v41 = vld [vmem:[%s12974_s5 + $0xb8] sm:$0xff]  ;;  %v11473_v12 = vpop.permute.xlu1 %4510 }
 0x340   : > { %v4612_v7 = vmul.f32 %v11143_v17, %v4360_v54  ;;  %v3830_v47 = vpop.xlane.xlu2 %3829  ;;  %v3541_v25 = vld [vmem:[#allocation3 + $0xe8] sm:$0xff]  ;;  %v3873_v17 = vsel %vm527_vm2, %v3791_v51, 0.0 }
 0x341   : > { %3232 = vst.msk [vmem:[#allocation3 + $0xf0] sm:$0xff] %vm527_vm2, %v3196_v0  ;;  %v3927_v60 = vmul.f32 %v11146_v29, %v3830_v47  ;;  %v3577_v32 = vadd.f32 %v3541_v25, %v11402_v10  ;;  %v9366_v10 = vld [vmem:[%s12972_s3 + $0x20] sm:$0xff]  ;;  %v2781_v25 = vld [vmem:[#allocation3 + $0x108] sm:$0xff] }
 0x342   : > { %v9594_v27 = vpop.eup %9593  ;;  %4655 = vst.msk [vmem:[#allocation2 + $0x5b] sm:$0xff] %vm527_vm2, %v4612_v7  ;;  %3874 = vadd.xlane.f32.xlu0 %v3873_v17  ;;  %6286 = vmatpush.msrb.mxu1 %v9366_v10 }
 0x343   : > { %v4102_v14 = vmul.f32 %v9594_v27, %v11428_v35  ;;  %v11459_v63 = vadd.f32 1e-08, %v3927_v60  ;;  %3613 = vst.msk [vmem:[#allocation3 + $0xe8] sm:$0xff] %vm527_vm2, %v3577_v32  ;;  %3880 = vadd.xlane.f32.xlu1 %v3879_v21  ;;  %vm4108_vm1 = vweird.f32 %v9594_v27  ;;  %v4847_v32 = vpop.f32.mrf.mxu1 }
 0x344   : > { %v2736_v49 = vpop.f32.mrf.mxu2  ;;  %vm4109_vm4 = vmor %vm4107_vm3, %vm4108_vm1  ;;  %4953 = vst.msk [vmem:[#allocation3 + $0x8] sm:$0xff] %vm527_vm2, %v4847_v32 }
 0x345   : > { %v3118_v61 = vpop.f32.mrf.mxu3  ;;  %v4103_v59 = vmul.f32 %v9594_v27, %v4102_v14  ;;  %9595 = vrsqrt.f32 %v11459_v63  ;;  %v2816_v43 = vadd.f32 %v2780_v44, %v2736_v49  ;;  %4540 = vperm.xlu2 %9568, %v4410_v41   ;;  %vm4077_vm6 = vweird.f32 %v11459_v63 }
 0x346   : > { %v3161_v53 = vld [vmem:[#allocation3 + $0xf8] sm:$0xff] }
 0x347   : > { %v4104_v16 = vmul.f32 0.5, %v4103_v59  ;;  %2852 = vst.msk [vmem:[#allocation3 + $0x100] sm:$0xff] %vm527_vm2, %v2816_v43  ;;  %v3197_v8 = vadd.f32 %v3161_v53, %v3115_v30  ;;  %v3845_v24 = vpop.xlane.xlu0 %3844  ;;  %v3500_v59 = vpop.f32.mrf.mxu0 }
 0x348   : > { %v3932_v33 = vmul.f32 %v11146_v29, %v3845_v24  ;;  %v3842_v4 = vpop.xlane.xlu2 %3841  ;;  %v3542_v13 = vld [vmem:[#allocation3 + $0xf0] sm:$0xff] }
 0x349   : > { %v4105_v38 = vsub.f32 1.5, %v4104_v16  ;;  %3233 = vst.msk [vmem:[#allocation3 + $0xf8] sm:$0xff] %vm527_vm2, %v3197_v8  ;;  %v3931_v40 = vmul.f32 %v11146_v29, %v3842_v4  ;;  %v3578_v54 = vadd.f32 %v3542_v13, %v3494_v31  ;;  %v2782_v24 = vld [vmem:[#allocation3 + $0x110] sm:$0xff] }
 0x34a   : > { %v11475_v0 = vadd.f32 1e-08, %v3932_v33 }
 0x34b   : > { %v9596_v51 = vpop.eup %9595  ;;  %v4106_v52 = vmul.f32 %v9594_v27, %v4105_v38  ;;  %v11478_v30 = vadd.f32 1e-08, %v3931_v40  ;;  %3614 = vst.msk [vmem:[#allocation3 + $0xf0] sm:$0xff] %vm527_vm2, %v3578_v54  ;;  %v4412_v38 = vld [vmem:[%s12974_s5 + $0xc8] sm:$0xff] }
 0x34c   : > { %v4072_v7 = vmul.f32 %v9596_v51, %v11459_v63  ;;  %9597 = vrsqrt.f32 %v11475_v0  ;;  %v2739_v47 = vpop.f32.mrf.mxu2  ;;  %vm4078_vm5 = vweird.f32 %v9596_v51  ;;  %vm4127_vm10 = vweird.f32 %v11475_v0 }
 0x34d   : > { %v4110_v31 = vsel %vm4109_vm4, %v9594_v27, %v4106_v52  ;;  %9599 = vrsqrt.f32 %v11478_v30  ;;  %v2817_v60 = vadd.f32 %v2781_v25, %v2739_v47  ;;  %v3121_v17 = vpop.f32.mrf.mxu3  ;;  %vm4079_vm7 = vmor %vm4077_vm6, %vm4078_vm5  ;;  %vm4117_vm12 = vweird.f32 %v11478_v30 }
 0x34e   : > { %v4362_v41 = vmul.f32 %v4110_v31, %v11033_v19  ;;  %v4073_v14 = vmul.f32 %v9596_v51, %v4072_v7  ;;  %v3162_v35 = vld [vmem:[#allocation3 + $0x100] sm:$0xff] }
 0x34f   : > { %2853 = vst.msk [vmem:[#allocation3 + $0x108] sm:$0xff] %vm527_vm2, %v2817_v60  ;;  %v3198_v21 = vadd.f32 %v3162_v35, %v3118_v61 }
 0x350   : > { %v4614_v10 = vmul.f32 %v11130_v5, %v4362_v41  ;;  %v4074_v49 = vmul.f32 0.5, %v4073_v14  ;;  %v3543_v44 = vld [vmem:[#allocation3 + $0xf8] sm:$0xff] }
 0x351   : > { %3234 = vst.msk [vmem:[#allocation3 + $0x100] sm:$0xff] %vm527_vm2, %v3198_v21  ;;  %v3579_v27 = vadd.f32 %v3543_v44, %v3497_v36  ;;  %v3503_v44 = vpop.f32.mrf.mxu0 }
 0x352   : > { %v11489_v43 = vpop.eup %9597  ;;  %4657 = vst.msk [vmem:[#allocation2 + $0x6b] sm:$0xff] %vm527_vm2, %v4614_v10  ;;  %v4075_v19 = vsub.f32 1.5, %v4074_v49  ;;  %v3836_v22 = vpop.xlane.xlu1 %3835  ;;  %v4411_v49 = vld [vmem:[%s12974_s5 + $0xc0] sm:$0xff] }
 0x353   : > { %v11492_v53 = vpop.eup %9599  ;;  %v4122_v61 = vmul.f32 %v11489_v43, %v11475_v0  ;;  %3615 = vst.msk [vmem:[#allocation3 + $0xf8] sm:$0xff] %vm527_vm2, %v3579_v27  ;;  %v3929_v5 = vmul.f32 %v11146_v29, %v3836_v22  ;;  %vm4128_vm8 = vweird.f32 %v11489_v43  ;;  %v2783_v22 = vld [vmem:[#allocation3 + $0x118] sm:$0xff] }
 0x354   : > { %v4076_v16 = vmul.f32 %v9596_v51, %v4075_v19  ;;  %v4112_v36 = vmul.f32 %v11492_v53, %v11478_v30  ;;  %v2742_v8 = vpop.f32.mrf.mxu2  ;;  %vm4118_vm9 = vweird.f32 %v11492_v53  ;;  %vm4129_vm11 = vmor %vm4127_vm10, %vm4128_vm8  ;;  %v4413_v30 = vld [vmem:[%s12974_s5 + $0xd0] sm:$0xff] }
 0x355   : > { %v4123_v33 = vmul.f32 %v11489_v43, %v4122_v61  ;;  %v11502_v4 = vadd.f32 1e-08, %v3929_v5  ;;  %v2818_v13 = vadd.f32 %v2782_v24, %v2742_v8  ;;  %v3124_v41 = vpop.f32.mrf.mxu3  ;;  %vm4119_vm13 = vmor %vm4117_vm12, %vm4118_vm9 }
 0x356   : > { %v4080_v40 = vsel %vm4079_vm7, %v9596_v51, %v4076_v16  ;;  %v4113_v54 = vmul.f32 %v11492_v53, %v4112_v36  ;;  %v3163_v52 = vld [vmem:[#allocation3 + $0x108] sm:$0xff]  ;;  %4550 = vperm.xlu0 %9569, %v4412_v38  }
 0x357   : > { %v4359_v63 = vmul.f32 %v4080_v40, %v11051_v28  ;;  %v4124_v7 = vmul.f32 0.5, %v4123_v33  ;;  %9601 = vrsqrt.f32 %v11502_v4  ;;  %2854 = vst.msk [vmem:[#allocation3 + $0x110] sm:$0xff] %vm527_vm2, %v2818_v13  ;;  %v3851_v47 = vpop.xlane.xlu0 %3850  ;;  %v3199_v31 = vadd.f32 %v3163_v52, %v3121_v17  ;;  %v3647_v28 = vld [vmem:[#allocation3 + $0xd8] sm:$0xff] }
 0x358   : > { %v4114_v25 = vmul.f32 0.5, %v4113_v54  ;;  %v3934_v60 = vmul.f32 %v11146_v29, %v3851_v47  ;;  %v3544_v32 = vld [vmem:[#allocation3 + $0x100] sm:$0xff]  ;;  %v3687_v61 = vadd.f32 %v11266_v6, %v3647_v28  ;;  %vm4097_vm15 = vweird.f32 %v11502_v4 }
 0x359   : > { %v4611_v51 = vmul.f32 %v11092_v20, %v4359_v63  ;;  %v4125_v14 = vsub.f32 1.5, %v4124_v7  ;;  %v3580_v35 = vadd.f32 %v3544_v32, %v3500_v59  ;;  %3235 = vst.msk [vmem:[#allocation3 + $0x108] sm:$0xff] %vm527_vm2, %v3199_v31  ;;  %v5259_v63 = vld [vmem:[#allocation3] sm:$0xff]  ;;  %v3650_v7 = vld [vmem:[#allocation3 + $0xf0] sm:$0xff] }
 0x35a   : > { %v4115_v21 = vsub.f32 1.5, %v4114_v25  ;;  %v11516_v10 = vadd.f32 1e-08, %v3934_v60  ;;  %v3848_v17 = vpop.xlane.xlu1 %3847  ;;  %v3723_v52 = vmul.f32 0.2, %v3687_v61 }
 0x35b   : > { %4654 = vst.msk [vmem:[#allocation2 + $0x53] sm:$0xff] %vm527_vm2, %v4611_v51  ;;  %v4126_v20 = vmul.f32 %v11489_v43, %v4125_v14  ;;  %v3933_v59 = vmul.f32 %v11146_v29, %v3848_v17  ;;  %v3690_v17 = vadd.f32 %v11266_v6, %v3650_v7 }
 0x35c   : > { %v4116_v27 = vmul.f32 %v11492_v53, %v4115_v21  ;;  %9603 = vrsqrt.f32 %v11516_v10  ;;  %3616 = vst.msk [vmem:[#allocation3 + $0x100] sm:$0xff] %vm527_vm2, %v3580_v35  ;;  %v2745_v19 = vpop.f32.mrf.mxu2  ;;  %4545 = vperm.xlu1 %9570, %v4411_v49   ;;  %v3506_v35 = vpop.f32.mrf.mxu0  ;;  %v11564_v21 = vmax.f32 %v3687_v61, %v3723_v52  ;;  %vm4147_vm3 = vweird.f32 %v11516_v10 }
 0x35d   : > { %v11530_v5 = vpop.eup %9601  ;;  %v4130_v16 = vsel %vm4129_vm11, %v11489_v43, %v4126_v20  ;;  %v11535_v0 = vadd.f32 1e-08, %v3933_v59  ;;  %v2819_v36 = vadd.f32 %v2783_v22, %v2745_v19  ;;  %v4414_v59 = vld [vmem:[%s12974_s5 + $0xd8] sm:$0xff] }
 0x35e   : > { %v4364_v8 = vmul.f32 %v4130_v16, %v11095_v26  ;;  %v4120_v24 = vsel %vm4119_vm13, %v11492_v53, %v4116_v27  ;;  %v4092_v33 = vmul.f32 %v11530_v5, %v11502_v4  ;;  %v3164_v13 = vld [vmem:[#allocation3 + $0x110] sm:$0xff]  ;;  %4555 = vperm.xlu0 %9569, %v4413_v30   ;;  %vm4098_vm14 = vweird.f32 %v11530_v5 }
 0x35f   : > { %v4363_v43 = vmul.f32 %v4120_v24, %v11085_v9  ;;  %9605 = vrsqrt.f32 %v11535_v0  ;;  %2855 = vst.msk [vmem:[#allocation3 + $0x118] sm:$0xff] %vm527_vm2, %v2819_v36  ;;  %v3200_v38 = vadd.f32 %v3164_v13, %v3124_v41  ;;  %v3127_v41 = vpop.f32.mrf.mxu3  ;;  %vm4099_vm0 = vmor %vm4097_vm15, %vm4098_vm14  ;;  %v3795_v4 = vmul.f32 %v11564_v21, %v11564_v21 }
 0x360   : > { %v4616_v40 = vmul.f32 %v11200_v56, %v4364_v8  ;;  %v4093_v54 = vmul.f32 %v11530_v5, %v4092_v33  ;;  %v3545_v53 = vld [vmem:[#allocation3 + $0x108] sm:$0xff]  ;;  %v3726_v24 = vmul.f32 0.2, %v3690_v17  ;;  %vm4137_vm6 = vweird.f32 %v11535_v0 }
 0x361   : > { %v4615_v26 = vmul.f32 %v11170_v1, %v4363_v43  ;;  %3236 = vst.msk [vmem:[#allocation3 + $0x110] sm:$0xff] %vm527_vm2, %v3200_v38  ;;  %v3581_v25 = vadd.f32 %v3545_v53, %v3503_v44  ;;  %v5260_v38 = vld [vmem:[#allocation3 + $0x8] sm:$0xff]  ;;  %v3651_v53 = vld [vmem:[#allocation3 + $0xf8] sm:$0xff] }
 0x362   : > { %v11551_v47 = vpop.eup %9603  ;;  %4659 = vst.msk [vmem:[#allocation2 + $0x7b] sm:$0xff] %vm527_vm2, %v4616_v40  ;;  %v4094_v9 = vmul.f32 0.5, %v4093_v54  ;;  %v3854_v31 = vpop.xlane.xlu1 %3853  ;;  %v4692_v60 = vld [vmem:[#allocation2 + $0x50] sm:$0xff]  ;;  %v4693_v54 = vld [vmem:[#allocation2 + $0x58] sm:$0xff] }
 0x363   : > { %v4998_v56 = vld [vmem:[#allocation2 + $0x51] sm:$0xff]  ;;  %4658 = vst.msk [vmem:[#allocation2 + $0x73] sm:$0xff] %vm527_vm2, %v4615_v26  ;;  %v4142_v1 = vmul.f32 %v11551_v47, %v11516_v10  ;;  %v3935_v51 = vmul.f32 %v11146_v29, %v3854_v31  ;;  %9229 = vmatmul.msk.f32.gmra.mxu1 %vm527_vm2, %v4692_v60  ;;  %vm4148_vm1 = vweird.f32 %v11551_v47  ;;  %v4999_v52 = vld [vmem:[#allocation2 + $0x59] sm:$0xff]  ;;  %v11607_v60 = vmax.f32 %v3690_v17, %v3726_v24 }
 0x364   : > { %v5377_v32 = vld [vmem:[#allocation2 + $0x52] sm:$0xff]  ;;  %9266 = vmatmul.msk.f32.gmra.mxu2 %vm527_vm2, %v4998_v56  ;;  %v4095_v14 = vsub.f32 1.5, %v4094_v9  ;;  %3617 = vst.msk [vmem:[#allocation3 + $0x108] sm:$0xff] %vm527_vm2, %v3581_v25  ;;  %v5151_v28 = vpop.f32.mrf.mxu2  ;;  %v5378_v9 = vld [vmem:[#allocation2 + $0x5a] sm:$0xff]  ;;  %vm11599_vm4 = vmor %vm4147_vm3, %vm4148_vm1 }
 0x365   : > { %9303 = vmatmul.msk.f32.gmra.mxu3 %vm527_vm2, %v5377_v32  ;;  %9338 = vmatmul.msk.f32.gmra.mxu0 %vm527_vm2, %v5377_v32  ;;  %v11567_v49 = vpop.eup %9605  ;;  %v4143_v44 = vmul.f32 %v11551_v47, %v4142_v1  ;;  %v11570_v20 = vadd.f32 1e-08, %v3935_v51  ;;  %v5295_v27 = vadd.f32 %v5259_v63, %v5151_v28  ;;  %v4415_v1 = vld [vmem:[%s12974_s5 + $0xe0] sm:$0xff] }
 0x366   : > { %v4096_v19 = vmul.f32 %v11530_v5, %v4095_v14  ;;  %v4132_v22 = vmul.f32 %v11567_v49, %v11535_v0  ;;  %v3165_v61 = vld [vmem:[#allocation3 + $0x118] sm:$0xff]  ;;  %4560 = vperm.xlu0 %9569, %v4414_v59   ;;  %vm4138_vm5 = vweird.f32 %v11567_v49 }
 0x367   : > { %v4144_v6 = vmul.f32 0.5, %v4143_v44  ;;  %9607 = vrsqrt.f32 %v11570_v20  ;;  %v3201_v16 = vadd.f32 %v3165_v61, %v3127_v41  ;;  %5331 = vst.msk [vmem:[#allocation3] sm:$0xff] %vm527_vm2, %v5295_v27  ;;  %v5530_v26 = vpop.f32.mrf.mxu3  ;;  %v11621_v14 = vld [vmem:[%s12971_s2] ss:$0 sm:$0xff]  ;;  %v3509_v44 = vpop.f32.mrf.mxu0  ;;  %vm4139_vm7 = vmor %vm4137_vm6, %vm4138_vm5  ;;  %vm4157_vm9 = vweird.f32 %v11570_v20 }
 0x368   : > { %v4100_v36 = vsel %vm4099_vm0, %v11530_v5, %v4096_v19  ;;  %v4133_v30 = vmul.f32 %v11567_v49, %v4132_v22  ;;  %v3546_v8 = vld [vmem:[#allocation3 + $0x110] sm:$0xff] }
 0x369   : > { %v4361_v33 = vmul.f32 %v4100_v36, %v11122_v58  ;;  %v4145_v13 = vsub.f32 1.5, %v4144_v6  ;;  %3237 = vst.msk [vmem:[#allocation3 + $0x118] sm:$0xff] %vm527_vm2, %v3201_v16  ;;  %v3582_v43 = vadd.f32 %v3546_v8, %v3506_v35  ;;  %v3691_v35 = vadd.f32 %v11621_v14, %v3651_v53  ;;  %v3649_v8 = vld [vmem:[#allocation3 + $0xe8] sm:$0xff] }
 0x36a   : > { %v4134_v5 = vmul.f32 0.5, %v4133_v30  ;;  %v3857_v40 = vpop.xlane.xlu1 %3856  ;;  %v3798_v16 = vmul.f32 %v11607_v60, %v11607_v60 }
 0x36b   : > { %v4613_v63 = vmul.f32 %v11080_v57, %v4361_v33  ;;  %v4146_v7 = vmul.f32 %v11551_v47, %v4145_v13  ;;  %3618 = vst.msk [vmem:[#allocation3 + $0x110] sm:$0xff] %vm527_vm2, %v3582_v43  ;;  %v3936_v58 = vmul.f32 %v11146_v29, %v3857_v40  ;;  %9230 = vmatmul.msk.f32.gmra.mxu1 %vm527_vm2, %v4693_v54  ;;  %v3885_v57 = vsel %vm527_vm2, %v3795_v4, 0.0 }
 0x36c   : > { %9267 = vmatmul.msk.f32.gmra.mxu2 %vm527_vm2, %v4999_v52  ;;  %v4135_v25 = vsub.f32 1.5, %v4134_v5  ;;  %v5154_v31 = vpop.f32.mrf.mxu2  ;;  %v3727_v36 = vmul.f32 0.2, %v3691_v35 }
 0x36d   : > { %9304 = vmatmul.msk.f32.gmra.mxu3 %vm527_vm2, %v5378_v9  ;;  %9339 = vmatmul.msk.f32.gmra.mxu0 %vm527_vm2, %v5378_v9  ;;  %v9608_v56 = vpop.eup %9607  ;;  %4656 = vst.msk [vmem:[#allocation2 + $0x63] sm:$0xff] %vm527_vm2, %v4613_v63  ;;  %v4150_v32 = vsel %vm11599_vm4, %v11551_v47, %v4146_v7  ;;  %v11613_v41 = vadd.f32 1e-08, %v3936_v58  ;;  %v5296_v51 = vadd.f32 %v5260_v38, %v5154_v31  ;;  %v3894_v38 = vsel %vm527_vm2, %v3798_v16, 0.0  ;;  %v3653_v31 = vld [vmem:[#allocation3 + $0x108] sm:$0xff] }
 0x36e   : > { %v4366_v28 = vmul.f32 %v4150_v32, %v11152_v45  ;;  %v4136_v17 = vmul.f32 %v11567_v49, %v4135_v25  ;;  %v4152_v47 = vmul.f32 %v9608_v56, %v11570_v20  ;;  %3886 = vadd.xlane.f32.xlu2 %v3885_v57  ;;  %v5638_v59 = vld [vmem:[#allocation3] sm:$0xff]  ;;  %4565 = vperm.xlu0 %9569, %v4415_v1   ;;  %vm4158_vm8 = vweird.f32 %v9608_v56  ;;  %v4696_v16 = vld [vmem:[#allocation2 + $0x70] sm:$0xff] }
 0x36f   : > { %9609 = vrsqrt.f32 %v11613_v41  ;;  %5332 = vst.msk [vmem:[#allocation3 + $0x8] sm:$0xff] %vm527_vm2, %v5296_v51  ;;  %v5674_v27 = vadd.f32 %v5638_v59, %v5530_v26  ;;  %v5533_v13 = vpop.f32.mrf.mxu3  ;;  %v11645_v5 = vmax.f32 %v3691_v35, %v3727_v36  ;;  %vm4159_vm10 = vmor %vm4157_vm9, %vm4158_vm8  ;;  %vm4167_vm12 = vweird.f32 %v11613_v41  ;;  %v5002_v36 = vld [vmem:[#allocation2 + $0x71] sm:$0xff] }
 0x370   : > { %v4618_v19 = vmul.f32 %v11177_v18, %v4366_v28  ;;  %v4140_v45 = vsel %vm4139_vm7, %v11567_v49, %v4136_v17  ;;  %v4153_v22 = vmul.f32 %v9608_v56, %v4152_v47  ;;  %v3547_v0 = vld [vmem:[#allocation3 + $0x118] sm:$0xff]  ;;  %v3652_v49 = vld [vmem:[#allocation3 + $0x100] sm:$0xff]  ;;  %v3693_v47 = vadd.f32 %v11621_v14, %v3653_v31 }
 0x371   : > { %v4365_v61 = vmul.f32 %v4140_v45, %v11149_v37  ;;  %v3583_v6 = vadd.f32 %v3547_v0, %v3509_v44  ;;  %5710 = vst.msk [vmem:[#allocation3] sm:$0xff] %vm527_vm2, %v5674_v27  ;;  %v3692_v26 = vadd.f32 %v11621_v14, %v3652_v49  ;;  %v3799_v20 = vmul.f32 %v11645_v5, %v11645_v5 }
 0x372   : > { %4661 = vst.msk [vmem:[#allocation2 + $0x8b] sm:$0xff] %vm527_vm2, %v4618_v19  ;;  %v4154_v30 = vmul.f32 0.5, %v4153_v22  ;;  %v11673_v19 = vpop.permute.xlu2 %4520 }
 0x373   : > { %v4617_v18 = vmul.f32 %v11224_v62, %v4365_v61  ;;  %3619 = vst.msk [vmem:[#allocation3 + $0x118] sm:$0xff] %vm527_vm2, %v3583_v6  ;;  %v3689_v62 = vadd.f32 %v11621_v14, %v3649_v8  ;;  %v3728_v25 = vmul.f32 0.2, %v3692_v26  ;;  %v3729_v61 = vmul.f32 0.2, %v3693_v47 }
 0x374   : > { %v4155_v4 = vsub.f32 1.5, %v4154_v30  ;;  %v4694_v24 = vld [vmem:[#allocation2 + $0x60] sm:$0xff]  ;;  %v4695_v1 = vld [vmem:[#allocation2 + $0x68] sm:$0xff] }
 0x375   : > { %v5000_v37 = vld [vmem:[#allocation2 + $0x61] sm:$0xff]  ;;  %v9610_v43 = vpop.eup %9609  ;;  %4660 = vst.msk [vmem:[#allocation2 + $0x83] sm:$0xff] %vm527_vm2, %v4617_v18  ;;  %9231 = vmatmul.msk.f32.gmra.mxu1 %vm527_vm2, %v4694_v24  ;;  %v3725_v9 = vmul.f32 0.2, %v3689_v62  ;;  %v5001_v51 = vld [vmem:[#allocation2 + $0x69] sm:$0xff]  ;;  %v11668_v17 = vmax.f32 %v3692_v26, %v3728_v25  ;;  %v3646_v24 = vld [vmem:[#allocation3 + $0xd0] sm:$0xff] }
 0x376   : > { %v5379_v33 = vld [vmem:[#allocation2 + $0x62] sm:$0xff]  ;;  %9268 = vmatmul.msk.f32.gmra.mxu2 %vm527_vm2, %v5000_v37  ;;  %v4156_v40 = vmul.f32 %v9608_v56, %v4155_v4  ;;  %v4162_v54 = vmul.f32 %v9610_v43, %v11613_v41  ;;  %v5639_v52 = vld [vmem:[#allocation3 + $0x8] sm:$0xff]  ;;  %3895 = vadd.xlane.f32.xlu2 %v3894_v38  ;;  %vm4168_vm11 = vweird.f32 %v9610_v43  ;;  %v11689_v4 = vmax.f32 %v3693_v47, %v3729_v61 }
 0x377   : > { %9305 = vmatmul.msk.f32.gmra.mxu3 %vm527_vm2, %v5379_v33  ;;  %9340 = vmatmul.msk.f32.gmra.mxu0 %vm527_vm2, %v5379_v33  ;;  %v5675_v53 = vadd.f32 %v5639_v52, %v5533_v13  ;;  %v11663_v35 = vmax.f32 %v3689_v62, %v3725_v9  ;;  %vm4169_vm13 = vmor %vm4167_vm12, %vm4168_vm11  ;;  %v3800_v22 = vmul.f32 %v11668_v17, %v11668_v17 }
 0x378   : > { %v4160_v63 = vsel %vm4159_vm10, %v9608_v56, %v4156_v40  ;;  %v4163_v7 = vmul.f32 %v9610_v43, %v4162_v54  ;;  %v3897_v56 = vsel %vm527_vm2, %v3799_v20, 0.0  ;;  %v3686_v40 = vadd.f32 %v11621_v14, %v3646_v24  ;;  %v5382_v20 = vld [vmem:[#allocation2 + $0x7a] sm:$0xff] }
 0x379   : > { %v4367_v58 = vmul.f32 %v4160_v63, %v11180_v23  ;;  %5711 = vst.msk [vmem:[#allocation3 + $0x8] sm:$0xff] %vm527_vm2, %v5675_v53  ;;  %v5380_v23 = vld [vmem:[#allocation2 + $0x6a] sm:$0xff]  ;;  %v3797_v0 = vmul.f32 %v11663_v35, %v11663_v35  ;;  %v3900_v18 = vsel %vm527_vm2, %v3800_v22, 0.0  ;;  %v3801_v52 = vmul.f32 %v11689_v4, %v11689_v4  ;;  %v4697_v53 = vld [vmem:[#allocation2 + $0x78] sm:$0xff] }
 0x37a   : > { %v4164_v10 = vmul.f32 0.5, %v4163_v7  ;;  %v5003_v63 = vld [vmem:[#allocation2 + $0x79] sm:$0xff]  ;;  %v11700_v7 = vpop.permute.xlu0 %4530  ;;  %v3722_v9 = vmul.f32 0.2, %v3686_v40 }
 0x37b   : > { %v4619_v57 = vmul.f32 %v11118_v50, %v4367_v58  ;;  %v6017_v50 = vld [vmem:[#allocation3] sm:$0xff]  ;;  %v3903_v25 = vsel %vm527_vm2, %v3801_v52, 0.0 }
 0x37c   : > { %v4165_v32 = vsub.f32 1.5, %v4164_v10  ;;  %v5384_v52 = vld [vmem:[#allocation2 + $0x8a] sm:$0xff] }
 0x37d   : > { %4662 = vst.msk [vmem:[#allocation2 + $0x93] sm:$0xff] %vm527_vm2, %v4619_v57  ;;  %9232 = vmatmul.msk.f32.gmra.mxu1 %vm527_vm2, %v4695_v1  ;;  %v3648_v57 = vld [vmem:[#allocation3 + $0xe0] sm:$0xff] }
 0x37e   : > { %9269 = vmatmul.msk.f32.gmra.mxu2 %vm527_vm2, %v5001_v51  ;;  %v4166_v28 = vmul.f32 %v9610_v43, %v4165_v32  ;;  %3898 = vadd.xlane.f32.xlu2 %v3897_v56  ;;  %v11709_v56 = vmax.f32 %v3686_v40, %v3722_v9 }
 0x37f   : > { %9306 = vmatmul.msk.f32.gmra.mxu3 %vm527_vm2, %v5380_v23  ;;  %9341 = vmatmul.msk.f32.gmra.mxu0 %vm527_vm2, %v5380_v23  ;;  %v4850_v44 = vpop.f32.mrf.mxu1 }
 0x380   : > { %v4170_v59 = vsel %vm4169_vm13, %v9610_v43, %v4166_v28  ;;  %4954 = vst.msk [vmem:[#allocation3 + $0x10] sm:$0xff] %vm527_vm2, %v4850_v44  ;;  %v6018_v49 = vld [vmem:[#allocation3 + $0x8] sm:$0xff]  ;;  %v3688_v28 = vadd.f32 %v11621_v14, %v3648_v57  ;;  %v4698_v44 = vld [vmem:[#allocation2 + $0x80] sm:$0xff]  ;;  %v3794_v22 = vmul.f32 %v11709_v56, %v11709_v56 }
 0x381   : > { %v5909_v27 = vpop.f32.mrf.mxu0  ;;  %v4368_v41 = vmul.f32 %v4170_v59, %v11204_v46  ;;  %v5381_v46 = vld [vmem:[#allocation2 + $0x72] sm:$0xff]  ;;  %v5004_v59 = vld [vmem:[#allocation2 + $0x81] sm:$0xff] }
 0x382   : > { %v6053_v45 = vadd.f32 %v6017_v50, %v5909_v27  ;;  %v11721_v61 = vpop.permute.xlu0 %4535 }
 0x383   : > { %v4620_v6 = vmul.f32 %v11473_v12, %v4368_v41  ;;  %v3891_v12 = vsel %vm527_vm2, %v3797_v0, 0.0  ;;  %v3724_v0 = vmul.f32 0.2, %v3688_v28 }
 0x384   : > { %6089 = vst.msk [vmem:[#allocation3] sm:$0xff] %vm527_vm2, %v6053_v45  ;;  %v5383_v45 = vld [vmem:[#allocation2 + $0x82] sm:$0xff] }
 0x385   : > { %4663 = vst.msk [vmem:[#allocation2 + $0x9b] sm:$0xff] %vm527_vm2, %v4620_v6  ;;  %9233 = vmatmul.msk.f32.gmra.mxu1 %vm527_vm2, %v4696_v16 }
 0x386   : > { %v5157_v30 = vpop.f32.mrf.mxu2  ;;  %9270 = vmatmul.msk.f32.gmra.mxu2 %vm527_vm2, %v5002_v36  ;;  %3901 = vadd.xlane.f32.xlu2 %v3900_v18 }
 0x387   : > { %v5536_v8 = vpop.f32.mrf.mxu3  ;;  %9307 = vmatmul.msk.f32.gmra.mxu3 %vm527_vm2, %v5381_v46  ;;  %9342 = vmatmul.msk.f32.gmra.mxu0 %vm527_vm2, %v5381_v46  ;;  %v5261_v37 = vld [vmem:[#allocation3 + $0x10] sm:$0xff]  ;;  %v4853_v33 = vpop.f32.mrf.mxu1 }
 0x388   : > { %3892 = vadd.xlane.f32.xlu1 %v3891_v12  ;;  %v5297_v13 = vadd.f32 %v5261_v37, %v5157_v30  ;;  %4955 = vst.msk [vmem:[#allocation3 + $0x18] sm:$0xff] %vm527_vm2, %v4853_v33  ;;  %v3882_v12 = vsel %vm527_vm2, %v3794_v22, 0.0  ;;  %v5385_v22 = vld [vmem:[#allocation2 + $0x92] sm:$0xff] }
 0x389   : > { %v5912_v43 = vpop.f32.mrf.mxu0  ;;  %v3863_v62 = vpop.xlane.xlu2 %3862 }
 0x38a   : > { %v6054_v38 = vadd.f32 %v6018_v49, %v5912_v43  ;;  %5333 = vst.msk [vmem:[#allocation3 + $0x10] sm:$0xff] %vm527_vm2, %v5297_v13  ;;  %v3938_v54 = vmul.f32 %v11146_v29, %v3863_v62  ;;  %v11725_v49 = vmax.f32 %v3688_v28, %v3724_v0  ;;  %v5005_v62 = vld [vmem:[#allocation2 + $0x89] sm:$0xff]  ;;  %v11757_v0 = vpop.permute.xlu1 %4525 }
 0x38c   : > { %6090 = vst.msk [vmem:[#allocation3 + $0x8] sm:$0xff] %vm527_vm2, %v6054_v38  ;;  %v11698_v26 = vadd.f32 1e-08, %v3938_v54  ;;  %v4699_v38 = vld [vmem:[#allocation2 + $0x88] sm:$0xff] }
 0x38d   : > { %9234 = vmatmul.msk.f32.gmra.mxu1 %vm527_vm2, %v4697_v53  ;;  %v4417_v53 = vld [vmem:[%s12974_s5 + $0xf0] sm:$0xff] }
 0x38e   : > { %v5160_v58 = vpop.f32.mrf.mxu2  ;;  %9271 = vmatmul.msk.f32.gmra.mxu2 %vm527_vm2, %v5003_v63  ;;  %9611 = vrsqrt.f32 %v11698_v26  ;;  %3904 = vadd.xlane.f32.xlu2 %v3903_v25  ;;  %vm4187_vm15 = vweird.f32 %v11698_v26  ;;  %v3796_v63 = vmul.f32 %v11725_v49, %v11725_v49 }
 0x38f   : > { %v5539_v10 = vpop.f32.mrf.mxu3  ;;  %9308 = vmatmul.msk.f32.gmra.mxu3 %vm527_vm2, %v5382_v20  ;;  %9343 = vmatmul.msk.f32.gmra.mxu0 %vm527_vm2, %v5382_v20  ;;  %v5262_v31 = vld [vmem:[#allocation3 + $0x18] sm:$0xff]  ;;  %v4856_v32 = vpop.f32.mrf.mxu1 }
 0x390   : > { %v5298_v1 = vadd.f32 %v5262_v31, %v5160_v58  ;;  %4956 = vst.msk [vmem:[#allocation3 + $0x20] sm:$0xff] %vm527_vm2, %v4856_v32 }
 0x391   : > { %v5915_v51 = vpop.f32.mrf.mxu0  ;;  %v5640_v23 = vld [vmem:[#allocation3 + $0x10] sm:$0xff] }
 0x392   : > { %v5676_v50 = vadd.f32 %v5640_v23, %v5536_v8  ;;  %5334 = vst.msk [vmem:[#allocation3 + $0x18] sm:$0xff] %vm527_vm2, %v5298_v1  ;;  %v3888_v1 = vsel %vm527_vm2, %v3796_v63, 0.0  ;;  %v5386_v63 = vld [vmem:[#allocation2 + $0x9a] sm:$0xff] }
 0x394   : > { %v9612_v47 = vpop.eup %9611  ;;  %5712 = vst.msk [vmem:[#allocation3 + $0x10] sm:$0xff] %vm527_vm2, %v5676_v50 }
 0x395   : > { %v4182_v27 = vmul.f32 %v9612_v47, %v11698_v26  ;;  %9235 = vmatmul.msk.f32.gmra.mxu1 %vm527_vm2, %v4698_v44  ;;  %vm4188_vm14 = vweird.f32 %v9612_v47 }
 0x396   : > { %v5163_v41 = vpop.f32.mrf.mxu2  ;;  %9272 = vmatmul.msk.f32.gmra.mxu2 %vm527_vm2, %v5004_v59  ;;  %vm4189_vm0 = vmor %vm4187_vm15, %vm4188_vm14 }
 0x397   : > { %9309 = vmatmul.msk.f32.gmra.mxu3 %vm527_vm2, %v5383_v45  ;;  %9344 = vmatmul.msk.f32.gmra.mxu0 %vm527_vm2, %v5383_v45  ;;  %v4183_v6 = vmul.f32 %v9612_v47, %v4182_v27  ;;  %v5263_v16 = vld [vmem:[#allocation3 + $0x20] sm:$0xff]  ;;  %v4859_v36 = vpop.f32.mrf.mxu1  ;;  %v5542_v46 = vpop.f32.mrf.mxu3  ;;  %v4700_v27 = vld [vmem:[#allocation2 + $0x90] sm:$0xff] }
 0x398   : > { %v5299_v30 = vadd.f32 %v5263_v16, %v5163_v41  ;;  %4957 = vst.msk [vmem:[#allocation3 + $0x28] sm:$0xff] %vm527_vm2, %v4859_v36  ;;  %3883 = vadd.xlane.f32.xlu0 %v3882_v12  ;;  %v5006_v41 = vld [vmem:[#allocation2 + $0x91] sm:$0xff] }
 0x399   : > { %v4184_v8 = vmul.f32 0.5, %v4183_v6  ;;  %v5641_v18 = vld [vmem:[#allocation3 + $0x18] sm:$0xff]  ;;  %v5918_v37 = vpop.f32.mrf.mxu0 }
 0x39a   : > { %v5677_v24 = vadd.f32 %v5641_v18, %v5539_v10  ;;  %5335 = vst.msk [vmem:[#allocation3 + $0x20] sm:$0xff] %vm527_vm2, %v5299_v30 }
 0x39b   : > { %v4185_v33 = vsub.f32 1.5, %v4184_v8  ;;  %v6019_v13 = vld [vmem:[#allocation3 + $0x10] sm:$0xff] }
 0x39c   : > { %5713 = vst.msk [vmem:[#allocation3 + $0x18] sm:$0xff] %vm527_vm2, %v5677_v24  ;;  %v6055_v43 = vadd.f32 %v6019_v13, %v5915_v51  ;;  %v4701_v13 = vld [vmem:[#allocation2 + $0x98] sm:$0xff] }
 0x39d   : > { %v4186_v40 = vmul.f32 %v9612_v47, %v4185_v33  ;;  %9236 = vmatmul.msk.f32.gmra.mxu1 %vm527_vm2, %v4699_v38  ;;  %v3860_v20 = vpop.xlane.xlu0 %3859 }
 0x39e   : > { %v5166_v54 = vpop.f32.mrf.mxu2  ;;  %9273 = vmatmul.msk.f32.gmra.mxu2 %vm527_vm2, %v5005_v62  ;;  %6091 = vst.msk [vmem:[#allocation3 + $0x10] sm:$0xff] %vm527_vm2, %v6055_v43  ;;  %v3937_v57 = vmul.f32 %v11146_v29, %v3860_v20  ;;  %v4421_v62 = vld [vmem:[%s12974_s5 + $0x110] sm:$0xff] }
 0x39f   : > { %9310 = vmatmul.msk.f32.gmra.mxu3 %vm527_vm2, %v5384_v52  ;;  %9345 = vmatmul.msk.f32.gmra.mxu0 %vm527_vm2, %v5384_v52  ;;  %v4190_v26 = vsel %vm4189_vm0, %v9612_v47, %v4186_v40  ;;  %v5264_v58 = vld [vmem:[#allocation3 + $0x28] sm:$0xff]  ;;  %v4862_v9 = vpop.f32.mrf.mxu1  ;;  %v5545_v28 = vpop.f32.mrf.mxu3  ;;  %v5007_v40 = vld [vmem:[#allocation2 + $0x99] sm:$0xff] }
 0x3a0   : > { %v4370_v10 = vmul.f32 %v4190_v26, %v11292_v3  ;;  %v5300_v25 = vadd.f32 %v5264_v58, %v5166_v54  ;;  %4958 = vst.msk [vmem:[#allocation3 + $0x30] sm:$0xff] %vm527_vm2, %v4862_v9  ;;  %v3878_v31 = vpop.xlane.xlu2 %3877  ;;  %v11746_v50 = vadd.f32 1e-08, %v3937_v57  ;;  %3889 = vadd.xlane.f32.xlu0 %v3888_v1 }
 0x3a1   : > { %4575 = vperm.xlu1 %9570, %v4417_v53   ;;  %v5642_v32 = vld [vmem:[#allocation3 + $0x20] sm:$0xff]  ;;  %v3943_v47 = vmul.f32 %v11146_v29, %v3878_v31  ;;  %v5921_v59 = vpop.f32.mrf.mxu0 }
 0x3a2   : > { %v4622_v51 = vmul.f32 %v11673_v19, %v4370_v10  ;;  %v5678_v23 = vadd.f32 %v5642_v32, %v5542_v46  ;;  %5336 = vst.msk [vmem:[#allocation3 + $0x28] sm:$0xff] %vm527_vm2, %v5300_v25  ;;  %9613 = vrsqrt.f32 %v11746_v50  ;;  %v4419_v19 = vld [vmem:[%s12974_s5 + $0x100] sm:$0xff]  ;;  %vm4177_vm3 = vweird.f32 %v11746_v50 }
 0x3a3   : > { %v6020_v3 = vld [vmem:[#allocation3 + $0x18] sm:$0xff]  ;;  %v11762_v6 = vadd.f32 1e-08, %v3943_v47 }
 0x3a4   : > { %4665 = vst.msk [vmem:[#allocation2 + $0xab] sm:$0xff] %vm527_vm2, %v4622_v51  ;;  %v6056_v44 = vadd.f32 %v6020_v3, %v5918_v37 }
 0x3a5   : > { %5714 = vst.msk [vmem:[#allocation3 + $0x20] sm:$0xff] %vm527_vm2, %v5678_v23  ;;  %9237 = vmatmul.msk.f32.gmra.mxu1 %vm527_vm2, %v4700_v27  ;;  %v3866_v36 = vpop.xlane.xlu0 %3865  ;;  %9615 = vrsqrt.f32 %v11762_v6  ;;  %vm4237_vm15 = vweird.f32 %v11762_v6 }
 0x3a6   : > { %v5169_v45 = vpop.f32.mrf.mxu2  ;;  %9274 = vmatmul.msk.f32.gmra.mxu2 %vm527_vm2, %v5006_v41  ;;  %6092 = vst.msk [vmem:[#allocation3 + $0x18] sm:$0xff] %vm527_vm2, %v6056_v44  ;;  %4585 = vperm.xlu2 %9568, %v4419_v19   ;;  %v3939_v8 = vmul.f32 %v11146_v29, %v3866_v36  ;;  %v4416_v19 = vld [vmem:[%s12974_s5 + $0xe8] sm:$0xff] }
 0x3a7   : > { %9311 = vmatmul.msk.f32.gmra.mxu3 %vm527_vm2, %v5385_v22  ;;  %9346 = vmatmul.msk.f32.gmra.mxu0 %vm527_vm2, %v5385_v22  ;;  %v5265_v16 = vld [vmem:[#allocation3 + $0x30] sm:$0xff]  ;;  %v4865_v30 = vpop.f32.mrf.mxu1  ;;  %v5548_v38 = vpop.f32.mrf.mxu3 }
 0x3a8   : > { %v5301_v46 = vadd.f32 %v5265_v16, %v5169_v45  ;;  %4959 = vst.msk [vmem:[#allocation3 + $0x38] sm:$0xff] %vm527_vm2, %v4865_v30  ;;  %v9614_v12 = vpop.eup %9613  ;;  %v11767_v37 = vadd.f32 1e-08, %v3939_v8  ;;  %v4422_v22 = vld [vmem:[%s12974_s5 + $0x118] sm:$0xff]  ;;  %v3655_v30 = vld [vmem:[#allocation3 + $0x118] sm:$0xff] }
 0x3a9   : > { %v5643_v18 = vld [vmem:[#allocation3 + $0x28] sm:$0xff]  ;;  %v4172_v33 = vmul.f32 %v9614_v12, %v11746_v50  ;;  %v5924_v26 = vpop.f32.mrf.mxu0  ;;  %vm4178_vm1 = vweird.f32 %v9614_v12 }
 0x3aa   : > { %v5679_v24 = vadd.f32 %v5643_v18, %v5545_v28  ;;  %5337 = vst.msk [vmem:[#allocation3 + $0x30] sm:$0xff] %vm527_vm2, %v5301_v46  ;;  %9617 = vrsqrt.f32 %v11767_v37  ;;  %vm4179_vm4 = vmor %vm4177_vm3, %vm4178_vm1  ;;  %vm4197_vm6 = vweird.f32 %v11767_v37 }
 0x3ab   : > { %v4173_v54 = vmul.f32 %v9614_v12, %v4172_v33  ;;  %v11783_v1 = vpop.eup %9615 }
 0x3ac   : > { %5715 = vst.msk [vmem:[#allocation3 + $0x28] sm:$0xff] %vm527_vm2, %v5679_v24  ;;  %v6021_v43 = vld [vmem:[#allocation3 + $0x20] sm:$0xff]  ;;  %v4232_v50 = vmul.f32 %v11783_v1, %v11762_v6  ;;  %vm4238_vm14 = vweird.f32 %v11783_v1 }
 0x3ad   : > { %v6057_v52 = vadd.f32 %v6021_v43, %v5921_v59  ;;  %9238 = vmatmul.msk.f32.gmra.mxu1 %vm527_vm2, %v4701_v13  ;;  %v4174_v58 = vmul.f32 0.5, %v4173_v54  ;;  %v3872_v9 = vpop.xlane.xlu0 %3871  ;;  %v3695_v54 = vadd.f32 %v11621_v14, %v3655_v30  ;;  %vm11893_vm1 = vmor %vm4237_vm15, %vm4238_vm14 }
 0x3ae   : > { %v5172_v53 = vpop.f32.mrf.mxu2  ;;  %9275 = vmatmul.msk.f32.gmra.mxu2 %vm527_vm2, %v5007_v40  ;;  %4595 = vperm.xlu2 %9568, %v4421_v62   ;;  %v3869_v10 = vpop.xlane.xlu1 %3868  ;;  %v3941_v57 = vmul.f32 %v11146_v29, %v3872_v9 }
 0x3af   : > { %9312 = vmatmul.msk.f32.gmra.mxu3 %vm527_vm2, %v5386_v63  ;;  %9347 = vmatmul.msk.f32.gmra.mxu0 %vm527_vm2, %v5386_v63  ;;  %6093 = vst.msk [vmem:[#allocation3 + $0x20] sm:$0xff] %vm527_vm2, %v6057_v52  ;;  %v5266_v20 = vld [vmem:[#allocation3 + $0x38] sm:$0xff]  ;;  %v3940_v31 = vmul.f32 %v11146_v29, %v3869_v10  ;;  %v4868_v32 = vpop.f32.mrf.mxu1  ;;  %v4175_v51 = vsub.f32 1.5, %v4174_v58  ;;  %v5551_v8 = vpop.f32.mrf.mxu3 }
 0x3b0   : > { %v5302_v25 = vadd.f32 %v5266_v20, %v5172_v53  ;;  %4960 = vst.msk [vmem:[#allocation3 + $0x40] sm:$0xff] %vm527_vm2, %v4868_v32  ;;  %v11786_v28 = vpop.eup %9617  ;;  %v11789_v47 = vadd.f32 1e-08, %v3941_v57  ;;  %v4418_v32 = vld [vmem:[%s12974_s5 + $0xf8] sm:$0xff] }
 0x3b1   : > { %v5644_v23 = vld [vmem:[#allocation3 + $0x30] sm:$0xff]  ;;  %v11791_v44 = vadd.f32 1e-08, %v3940_v31  ;;  %v4176_v59 = vmul.f32 %v9614_v12, %v4175_v51  ;;  %v4192_v27 = vmul.f32 %v11786_v28, %v11767_v37  ;;  %vm4198_vm5 = vweird.f32 %v11786_v28  ;;  %v5927_v63 = vpop.f32.mrf.mxu0 }
 0x3b2   : > { %v5680_v3 = vadd.f32 %v5644_v23, %v5548_v38  ;;  %5338 = vst.msk [vmem:[#allocation3 + $0x38] sm:$0xff] %vm527_vm2, %v5302_v25  ;;  %9619 = vrsqrt.f32 %v11789_v47  ;;  %vm4199_vm7 = vmor %vm4197_vm6, %vm4198_vm5  ;;  %v3731_v37 = vmul.f32 0.2, %v3695_v54  ;;  %vm4217_vm10 = vweird.f32 %v11789_v47 }
 0x3b3   : > { %v6022_v41 = vld [vmem:[#allocation3 + $0x28] sm:$0xff]  ;;  %v4180_v16 = vsel %vm4179_vm4, %v9614_v12, %v4176_v59  ;;  %v4193_v36 = vmul.f32 %v11786_v28, %v4192_v27  ;;  %9621 = vrsqrt.f32 %v11791_v44  ;;  %vm4207_vm12 = vweird.f32 %v11791_v44 }
 0x3b4   : > { %5716 = vst.msk [vmem:[#allocation3 + $0x30] sm:$0xff] %vm527_vm2, %v5680_v3  ;;  %v6058_v45 = vadd.f32 %v6022_v41, %v5924_v26  ;;  %v4369_v46 = vmul.f32 %v4180_v16, %v11349_v39  ;;  %4570 = vperm.xlu0 %9569, %v4416_v19   ;;  %v4233_v39 = vmul.f32 %v11783_v1, %v4232_v50 }
 0x3b5   : > { %v4194_v24 = vmul.f32 0.5, %v4193_v36  ;;  %v3875_v33 = vpop.xlane.xlu0 %3874 }
 0x3b6   : > { %6094 = vst.msk [vmem:[#allocation3 + $0x28] sm:$0xff] %vm527_vm2, %v6058_v45  ;;  %v5175_v18 = vpop.f32.mrf.mxu2  ;;  %4600 = vperm.xlu2 %9568, %v4422_v22   ;;  %v3881_v13 = vpop.xlane.xlu1 %3880  ;;  %v4621_v12 = vmul.f32 %v11423_v2, %v4369_v46  ;;  %v3942_v38 = vmul.f32 %v11146_v29, %v3875_v33  ;;  %v4234_v3 = vmul.f32 0.5, %v4233_v39  ;;  %v11847_v46 = vmax.f32 %v3695_v54, %v3731_v37 }
 0x3b7   : > { %v5267_v43 = vld [vmem:[#allocation3 + $0x40] sm:$0xff]  ;;  %v3944_v62 = vmul.f32 %v11146_v29, %v3881_v13  ;;  %v4871_v40 = vpop.f32.mrf.mxu1  ;;  %v4195_v52 = vsub.f32 1.5, %v4194_v24  ;;  %v5554_v50 = vpop.f32.mrf.mxu3 }
 0x3b8   : > { %v5303_v26 = vadd.f32 %v5267_v43, %v5175_v18  ;;  %4961 = vst.msk [vmem:[#allocation3 + $0x48] sm:$0xff] %vm527_vm2, %v4871_v40  ;;  %v11817_v58 = vpop.eup %9619  ;;  %v11820_v20 = vadd.f32 1e-08, %v3942_v38 }
 0x3b9   : > { %v5645_v53 = vld [vmem:[#allocation3 + $0x38] sm:$0xff]  ;;  %4664 = vst.msk [vmem:[#allocation2 + $0xa3] sm:$0xff] %vm527_vm2, %v4621_v12  ;;  %v11822_v9 = vadd.f32 1e-08, %v3944_v62  ;;  %v11824_v10 = vpop.eup %9621  ;;  %v4196_v25 = vmul.f32 %v11786_v28, %v4195_v52  ;;  %v4212_v57 = vmul.f32 %v11817_v58, %v11789_v47  ;;  %vm4218_vm8 = vweird.f32 %v11817_v58  ;;  %v5930_v54 = vpop.f32.mrf.mxu0  ;;  %v4420_v52 = vld [vmem:[%s12974_s5 + $0x108] sm:$0xff] }
 0x3ba   : > { %v5681_v2 = vadd.f32 %v5645_v53, %v5551_v8  ;;  %5339 = vst.msk [vmem:[#allocation3 + $0x40] sm:$0xff] %vm527_vm2, %v5303_v26  ;;  %v4202_v51 = vmul.f32 %v11824_v10, %v11791_v44  ;;  %9623 = vrsqrt.f32 %v11820_v20  ;;  %vm4208_vm9 = vweird.f32 %v11824_v10  ;;  %vm4219_vm11 = vmor %vm4217_vm10, %vm4218_vm8 }
 0x3bb   : > { %v6023_v31 = vld [vmem:[#allocation3 + $0x30] sm:$0xff]  ;;  %v4200_v59 = vsel %vm4199_vm7, %v11786_v28, %v4196_v25  ;;  %v4213_v27 = vmul.f32 %v11817_v58, %v4212_v57  ;;  %9625 = vrsqrt.f32 %v11822_v9  ;;  %v4235_v28 = vsub.f32 1.5, %v4234_v3  ;;  %vm4209_vm13 = vmor %vm4207_vm12, %vm4208_vm9 }
 0x3bc   : > { %5717 = vst.msk [vmem:[#allocation3 + $0x38] sm:$0xff] %vm527_vm2, %v5681_v2  ;;  %v6059_v23 = vadd.f32 %v6023_v31, %v5927_v63  ;;  %v4371_v41 = vmul.f32 %v4200_v59, %v11373_v42  ;;  %v4203_v19 = vmul.f32 %v11824_v10, %v4202_v51  ;;  %4580 = vperm.xlu0 %9569, %v4418_v32   ;;  %vm4227_vm4 = vweird.f32 %v11820_v20 }
 0x3bd   : > { %v4214_v45 = vmul.f32 0.5, %v4213_v27  ;;  %v3803_v25 = vmul.f32 %v11847_v46, %v11847_v46  ;;  %v4236_v44 = vmul.f32 %v11783_v1, %v4235_v28  ;;  %vm4247_vm6 = vweird.f32 %v11822_v9 }
 0x3be   : > { %6095 = vst.msk [vmem:[#allocation3 + $0x30] sm:$0xff] %vm527_vm2, %v6059_v23  ;;  %v4623_v22 = vmul.f32 %v11757_v0, %v4371_v41  ;;  %v4204_v16 = vmul.f32 0.5, %v4203_v19  ;;  %v5178_v36 = vpop.f32.mrf.mxu2 }
 0x3bf   : > { %v5268_v30 = vld [vmem:[#allocation3 + $0x48] sm:$0xff]  ;;  %v4215_v8 = vsub.f32 1.5, %v4214_v45  ;;  %v5557_v41 = vpop.f32.mrf.mxu3  ;;  %v4240_v19 = vsel %vm11893_vm1, %v11783_v1, %v4236_v44 }
 0x3c0   : > { %v5304_v18 = vadd.f32 %v5268_v30, %v5178_v36  ;;  %v4702_v42 = vld [vmem:[#allocation2 + $0xa0] sm:$0xff]  ;;  %v11850_v13 = vpop.eup %9623  ;;  %4666 = vst.msk [vmem:[#allocation2 + $0xb3] sm:$0xff] %vm527_vm2, %v4623_v22  ;;  %v4205_v12 = vsub.f32 1.5, %v4204_v16  ;;  %v4703_v59 = vld [vmem:[#allocation2 + $0xa8] sm:$0xff]  ;;  %v4375_v36 = vmul.f32 %v4240_v19, %v11368_v55  ;;  %v4541_v30 = vpop.permute.xlu2 %4540 }
 0x3c1   : > { %v5008_v24 = vld [vmem:[#allocation2 + $0xa1] sm:$0xff]  ;;  %9239 = vmatmul.msk.f32.gmra.mxu1 %vm527_vm2, %v4702_v42  ;;  %v11856_v43 = vpop.eup %9625  ;;  %v4216_v38 = vmul.f32 %v11817_v58, %v4215_v8  ;;  %v4222_v40 = vmul.f32 %v11850_v13, %v11820_v20  ;;  %vm4228_vm0 = vweird.f32 %v11850_v13 }
 0x3c2   : > { %v5387_v33 = vld [vmem:[#allocation2 + $0xa2] sm:$0xff]  ;;  %9276 = vmatmul.msk.f32.gmra.mxu2 %vm527_vm2, %v5008_v24  ;;  %5340 = vst.msk [vmem:[#allocation3 + $0x48] sm:$0xff] %vm527_vm2, %v5304_v18  ;;  %v4206_v53 = vmul.f32 %v11824_v10, %v4205_v12  ;;  %v4242_v47 = vmul.f32 %v11856_v43, %v11822_v9  ;;  %vm4248_vm3 = vweird.f32 %v11856_v43  ;;  %vm4229_vm5 = vmor %vm4227_vm4, %vm4228_vm0 }
 0x3c3   : > { %v5646_v0 = vld [vmem:[#allocation3 + $0x40] sm:$0xff]  ;;  %v6024_v39 = vld [vmem:[#allocation3 + $0x38] sm:$0xff]  ;;  %9313 = vmatmul.msk.f32.gmra.mxu3 %vm527_vm2, %v5387_v33  ;;  %9348 = vmatmul.msk.f32.gmra.mxu0 %vm527_vm2, %v5387_v33  ;;  %v4220_v26 = vsel %vm4219_vm11, %v11817_v58, %v4216_v38  ;;  %v4223_v2 = vmul.f32 %v11850_v13, %v4222_v40  ;;  %vm4249_vm7 = vmor %vm4247_vm6, %vm4248_vm3 }
 0x3c4   : > { %v5682_v62 = vadd.f32 %v5646_v0, %v5554_v50  ;;  %v6060_v63 = vadd.f32 %v6024_v39, %v5930_v54  ;;  %v4373_v57 = vmul.f32 %v4220_v26, %v11415_v48  ;;  %v4210_v31 = vsel %vm4209_vm13, %v11824_v10, %v4206_v53  ;;  %4590 = vperm.xlu0 %9569, %v4420_v52   ;;  %v3654_v0 = vld [vmem:[#allocation3 + $0x110] sm:$0xff] }
 0x3c5   : > { %v4243_v32 = vmul.f32 %v11856_v43, %v4242_v47  ;;  %v4372_v58 = vmul.f32 %v4210_v31, %v11408_v15  ;;  %v4224_v51 = vmul.f32 0.5, %v4223_v2  ;;  %v3909_v10 = vsel %vm527_vm2, %v3803_v25, 0.0 }
 0x3c6   : > { %5718 = vst.msk [vmem:[#allocation3 + $0x40] sm:$0xff] %vm527_vm2, %v5682_v62  ;;  %v4625_v23 = vmul.f32 %v11721_v61, %v4373_v57  ;;  %v5388_v61 = vld [vmem:[#allocation2 + $0xaa] sm:$0xff] }
 0x3c7   : > { %6096 = vst.msk [vmem:[#allocation3 + $0x38] sm:$0xff] %vm527_vm2, %v6060_v63  ;;  %v4244_v37 = vmul.f32 0.5, %v4243_v32  ;;  %v4624_v3 = vmul.f32 %v11700_v7, %v4372_v58  ;;  %v4225_v48 = vsub.f32 1.5, %v4224_v51  ;;  %v5009_v7 = vld [vmem:[#allocation2 + $0xa9] sm:$0xff]  ;;  %v5389_v12 = vld [vmem:[#allocation2 + $0xb2] sm:$0xff] }
 0x3c8   : > { %4668 = vst.msk [vmem:[#allocation2 + $0xc3] sm:$0xff] %vm527_vm2, %v4625_v23  ;;  %v4551_v18 = vpop.permute.xlu0 %4550  ;;  %v4704_v33 = vld [vmem:[#allocation2 + $0xb0] sm:$0xff] }
 0x3c9   : > { %v4245_v15 = vsub.f32 1.5, %v4244_v37  ;;  %v5647_v6 = vld [vmem:[#allocation3 + $0x48] sm:$0xff]  ;;  %9240 = vmatmul.msk.f32.gmra.mxu1 %vm527_vm2, %v4703_v59  ;;  %4667 = vst.msk [vmem:[#allocation2 + $0xbb] sm:$0xff] %vm527_vm2, %v4624_v3  ;;  %v4226_v45 = vmul.f32 %v11850_v13, %v4225_v48 }
 0x3ca   : > { %v5683_v22 = vadd.f32 %v5647_v6, %v5557_v41  ;;  %9277 = vmatmul.msk.f32.gmra.mxu2 %vm527_vm2, %v5009_v7 }
 0x3cb   : > { %3910 = vadd.xlane.f32.xlu1 %v3909_v10  ;;  %9314 = vmatmul.msk.f32.gmra.mxu3 %vm527_vm2, %v5388_v61  ;;  %v4246_v16 = vmul.f32 %v11856_v43, %v4245_v15  ;;  %v4230_v1 = vsel %vm4229_vm5, %v11850_v13, %v4226_v45  ;;  %v5010_v13 = vld [vmem:[#allocation2 + $0xb1] sm:$0xff] }
 0x3cc   : > { %9349 = vmatmul.msk.f32.gmra.mxu0 %vm527_vm2, %v5388_v61  ;;  %5719 = vst.msk [vmem:[#allocation3 + $0x48] sm:$0xff] %vm527_vm2, %v5683_v22  ;;  %v4374_v20 = vmul.f32 %v4230_v1, %v11433_v34 }
 0x3cd   : > { %v4250_v50 = vsel %vm4249_vm7, %v11856_v43, %v4246_v16  ;;  %v3694_v43 = vadd.f32 %v11621_v14, %v3654_v0  ;;  %v6025_v39 = vld [vmem:[#allocation3 + $0x40] sm:$0xff] }
 0x3ce   : > { %v4376_v9 = vmul.f32 %v4250_v50, %v11440_v11  ;;  %v4546_v28 = vpop.permute.xlu1 %4545  ;;  %v4626_v8 = vmul.f32 %v4541_v30, %v4374_v20 }
 0x3cf   : > { %v4627_v42 = vmul.f32 %v4546_v28, %v4375_v36  ;;  %v3730_v26 = vmul.f32 0.2, %v3694_v43 }
 0x3d0   : > { %v4628_v24 = vmul.f32 %v4551_v18, %v4376_v9  ;;  %4669 = vst.msk [vmem:[#allocation2 + $0xcb] sm:$0xff] %vm527_vm2, %v4626_v8  ;;  %v4705_v55 = vld [vmem:[#allocation2 + $0xb8] sm:$0xff]  ;;  %v4706_v40 = vld [vmem:[#allocation2 + $0xc0] sm:$0xff]  ;;  %v11954_v7 = vpop.permute.xlu0 %4555 }
 0x3d1   : > { %9241 = vmatmul.msk.f32.gmra.mxu1 %vm527_vm2, %v4704_v33  ;;  %4670 = vst.msk [vmem:[#allocation2 + $0xd3] sm:$0xff] %vm527_vm2, %v4627_v42  ;;  %v5011_v34 = vld [vmem:[#allocation2 + $0xb9] sm:$0xff]  ;;  %v5012_v53 = vld [vmem:[#allocation2 + $0xc1] sm:$0xff]  ;;  %v11940_v44 = vmax.f32 %v3694_v43, %v3730_v26 }
 0x3d2   : > { %4671 = vst.msk [vmem:[#allocation2 + $0xdb] sm:$0xff] %vm527_vm2, %v4628_v24  ;;  %9278 = vmatmul.msk.f32.gmra.mxu2 %vm527_vm2, %v5010_v13  ;;  %v5390_v11 = vld [vmem:[#allocation2 + $0xba] sm:$0xff]  ;;  %v5391_v47 = vld [vmem:[#allocation2 + $0xc2] sm:$0xff] }
 0x3d3   : > { %9315 = vmatmul.msk.f32.gmra.mxu3 %vm527_vm2, %v5389_v12  ;;  %v6026_v23 = vld [vmem:[#allocation3 + $0x48] sm:$0xff]  ;;  %v3802_v27 = vmul.f32 %v11940_v44, %v11940_v44 }
 0x3d4   : > { %9350 = vmatmul.msk.f32.gmra.mxu0 %vm527_vm2, %v5389_v12 }
 0x3d5   : > { %v3906_v19 = vsel %vm527_vm2, %v3802_v27, 0.0 }
 0x3d7   : > { %v4707_v58 = vld [vmem:[#allocation2 + $0xc8] sm:$0xff] }
 0x3d8   : > { %v5013_v3 = vld [vmem:[#allocation2 + $0xc9] sm:$0xff]  ;;  %v5014_v9 = vld [vmem:[#allocation2 + $0xd1] sm:$0xff] }
 0x3d9   : > { %9242 = vmatmul.msk.f32.gmra.mxu1 %vm527_vm2, %v4705_v55  ;;  %v5392_v48 = vld [vmem:[#allocation2 + $0xca] sm:$0xff]  ;;  %v5393_v28 = vld [vmem:[#allocation2 + $0xd2] sm:$0xff] }
 0x3da   : > { %9279 = vmatmul.msk.f32.gmra.mxu2 %vm527_vm2, %v5011_v34  ;;  %v4708_v50 = vld [vmem:[#allocation2 + $0xd0] sm:$0xff]  ;;  %v4709_v43 = vld [vmem:[#allocation2 + $0xd8] sm:$0xff] }
 0x3db   : > { %9316 = vmatmul.msk.f32.gmra.mxu3 %vm527_vm2, %v5390_v11 }
 0x3dc   : > { %9351 = vmatmul.msk.f32.gmra.mxu0 %vm527_vm2, %v5390_v11  ;;  %v4561_v11 = vpop.permute.xlu0 %4560 }
 0x3e0   : > { %v4874_v38 = vpop.f32.mrf.mxu1 }
 0x3e1   : > { %4962 = vst.msk [vmem:[#allocation3 + $0x50] sm:$0xff] %vm527_vm2, %v4874_v38  ;;  %v3887_v62 = vpop.xlane.xlu2 %3886  ;;  %9243 = vmatmul.msk.f32.gmra.mxu1 %vm527_vm2, %v4706_v40 }
 0x3e2   : > { %v5933_v54 = vpop.f32.mrf.mxu0  ;;  %v3946_v52 = vmul.f32 %v11146_v29, %v3887_v62  ;;  %9280 = vmatmul.msk.f32.gmra.mxu2 %vm527_vm2, %v5012_v53 }
 0x3e3   : > { %v6061_v63 = vadd.f32 %v6025_v39, %v5933_v54  ;;  %9317 = vmatmul.msk.f32.gmra.mxu3 %vm527_vm2, %v5391_v47  ;;  %v5015_v39 = vld [vmem:[#allocation2 + $0xd9] sm:$0xff] }
 0x3e4   : > { %v3982_v14 = vadd.f32 1e-08, %v3946_v52  ;;  %9352 = vmatmul.msk.f32.gmra.mxu0 %vm527_vm2, %v5391_v47  ;;  %v5394_v52 = vld [vmem:[#allocation2 + $0xda] sm:$0xff]  ;;  %v11985_v27 = vpop.permute.xlu0 %4565 }
 0x3e5   : > { %6097 = vst.msk [vmem:[#allocation3 + $0x40] sm:$0xff] %vm527_vm2, %v6061_v63 }
 0x3e6   : > { %9627 = vrsqrt.f32 %v3982_v14  ;;  %vm4267_vm9 = vweird.f32 %v3982_v14 }
 0x3e7   : > { %v5181_v2 = vpop.f32.mrf.mxu2 }
 0x3e8   : > { %v5560_v25 = vpop.f32.mrf.mxu3  ;;  %v5269_v57 = vld [vmem:[#allocation3 + $0x50] sm:$0xff]  ;;  %v4877_v31 = vpop.f32.mrf.mxu1 }
 0x3e9   : > { %v5305_v32 = vadd.f32 %v5269_v57, %v5181_v2  ;;  %4963 = vst.msk [vmem:[#allocation3 + $0x58] sm:$0xff] %vm527_vm2, %v4877_v31  ;;  %v3896_v37 = vpop.xlane.xlu2 %3895  ;;  %9244 = vmatmul.msk.f32.gmra.mxu1 %vm527_vm2, %v4707_v58 }
 0x3ea   : > { %v5936_v51 = vpop.f32.mrf.mxu0  ;;  %v3949_v59 = vmul.f32 %v11146_v29, %v3896_v37  ;;  %9281 = vmatmul.msk.f32.gmra.mxu2 %vm527_vm2, %v5013_v3 }
 0x3eb   : > { %v6062_v10 = vadd.f32 %v6026_v23, %v5936_v51  ;;  %5341 = vst.msk [vmem:[#allocation3 + $0x50] sm:$0xff] %vm527_vm2, %v5305_v32  ;;  %9318 = vmatmul.msk.f32.gmra.mxu3 %vm527_vm2, %v5392_v48 }
 0x3ec   : > { %v9628_v15 = vpop.eup %9627  ;;  %9353 = vmatmul.msk.f32.gmra.mxu0 %vm527_vm2, %v5392_v48  ;;  %v11952_v6 = vadd.f32 1e-08, %v3949_v59 }
 0x3ed   : > { %6098 = vst.msk [vmem:[#allocation3 + $0x48] sm:$0xff] %vm527_vm2, %v6062_v10  ;;  %v4262_v41 = vmul.f32 %v9628_v15, %v3982_v14  ;;  %vm4268_vm8 = vweird.f32 %v9628_v15 }
 0x3ee   : > { %3907 = vadd.xlane.f32.xlu0 %v3906_v19  ;;  %9629 = vrsqrt.f32 %v11952_v6  ;;  %vm4269_vm10 = vmor %vm4267_vm9, %vm4268_vm8  ;;  %vm4297_vm12 = vweird.f32 %v11952_v6 }
 0x3ef   : > { %v4263_v61 = vmul.f32 %v9628_v15, %v4262_v41  ;;  %v5184_v45 = vpop.f32.mrf.mxu2 }
 0x3f0   : > { %v5270_v22 = vld [vmem:[#allocation3 + $0x58] sm:$0xff]  ;;  %v5563_v20 = vpop.f32.mrf.mxu3 }
 0x3f1   : > { %v4264_v16 = vmul.f32 0.5, %v4263_v61  ;;  %v5306_v1 = vadd.f32 %v5270_v22, %v5184_v45  ;;  %v3899_v30 = vpop.xlane.xlu2 %3898  ;;  %9245 = vmatmul.msk.f32.gmra.mxu1 %vm527_vm2, %v4708_v50 }
 0x3f2   : > { %v5648_v36 = vld [vmem:[#allocation3 + $0x50] sm:$0xff]  ;;  %v4880_v8 = vpop.f32.mrf.mxu1  ;;  %9282 = vmatmul.msk.f32.gmra.mxu2 %vm527_vm2, %v5014_v9 }
 0x3f3   : > { %v4265_v18 = vsub.f32 1.5, %v4264_v16  ;;  %v5684_v42 = vadd.f32 %v5648_v36, %v5560_v25  ;;  %5342 = vst.msk [vmem:[#allocation3 + $0x58] sm:$0xff] %vm527_vm2, %v5306_v1  ;;  %9319 = vmatmul.msk.f32.gmra.mxu3 %vm527_vm2, %v5393_v28 }
 0x3f4   : > { %v5939_v24 = vpop.f32.mrf.mxu0  ;;  %9354 = vmatmul.msk.f32.gmra.mxu0 %vm527_vm2, %v5393_v28  ;;  %4964 = vst.msk [vmem:[#allocation3 + $0x60] sm:$0xff] %vm527_vm2, %v4880_v8  ;;  %v11965_v13 = vpop.eup %9629 }
 0x3f5   : > { %v4266_v33 = vmul.f32 %v9628_v15, %v4265_v18  ;;  %5720 = vst.msk [vmem:[#allocation3 + $0x50] sm:$0xff] %vm527_vm2, %v5684_v42  ;;  %v4292_v62 = vmul.f32 %v11965_v13, %v11952_v6  ;;  %vm4298_vm11 = vweird.f32 %v11965_v13 }
 0x3f6   : > { %vm12001_vm14 = vmor %vm4297_vm12, %vm4298_vm11 }
 0x3f7   : > { %v4270_v12 = vsel %vm4269_vm10, %v9628_v15, %v4266_v33  ;;  %v4293_v32 = vmul.f32 %v11965_v13, %v4292_v62  ;;  %v3950_v15 = vmul.f32 %v11146_v29, %v3899_v30 }
 0x3f8   : > { %v4378_v55 = vmul.f32 %v4270_v12, %v11564_v21 }
 0x3f9   : > { %v5187_v34 = vpop.f32.mrf.mxu2  ;;  %v3902_v54 = vpop.xlane.xlu2 %3901  ;;  %9246 = vmatmul.msk.f32.gmra.mxu1 %vm527_vm2, %v4709_v43  ;;  %v4294_v37 = vmul.f32 0.5, %v4293_v32  ;;  %v11991_v28 = vadd.f32 1e-08, %v3950_v15 }
 0x3fa   : > { %v5566_v0 = vpop.f32.mrf.mxu3  ;;  %v4630_v38 = vmul.f32 %v4561_v11, %v4378_v55  ;;  %v5649_v40 = vld [vmem:[#allocation3 + $0x58] sm:$0xff]  ;;  %v3951_v63 = vmul.f32 %v11146_v29, %v3902_v54  ;;  %9283 = vmatmul.msk.f32.gmra.mxu2 %vm527_vm2, %v5015_v39  ;;  %v4883_v21 = vpop.f32.mrf.mxu1 }
 0x3fb   : > { %v5685_v53 = vadd.f32 %v5649_v40, %v5563_v20  ;;  %v5271_v47 = vld [vmem:[#allocation3 + $0x60] sm:$0xff]  ;;  %9320 = vmatmul.msk.f32.gmra.mxu3 %vm527_vm2, %v5394_v52  ;;  %v3893_v2 = vpop.xlane.xlu1 %3892  ;;  %4965 = vst.msk [vmem:[#allocation3 + $0x68] sm:$0xff] %vm527_vm2, %v4883_v21  ;;  %v4295_v19 = vsub.f32 1.5, %v4294_v37  ;;  %vm4307_vm11 = vweird.f32 %v11991_v28 }
 0x3fc   : > { %4673 = vst.msk [vmem:[#allocation2 + $0xeb] sm:$0xff] %vm527_vm2, %v4630_v38  ;;  %v6027_v26 = vld [vmem:[#allocation3 + $0x50] sm:$0xff]  ;;  %v5307_v14 = vadd.f32 %v5271_v47, %v5187_v34  ;;  %9355 = vmatmul.msk.f32.gmra.mxu0 %vm527_vm2, %v5394_v52  ;;  %v5942_v25 = vpop.f32.mrf.mxu0  ;;  %v3987_v31 = vadd.f32 1e-08, %v3951_v63  ;;  %v3948_v58 = vmul.f32 %v11146_v29, %v3893_v2 }
 0x3fd   : > { %5721 = vst.msk [vmem:[#allocation3 + $0x58] sm:$0xff] %vm527_vm2, %v5685_v53  ;;  %v6063_v57 = vadd.f32 %v6027_v26, %v5939_v24  ;;  %v4296_v8 = vmul.f32 %v11965_v13, %v4295_v19 }
 0x3fe   : > { %5343 = vst.msk [vmem:[#allocation3 + $0x60] sm:$0xff] %vm527_vm2, %v5307_v14  ;;  %9631 = vrsqrt.f32 %v3987_v31  ;;  %v11982_v3 = vadd.f32 1e-08, %v3948_v58  ;;  %vm4317_vm15 = vweird.f32 %v3987_v31 }
 0x3ff   : > { %6099 = vst.msk [vmem:[#allocation3 + $0x50] sm:$0xff] %vm527_vm2, %v6063_v57  ;;  %v4300_v43 = vsel %vm12001_vm14, %v11965_v13, %v4296_v8 }
 0x400   : > { %9633 = vrsqrt.f32 %v11982_v3  ;;  %v4381_v26 = vmul.f32 %v4300_v43, %v11607_v60  ;;  %vm4287_vm5 = vweird.f32 %v11982_v3 }
 0x401   : > { %v5190_v51 = vpop.f32.mrf.mxu2  ;;  %v3905_v36 = vpop.xlane.xlu2 %3904  ;;  %9635 = vrsqrt.f32 %v11991_v28 }
 0x402   : > { %v5569_v23 = vpop.f32.mrf.mxu3  ;;  %v4886_v48 = vpop.f32.mrf.mxu1  ;;  %v5272_v1 = vld [vmem:[#allocation3 + $0x68] sm:$0xff]  ;;  %v3952_v38 = vmul.f32 %v11146_v29, %v3905_v36 }
 0x403   : > { %4966 = vst.msk [vmem:[#allocation3 + $0x70] sm:$0xff] %vm527_vm2, %v4886_v48  ;;  %v5308_v50 = vadd.f32 %v5272_v1, %v5190_v51 }
 0x404   : > { %v6028_v10 = vld [vmem:[#allocation3 + $0x58] sm:$0xff]  ;;  %v9632_v59 = vpop.eup %9631  ;;  %v5945_v16 = vpop.f32.mrf.mxu0  ;;  %v12021_v57 = vadd.f32 1e-08, %v3952_v38 }
 0x405   : > { %v5650_v41 = vld [vmem:[#allocation3 + $0x60] sm:$0xff]  ;;  %v6064_v61 = vadd.f32 %v6028_v10, %v5942_v25  ;;  %v4312_v22 = vmul.f32 %v9632_v59, %v3987_v31  ;;  %5344 = vst.msk [vmem:[#allocation3 + $0x68] sm:$0xff] %vm527_vm2, %v5308_v50  ;;  %vm4318_vm13 = vweird.f32 %v9632_v59 }
 0x406   : > { %v5686_v45 = vadd.f32 %v5650_v41, %v5566_v0  ;;  %v11998_v55 = vpop.eup %9633  ;;  %vm4319_vm0 = vmor %vm4317_vm15, %vm4318_vm13  ;;  %vm4327_vm15 = vweird.f32 %v12021_v57 }
 0x407   : > { %6100 = vst.msk [vmem:[#allocation3 + $0x58] sm:$0xff] %vm527_vm2, %v6064_v61  ;;  %v4313_v20 = vmul.f32 %v9632_v59, %v4312_v22  ;;  %v4282_v40 = vmul.f32 %v11998_v55, %v11982_v3  ;;  %v12019_v25 = vpop.eup %9635  ;;  %vm4288_vm3 = vweird.f32 %v11998_v55 }
 0x408   : > { %5722 = vst.msk [vmem:[#allocation3 + $0x60] sm:$0xff] %vm527_vm2, %v5686_v45  ;;  %v4302_v15 = vmul.f32 %v12019_v25, %v11991_v28  ;;  %vm4289_vm7 = vmor %vm4287_vm5, %vm4288_vm3  ;;  %vm4308_vm9 = vweird.f32 %v12019_v25 }
 0x409   : > { %v5193_v9 = vpop.f32.mrf.mxu2  ;;  %v4314_v30 = vmul.f32 0.5, %v4313_v20  ;;  %v4586_v13 = vpop.permute.xlu2 %4585  ;;  %v4283_v37 = vmul.f32 %v11998_v55, %v4282_v40  ;;  %vm4309_vm13 = vmor %vm4307_vm11, %vm4308_vm9 }
 0x40a   : > { %v5273_v18 = vld [vmem:[#allocation3 + $0x70] sm:$0xff]  ;;  %v5572_v42 = vpop.f32.mrf.mxu3  ;;  %v4889_v24 = vpop.f32.mrf.mxu1  ;;  %v4303_v1 = vmul.f32 %v12019_v25, %v4302_v15 }
 0x40b   : > { %v4315_v33 = vsub.f32 1.5, %v4314_v30  ;;  %v5309_v12 = vadd.f32 %v5273_v18, %v5193_v9  ;;  %4967 = vst.msk [vmem:[#allocation3 + $0x78] sm:$0xff] %vm527_vm2, %v4889_v24  ;;  %v3884_v34 = vpop.xlane.xlu0 %3883  ;;  %v4284_v61 = vmul.f32 0.5, %v4283_v37 }
 0x40c   : > { %v3945_v6 = vmul.f32 %v11146_v29, %v3884_v34  ;;  %v5948_v52 = vpop.f32.mrf.mxu0  ;;  %v5651_v63 = vld [vmem:[#allocation3 + $0x68] sm:$0xff] }
 0x40d   : > { %5345 = vst.msk [vmem:[#allocation3 + $0x70] sm:$0xff] %vm527_vm2, %v5309_v12  ;;  %v4316_v0 = vmul.f32 %v9632_v59, %v4315_v33  ;;  %v5687_v14 = vadd.f32 %v5651_v63, %v5569_v23  ;;  %v4285_v9 = vsub.f32 1.5, %v4284_v61  ;;  %v4304_v33 = vmul.f32 0.5, %v4303_v1 }
 0x40e   : > { %v12013_v53 = vadd.f32 1e-08, %v3945_v6 }
 0x40f   : > { %v6029_v62 = vld [vmem:[#allocation3 + $0x60] sm:$0xff]  ;;  %v4320_v39 = vsel %vm4319_vm0, %v9632_v59, %v4316_v0  ;;  %5723 = vst.msk [vmem:[#allocation3 + $0x68] sm:$0xff] %vm527_vm2, %v5687_v14  ;;  %v4286_v40 = vmul.f32 %v11998_v55, %v4285_v9 }
 0x410   : > { %v6065_v54 = vadd.f32 %v6029_v62, %v5945_v16  ;;  %v4383_v21 = vmul.f32 %v4320_v39, %v11668_v17  ;;  %9637 = vrsqrt.f32 %v12013_v53  ;;  %vm4257_vm4 = vweird.f32 %v12013_v53 }
 0x411   : > { %v5196_v47 = vpop.f32.mrf.mxu2  ;;  %9639 = vrsqrt.f32 %v12021_v57  ;;  %v4290_v3 = vsel %vm4289_vm7, %v11998_v55, %v4286_v40 }
 0x412   : > { %6101 = vst.msk [vmem:[#allocation3 + $0x60] sm:$0xff] %vm527_vm2, %v6065_v54  ;;  %v4635_v31 = vmul.f32 %v4586_v13, %v4383_v21  ;;  %v5274_v32 = vld [vmem:[#allocation3 + $0x78] sm:$0xff]  ;;  %v4892_v51 = vpop.f32.mrf.mxu1  ;;  %v5575_v23 = vpop.f32.mrf.mxu3 }
 0x413   : > { %v4576_v2 = vpop.permute.xlu1 %4575  ;;  %v5310_v60 = vadd.f32 %v5274_v32, %v5196_v47  ;;  %v3890_v48 = vpop.xlane.xlu0 %3889  ;;  %4968 = vst.msk [vmem:[#allocation3 + $0x80] sm:$0xff] %vm527_vm2, %v4892_v51  ;;  %v4305_v47 = vsub.f32 1.5, %v4304_v33 }
 0x414   : > { %v4633_v58 = vmul.f32 %v4576_v2, %v4381_v26  ;;  %v5652_v17 = vld [vmem:[#allocation3 + $0x70] sm:$0xff]  ;;  %4678 = vst.msk [vmem:[#allocation2 + $0x113] sm:$0xff] %vm527_vm2, %v4635_v31  ;;  %v3947_v59 = vmul.f32 %v11146_v29, %v3890_v48  ;;  %v5951_v16 = vpop.f32.mrf.mxu0 }
 0x415   : > { %v5688_v10 = vadd.f32 %v5652_v17, %v5572_v42  ;;  %5346 = vst.msk [vmem:[#allocation3 + $0x78] sm:$0xff] %vm527_vm2, %v5310_v60  ;;  %v4380_v60 = vmul.f32 %v4290_v3, %v11663_v35  ;;  %v4306_v48 = vmul.f32 %v12019_v25, %v4305_v47 }
 0x416   : > { %4676 = vst.msk [vmem:[#allocation2 + $0x103] sm:$0xff] %vm527_vm2, %v4633_v58  ;;  %v9638_v41 = vpop.eup %9637  ;;  %v12033_v19 = vadd.f32 1e-08, %v3947_v59  ;;  %v6030_v20 = vld [vmem:[#allocation3 + $0x68] sm:$0xff] }
 0x417   : > { %5724 = vst.msk [vmem:[#allocation3 + $0x70] sm:$0xff] %vm527_vm2, %v5688_v10  ;;  %v4252_v22 = vmul.f32 %v9638_v41, %v12013_v53  ;;  %v6066_v30 = vadd.f32 %v6030_v20, %v5948_v52  ;;  %v12040_v8 = vpop.eup %9639  ;;  %vm4258_vm1 = vweird.f32 %v9638_v41  ;;  %v4310_v28 = vsel %vm4309_vm13, %v12019_v25, %v4306_v48 }
 0x418   : > { %9641 = vrsqrt.f32 %v12033_v19  ;;  %v4322_v6 = vmul.f32 %v12040_v8, %v12021_v57  ;;  %vm4259_vm6 = vmor %vm4257_vm4, %vm4258_vm1  ;;  %vm4277_vm10 = vweird.f32 %v12033_v19  ;;  %v4382_v9 = vmul.f32 %v4310_v28, %v11645_v5 }
 0x419   : > { %v5199_v45 = vpop.f32.mrf.mxu2  ;;  %v4253_v50 = vmul.f32 %v9638_v41, %v4252_v22  ;;  %6102 = vst.msk [vmem:[#allocation3 + $0x68] sm:$0xff] %vm527_vm2, %v6066_v30  ;;  %vm4328_vm14 = vweird.f32 %v12040_v8 }
 0x41a   : > { %v4895_v36 = vpop.f32.mrf.mxu1  ;;  %v5578_v11 = vpop.f32.mrf.mxu3  ;;  %v5275_v38 = vld [vmem:[#allocation3 + $0x80] sm:$0xff]  ;;  %v4323_v13 = vmul.f32 %v12040_v8, %v4322_v6  ;;  %vm4329_vm0 = vmor %vm4327_vm15, %vm4328_vm14 }
 0x41b   : > { %4969 = vst.msk [vmem:[#allocation3 + $0x88] sm:$0xff] %vm527_vm2, %v4895_v36  ;;  %v4254_v18 = vmul.f32 0.5, %v4253_v50  ;;  %v5311_v52 = vadd.f32 %v5275_v38, %v5199_v45 }
 0x41c   : > { %v5653_v42 = vld [vmem:[#allocation3 + $0x78] sm:$0xff]  ;;  %v5954_v2 = vpop.f32.mrf.mxu0  ;;  %v4324_v17 = vmul.f32 0.5, %v4323_v13 }
 0x41d   : > { %v5689_v24 = vadd.f32 %v5653_v42, %v5575_v23  ;;  %v4255_v12 = vsub.f32 1.5, %v4254_v18  ;;  %5347 = vst.msk [vmem:[#allocation3 + $0x80] sm:$0xff] %vm527_vm2, %v5311_v52 }
 0x41e   : > { %v6031_v34 = vld [vmem:[#allocation3 + $0x70] sm:$0xff]  ;;  %v9642_v0 = vpop.eup %9641 }
 0x41f   : > { %5725 = vst.msk [vmem:[#allocation3 + $0x78] sm:$0xff] %vm527_vm2, %v5689_v24  ;;  %v6067_v43 = vadd.f32 %v6031_v34, %v5951_v16  ;;  %v4256_v54 = vmul.f32 %v9638_v41, %v4255_v12  ;;  %v4272_v39 = vmul.f32 %v9642_v0, %v12033_v19  ;;  %vm4278_vm8 = vweird.f32 %v9642_v0 }
 0x420   : > { %vm4279_vm12 = vmor %vm4277_vm10, %vm4278_vm8  ;;  %v4325_v19 = vsub.f32 1.5, %v4324_v17 }
 0x421   : > { %v5202_v62 = vpop.f32.mrf.mxu2  ;;  %6103 = vst.msk [vmem:[#allocation3 + $0x70] sm:$0xff] %vm527_vm2, %v6067_v43  ;;  %v4260_v63 = vsel %vm4259_vm6, %v9638_v41, %v4256_v54  ;;  %v4273_v21 = vmul.f32 %v9642_v0, %v4272_v39 }
 0x422   : > { %v5276_v26 = vld [vmem:[#allocation3 + $0x88] sm:$0xff]  ;;  %v4898_v14 = vpop.f32.mrf.mxu1  ;;  %v4377_v53 = vmul.f32 %v4260_v63, %v11709_v56  ;;  %v4326_v25 = vmul.f32 %v12040_v8, %v4325_v19  ;;  %v12118_v19 = vpop.permute.xlu2 %4595 }
 0x423   : > { %v5312_v31 = vadd.f32 %v5276_v26, %v5202_v62  ;;  %4970 = vst.msk [vmem:[#allocation3 + $0x90] sm:$0xff] %vm527_vm2, %v4898_v14  ;;  %v4274_v32 = vmul.f32 0.5, %v4273_v21 }
 0x424   : > { %v4629_v58 = vmul.f32 %v11954_v7, %v4377_v53  ;;  %v5581_v7 = vpop.f32.mrf.mxu3  ;;  %v5654_v35 = vld [vmem:[#allocation3 + $0x80] sm:$0xff]  ;;  %v5957_v36 = vpop.f32.mrf.mxu0 }
 0x425   : > { %5348 = vst.msk [vmem:[#allocation3 + $0x88] sm:$0xff] %vm527_vm2, %v5312_v31  ;;  %v4275_v51 = vsub.f32 1.5, %v4274_v32  ;;  %v5690_v41 = vadd.f32 %v5654_v35, %v5578_v11  ;;  %v4330_v11 = vsel %vm4329_vm0, %v12040_v8, %v4326_v25 }
 0x426   : > { %v6032_v37 = vld [vmem:[#allocation3 + $0x78] sm:$0xff]  ;;  %4672 = vst.msk [vmem:[#allocation2 + $0xe3] sm:$0xff] %vm527_vm2, %v4629_v58  ;;  %v4571_v23 = vpop.permute.xlu0 %4570  ;;  %v4384_v38 = vmul.f32 %v4330_v11, %v11689_v4  ;;  %v9403_v4 = vld [vmem:[%s12972_s3 + $0x28] sm:$0xff] }
 0x427   : > { %v6068_v56 = vadd.f32 %v6032_v37, %v5954_v2  ;;  %v4276_v55 = vmul.f32 %v9642_v0, %v4275_v51  ;;  %v4632_v10 = vmul.f32 %v4571_v23, %v4380_v60  ;;  %5726 = vst.msk [vmem:[#allocation3 + $0x80] sm:$0xff] %vm527_vm2, %v5690_v41  ;;  %6665 = vmatpush.msra.mxu2 %v9403_v4  ;;  %v9440_v60 = vld [vmem:[%s12972_s3 + $0x30] sm:$0xff]  ;;  %v9477_v4 = vld [vmem:[%s12972_s3 + $0x38] sm:$0xff] }
 0x428   : > { %7044 = vmatpush.msra.mxu3 %v9440_v60  ;;  %7423 = vmatpush.msra.mxu0 %v9477_v4 }
 0x429   : > { %v5205_v59 = vpop.f32.mrf.mxu2  ;;  %6104 = vst.msk [vmem:[#allocation3 + $0x78] sm:$0xff] %vm527_vm2, %v6068_v56  ;;  %v4280_v15 = vsel %vm4279_vm12, %v9642_v0, %v4276_v55 }
 0x42a   : > { %4675 = vst.msk [vmem:[#allocation2 + $0xfb] sm:$0xff] %vm527_vm2, %v4632_v10  ;;  %v5277_v61 = vld [vmem:[#allocation3 + $0x90] sm:$0xff]  ;;  %v4901_v45 = vpop.f32.mrf.mxu1  ;;  %v4379_v22 = vmul.f32 %v4280_v15, %v11725_v49 }
 0x42b   : > { %v5313_v16 = vadd.f32 %v5277_v61, %v5205_v59  ;;  %4971 = vst.msk [vmem:[#allocation3 + $0x98] sm:$0xff] %vm527_vm2, %v4901_v45 }
 0x42c   : > { %v5655_v1 = vld [vmem:[#allocation3 + $0x88] sm:$0xff]  ;;  %v4631_v20 = vmul.f32 %v11985_v27, %v4379_v22  ;;  %v5584_v5 = vpop.f32.mrf.mxu3  ;;  %v5960_v40 = vpop.f32.mrf.mxu0 }
 0x42d   : > { %v5691_v50 = vadd.f32 %v5655_v1, %v5581_v7  ;;  %5349 = vst.msk [vmem:[#allocation3 + $0x90] sm:$0xff] %vm527_vm2, %v5313_v16  ;;  %v4710_v30 = vld [vmem:[#allocation2 + $0xe0] sm:$0xff]  ;;  %v4711_v57 = vld [vmem:[#allocation2 + $0xe8] sm:$0xff] }
 0x42e   : > { %v5016_v18 = vld [vmem:[#allocation2 + $0xe1] sm:$0xff]  ;;  %4674 = vst.msk [vmem:[#allocation2 + $0xf3] sm:$0xff] %vm527_vm2, %v4631_v20  ;;  %v4581_v49 = vpop.permute.xlu0 %4580  ;;  %9247 = vmatmul.msk.f32.gmra.mxu1 %vm527_vm2, %v4710_v30  ;;  %v5017_v62 = vld [vmem:[#allocation2 + $0xe9] sm:$0xff] }
 0x42f   : > { %v5395_v42 = vld [vmem:[#allocation2 + $0xe2] sm:$0xff]  ;;  %9284 = vmatmul.msk.f32.gmra.mxu2 %vm527_vm2, %v5016_v18  ;;  %5727 = vst.msk [vmem:[#allocation3 + $0x88] sm:$0xff] %vm527_vm2, %v5691_v50  ;;  %v4634_v27 = vmul.f32 %v4581_v49, %v4382_v9  ;;  %v5396_v8 = vld [vmem:[#allocation2 + $0xea] sm:$0xff] }
 0x430   : > { %9321 = vmatmul.msk.f32.gmra.mxu3 %vm527_vm2, %v5395_v42  ;;  %9356 = vmatmul.msk.f32.gmra.mxu0 %vm527_vm2, %v5395_v42  ;;  %v6033_v12 = vld [vmem:[#allocation3 + $0x80] sm:$0xff] }
 0x431   : > { %4677 = vst.msk [vmem:[#allocation2 + $0x10b] sm:$0xff] %vm527_vm2, %v4634_v27  ;;  %v5208_v24 = vpop.f32.mrf.mxu2  ;;  %v6069_v0 = vadd.f32 %v6033_v12, %v5957_v36  ;;  %v4714_v9 = vld [vmem:[#allocation2 + $0x100] sm:$0xff]  ;;  %v4601_v12 = vpop.permute.xlu2 %4600 }
 0x432   : > { %v5278_v33 = vld [vmem:[#allocation3 + $0x98] sm:$0xff] }
 0x433   : > { %v5314_v34 = vadd.f32 %v5278_v33, %v5208_v24  ;;  %6105 = vst.msk [vmem:[#allocation3 + $0x80] sm:$0xff] %vm527_vm2, %v6069_v0  ;;  %v5020_v30 = vld [vmem:[#allocation2 + $0x101] sm:$0xff] }
 0x434   : > { %v5656_v6 = vld [vmem:[#allocation3 + $0x90] sm:$0xff]  ;;  %v5587_v63 = vpop.f32.mrf.mxu3  ;;  %v5399_v42 = vld [vmem:[#allocation2 + $0x102] sm:$0xff] }
 0x435   : > { %v5692_v43 = vadd.f32 %v5656_v6, %v5584_v5  ;;  %5350 = vst.msk [vmem:[#allocation3 + $0x98] sm:$0xff] %vm527_vm2, %v5314_v34  ;;  %v4712_v31 = vld [vmem:[#allocation2 + $0xf0] sm:$0xff]  ;;  %v4713_v55 = vld [vmem:[#allocation2 + $0xf8] sm:$0xff] }
 0x436   : > { %v6034_v54 = vld [vmem:[#allocation3 + $0x88] sm:$0xff]  ;;  %v4591_v39 = vpop.permute.xlu0 %4590  ;;  %9248 = vmatmul.msk.f32.gmra.mxu1 %vm527_vm2, %v4711_v57  ;;  %v5019_v7 = vld [vmem:[#allocation2 + $0xf9] sm:$0xff] }
 0x437   : > { %5728 = vst.msk [vmem:[#allocation3 + $0x90] sm:$0xff] %vm527_vm2, %v5692_v43  ;;  %9285 = vmatmul.msk.f32.gmra.mxu2 %vm527_vm2, %v5017_v62  ;;  %v6070_v52 = vadd.f32 %v6034_v54, %v5960_v40  ;;  %v4636_v47 = vmul.f32 %v4591_v39, %v4384_v38  ;;  %v5018_v3 = vld [vmem:[#allocation2 + $0xf1] sm:$0xff]  ;;  %v5398_v35 = vld [vmem:[#allocation2 + $0xfa] sm:$0xff] }
 0x438   : > { %9322 = vmatmul.msk.f32.gmra.mxu3 %vm527_vm2, %v5396_v8  ;;  %9357 = vmatmul.msk.f32.gmra.mxu0 %vm527_vm2, %v5396_v8  ;;  %v5397_v58 = vld [vmem:[#allocation2 + $0xf2] sm:$0xff]  ;;  %v4715_v38 = vld [vmem:[#allocation2 + $0x108] sm:$0xff] }
 0x439   : > { %6106 = vst.msk [vmem:[#allocation3 + $0x88] sm:$0xff] %vm527_vm2, %v6070_v52  ;;  %v5021_v57 = vld [vmem:[#allocation2 + $0x109] sm:$0xff] }
 0x43a   : > { %4679 = vst.msk [vmem:[#allocation2 + $0x11b] sm:$0xff] %vm527_vm2, %v4636_v47  ;;  %v5400_v40 = vld [vmem:[#allocation2 + $0x10a] sm:$0xff] }
 0x43c   : > { %v5657_v21 = vld [vmem:[#allocation3 + $0x98] sm:$0xff] }
 0x43d   : > { %v5693_v14 = vadd.f32 %v5657_v21, %v5587_v63  ;;  %v4716_v21 = vld [vmem:[#allocation2 + $0x110] sm:$0xff] }
 0x43e   : > { %v3911_v26 = vpop.xlane.xlu1 %3910  ;;  %v4904_v53 = vpop.f32.mrf.mxu1  ;;  %v6035_v2 = vld [vmem:[#allocation3 + $0x90] sm:$0xff]  ;;  %9249 = vmatmul.msk.f32.gmra.mxu1 %vm527_vm2, %v4712_v31 }
 0x43f   : > { %v3954_v13 = vmul.f32 %v11146_v29, %v3911_v26  ;;  %5729 = vst.msk [vmem:[#allocation3 + $0x98] sm:$0xff] %vm527_vm2, %v5693_v14  ;;  %9286 = vmatmul.msk.f32.gmra.mxu2 %vm527_vm2, %v5018_v3  ;;  %v5022_v26 = vld [vmem:[#allocation2 + $0x111] sm:$0xff]  ;;  %v9514_v14 = vld [vmem:[%s12972_s3 + $0x40] sm:$0xff] }
 0x440   : > { %4972 = vst.msk [vmem:[#allocation3 + $0xa0] sm:$0xff] %vm527_vm2, %v4904_v53  ;;  %v5963_v51 = vpop.f32.mrf.mxu0  ;;  %9323 = vmatmul.msk.f32.gmra.mxu3 %vm527_vm2, %v5397_v58  ;;  %9358 = vmatmul.msk.f32.gmra.mxu0 %vm527_vm2, %v5397_v58  ;;  %v5401_v53 = vld [vmem:[#allocation2 + $0x112] sm:$0xff] }
 0x441   : > { %v3990_v32 = vadd.f32 1e-08, %v3954_v13  ;;  %v6071_v37 = vadd.f32 %v6035_v2, %v5963_v51  ;;  %7802 = vmatpush.msra.mxu1 %v9514_v14 }
 0x443   : > { %9643 = vrsqrt.f32 %v3990_v32  ;;  %6107 = vst.msk [vmem:[#allocation3 + $0x90] sm:$0xff] %vm527_vm2, %v6071_v37  ;;  %vm4347_vm3 = vweird.f32 %v3990_v32 }
 0x445   : > { %v5211_v17 = vpop.f32.mrf.mxu2 }
 0x446   : > { %v5590_v56 = vpop.f32.mrf.mxu3  ;;  %v4907_v23 = vpop.f32.mrf.mxu1  ;;  %v6036_v48 = vld [vmem:[#allocation3 + $0x98] sm:$0xff]  ;;  %9250 = vmatmul.msk.f32.gmra.mxu1 %vm527_vm2, %v4713_v55 }
 0x447   : > { %v5279_v59 = vld [vmem:[#allocation3 + $0xa0] sm:$0xff]  ;;  %4973 = vst.msk [vmem:[#allocation3 + $0xa8] sm:$0xff] %vm527_vm2, %v4907_v23  ;;  %9287 = vmatmul.msk.f32.gmra.mxu2 %vm527_vm2, %v5019_v7  ;;  %v4717_v7 = vld [vmem:[#allocation2 + $0x118] sm:$0xff] }
 0x448   : > { %v5315_v41 = vadd.f32 %v5279_v59, %v5211_v17  ;;  %9324 = vmatmul.msk.f32.gmra.mxu3 %vm527_vm2, %v5398_v35  ;;  %9359 = vmatmul.msk.f32.gmra.mxu0 %vm527_vm2, %v5398_v35  ;;  %v5402_v35 = vld [vmem:[#allocation2 + $0x11a] sm:$0xff] }
 0x449   : > { %v9644_v10 = vpop.eup %9643  ;;  %v5966_v61 = vpop.f32.mrf.mxu0 }
 0x44a   : > { %v4342_v15 = vmul.f32 %v9644_v10, %v3990_v32  ;;  %v6072_v45 = vadd.f32 %v6036_v48, %v5966_v61  ;;  %5351 = vst.msk [vmem:[#allocation3 + $0xa0] sm:$0xff] %vm527_vm2, %v5315_v41  ;;  %vm4348_vm1 = vweird.f32 %v9644_v10 }
 0x44b   : > { %vm4349_vm4 = vmor %vm4347_vm3, %vm4348_vm1 }
 0x44c   : > { %v4343_v22 = vmul.f32 %v9644_v10, %v4342_v15  ;;  %6108 = vst.msk [vmem:[#allocation3 + $0x98] sm:$0xff] %vm527_vm2, %v6072_v45 }
 0x44d   : > { %v5214_v28 = vpop.f32.mrf.mxu2 }
 0x44e   : > { %v4344_v16 = vmul.f32 0.5, %v4343_v22  ;;  %v5593_v1 = vpop.f32.mrf.mxu3  ;;  %v5280_v50 = vld [vmem:[#allocation3 + $0xa8] sm:$0xff]  ;;  %v4910_v36 = vpop.f32.mrf.mxu1  ;;  %9251 = vmatmul.msk.f32.gmra.mxu1 %vm527_vm2, %v4714_v9 }
 0x44f   : > { %v5316_v18 = vadd.f32 %v5280_v50, %v5214_v28  ;;  %4974 = vst.msk [vmem:[#allocation3 + $0xb0] sm:$0xff] %vm527_vm2, %v4910_v36  ;;  %9288 = vmatmul.msk.f32.gmra.mxu2 %vm527_vm2, %v5020_v30  ;;  %v6125_v9 = vld [vmem:[#allocation2 + $0x13] sm:$0xff] }
 0x450   : > { %v4345_v20 = vsub.f32 1.5, %v4344_v16  ;;  %9325 = vmatmul.msk.f32.gmra.mxu3 %vm527_vm2, %v5399_v42  ;;  %9360 = vmatmul.msk.f32.gmra.mxu0 %vm527_vm2, %v5399_v42  ;;  %v6504_v30 = vld [vmem:[#allocation2 + $0x14] sm:$0xff]  ;;  %v6883_v42 = vld [vmem:[#allocation2 + $0x24] sm:$0xff] }
 0x451   : > { %v5969_v25 = vpop.f32.mrf.mxu0  ;;  %v5658_v27 = vld [vmem:[#allocation3 + $0xa0] sm:$0xff]  ;;  %5352 = vst.msk [vmem:[#allocation3 + $0xa8] sm:$0xff] %vm527_vm2, %v5316_v18 }
 0x452   : > { %v4346_v49 = vmul.f32 %v9644_v10, %v4345_v20  ;;  %v5694_v24 = vadd.f32 %v5658_v27, %v5590_v56 }
 0x454   : > { %v4350_v5 = vsel %vm4349_vm4, %v9644_v10, %v4346_v49  ;;  %5730 = vst.msk [vmem:[#allocation3 + $0xa0] sm:$0xff] %vm527_vm2, %v5694_v24  ;;  %v5023_v10 = vld [vmem:[#allocation2 + $0x119] sm:$0xff] }
 0x455   : > { %v4386_v33 = vmul.f32 %v4350_v5, %v11847_v46  ;;  %v5217_v11 = vpop.f32.mrf.mxu2 }
 0x456   : > { %v5281_v0 = vld [vmem:[#allocation3 + $0xb0] sm:$0xff]  ;;  %v5596_v6 = vpop.f32.mrf.mxu3  ;;  %v4913_v43 = vpop.f32.mrf.mxu1  ;;  %9252 = vmatmul.msk.f32.gmra.mxu1 %vm527_vm2, %v4715_v38 }
 0x457   : > { %v4638_v34 = vmul.f32 %v4601_v12, %v4386_v33  ;;  %v5317_v62 = vadd.f32 %v5281_v0, %v5217_v11  ;;  %9289 = vmatmul.msk.f32.gmra.mxu2 %vm527_vm2, %v5021_v57  ;;  %4975 = vst.msk [vmem:[#allocation3 + $0xb8] sm:$0xff] %vm527_vm2, %v4913_v43  ;;  %v6126_v38 = vld [vmem:[#allocation2 + $0x1b] sm:$0xff] }
 0x458   : > { %v5659_v54 = vld [vmem:[#allocation3 + $0xa8] sm:$0xff]  ;;  %9326 = vmatmul.msk.f32.gmra.mxu3 %vm527_vm2, %v5400_v40  ;;  %9361 = vmatmul.msk.f32.gmra.mxu0 %vm527_vm2, %v5400_v40  ;;  %v6505_v57 = vld [vmem:[#allocation2 + $0x1c] sm:$0xff] }
 0x459   : > { %4681 = vst.msk [vmem:[#allocation2 + $0x12b] sm:$0xff] %vm527_vm2, %v4638_v34  ;;  %v5695_v46 = vadd.f32 %v5659_v54, %v5593_v1  ;;  %v5972_v39 = vpop.f32.mrf.mxu0  ;;  %v6884_v40 = vld [vmem:[#allocation2 + $0x2c] sm:$0xff] }
 0x45a   : > { %5353 = vst.msk [vmem:[#allocation3 + $0xb0] sm:$0xff] %vm527_vm2, %v5317_v62 }
 0x45b   : > { %5731 = vst.msk [vmem:[#allocation3 + $0xa8] sm:$0xff] %vm527_vm2, %v5695_v46  ;;  %v6037_v8 = vld [vmem:[#allocation3 + $0xa0] sm:$0xff] }
 0x45c   : > { %v6073_v52 = vadd.f32 %v6037_v8, %v5969_v25 }
 0x45d   : > { %v5220_v47 = vpop.f32.mrf.mxu2 }
 0x45e   : > { %6109 = vst.msk [vmem:[#allocation3 + $0xa0] sm:$0xff] %vm527_vm2, %v6073_v52  ;;  %v4916_v63 = vpop.f32.mrf.mxu1  ;;  %v5282_v13 = vld [vmem:[#allocation3 + $0xb8] sm:$0xff]  ;;  %9253 = vmatmul.msk.f32.gmra.mxu1 %vm527_vm2, %v4716_v21  ;;  %v5599_v3 = vpop.f32.mrf.mxu3 }
 0x45f   : > { %4976 = vst.msk [vmem:[#allocation3 + $0xc0] sm:$0xff] %vm527_vm2, %v4916_v63  ;;  %9290 = vmatmul.msk.f32.gmra.mxu2 %vm527_vm2, %v5022_v26  ;;  %v5318_v31 = vadd.f32 %v5282_v13, %v5220_v47  ;;  %v6127_v13 = vld [vmem:[#allocation2 + $0x23] sm:$0xff] }
 0x460   : > { %9327 = vmatmul.msk.f32.gmra.mxu3 %vm527_vm2, %v5401_v53  ;;  %9362 = vmatmul.msk.f32.gmra.mxu0 %vm527_vm2, %v5401_v53 }
 0x461   : > { %v5660_v2 = vld [vmem:[#allocation3 + $0xb0] sm:$0xff]  ;;  %5354 = vst.msk [vmem:[#allocation3 + $0xb8] sm:$0xff] %vm527_vm2, %v5318_v31  ;;  %v3908_v51 = vpop.xlane.xlu0 %3907  ;;  %v5975_v17 = vpop.f32.mrf.mxu0 }
 0x462   : > { %v5696_v32 = vadd.f32 %v5660_v2, %v5596_v6  ;;  %v6038_v58 = vld [vmem:[#allocation3 + $0xa8] sm:$0xff]  ;;  %v3953_v60 = vmul.f32 %v11146_v29, %v3908_v51 }
 0x463   : > { %v6074_v37 = vadd.f32 %v6038_v58, %v5972_v39  ;;  %v6128_v51 = vld [vmem:[#allocation2 + $0x2b] sm:$0xff] }
 0x464   : > { %5732 = vst.msk [vmem:[#allocation3 + $0xb0] sm:$0xff] %vm527_vm2, %v5696_v32  ;;  %v3989_v56 = vadd.f32 1e-08, %v3953_v60 }
 0x465   : > { %6110 = vst.msk [vmem:[#allocation3 + $0xa8] sm:$0xff] %vm527_vm2, %v6074_v37  ;;  %v5223_v23 = vpop.f32.mrf.mxu2  ;;  %v6886_v37 = vld [vmem:[#allocation2 + $0x3c] sm:$0xff] }
 0x466   : > { %v5283_v48 = vld [vmem:[#allocation3 + $0xc0] sm:$0xff]  ;;  %v4919_v55 = vpop.f32.mrf.mxu1  ;;  %9645 = vrsqrt.f32 %v3989_v56  ;;  %9254 = vmatmul.msk.f32.gmra.mxu1 %vm527_vm2, %v4717_v7  ;;  %v5602_v45 = vpop.f32.mrf.mxu3  ;;  %vm4337_vm6 = vweird.f32 %v3989_v56 }
 0x467   : > { %v5319_v59 = vadd.f32 %v5283_v48, %v5223_v23  ;;  %4977 = vst.msk [vmem:[#allocation3 + $0xc8] sm:$0xff] %vm527_vm2, %v4919_v55  ;;  %9291 = vmatmul.msk.f32.gmra.mxu2 %vm527_vm2, %v5023_v10  ;;  %v6129_v48 = vld [vmem:[#allocation2 + $0x33] sm:$0xff]  ;;  %v6887_v55 = vld [vmem:[#allocation2 + $0x44] sm:$0xff]  ;;  %v6130_v10 = vld [vmem:[#allocation2 + $0x3b] sm:$0xff] }
 0x468   : > { %9328 = vmatmul.msk.f32.gmra.mxu3 %vm527_vm2, %v5402_v35  ;;  %9363 = vmatmul.msk.f32.gmra.mxu0 %vm527_vm2, %v5402_v35  ;;  %v5661_v15 = vld [vmem:[#allocation3 + $0xb8] sm:$0xff]  ;;  %v7263_v35 = vld [vmem:[#allocation2 + $0x2d] sm:$0xff] }
 0x469   : > { %5355 = vst.msk [vmem:[#allocation3 + $0xc0] sm:$0xff] %vm527_vm2, %v5319_v59  ;;  %v5697_v41 = vadd.f32 %v5661_v15, %v5599_v3  ;;  %v5978_v20 = vpop.f32.mrf.mxu0  ;;  %v7262_v7 = vld [vmem:[#allocation2 + $0x25] sm:$0xff] }
 0x46a   : > { %v6888_v59 = vld [vmem:[#allocation2 + $0x4c] sm:$0xff]  ;;  %v6131_v15 = vld [vmem:[#allocation2 + $0x43] sm:$0xff] }
 0x46b   : > { %v6039_v61 = vld [vmem:[#allocation3 + $0xb0] sm:$0xff]  ;;  %5733 = vst.msk [vmem:[#allocation3 + $0xb8] sm:$0xff] %vm527_vm2, %v5697_v41 }
 0x46c   : > { %v6075_v22 = vadd.f32 %v6039_v61, %v5975_v17  ;;  %v9646_v16 = vpop.eup %9645  ;;  %v6889_v41 = vld [vmem:[#allocation2 + $0x54] sm:$0xff] }
 0x46d   : > { %v5226_v28 = vpop.f32.mrf.mxu2  ;;  %v4332_v1 = vmul.f32 %v9646_v16, %v3989_v56  ;;  %vm4338_vm5 = vweird.f32 %v9646_v16  ;;  %v7264_v61 = vld [vmem:[#allocation2 + $0x35] sm:$0xff] }
 0x46e   : > { %6111 = vst.msk [vmem:[#allocation3 + $0xb0] sm:$0xff] %vm527_vm2, %v6075_v22  ;;  %v5284_v50 = vld [vmem:[#allocation3 + $0xc8] sm:$0xff]  ;;  %v4922_v36 = vpop.f32.mrf.mxu1  ;;  %9367 = vmatmul.msk.f32.vlgmr.msrb.gmra.mxu1 %vm527_vm2, %v6125_v9  ;;  %v5605_v34 = vpop.f32.mrf.mxu3  ;;  %vm4339_vm7 = vmor %vm4337_vm6, %vm4338_vm5  ;;  %v6890_v22 = vld [vmem:[#allocation2 + $0x5c] sm:$0xff] }
 0x46f   : > { %v5320_v18 = vadd.f32 %v5284_v50, %v5226_v28  ;;  %4978 = vst.msk [vmem:[#allocation3 + $0xd0] sm:$0xff] %vm527_vm2, %v4922_v36  ;;  %9404 = vmatmul.msk.f32.vlgmr.msra.gmra.mxu2 %vm527_vm2, %v6504_v30  ;;  %v4333_v49 = vmul.f32 %v9646_v16, %v4332_v1  ;;  %v7265_v28 = vld [vmem:[#allocation2 + $0x3d] sm:$0xff]  ;;  %v6133_v36 = vld [vmem:[#allocation2 + $0x53] sm:$0xff] }
 0x470   : > { %v5662_v25 = vld [vmem:[#allocation3 + $0xc0] sm:$0xff]  ;;  %9441 = vmatmul.msk.f32.vlgmr.msra.gmra.mxu3 %vm527_vm2, %v6883_v42 }
 0x471   : > { %v5698_v27 = vadd.f32 %v5662_v25, %v5602_v45  ;;  %5356 = vst.msk [vmem:[#allocation3 + $0xc8] sm:$0xff] %vm527_vm2, %v5320_v18  ;;  %v4334_v5 = vmul.f32 0.5, %v4333_v49  ;;  %v5981_v39 = vpop.f32.mrf.mxu0  ;;  %v6132_v45 = vld [vmem:[#allocation2 + $0x4b] sm:$0xff] }
 0x472   : > { %v6040_v24 = vld [vmem:[#allocation3 + $0xb8] sm:$0xff] }
 0x473   : > { %5734 = vst.msk [vmem:[#allocation3 + $0xc0] sm:$0xff] %vm527_vm2, %v5698_v27  ;;  %v4335_v33 = vsub.f32 1.5, %v4334_v5  ;;  %v6076_v12 = vadd.f32 %v6040_v24, %v5978_v20  ;;  %v6891_v9 = vld [vmem:[#allocation2 + $0x64] sm:$0xff] }
 0x474   : > { %v7266_v25 = vld [vmem:[#allocation2 + $0x45] sm:$0xff] }
 0x475   : > { %v5229_v11 = vpop.f32.mrf.mxu2  ;;  %v4336_v0 = vmul.f32 %v9646_v16, %v4335_v33  ;;  %6112 = vst.msk [vmem:[#allocation3 + $0xb8] sm:$0xff] %vm527_vm2, %v6076_v12  ;;  %v6134_v12 = vld [vmem:[#allocation2 + $0x5b] sm:$0xff] }
 0x476   : > { %v5285_v6 = vld [vmem:[#allocation3 + $0xd0] sm:$0xff]  ;;  %v4925_v43 = vpop.f32.mrf.mxu1  ;;  %9368 = vmatmul.msk.f32.gmra.mxu1 %vm527_vm2, %v6126_v38  ;;  %v5608_v21 = vpop.f32.mrf.mxu3  ;;  %v7267_v38 = vld [vmem:[#allocation2 + $0x4d] sm:$0xff] }
 0x477   : > { %v5321_v62 = vadd.f32 %v5285_v6, %v5229_v11  ;;  %4979 = vst.msk [vmem:[#allocation3 + $0xd8] sm:$0xff] %vm527_vm2, %v4925_v43  ;;  %9405 = vmatmul.msk.f32.gmra.mxu2 %vm527_vm2, %v6505_v57  ;;  %v4340_v54 = vsel %vm4339_vm7, %v9646_v16, %v4336_v0 }
 0x478   : > { %v5663_v46 = vld [vmem:[#allocation3 + $0xc8] sm:$0xff]  ;;  %9442 = vmatmul.msk.f32.gmra.mxu3 %vm527_vm2, %v6884_v40  ;;  %v4385_v8 = vmul.f32 %v4340_v54, %v11940_v44  ;;  %v6135_v54 = vld [vmem:[#allocation2 + $0x63] sm:$0xff] }
 0x479   : > { %v5699_v52 = vadd.f32 %v5663_v46, %v5605_v34  ;;  %5357 = vst.msk [vmem:[#allocation3 + $0xd0] sm:$0xff] %vm527_vm2, %v5321_v62  ;;  %v6885_v44 = vld [vmem:[#allocation2 + $0x34] sm:$0xff]  ;;  %v5984_v31 = vpop.f32.mrf.mxu0  ;;  %v6892_v34 = vld [vmem:[#allocation2 + $0x6c] sm:$0xff] }
 0x47a   : > { %v6041_v47 = vld [vmem:[#allocation3 + $0xc0] sm:$0xff]  ;;  %v4637_v4 = vmul.f32 %v12118_v19, %v4385_v8 }
 0x47b   : > { %5735 = vst.msk [vmem:[#allocation3 + $0xc8] sm:$0xff] %vm527_vm2, %v5699_v52  ;;  %v6077_v63 = vadd.f32 %v6041_v47, %v5981_v39  ;;  %v6893_v39 = vld [vmem:[#allocation2 + $0x74] sm:$0xff] }
 0x47c   : > { %4680 = vst.msk [vmem:[#allocation2 + $0x123] sm:$0xff] %vm527_vm2, %v4637_v4 }
 0x47d   : > { %6113 = vst.msk [vmem:[#allocation3 + $0xc0] sm:$0xff] %vm527_vm2, %v6077_v63  ;;  %v5232_v26 = vpop.f32.mrf.mxu2  ;;  %v7268_v63 = vld [vmem:[#allocation2 + $0x55] sm:$0xff] }
 0x47e   : > { %v5286_v14 = vld [vmem:[#allocation3 + $0xd8] sm:$0xff]  ;;  %9369 = vmatmul.msk.f32.gmra.mxu1 %vm527_vm2, %v6127_v13  ;;  %v5611_v60 = vpop.f32.mrf.mxu3 }
 0x47f   : > { %v5322_v53 = vadd.f32 %v5286_v14, %v5232_v26  ;;  %9406 = vmatmul.msk.f32.gmra.mxu2 %vm527_vm2, %v6883_v42  ;;  %v6136_v14 = vld [vmem:[#allocation2 + $0x6b] sm:$0xff] }
 0x480   : > { %v5664_v2 = vld [vmem:[#allocation3 + $0xd0] sm:$0xff]  ;;  %9443 = vmatmul.msk.f32.gmra.mxu3 %vm527_vm2, %v6885_v44 }
 0x481   : > { %v5700_v19 = vadd.f32 %v5664_v2, %v5608_v21  ;;  %5358 = vst.msk [vmem:[#allocation3 + $0xd8] sm:$0xff] %vm527_vm2, %v5322_v53  ;;  %v6894_v53 = vld [vmem:[#allocation2 + $0x7c] sm:$0xff] }
 0x482   : > { %v6042_v3 = vld [vmem:[#allocation3 + $0xc8] sm:$0xff] }
 0x483   : > { %5736 = vst.msk [vmem:[#allocation3 + $0xd0] sm:$0xff] %vm527_vm2, %v5700_v19  ;;  %v6078_v32 = vadd.f32 %v6042_v3, %v5984_v31  ;;  %v5780_v58 = vld [vmem:[#allocation2 + $0x122] sm:$0xff]  ;;  %v5781_v23 = vld [vmem:[#allocation2 + $0x12a] sm:$0xff] }
 0x484   : > { %9364 = vmatmul.msk.f32.gmra.mxu0 %vm527_vm2, %v5780_v58 }
 0x485   : > { %6114 = vst.msk [vmem:[#allocation3 + $0xc8] sm:$0xff] %vm527_vm2, %v6078_v32 }
 0x486   : > { %9370 = vmatmul.msk.f32.gmra.mxu1 %vm527_vm2, %v6128_v51  ;;  %v7269_v51 = vld [vmem:[#allocation2 + $0x5d] sm:$0xff] }
 0x487   : > { %9407 = vmatmul.msk.f32.gmra.mxu2 %vm527_vm2, %v6884_v40 }
 0x488   : > { %v5665_v17 = vld [vmem:[#allocation3 + $0xd8] sm:$0xff]  ;;  %9444 = vmatmul.msk.f32.gmra.mxu3 %vm527_vm2, %v6886_v37 }
 0x489   : > { %v5701_v56 = vadd.f32 %v5665_v17, %v5611_v60  ;;  %v6137_v17 = vld [vmem:[#allocation2 + $0x73] sm:$0xff] }
 0x48a   : > { %v6043_v20 = vld [vmem:[#allocation3 + $0xd0] sm:$0xff] }
 0x48b   : > { %5737 = vst.msk [vmem:[#allocation3 + $0xd8] sm:$0xff] %vm527_vm2, %v5701_v56 }
 0x48c   : > { %9365 = vmatmul.msk.f32.gmra.mxu0 %vm527_vm2, %v5781_v23  ;;  %v6895_v23 = vld [vmem:[#allocation2 + $0x84] sm:$0xff] }
 0x48e   : > { %9371 = vmatmul.msk.f32.gmra.mxu1 %vm527_vm2, %v6129_v48 }
 0x48f   : > { %9408 = vmatmul.msk.f32.gmra.mxu2 %vm527_vm2, %v6885_v44 }
 0x490   : > { %9445 = vmatmul.msk.f32.gmra.mxu3 %vm527_vm2, %v6887_v55 }
 0x492   : > { %v6044_v24 = vld [vmem:[#allocation3 + $0xd8] sm:$0xff] }
 0x494   : > { %9478 = vmatmul.msk.f32.vlgmr.msra.gmra.mxu0 %vm527_vm2, %v7262_v7 }
 0x496   : > { %9372 = vmatmul.msk.f32.gmra.mxu1 %vm527_vm2, %v6130_v10 }
 0x497   : > { %9409 = vmatmul.msk.f32.gmra.mxu2 %vm527_vm2, %v6886_v37 }
 0x498   : > { %9446 = vmatmul.msk.f32.gmra.mxu3 %vm527_vm2, %v6888_v59 }
 0x49c   : > { %9479 = vmatmul.msk.f32.gmra.mxu0 %vm527_vm2, %v7263_v35 }
 0x49e   : > { %9373 = vmatmul.msk.f32.gmra.mxu1 %vm527_vm2, %v6131_v15 }
 0x49f   : > { %9410 = vmatmul.msk.f32.gmra.mxu2 %vm527_vm2, %v6887_v55 }
 0x4a0   : > { %9447 = vmatmul.msk.f32.gmra.mxu3 %vm527_vm2, %v6889_v41 }
 0x4a4   : > { %9480 = vmatmul.msk.f32.gmra.mxu0 %vm527_vm2, %v7264_v61 }
 0x4a6   : > { %9374 = vmatmul.msk.f32.gmra.mxu1 %vm527_vm2, %v6132_v45 }
 0x4a7   : > { %9411 = vmatmul.msk.f32.gmra.mxu2 %vm527_vm2, %v6888_v59 }
 0x4a8   : > { %9448 = vmatmul.msk.f32.gmra.mxu3 %vm527_vm2, %v6890_v22 }
 0x4ab   : > { %v4928_v16 = vpop.f32.mrf.mxu1 }
 0x4ac   : > { %4980 = vst.msk [vmem:[#allocation3 + $0xe0] sm:$0xff] %vm527_vm2, %v4928_v16  ;;  %9481 = vmatmul.msk.f32.gmra.mxu0 %vm527_vm2, %v7265_v28  ;;  %v6896_v28 = vld [vmem:[#allocation2 + $0x8c] sm:$0xff] }
 0x4ad   : > { %v5987_v1 = vpop.f32.mrf.mxu0 }
 0x4ae   : > { %v6079_v50 = vadd.f32 %v6043_v20, %v5987_v1  ;;  %9375 = vmatmul.msk.f32.gmra.mxu1 %vm527_vm2, %v6133_v36 }
 0x4af   : > { %9412 = vmatmul.msk.f32.gmra.mxu2 %vm527_vm2, %v6889_v41  ;;  %v7270_v41 = vld [vmem:[#allocation2 + $0x65] sm:$0xff] }
 0x4b0   : > { %6115 = vst.msk [vmem:[#allocation3 + $0xd0] sm:$0xff] %vm527_vm2, %v6079_v50  ;;  %9449 = vmatmul.msk.f32.gmra.mxu3 %vm527_vm2, %v6891_v9 }
 0x4b2   : > { %v5235_v30 = vpop.f32.mrf.mxu2 }
 0x4b3   : > { %v5614_v18 = vpop.f32.mrf.mxu3  ;;  %v5287_v42 = vld [vmem:[#allocation3 + $0xe0] sm:$0xff]  ;;  %v4931_v49 = vpop.f32.mrf.mxu1 }
 0x4b4   : > { %v5323_v27 = vadd.f32 %v5287_v42, %v5235_v30  ;;  %4981 = vst.msk [vmem:[#allocation3 + $0xe8] sm:$0xff] %vm527_vm2, %v4931_v49  ;;  %9482 = vmatmul.msk.f32.gmra.mxu0 %vm527_vm2, %v7266_v25  ;;  %v7271_v42 = vld [vmem:[#allocation2 + $0x6d] sm:$0xff] }
 0x4b5   : > { %v5990_v5 = vpop.f32.mrf.mxu0 }
 0x4b6   : > { %v6080_v33 = vadd.f32 %v6044_v24, %v5990_v5  ;;  %5359 = vst.msk [vmem:[#allocation3 + $0xe0] sm:$0xff] %vm527_vm2, %v5323_v27  ;;  %9376 = vmatmul.msk.f32.gmra.mxu1 %vm527_vm2, %v6134_v12  ;;  %v6139_v27 = vld [vmem:[#allocation2 + $0x83] sm:$0xff]  ;;  %v6897_v24 = vld [vmem:[#allocation2 + $0x94] sm:$0xff] }
 0x4b7   : > { %9413 = vmatmul.msk.f32.gmra.mxu2 %vm527_vm2, %v6890_v22  ;;  %v6138_v22 = vld [vmem:[#allocation2 + $0x7b] sm:$0xff] }
 0x4b8   : > { %6116 = vst.msk [vmem:[#allocation3 + $0xd8] sm:$0xff] %vm527_vm2, %v6080_v33  ;;  %9450 = vmatmul.msk.f32.gmra.mxu3 %vm527_vm2, %v6892_v34 }
 0x4ba   : > { %v5238_v11 = vpop.f32.mrf.mxu2 }
 0x4bb   : > { %v5617_v0 = vpop.f32.mrf.mxu3  ;;  %v5288_v6 = vld [vmem:[#allocation3 + $0xe8] sm:$0xff]  ;;  %v4934_v43 = vpop.f32.mrf.mxu1 }
 0x4bc   : > { %v5324_v57 = vadd.f32 %v5288_v6, %v5238_v11  ;;  %4982 = vst.msk [vmem:[#allocation3 + $0xf0] sm:$0xff] %vm527_vm2, %v4934_v43  ;;  %9483 = vmatmul.msk.f32.gmra.mxu0 %vm527_vm2, %v7267_v38  ;;  %v7272_v43 = vld [vmem:[#allocation2 + $0x75] sm:$0xff] }
 0x4bd   : > { %v5666_v62 = vld [vmem:[#allocation3 + $0xe0] sm:$0xff]  ;;  %v5993_v40 = vpop.f32.mrf.mxu0 }
 0x4be   : > { %v5702_v46 = vadd.f32 %v5666_v62, %v5614_v18  ;;  %5360 = vst.msk [vmem:[#allocation3 + $0xe8] sm:$0xff] %vm527_vm2, %v5324_v57  ;;  %9377 = vmatmul.msk.f32.gmra.mxu1 %vm527_vm2, %v6135_v54 }
 0x4bf   : > { %9414 = vmatmul.msk.f32.gmra.mxu2 %vm527_vm2, %v6891_v9 }
 0x4c0   : > { %9451 = vmatmul.msk.f32.gmra.mxu3 %vm527_vm2, %v6893_v39  ;;  %5738 = vst.msk [vmem:[#allocation3 + $0xe0] sm:$0xff] %vm527_vm2, %v5702_v46  ;;  %v6898_v46 = vld [vmem:[#allocation2 + $0x9c] sm:$0xff] }
 0x4c2   : > { %v5241_v8 = vpop.f32.mrf.mxu2 }
 0x4c3   : > { %v5620_v52 = vpop.f32.mrf.mxu3  ;;  %v5289_v47 = vld [vmem:[#allocation3 + $0xf0] sm:$0xff]  ;;  %v4937_v4 = vpop.f32.mrf.mxu1 }
 0x4c4   : > { %v5325_v21 = vadd.f32 %v5289_v47, %v5241_v8  ;;  %4983 = vst.msk [vmem:[#allocation3 + $0xf8] sm:$0xff] %vm527_vm2, %v4937_v4  ;;  %9484 = vmatmul.msk.f32.gmra.mxu0 %vm527_vm2, %v7268_v63 }
 0x4c5   : > { %v5667_v26 = vld [vmem:[#allocation3 + $0xe8] sm:$0xff]  ;;  %v5996_v2 = vpop.f32.mrf.mxu0 }
 0x4c6   : > { %v5703_v13 = vadd.f32 %v5667_v26, %v5617_v0  ;;  %5361 = vst.msk [vmem:[#allocation3 + $0xf0] sm:$0xff] %vm527_vm2, %v5325_v21  ;;  %9378 = vmatmul.msk.f32.gmra.mxu1 %vm527_vm2, %v6136_v14  ;;  %v6396_v21 = vld [vmem:[#allocation3] sm:$0xff]  ;;  %v7273_v26 = vld [vmem:[#allocation2 + $0x7d] sm:$0xff] }
 0x4c7   : > { %9415 = vmatmul.msk.f32.gmra.mxu2 %vm527_vm2, %v6892_v34  ;;  %v6045_v44 = vld [vmem:[#allocation3 + $0xe0] sm:$0xff] }
 0x4c8   : > { %9452 = vmatmul.msk.f32.gmra.mxu3 %vm527_vm2, %v6894_v53  ;;  %5739 = vst.msk [vmem:[#allocation3 + $0xe8] sm:$0xff] %vm527_vm2, %v5703_v13  ;;  %v6081_v19 = vadd.f32 %v6045_v44, %v5993_v40  ;;  %v6140_v40 = vld [vmem:[#allocation2 + $0x8b] sm:$0xff]  ;;  %v6141_v44 = vld [vmem:[#allocation2 + $0x93] sm:$0xff] }
 0x4ca   : > { %v5244_v31 = vpop.f32.mrf.mxu2  ;;  %6117 = vst.msk [vmem:[#allocation3 + $0xe0] sm:$0xff] %vm527_vm2, %v6081_v19  ;;  %v6899_v19 = vld [vmem:[#allocation2 + $0xa4] sm:$0xff] }
 0x4cb   : > { %v5623_v3 = vpop.f32.mrf.mxu3  ;;  %v5290_v32 = vld [vmem:[#allocation3 + $0xf8] sm:$0xff]  ;;  %v4940_v58 = vpop.f32.mrf.mxu1 }
 0x4cc   : > { %v5326_v37 = vadd.f32 %v5290_v32, %v5244_v31  ;;  %4984 = vst.msk [vmem:[#allocation3 + $0x100] sm:$0xff] %vm527_vm2, %v4940_v58  ;;  %9485 = vmatmul.msk.f32.gmra.mxu0 %vm527_vm2, %v7269_v51 }
 0x4cd   : > { %v5668_v60 = vld [vmem:[#allocation3 + $0xf0] sm:$0xff]  ;;  %v5999_v7 = vpop.f32.mrf.mxu0 }
 0x4ce   : > { %v5704_v56 = vadd.f32 %v5668_v60, %v5620_v52  ;;  %5362 = vst.msk [vmem:[#allocation3 + $0xf8] sm:$0xff] %vm527_vm2, %v5326_v37  ;;  %9379 = vmatmul.msk.f32.gmra.mxu1 %vm527_vm2, %v6137_v17  ;;  %v6397_v60 = vld [vmem:[#allocation3 + $0x8] sm:$0xff]  ;;  %v7274_v17 = vld [vmem:[#allocation2 + $0x85] sm:$0xff] }
 0x4cf   : > { %9416 = vmatmul.msk.f32.gmra.mxu2 %vm527_vm2, %v6893_v39  ;;  %v6046_v48 = vld [vmem:[#allocation3 + $0xe8] sm:$0xff] }
 0x4d0   : > { %9453 = vmatmul.msk.f32.gmra.mxu3 %vm527_vm2, %v6895_v23  ;;  %5740 = vst.msk [vmem:[#allocation3 + $0xf0] sm:$0xff] %vm527_vm2, %v5704_v56  ;;  %v6082_v55 = vadd.f32 %v6046_v48, %v5996_v2  ;;  %v6142_v48 = vld [vmem:[#allocation2 + $0x9b] sm:$0xff] }
 0x4d2   : > { %v5247_v10 = vpop.f32.mrf.mxu2  ;;  %6118 = vst.msk [vmem:[#allocation3 + $0xe8] sm:$0xff] %vm527_vm2, %v6082_v55 }
 0x4d3   : > { %v5626_v59 = vpop.f32.mrf.mxu3  ;;  %v5291_v35 = vld [vmem:[#allocation3 + $0x100] sm:$0xff]  ;;  %v4943_v15 = vpop.f32.mrf.mxu1 }
 0x4d4   : > { %v5327_v61 = vadd.f32 %v5291_v35, %v5247_v10  ;;  %4985 = vst.msk [vmem:[#allocation3 + $0x108] sm:$0xff] %vm527_vm2, %v4943_v15  ;;  %9486 = vmatmul.msk.f32.gmra.mxu0 %vm527_vm2, %v7270_v41  ;;  %v6900_v10 = vld [vmem:[#allocation2 + $0xac] sm:$0xff] }
 0x4d5   : > { %v5669_v45 = vld [vmem:[#allocation3 + $0xf8] sm:$0xff]  ;;  %v6002_v9 = vpop.f32.mrf.mxu0 }
 0x4d6   : > { %v5705_v16 = vadd.f32 %v5669_v45, %v5623_v3  ;;  %5363 = vst.msk [vmem:[#allocation3 + $0x100] sm:$0xff] %vm527_vm2, %v5327_v61  ;;  %9380 = vmatmul.msk.f32.gmra.mxu1 %vm527_vm2, %v6138_v22  ;;  %v6398_v61 = vld [vmem:[#allocation3 + $0x10] sm:$0xff]  ;;  %v7275_v45 = vld [vmem:[#allocation2 + $0x8d] sm:$0xff] }
 0x4d7   : > { %9417 = vmatmul.msk.f32.gmra.mxu2 %vm527_vm2, %v6894_v53  ;;  %v6047_v1 = vld [vmem:[#allocation3 + $0xf0] sm:$0xff] }
 0x4d8   : > { %9454 = vmatmul.msk.f32.gmra.mxu3 %vm527_vm2, %v6896_v28  ;;  %5741 = vst.msk [vmem:[#allocation3 + $0xf8] sm:$0xff] %vm527_vm2, %v5705_v16  ;;  %v6083_v20 = vadd.f32 %v6047_v1, %v5999_v7 }
 0x4da   : > { %v5250_v50 = vpop.f32.mrf.mxu2  ;;  %6119 = vst.msk [vmem:[#allocation3 + $0xf0] sm:$0xff] %vm527_vm2, %v6083_v20  ;;  %v6901_v20 = vld [vmem:[#allocation2 + $0xb4] sm:$0xff] }
 0x4db   : > { %v5629_v36 = vpop.f32.mrf.mxu3  ;;  %v5292_v30 = vld [vmem:[#allocation3 + $0x108] sm:$0xff]  ;;  %v4946_v18 = vpop.f32.mrf.mxu1 }
 0x4dc   : > { %v5328_v49 = vadd.f32 %v5292_v30, %v5250_v50  ;;  %4986 = vst.msk [vmem:[#allocation3 + $0x110] sm:$0xff] %vm527_vm2, %v4946_v18  ;;  %9487 = vmatmul.msk.f32.gmra.mxu0 %vm527_vm2, %v7271_v42 }
 0x4dd   : > { %v5670_v25 = vld [vmem:[#allocation3 + $0x100] sm:$0xff]  ;;  %v6005_v62 = vpop.f32.mrf.mxu0 }
 0x4de   : > { %v5706_v5 = vadd.f32 %v5670_v25, %v5626_v59  ;;  %5364 = vst.msk [vmem:[#allocation3 + $0x108] sm:$0xff] %vm527_vm2, %v5328_v49  ;;  %9381 = vmatmul.msk.f32.gmra.mxu1 %vm527_vm2, %v6139_v27  ;;  %v6399_v27 = vld [vmem:[#allocation3 + $0x18] sm:$0xff] }
 0x4df   : > { %9418 = vmatmul.msk.f32.gmra.mxu2 %vm527_vm2, %v6895_v23  ;;  %v6048_v33 = vld [vmem:[#allocation3 + $0xf8] sm:$0xff] }
 0x4e0   : > { %9455 = vmatmul.msk.f32.gmra.mxu3 %vm527_vm2, %v6897_v24  ;;  %5742 = vst.msk [vmem:[#allocation3 + $0x100] sm:$0xff] %vm527_vm2, %v5706_v5  ;;  %v6084_v12 = vadd.f32 %v6048_v33, %v6002_v9  ;;  %v7276_v5 = vld [vmem:[#allocation2 + $0x95] sm:$0xff] }
 0x4e2   : > { %v5253_v34 = vpop.f32.mrf.mxu2  ;;  %6120 = vst.msk [vmem:[#allocation3 + $0xf8] sm:$0xff] %vm527_vm2, %v6084_v12  ;;  %v6144_v12 = vld [vmem:[#allocation2 + $0xab] sm:$0xff] }
 0x4e3   : > { %v5632_v11 = vpop.f32.mrf.mxu3  ;;  %v5293_v0 = vld [vmem:[#allocation3 + $0x110] sm:$0xff]  ;;  %v4949_v6 = vpop.f32.mrf.mxu1 }
 0x4e4   : > { %v5329_v38 = vadd.f32 %v5293_v0, %v5253_v34  ;;  %4987 = vst.msk [vmem:[#allocation3 + $0x118] sm:$0xff] %vm527_vm2, %v4949_v6  ;;  %9488 = vmatmul.msk.f32.gmra.mxu0 %vm527_vm2, %v7272_v43 }
 0x4e5   : > { %v5671_v57 = vld [vmem:[#allocation3 + $0x108] sm:$0xff]  ;;  %v6008_v31 = vpop.f32.mrf.mxu0 }
 0x4e6   : > { %v5707_v54 = vadd.f32 %v5671_v57, %v5629_v36  ;;  %5365 = vst.msk [vmem:[#allocation3 + $0x110] sm:$0xff] %vm527_vm2, %v5329_v38  ;;  %9382 = vmatmul.msk.f32.gmra.mxu1 %vm527_vm2, %v6140_v40 }
 0x4e7   : > { %9419 = vmatmul.msk.f32.gmra.mxu2 %vm527_vm2, %v6896_v28  ;;  %v6049_v39 = vld [vmem:[#allocation3 + $0x100] sm:$0xff] }
 0x4e8   : > { %9456 = vmatmul.msk.f32.gmra.mxu3 %vm527_vm2, %v6898_v46  ;;  %5743 = vst.msk [vmem:[#allocation3 + $0x108] sm:$0xff] %vm527_vm2, %v5707_v54  ;;  %v6085_v8 = vadd.f32 %v6049_v39, %v6005_v62  ;;  %v6143_v28 = vld [vmem:[#allocation2 + $0xa3] sm:$0xff] }
 0x4e9   : > { %v7277_v39 = vld [vmem:[#allocation2 + $0x9d] sm:$0xff] }
 0x4ea   : > { %v5256_v52 = vpop.f32.mrf.mxu2  ;;  %6121 = vst.msk [vmem:[#allocation3 + $0x100] sm:$0xff] %vm527_vm2, %v6085_v8 }
 0x4eb   : > { %v5635_v47 = vpop.f32.mrf.mxu3  ;;  %v5294_v4 = vld [vmem:[#allocation3 + $0x118] sm:$0xff]  ;;  %v6288_v63 = vpop.f32.mrf.mxu1 }
 0x4ec   : > { %v5330_v14 = vadd.f32 %v5294_v4, %v5256_v52  ;;  %v6432_v13 = vadd.f32 %v6396_v21, %v6288_v63  ;;  %9489 = vmatmul.msk.f32.gmra.mxu0 %vm527_vm2, %v7273_v26  ;;  %v6903_v63 = vld [vmem:[#allocation2 + $0xc4] sm:$0xff] }
 0x4ed   : > { %v5672_v53 = vld [vmem:[#allocation3 + $0x110] sm:$0xff] }
 0x4ee   : > { %v5708_v2 = vadd.f32 %v5672_v53, %v5632_v11  ;;  %5366 = vst.msk [vmem:[#allocation3 + $0x118] sm:$0xff] %vm527_vm2, %v5330_v14  ;;  %9383 = vmatmul.msk.f32.gmra.mxu1 %vm527_vm2, %v6141_v44  ;;  %v6902_v11 = vld [vmem:[#allocation2 + $0xbc] sm:$0xff] }
 0x4ef   : > { %9420 = vmatmul.msk.f32.gmra.mxu2 %vm527_vm2, %v6897_v24  ;;  %v6050_v3 = vld [vmem:[#allocation3 + $0x108] sm:$0xff]  ;;  %6468 = vst.msk [vmem:[#allocation3] sm:$0xff] %vm527_vm2, %v6432_v13 }
 0x4f0   : > { %9457 = vmatmul.msk.f32.gmra.mxu3 %vm527_vm2, %v6899_v19  ;;  %5744 = vst.msk [vmem:[#allocation3 + $0x110] sm:$0xff] %vm527_vm2, %v5708_v2  ;;  %v6086_v32 = vadd.f32 %v6050_v3, %v6008_v31  ;;  %v6401_v31 = vld [vmem:[#allocation3 + $0x28] sm:$0xff]  ;;  %v7278_v3 = vld [vmem:[#allocation2 + $0xa5] sm:$0xff] }
 0x4f2   : > { %v6667_v58 = vpop.f32.mrf.mxu2  ;;  %6122 = vst.msk [vmem:[#allocation3 + $0x108] sm:$0xff] %vm527_vm2, %v6086_v32 }
 0x4f3   : > { %v7046_v51 = vpop.f32.mrf.mxu3  ;;  %v6291_v37 = vpop.f32.mrf.mxu1 }
 0x4f4   : > { %v6433_v56 = vadd.f32 %v6397_v60, %v6291_v37  ;;  %9490 = vmatmul.msk.f32.gmra.mxu0 %vm527_vm2, %v7274_v17  ;;  %v6904_v60 = vld [vmem:[#allocation2 + $0xcc] sm:$0xff] }
 0x4f5   : > { %v5673_v23 = vld [vmem:[#allocation3 + $0x118] sm:$0xff] }
 0x4f6   : > { %v5709_v55 = vadd.f32 %v5673_v23, %v5635_v47  ;;  %v6775_v7 = vld [vmem:[#allocation3] sm:$0xff]  ;;  %6469 = vst.msk [vmem:[#allocation3 + $0x8] sm:$0xff] %vm527_vm2, %v6433_v56  ;;  %9384 = vmatmul.msk.f32.gmra.mxu1 %vm527_vm2, %v6142_v48  ;;  %v6145_v47 = vld [vmem:[#allocation2 + $0xb3] sm:$0xff] }
 0x4f7   : > { %9421 = vmatmul.msk.f32.gmra.mxu2 %vm527_vm2, %v6898_v46  ;;  %v6811_v59 = vadd.f32 %v6775_v7, %v6667_v58  ;;  %v6051_v30 = vld [vmem:[#allocation3 + $0x110] sm:$0xff]  ;;  %v6400_v46 = vld [vmem:[#allocation3 + $0x20] sm:$0xff] }
 0x4f8   : > { %9458 = vmatmul.msk.f32.gmra.mxu3 %vm527_vm2, %v6900_v10  ;;  %5745 = vst.msk [vmem:[#allocation3 + $0x118] sm:$0xff] %vm527_vm2, %v5709_v55 }
 0x4f9   : > { %6847 = vst.msk [vmem:[#allocation3] sm:$0xff] %vm527_vm2, %v6811_v59 }
 0x4fa   : > { %v6670_v35 = vpop.f32.mrf.mxu2 }
 0x4fb   : > { %v7049_v15 = vpop.f32.mrf.mxu3  ;;  %v6294_v41 = vpop.f32.mrf.mxu1 }
 0x4fc   : > { %v6434_v22 = vadd.f32 %v6398_v61, %v6294_v41  ;;  %9491 = vmatmul.msk.f32.gmra.mxu0 %vm527_vm2, %v7275_v45  ;;  %v6147_v45 = vld [vmem:[#allocation2 + $0xc3] sm:$0xff] }
 0x4fd   : > { %v6776_v16 = vld [vmem:[#allocation3 + $0x8] sm:$0xff] }
 0x4fe   : > { %v6812_v1 = vadd.f32 %v6776_v16, %v6670_v35  ;;  %6470 = vst.msk [vmem:[#allocation3 + $0x10] sm:$0xff] %vm527_vm2, %v6434_v22  ;;  %9385 = vmatmul.msk.f32.gmra.mxu1 %vm527_vm2, %v6143_v28  ;;  %v6402_v35 = vld [vmem:[#allocation3 + $0x30] sm:$0xff] }
 0x4ff   : > { %9422 = vmatmul.msk.f32.gmra.mxu2 %vm527_vm2, %v6899_v19  ;;  %v6052_v38 = vld [vmem:[#allocation3 + $0x118] sm:$0xff]  ;;  %v6905_v16 = vld [vmem:[#allocation2 + $0xd4] sm:$0xff] }
 0x500   : > { %9459 = vmatmul.msk.f32.gmra.mxu3 %vm527_vm2, %v6901_v20  ;;  %v7154_v50 = vld [vmem:[#allocation3] sm:$0xff]  ;;  %6848 = vst.msk [vmem:[#allocation3 + $0x8] sm:$0xff] %vm527_vm2, %v6812_v1 }
 0x501   : > { %v7190_v36 = vadd.f32 %v7154_v50, %v7046_v51  ;;  %v6011_v9 = vpop.f32.mrf.mxu0  ;;  %v6146_v51 = vld [vmem:[#allocation2 + $0xbb] sm:$0xff] }
 0x502   : > { %v6673_v18 = vpop.f32.mrf.mxu2  ;;  %v6087_v42 = vadd.f32 %v6051_v30, %v6011_v9 }
 0x503   : > { %v7052_v49 = vpop.f32.mrf.mxu3  ;;  %7226 = vst.msk [vmem:[#allocation3] sm:$0xff] %vm527_vm2, %v7190_v36  ;;  %v6297_v25 = vpop.f32.mrf.mxu1 }
 0x504   : > { %6123 = vst.msk [vmem:[#allocation3 + $0x110] sm:$0xff] %vm527_vm2, %v6087_v42  ;;  %v6435_v24 = vadd.f32 %v6399_v27, %v6297_v25  ;;  %9492 = vmatmul.msk.f32.gmra.mxu0 %vm527_vm2, %v7276_v5  ;;  %v6403_v42 = vld [vmem:[#allocation3 + $0x38] sm:$0xff]  ;;  %v6148_v5 = vld [vmem:[#allocation2 + $0xcb] sm:$0xff] }
 0x505   : > { %v6777_v33 = vld [vmem:[#allocation3 + $0x10] sm:$0xff] }
 0x506   : > { %v6813_v34 = vadd.f32 %v6777_v33, %v6673_v18  ;;  %6471 = vst.msk [vmem:[#allocation3 + $0x18] sm:$0xff] %vm527_vm2, %v6435_v24  ;;  %9386 = vmatmul.msk.f32.gmra.mxu1 %vm527_vm2, %v6144_v12  ;;  %v6906_v33 = vld [vmem:[#allocation2 + $0xdc] sm:$0xff] }
 0x507   : > { %9423 = vmatmul.msk.f32.gmra.mxu2 %vm527_vm2, %v6900_v10  ;;  %v7155_v0 = vld [vmem:[#allocation3 + $0x8] sm:$0xff] }
 0x508   : > { %9460 = vmatmul.msk.f32.gmra.mxu3 %vm527_vm2, %v6902_v11  ;;  %v7191_v6 = vadd.f32 %v7155_v0, %v7049_v15  ;;  %6849 = vst.msk [vmem:[#allocation3 + $0x10] sm:$0xff] %vm527_vm2, %v6813_v34  ;;  %v7279_v15 = vld [vmem:[#allocation2 + $0xad] sm:$0xff] }
 0x509   : > { %v6014_v43 = vpop.f32.mrf.mxu0 }
 0x50a   : > { %v6676_v57 = vpop.f32.mrf.mxu2  ;;  %7227 = vst.msk [vmem:[#allocation3 + $0x8] sm:$0xff] %vm527_vm2, %v7191_v6  ;;  %v6088_v62 = vadd.f32 %v6052_v38, %v6014_v43  ;;  %v7533_v53 = vld [vmem:[#allocation3] sm:$0xff] }
 0x50b   : > { %v7055_v40 = vpop.f32.mrf.mxu3  ;;  %v6300_v54 = vpop.f32.mrf.mxu1 }
 0x50c   : > { %6124 = vst.msk [vmem:[#allocation3 + $0x118] sm:$0xff] %vm527_vm2, %v6088_v62  ;;  %v6436_v8 = vadd.f32 %v6400_v46, %v6300_v54  ;;  %9493 = vmatmul.msk.f32.gmra.mxu0 %vm527_vm2, %v7277_v39  ;;  %v6404_v62 = vld [vmem:[#allocation3 + $0x40] sm:$0xff]  ;;  %v6149_v39 = vld [vmem:[#allocation2 + $0xd3] sm:$0xff] }
 0x50d   : > { %v6778_v52 = vld [vmem:[#allocation3 + $0x18] sm:$0xff] }
 0x50e   : > { %v6814_v4 = vadd.f32 %v6778_v52, %v6676_v57  ;;  %6472 = vst.msk [vmem:[#allocation3 + $0x20] sm:$0xff] %vm527_vm2, %v6436_v8  ;;  %9387 = vmatmul.msk.f32.gmra.mxu1 %vm527_vm2, %v6145_v47  ;;  %v6907_v52 = vld [vmem:[#allocation2 + $0xe4] sm:$0xff] }
 0x50f   : > { %9424 = vmatmul.msk.f32.gmra.mxu2 %vm527_vm2, %v6901_v20  ;;  %v7156_v21 = vld [vmem:[#allocation3 + $0x10] sm:$0xff] }
 0x510   : > { %9461 = vmatmul.msk.f32.gmra.mxu3 %vm527_vm2, %v6903_v63  ;;  %v7192_v26 = vadd.f32 %v7156_v21, %v7052_v49  ;;  %6850 = vst.msk [vmem:[#allocation3 + $0x18] sm:$0xff] %vm527_vm2, %v6814_v4  ;;  %v7280_v49 = vld [vmem:[#allocation2 + $0xb5] sm:$0xff] }
 0x511   : > { %v7425_v13 = vpop.f32.mrf.mxu0  ;;  %v7534_v55 = vld [vmem:[#allocation3 + $0x8] sm:$0xff] }
 0x512   : > { %v6679_v14 = vpop.f32.mrf.mxu2  ;;  %7228 = vst.msk [vmem:[#allocation3 + $0x10] sm:$0xff] %vm527_vm2, %v7192_v26  ;;  %v7569_v2 = vadd.f32 %v7533_v53, %v7425_v13 }
 0x513   : > { %v7058_v44 = vpop.f32.mrf.mxu3  ;;  %v6303_v19 = vpop.f32.mrf.mxu1 }
 0x514   : > { %7605 = vst.msk [vmem:[#allocation3] sm:$0xff] %vm527_vm2, %v7569_v2  ;;  %v6437_v32 = vadd.f32 %v6401_v31, %v6303_v19  ;;  %9494 = vmatmul.msk.f32.gmra.mxu0 %vm527_vm2, %v7278_v3  ;;  %v7282_v2 = vld [vmem:[#allocation2 + $0xc5] sm:$0xff]  ;;  %v6150_v3 = vld [vmem:[#allocation2 + $0xdb] sm:$0xff] }
 0x515   : > { %v6779_v58 = vld [vmem:[#allocation3 + $0x20] sm:$0xff] }
 0x516   : > { %v6815_v37 = vadd.f32 %v6779_v58, %v6679_v14  ;;  %6473 = vst.msk [vmem:[#allocation3 + $0x28] sm:$0xff] %vm527_vm2, %v6437_v32  ;;  %9388 = vmatmul.msk.f32.gmra.mxu1 %vm527_vm2, %v6146_v51  ;;  %v6908_v58 = vld [vmem:[#allocation2 + $0xec] sm:$0xff] }
 0x517   : > { %9425 = vmatmul.msk.f32.gmra.mxu2 %vm527_vm2, %v6902_v11  ;;  %v7157_v17 = vld [vmem:[#allocation3 + $0x18] sm:$0xff] }
 0x518   : > { %9462 = vmatmul.msk.f32.gmra.mxu3 %vm527_vm2, %v6904_v60  ;;  %v7193_v56 = vadd.f32 %v7157_v17, %v7055_v40  ;;  %6851 = vst.msk [vmem:[#allocation3 + $0x20] sm:$0xff] %vm527_vm2, %v6815_v37  ;;  %v7281_v40 = vld [vmem:[#allocation2 + $0xbd] sm:$0xff] }
 0x519   : > { %v7428_v48 = vpop.f32.mrf.mxu0  ;;  %v7535_v36 = vld [vmem:[#allocation3 + $0x10] sm:$0xff] }
 0x51a   : > { %v6682_v23 = vpop.f32.mrf.mxu2  ;;  %7229 = vst.msk [vmem:[#allocation3 + $0x18] sm:$0xff] %vm527_vm2, %v7193_v56  ;;  %v7570_v10 = vadd.f32 %v7534_v55, %v7428_v48 }
 0x51b   : > { %v7061_v7 = vpop.f32.mrf.mxu3  ;;  %v6306_v59 = vpop.f32.mrf.mxu1 }
 0x51c   : > { %7606 = vst.msk [vmem:[#allocation3 + $0x8] sm:$0xff] %vm527_vm2, %v7570_v10  ;;  %v6438_v41 = vadd.f32 %v6402_v35, %v6306_v59  ;;  %9495 = vmatmul.msk.f32.gmra.mxu0 %vm527_vm2, %v7279_v15  ;;  %v7283_v10 = vld [vmem:[#allocation2 + $0xcd] sm:$0xff]  ;;  %v6151_v15 = vld [vmem:[#allocation2 + $0xe3] sm:$0xff] }
 0x51d   : > { %v6780_v61 = vld [vmem:[#allocation3 + $0x28] sm:$0xff] }
 0x51e   : > { %v6816_v22 = vadd.f32 %v6780_v61, %v6682_v23  ;;  %6474 = vst.msk [vmem:[#allocation3 + $0x30] sm:$0xff] %vm527_vm2, %v6438_v41  ;;  %9389 = vmatmul.msk.f32.gmra.mxu1 %vm527_vm2, %v6147_v45  ;;  %v6909_v61 = vld [vmem:[#allocation2 + $0xf4] sm:$0xff] }
 0x51f   : > { %9426 = vmatmul.msk.f32.gmra.mxu2 %vm527_vm2, %v6903_v63  ;;  %v7158_v28 = vld [vmem:[#allocation3 + $0x20] sm:$0xff] }
 0x520   : > { %9463 = vmatmul.msk.f32.gmra.mxu3 %vm527_vm2, %v6905_v16  ;;  %v7194_v1 = vadd.f32 %v7158_v28, %v7058_v44  ;;  %6852 = vst.msk [vmem:[#allocation3 + $0x28] sm:$0xff] %vm527_vm2, %v6816_v22  ;;  %v6405_v44 = vld [vmem:[#allocation3 + $0x48] sm:$0xff] }
 0x521   : > { %v7431_v50 = vpop.f32.mrf.mxu0  ;;  %v7536_v6 = vld [vmem:[#allocation3 + $0x18] sm:$0xff] }
 0x522   : > { %v6685_v20 = vpop.f32.mrf.mxu2  ;;  %7230 = vst.msk [vmem:[#allocation3 + $0x20] sm:$0xff] %vm527_vm2, %v7194_v1  ;;  %v7571_v30 = vadd.f32 %v7535_v36, %v7431_v50 }
 0x523   : > { %v7064_v9 = vpop.f32.mrf.mxu3  ;;  %v6309_v18 = vpop.f32.mrf.mxu1 }
 0x524   : > { %7607 = vst.msk [vmem:[#allocation3 + $0x10] sm:$0xff] %vm527_vm2, %v7571_v30  ;;  %v6439_v25 = vadd.f32 %v6403_v42, %v6309_v18  ;;  %9496 = vmatmul.msk.f32.gmra.mxu0 %vm527_vm2, %v7280_v49  ;;  %v7284_v30 = vld [vmem:[#allocation2 + $0xd5] sm:$0xff]  ;;  %v6152_v49 = vld [vmem:[#allocation2 + $0xeb] sm:$0xff] }
 0x525   : > { %v6781_v27 = vld [vmem:[#allocation3 + $0x30] sm:$0xff] }
 0x526   : > { %v6817_v24 = vadd.f32 %v6781_v27, %v6685_v20  ;;  %6475 = vst.msk [vmem:[#allocation3 + $0x38] sm:$0xff] %vm527_vm2, %v6439_v25  ;;  %9390 = vmatmul.msk.f32.gmra.mxu1 %vm527_vm2, %v6148_v5  ;;  %v6910_v27 = vld [vmem:[#allocation2 + $0xfc] sm:$0xff] }
 0x527   : > { %9427 = vmatmul.msk.f32.gmra.mxu2 %vm527_vm2, %v6904_v60  ;;  %v7159_v12 = vld [vmem:[#allocation3 + $0x28] sm:$0xff] }
 0x528   : > { %9464 = vmatmul.msk.f32.gmra.mxu3 %vm527_vm2, %v6906_v33  ;;  %v7195_v34 = vadd.f32 %v7159_v12, %v7061_v7  ;;  %6853 = vst.msk [vmem:[#allocation3 + $0x30] sm:$0xff] %vm527_vm2, %v6817_v24  ;;  %v6406_v7 = vld [vmem:[#allocation3 + $0x50] sm:$0xff] }
 0x529   : > { %v7434_v0 = vpop.f32.mrf.mxu0  ;;  %v7537_v26 = vld [vmem:[#allocation3 + $0x20] sm:$0xff] }
 0x52a   : > { %v6688_v11 = vpop.f32.mrf.mxu2  ;;  %7231 = vst.msk [vmem:[#allocation3 + $0x28] sm:$0xff] %vm527_vm2, %v7195_v34  ;;  %v7572_v38 = vadd.f32 %v7536_v6, %v7434_v0 }
 0x52b   : > { %v7067_v43 = vpop.f32.mrf.mxu3  ;;  %v6312_v57 = vpop.f32.mrf.mxu1 }
 0x52c   : > { %7608 = vst.msk [vmem:[#allocation3 + $0x18] sm:$0xff] %vm527_vm2, %v7572_v38  ;;  %v6440_v54 = vadd.f32 %v6404_v62, %v6312_v57  ;;  %9497 = vmatmul.msk.f32.gmra.mxu0 %vm527_vm2, %v7281_v40  ;;  %v7285_v38 = vld [vmem:[#allocation2 + $0xdd] sm:$0xff]  ;;  %v6153_v40 = vld [vmem:[#allocation2 + $0xf3] sm:$0xff] }
 0x52d   : > { %v6782_v46 = vld [vmem:[#allocation3 + $0x38] sm:$0xff] }
 0x52e   : > { %v6818_v8 = vadd.f32 %v6782_v46, %v6688_v11  ;;  %6476 = vst.msk [vmem:[#allocation3 + $0x40] sm:$0xff] %vm527_vm2, %v6440_v54  ;;  %9391 = vmatmul.msk.f32.gmra.mxu1 %vm527_vm2, %v6149_v39  ;;  %v6911_v46 = vld [vmem:[#allocation2 + $0x104] sm:$0xff] }
 0x52f   : > { %9428 = vmatmul.msk.f32.gmra.mxu2 %vm527_vm2, %v6905_v16  ;;  %v7160_v47 = vld [vmem:[#allocation3 + $0x30] sm:$0xff] }
 0x530   : > { %9465 = vmatmul.msk.f32.gmra.mxu3 %vm527_vm2, %v6907_v52  ;;  %v7196_v4 = vadd.f32 %v7160_v47, %v7064_v9  ;;  %6854 = vst.msk [vmem:[#allocation3 + $0x38] sm:$0xff] %vm527_vm2, %v6818_v8  ;;  %v6407_v9 = vld [vmem:[#allocation3 + $0x58] sm:$0xff] }
 0x531   : > { %v7437_v21 = vpop.f32.mrf.mxu0  ;;  %v7538_v56 = vld [vmem:[#allocation3 + $0x28] sm:$0xff] }
 0x532   : > { %v6691_v63 = vpop.f32.mrf.mxu2  ;;  %7232 = vst.msk [vmem:[#allocation3 + $0x30] sm:$0xff] %vm527_vm2, %v7196_v4  ;;  %v7573_v13 = vadd.f32 %v7537_v26, %v7437_v21 }
 0x533   : > { %v7070_v14 = vpop.f32.mrf.mxu3  ;;  %v6315_v53 = vpop.f32.mrf.mxu1 }
 0x534   : > { %7609 = vst.msk [vmem:[#allocation3 + $0x20] sm:$0xff] %vm527_vm2, %v7573_v13  ;;  %v6441_v19 = vadd.f32 %v6405_v44, %v6315_v53  ;;  %9498 = vmatmul.msk.f32.gmra.mxu0 %vm527_vm2, %v7282_v2  ;;  %v7286_v13 = vld [vmem:[#allocation2 + $0xe5] sm:$0xff]  ;;  %v6154_v2 = vld [vmem:[#allocation2 + $0xfb] sm:$0xff] }
 0x535   : > { %v6783_v31 = vld [vmem:[#allocation3 + $0x40] sm:$0xff] }
 0x536   : > { %v6819_v32 = vadd.f32 %v6783_v31, %v6691_v63  ;;  %6477 = vst.msk [vmem:[#allocation3 + $0x48] sm:$0xff] %vm527_vm2, %v6441_v19  ;;  %9392 = vmatmul.msk.f32.gmra.mxu1 %vm527_vm2, %v6150_v3  ;;  %v6912_v31 = vld [vmem:[#allocation2 + $0x10c] sm:$0xff] }
 0x537   : > { %9429 = vmatmul.msk.f32.gmra.mxu2 %vm527_vm2, %v6906_v33  ;;  %v7161_v51 = vld [vmem:[#allocation3 + $0x38] sm:$0xff] }
 0x538   : > { %9466 = vmatmul.msk.f32.gmra.mxu3 %vm527_vm2, %v6908_v58  ;;  %v7197_v37 = vadd.f32 %v7161_v51, %v7067_v43  ;;  %6855 = vst.msk [vmem:[#allocation3 + $0x40] sm:$0xff] %vm527_vm2, %v6819_v32  ;;  %v6408_v43 = vld [vmem:[#allocation3 + $0x60] sm:$0xff] }
 0x539   : > { %v7440_v17 = vpop.f32.mrf.mxu0  ;;  %v7539_v1 = vld [vmem:[#allocation3 + $0x30] sm:$0xff] }
 0x53a   : > { %v6694_v60 = vpop.f32.mrf.mxu2  ;;  %7233 = vst.msk [vmem:[#allocation3 + $0x38] sm:$0xff] %vm527_vm2, %v7197_v37  ;;  %v7574_v48 = vadd.f32 %v7538_v56, %v7440_v17 }
 0x53b   : > { %v7073_v23 = vpop.f32.mrf.mxu3  ;;  %v6318_v55 = vpop.f32.mrf.mxu1 }
 0x53c   : > { %7610 = vst.msk [vmem:[#allocation3 + $0x28] sm:$0xff] %vm527_vm2, %v7574_v48  ;;  %v6442_v59 = vadd.f32 %v6406_v7, %v6318_v55  ;;  %9499 = vmatmul.msk.f32.gmra.mxu0 %vm527_vm2, %v7283_v10  ;;  %v7287_v48 = vld [vmem:[#allocation2 + $0xed] sm:$0xff]  ;;  %v6155_v10 = vld [vmem:[#allocation2 + $0x103] sm:$0xff] }
 0x53d   : > { %v6784_v35 = vld [vmem:[#allocation3 + $0x48] sm:$0xff] }
 0x53e   : > { %v6820_v41 = vadd.f32 %v6784_v35, %v6694_v60  ;;  %6478 = vst.msk [vmem:[#allocation3 + $0x50] sm:$0xff] %vm527_vm2, %v6442_v59  ;;  %9393 = vmatmul.msk.f32.gmra.mxu1 %vm527_vm2, %v6151_v15  ;;  %v6913_v35 = vld [vmem:[#allocation2 + $0x114] sm:$0xff] }
 0x53f   : > { %9430 = vmatmul.msk.f32.gmra.mxu2 %vm527_vm2, %v6907_v52  ;;  %v7162_v45 = vld [vmem:[#allocation3 + $0x40] sm:$0xff] }
 0x540   : > { %9467 = vmatmul.msk.f32.gmra.mxu3 %vm527_vm2, %v6909_v61  ;;  %v7198_v22 = vadd.f32 %v7162_v45, %v7070_v14  ;;  %6856 = vst.msk [vmem:[#allocation3 + $0x48] sm:$0xff] %vm527_vm2, %v6820_v41  ;;  %v6409_v14 = vld [vmem:[#allocation3 + $0x68] sm:$0xff] }
 0x541   : > { %v7443_v28 = vpop.f32.mrf.mxu0  ;;  %v7540_v34 = vld [vmem:[#allocation3 + $0x38] sm:$0xff] }
 0x542   : > { %v6697_v16 = vpop.f32.mrf.mxu2  ;;  %7234 = vst.msk [vmem:[#allocation3 + $0x40] sm:$0xff] %vm527_vm2, %v7198_v22  ;;  %v7575_v50 = vadd.f32 %v7539_v1, %v7443_v28 }
 0x543   : > { %v7076_v20 = vpop.f32.mrf.mxu3  ;;  %v6321_v36 = vpop.f32.mrf.mxu1 }
 0x544   : > { %7611 = vst.msk [vmem:[#allocation3 + $0x30] sm:$0xff] %vm527_vm2, %v7575_v50  ;;  %v6443_v18 = vadd.f32 %v6407_v9, %v6321_v36  ;;  %9500 = vmatmul.msk.f32.gmra.mxu0 %vm527_vm2, %v7284_v30  ;;  %v7288_v50 = vld [vmem:[#allocation2 + $0xf5] sm:$0xff]  ;;  %v6156_v30 = vld [vmem:[#allocation2 + $0x10b] sm:$0xff] }
 0x545   : > { %v6785_v42 = vld [vmem:[#allocation3 + $0x50] sm:$0xff] }
 0x546   : > { %v6821_v25 = vadd.f32 %v6785_v42, %v6697_v16  ;;  %6479 = vst.msk [vmem:[#allocation3 + $0x58] sm:$0xff] %vm527_vm2, %v6443_v18  ;;  %9394 = vmatmul.msk.f32.gmra.mxu1 %vm527_vm2, %v6152_v49  ;;  %v6914_v42 = vld [vmem:[#allocation2 + $0x11c] sm:$0xff] }
 0x547   : > { %9431 = vmatmul.msk.f32.gmra.mxu2 %vm527_vm2, %v6908_v58  ;;  %v7163_v5 = vld [vmem:[#allocation3 + $0x48] sm:$0xff] }
 0x548   : > { %9468 = vmatmul.msk.f32.gmra.mxu3 %vm527_vm2, %v6910_v27  ;;  %v7199_v24 = vadd.f32 %v7163_v5, %v7073_v23  ;;  %6857 = vst.msk [vmem:[#allocation3 + $0x50] sm:$0xff] %vm527_vm2, %v6821_v25  ;;  %v6410_v23 = vld [vmem:[#allocation3 + $0x70] sm:$0xff] }
 0x549   : > { %v7446_v12 = vpop.f32.mrf.mxu0  ;;  %v7541_v4 = vld [vmem:[#allocation3 + $0x40] sm:$0xff] }
 0x54a   : > { %v6700_v33 = vpop.f32.mrf.mxu2  ;;  %7235 = vst.msk [vmem:[#allocation3 + $0x48] sm:$0xff] %vm527_vm2, %v7199_v24  ;;  %v7576_v0 = vadd.f32 %v7540_v34, %v7446_v12 }
 0x54b   : > { %v7079_v11 = vpop.f32.mrf.mxu3  ;;  %v6324_v6 = vpop.f32.mrf.mxu1 }
 0x54c   : > { %7612 = vst.msk [vmem:[#allocation3 + $0x38] sm:$0xff] %vm527_vm2, %v7576_v0  ;;  %v6444_v57 = vadd.f32 %v6408_v43, %v6324_v6  ;;  %9501 = vmatmul.msk.f32.gmra.mxu0 %vm527_vm2, %v7285_v38  ;;  %v7289_v0 = vld [vmem:[#allocation2 + $0xfd] sm:$0xff]  ;;  %v6157_v38 = vld [vmem:[#allocation2 + $0x113] sm:$0xff] }
 0x54d   : > { %v6786_v62 = vld [vmem:[#allocation3 + $0x58] sm:$0xff] }
 0x54e   : > { %v6822_v54 = vadd.f32 %v6786_v62, %v6700_v33  ;;  %6480 = vst.msk [vmem:[#allocation3 + $0x60] sm:$0xff] %vm527_vm2, %v6444_v57  ;;  %9395 = vmatmul.msk.f32.gmra.mxu1 %vm527_vm2, %v6153_v40  ;;  %v6915_v62 = vld [vmem:[#allocation2 + $0x124] sm:$0xff] }
 0x54f   : > { %9432 = vmatmul.msk.f32.gmra.mxu2 %vm527_vm2, %v6909_v61  ;;  %v7164_v39 = vld [vmem:[#allocation3 + $0x50] sm:$0xff] }
 0x550   : > { %9469 = vmatmul.msk.f32.gmra.mxu3 %vm527_vm2, %v6911_v46  ;;  %v7200_v8 = vadd.f32 %v7164_v39, %v7076_v20  ;;  %6858 = vst.msk [vmem:[#allocation3 + $0x58] sm:$0xff] %vm527_vm2, %v6822_v54  ;;  %v6411_v20 = vld [vmem:[#allocation3 + $0x78] sm:$0xff] }
 0x551   : > { %v7449_v47 = vpop.f32.mrf.mxu0  ;;  %v7542_v37 = vld [vmem:[#allocation3 + $0x48] sm:$0xff] }
 0x552   : > { %v6703_v52 = vpop.f32.mrf.mxu2  ;;  %7236 = vst.msk [vmem:[#allocation3 + $0x50] sm:$0xff] %vm527_vm2, %v7200_v8  ;;  %v7577_v21 = vadd.f32 %v7541_v4, %v7449_v47 }
 0x553   : > { %v7082_v63 = vpop.f32.mrf.mxu3  ;;  %v6327_v26 = vpop.f32.mrf.mxu1 }
 0x554   : > { %7613 = vst.msk [vmem:[#allocation3 + $0x40] sm:$0xff] %vm527_vm2, %v7577_v21  ;;  %v6445_v53 = vadd.f32 %v6409_v14, %v6327_v26  ;;  %9502 = vmatmul.msk.f32.gmra.mxu0 %vm527_vm2, %v7286_v13  ;;  %v7290_v21 = vld [vmem:[#allocation2 + $0x105] sm:$0xff]  ;;  %v6158_v13 = vld [vmem:[#allocation2 + $0x11b] sm:$0xff] }
 0x555   : > { %v6787_v44 = vld [vmem:[#allocation3 + $0x60] sm:$0xff] }
 0x556   : > { %v6823_v19 = vadd.f32 %v6787_v44, %v6703_v52  ;;  %6481 = vst.msk [vmem:[#allocation3 + $0x68] sm:$0xff] %vm527_vm2, %v6445_v53  ;;  %9396 = vmatmul.msk.f32.gmra.mxu1 %vm527_vm2, %v6154_v2  ;;  %v6916_v44 = vld [vmem:[#allocation2 + $0x12c] sm:$0xff] }
 0x557   : > { %9433 = vmatmul.msk.f32.gmra.mxu2 %vm527_vm2, %v6910_v27  ;;  %v7165_v3 = vld [vmem:[#allocation3 + $0x58] sm:$0xff] }
 0x558   : > { %9470 = vmatmul.msk.f32.gmra.mxu3 %vm527_vm2, %v6912_v31  ;;  %v7201_v32 = vadd.f32 %v7165_v3, %v7079_v11  ;;  %6859 = vst.msk [vmem:[#allocation3 + $0x60] sm:$0xff] %vm527_vm2, %v6823_v19  ;;  %v6412_v11 = vld [vmem:[#allocation3 + $0x80] sm:$0xff] }
 0x559   : > { %v7452_v51 = vpop.f32.mrf.mxu0  ;;  %v7543_v22 = vld [vmem:[#allocation3 + $0x50] sm:$0xff] }
 0x55a   : > { %v6706_v58 = vpop.f32.mrf.mxu2  ;;  %7237 = vst.msk [vmem:[#allocation3 + $0x58] sm:$0xff] %vm527_vm2, %v7201_v32  ;;  %v7578_v17 = vadd.f32 %v7542_v37, %v7452_v51 }
 0x55b   : > { %v7085_v60 = vpop.f32.mrf.mxu3  ;;  %v6330_v56 = vpop.f32.mrf.mxu1 }
 0x55c   : > { %7614 = vst.msk [vmem:[#allocation3 + $0x48] sm:$0xff] %vm527_vm2, %v7578_v17  ;;  %v6446_v55 = vadd.f32 %v6410_v23, %v6330_v56  ;;  %9503 = vmatmul.msk.f32.gmra.mxu0 %vm527_vm2, %v7287_v48  ;;  %v7291_v17 = vld [vmem:[#allocation2 + $0x10d] sm:$0xff] }
 0x55d   : > { %v6788_v7 = vld [vmem:[#allocation3 + $0x68] sm:$0xff] }
 0x55e   : > { %v6824_v59 = vadd.f32 %v6788_v7, %v6706_v58  ;;  %6482 = vst.msk [vmem:[#allocation3 + $0x70] sm:$0xff] %vm527_vm2, %v6446_v55  ;;  %9397 = vmatmul.msk.f32.gmra.mxu1 %vm527_vm2, %v6155_v10  ;;  %v6917_v23 = vld [vmem:[#allocation2 + $0x134] sm:$0xff]  ;;  %v6159_v55 = vld [vmem:[#allocation2 + $0x123] sm:$0xff] }
 0x55f   : > { %9434 = vmatmul.msk.f32.gmra.mxu2 %vm527_vm2, %v6911_v46  ;;  %v7166_v15 = vld [vmem:[#allocation3 + $0x60] sm:$0xff] }
 0x560   : > { %9471 = vmatmul.msk.f32.gmra.mxu3 %vm527_vm2, %v6913_v35  ;;  %v7202_v41 = vadd.f32 %v7166_v15, %v7082_v63  ;;  %6860 = vst.msk [vmem:[#allocation3 + $0x68] sm:$0xff] %vm527_vm2, %v6824_v59  ;;  %v6413_v63 = vld [vmem:[#allocation3 + $0x88] sm:$0xff] }
 0x561   : > { %v7455_v45 = vpop.f32.mrf.mxu0  ;;  %v7544_v24 = vld [vmem:[#allocation3 + $0x58] sm:$0xff] }
 0x562   : > { %v6709_v61 = vpop.f32.mrf.mxu2  ;;  %7238 = vst.msk [vmem:[#allocation3 + $0x60] sm:$0xff] %vm527_vm2, %v7202_v41  ;;  %v7579_v28 = vadd.f32 %v7543_v22, %v7455_v45 }
 0x563   : > { %v7088_v16 = vpop.f32.mrf.mxu3  ;;  %v6333_v1 = vpop.f32.mrf.mxu1 }
 0x564   : > { %7615 = vst.msk [vmem:[#allocation3 + $0x50] sm:$0xff] %vm527_vm2, %v7579_v28  ;;  %v6447_v36 = vadd.f32 %v6411_v20, %v6333_v1  ;;  %9504 = vmatmul.msk.f32.gmra.mxu0 %vm527_vm2, %v7288_v50  ;;  %v7292_v28 = vld [vmem:[#allocation2 + $0x115] sm:$0xff] }
 0x565   : > { %v6789_v9 = vld [vmem:[#allocation3 + $0x70] sm:$0xff] }
 0x566   : > { %v6825_v18 = vadd.f32 %v6789_v9, %v6709_v61  ;;  %6483 = vst.msk [vmem:[#allocation3 + $0x78] sm:$0xff] %vm527_vm2, %v6447_v36  ;;  %9398 = vmatmul.msk.f32.gmra.mxu1 %vm527_vm2, %v6156_v30  ;;  %v6918_v20 = vld [vmem:[#allocation2 + $0x13c] sm:$0xff]  ;;  %v6160_v36 = vld [vmem:[#allocation2 + $0x12b] sm:$0xff] }
 0x567   : > { %9435 = vmatmul.msk.f32.gmra.mxu2 %vm527_vm2, %v6912_v31  ;;  %v7167_v49 = vld [vmem:[#allocation3 + $0x68] sm:$0xff] }
 0x568   : > { %9472 = vmatmul.msk.f32.gmra.mxu3 %vm527_vm2, %v6914_v42  ;;  %v7203_v25 = vadd.f32 %v7167_v49, %v7085_v60  ;;  %6861 = vst.msk [vmem:[#allocation3 + $0x70] sm:$0xff] %vm527_vm2, %v6825_v18  ;;  %v6414_v60 = vld [vmem:[#allocation3 + $0x90] sm:$0xff] }
 0x569   : > { %v7458_v5 = vpop.f32.mrf.mxu0  ;;  %v7545_v8 = vld [vmem:[#allocation3 + $0x60] sm:$0xff] }
 0x56a   : > { %v6712_v27 = vpop.f32.mrf.mxu2  ;;  %7239 = vst.msk [vmem:[#allocation3 + $0x68] sm:$0xff] %vm527_vm2, %v7203_v25  ;;  %v7580_v12 = vadd.f32 %v7544_v24, %v7458_v5 }
 0x56b   : > { %v7091_v33 = vpop.f32.mrf.mxu3  ;;  %v6336_v34 = vpop.f32.mrf.mxu1 }
 0x56c   : > { %7616 = vst.msk [vmem:[#allocation3 + $0x58] sm:$0xff] %vm527_vm2, %v7580_v12  ;;  %v6448_v6 = vadd.f32 %v6412_v11, %v6336_v34  ;;  %9505 = vmatmul.msk.f32.gmra.mxu0 %vm527_vm2, %v7289_v0  ;;  %v7293_v12 = vld [vmem:[#allocation2 + $0x11d] sm:$0xff]  ;;  %v7641_v0 = vld [vmem:[#allocation2 + $0x26] sm:$0xff] }
 0x56d   : > { %v6790_v43 = vld [vmem:[#allocation3 + $0x78] sm:$0xff] }
 0x56e   : > { %v6826_v57 = vadd.f32 %v6790_v43, %v6712_v27  ;;  %6484 = vst.msk [vmem:[#allocation3 + $0x80] sm:$0xff] %vm527_vm2, %v6448_v6  ;;  %9399 = vmatmul.msk.f32.gmra.mxu1 %vm527_vm2, %v6157_v38 }
 0x56f   : > { %9436 = vmatmul.msk.f32.gmra.mxu2 %vm527_vm2, %v6913_v35  ;;  %v7168_v40 = vld [vmem:[#allocation3 + $0x70] sm:$0xff] }
 0x570   : > { %9473 = vmatmul.msk.f32.gmra.mxu3 %vm527_vm2, %v6915_v62  ;;  %v7204_v54 = vadd.f32 %v7168_v40, %v7088_v16  ;;  %6862 = vst.msk [vmem:[#allocation3 + $0x78] sm:$0xff] %vm527_vm2, %v6826_v57  ;;  %v6415_v16 = vld [vmem:[#allocation3 + $0x98] sm:$0xff] }
 0x571   : > { %v7461_v39 = vpop.f32.mrf.mxu0  ;;  %v7546_v32 = vld [vmem:[#allocation3 + $0x68] sm:$0xff] }
 0x572   : > { %v6715_v46 = vpop.f32.mrf.mxu2  ;;  %7240 = vst.msk [vmem:[#allocation3 + $0x70] sm:$0xff] %vm527_vm2, %v7204_v54  ;;  %v7581_v47 = vadd.f32 %v7545_v8, %v7461_v39  ;;  %v6417_v8 = vld [vmem:[#allocation3 + $0xa8] sm:$0xff] }
 0x573   : > { %v7094_v52 = vpop.f32.mrf.mxu3  ;;  %v6339_v4 = vpop.f32.mrf.mxu1 }
 0x574   : > { %7617 = vst.msk [vmem:[#allocation3 + $0x60] sm:$0xff] %vm527_vm2, %v7581_v47  ;;  %v6449_v26 = vadd.f32 %v6413_v63, %v6339_v4  ;;  %9506 = vmatmul.msk.f32.gmra.mxu0 %vm527_vm2, %v7290_v21  ;;  %v7642_v63 = vld [vmem:[#allocation2 + $0x2e] sm:$0xff] }
 0x575   : > { %v6791_v14 = vld [vmem:[#allocation3 + $0x80] sm:$0xff] }
 0x576   : > { %v6827_v53 = vadd.f32 %v6791_v14, %v6715_v46  ;;  %6485 = vst.msk [vmem:[#allocation3 + $0x88] sm:$0xff] %vm527_vm2, %v6449_v26  ;;  %9400 = vmatmul.msk.f32.gmra.mxu1 %vm527_vm2, %v6158_v13 }
 0x577   : > { %9437 = vmatmul.msk.f32.gmra.mxu2 %vm527_vm2, %v6914_v42  ;;  %v7169_v2 = vld [vmem:[#allocation3 + $0x78] sm:$0xff] }
 0x578   : > { %9474 = vmatmul.msk.f32.gmra.mxu3 %vm527_vm2, %v6916_v44  ;;  %v7205_v19 = vadd.f32 %v7169_v2, %v7091_v33  ;;  %6863 = vst.msk [vmem:[#allocation3 + $0x80] sm:$0xff] %vm527_vm2, %v6827_v53  ;;  %v6416_v33 = vld [vmem:[#allocation3 + $0xa0] sm:$0xff] }
 0x579   : > { %v7464_v3 = vpop.f32.mrf.mxu0  ;;  %v7547_v41 = vld [vmem:[#allocation3 + $0x70] sm:$0xff] }
 0x57a   : > { %v6718_v31 = vpop.f32.mrf.mxu2  ;;  %7241 = vst.msk [vmem:[#allocation3 + $0x78] sm:$0xff] %vm527_vm2, %v7205_v19  ;;  %v7582_v51 = vadd.f32 %v7546_v32, %v7464_v3  ;;  %v6418_v3 = vld [vmem:[#allocation3 + $0xb0] sm:$0xff]  ;;  %v7295_v32 = vld [vmem:[#allocation2 + $0x12d] sm:$0xff] }
 0x57b   : > { %v7097_v58 = vpop.f32.mrf.mxu3  ;;  %v6342_v37 = vpop.f32.mrf.mxu1 }
 0x57c   : > { %7618 = vst.msk [vmem:[#allocation3 + $0x68] sm:$0xff] %vm527_vm2, %v7582_v51  ;;  %v6450_v56 = vadd.f32 %v6414_v60, %v6342_v37  ;;  %9507 = vmatmul.msk.f32.gmra.mxu0 %vm527_vm2, %v7291_v17  ;;  %v7643_v37 = vld [vmem:[#allocation2 + $0x36] sm:$0xff] }
 0x57d   : > { %v6792_v48 = vld [vmem:[#allocation3 + $0x88] sm:$0xff] }
 0x57e   : > { %v6828_v7 = vadd.f32 %v6792_v48, %v6718_v31  ;;  %6486 = vst.msk [vmem:[#allocation3 + $0x90] sm:$0xff] %vm527_vm2, %v6450_v56  ;;  %9401 = vmatmul.msk.f32.gmra.mxu1 %vm527_vm2, %v6159_v55 }
 0x57f   : > { %9438 = vmatmul.msk.f32.gmra.mxu2 %vm527_vm2, %v6915_v62  ;;  %v7170_v10 = vld [vmem:[#allocation3 + $0x80] sm:$0xff] }
 0x580   : > { %9475 = vmatmul.msk.f32.gmra.mxu3 %vm527_vm2, %v6917_v23  ;;  %v7206_v59 = vadd.f32 %v7170_v10, %v7094_v52  ;;  %6864 = vst.msk [vmem:[#allocation3 + $0x88] sm:$0xff] %vm527_vm2, %v6828_v7  ;;  %v7294_v52 = vld [vmem:[#allocation2 + $0x125] sm:$0xff]  ;;  %v7296_v7 = vld [vmem:[#allocation2 + $0x135] sm:$0xff] }
 0x581   : > { %v7467_v15 = vpop.f32.mrf.mxu0  ;;  %v7548_v25 = vld [vmem:[#allocation3 + $0x78] sm:$0xff] }
 0x582   : > { %v6721_v35 = vpop.f32.mrf.mxu2  ;;  %7242 = vst.msk [vmem:[#allocation3 + $0x80] sm:$0xff] %vm527_vm2, %v7206_v59  ;;  %v7583_v45 = vadd.f32 %v7547_v41, %v7467_v15  ;;  %v6419_v15 = vld [vmem:[#allocation3 + $0xb8] sm:$0xff] }
 0x583   : > { %v7100_v61 = vpop.f32.mrf.mxu3  ;;  %v6345_v22 = vpop.f32.mrf.mxu1 }
 0x584   : > { %7619 = vst.msk [vmem:[#allocation3 + $0x70] sm:$0xff] %vm527_vm2, %v7583_v45  ;;  %v6451_v1 = vadd.f32 %v6415_v16, %v6345_v22  ;;  %9508 = vmatmul.msk.f32.gmra.mxu0 %vm527_vm2, %v7292_v28  ;;  %v7644_v45 = vld [vmem:[#allocation2 + $0x3e] sm:$0xff] }
 0x585   : > { %v6793_v50 = vld [vmem:[#allocation3 + $0x90] sm:$0xff] }
 0x586   : > { %v6829_v9 = vadd.f32 %v6793_v50, %v6721_v35  ;;  %6487 = vst.msk [vmem:[#allocation3 + $0x98] sm:$0xff] %vm527_vm2, %v6451_v1  ;;  %9402 = vmatmul.msk.f32.gmra.mxu1 %vm527_vm2, %v6160_v36  ;;  %v7297_v36 = vld [vmem:[#allocation2 + $0x13d] sm:$0xff] }
 0x587   : > { %9439 = vmatmul.msk.f32.gmra.mxu2 %vm527_vm2, %v6916_v44  ;;  %v7171_v30 = vld [vmem:[#allocation3 + $0x88] sm:$0xff] }
 0x588   : > { %9476 = vmatmul.msk.f32.gmra.mxu3 %vm527_vm2, %v6918_v20  ;;  %v7207_v18 = vadd.f32 %v7171_v30, %v7097_v58  ;;  %6865 = vst.msk [vmem:[#allocation3 + $0x90] sm:$0xff] %vm527_vm2, %v6829_v9 }
 0x589   : > { %v7470_v49 = vpop.f32.mrf.mxu0  ;;  %v7549_v40 = vld [vmem:[#allocation3 + $0x80] sm:$0xff] }
 0x58a   : > { %v6724_v42 = vpop.f32.mrf.mxu2  ;;  %7243 = vst.msk [vmem:[#allocation3 + $0x88] sm:$0xff] %vm527_vm2, %v7207_v18  ;;  %v7584_v5 = vadd.f32 %v7548_v25, %v7470_v49 }
 0x58b   : > { %v7103_v27 = vpop.f32.mrf.mxu3  ;;  %v6348_v24 = vpop.f32.mrf.mxu1 }
 0x58c   : > { %7620 = vst.msk [vmem:[#allocation3 + $0x78] sm:$0xff] %vm527_vm2, %v7584_v5  ;;  %v6452_v34 = vadd.f32 %v6416_v33, %v6348_v24  ;;  %9509 = vmatmul.msk.f32.gmra.mxu0 %vm527_vm2, %v7293_v12 }
 0x58d   : > { %v6794_v11 = vld [vmem:[#allocation3 + $0x98] sm:$0xff] }
 0x58e   : > { %v6830_v6 = vadd.f32 %v6794_v11, %v6724_v42  ;;  %6488 = vst.msk [vmem:[#allocation3 + $0xa0] sm:$0xff] %vm527_vm2, %v6452_v34  ;;  %9515 = vmatmul.msk.f32.vlgmr.msra.gmra.mxu1 %vm527_vm2, %v7641_v0  ;;  %v6420_v42 = vld [vmem:[#allocation3 + $0xc0] sm:$0xff] }
 0x58f   : > { %v7172_v43 = vld [vmem:[#allocation3 + $0x90] sm:$0xff] }
 0x590   : > { %v7208_v38 = vadd.f32 %v7172_v43, %v7100_v61  ;;  %6866 = vst.msk [vmem:[#allocation3 + $0x98] sm:$0xff] %vm527_vm2, %v6830_v6 }
 0x591   : > { %v7473_v62 = vpop.f32.mrf.mxu0  ;;  %v7550_v44 = vld [vmem:[#allocation3 + $0x88] sm:$0xff] }
 0x592   : > { %v6727_v57 = vpop.f32.mrf.mxu2  ;;  %7244 = vst.msk [vmem:[#allocation3 + $0x90] sm:$0xff] %vm527_vm2, %v7208_v38  ;;  %v7585_v46 = vadd.f32 %v7549_v40, %v7473_v62  ;;  %v6421_v38 = vld [vmem:[#allocation3 + $0xc8] sm:$0xff] }
 0x593   : > { %v7106_v54 = vpop.f32.mrf.mxu3  ;;  %v6351_v39 = vpop.f32.mrf.mxu1  ;;  %v7646_v40 = vld [vmem:[#allocation2 + $0x4e] sm:$0xff] }
 0x594   : > { %7621 = vst.msk [vmem:[#allocation3 + $0x80] sm:$0xff] %vm527_vm2, %v7585_v46  ;;  %v6453_v47 = vadd.f32 %v6417_v8, %v6351_v39  ;;  %9510 = vmatmul.msk.f32.gmra.mxu0 %vm527_vm2, %v7294_v52 }
 0x595   : > { %v6795_v4 = vld [vmem:[#allocation3 + $0xa0] sm:$0xff] }
 0x596   : > { %v6831_v21 = vadd.f32 %v6795_v4, %v6727_v57  ;;  %6489 = vst.msk [vmem:[#allocation3 + $0xa8] sm:$0xff] %vm527_vm2, %v6453_v47  ;;  %9516 = vmatmul.msk.f32.gmra.mxu1 %vm527_vm2, %v7642_v63 }
 0x597   : > { %v7173_v26 = vld [vmem:[#allocation3 + $0x98] sm:$0xff] }
 0x598   : > { %v7209_v14 = vadd.f32 %v7173_v26, %v7103_v27  ;;  %6867 = vst.msk [vmem:[#allocation3 + $0xa0] sm:$0xff] %vm527_vm2, %v6831_v21  ;;  %v7645_v27 = vld [vmem:[#allocation2 + $0x46] sm:$0xff]  ;;  %v6422_v26 = vld [vmem:[#allocation3 + $0xd0] sm:$0xff] }
 0x599   : > { %v7476_v53 = vpop.f32.mrf.mxu0  ;;  %v7551_v55 = vld [vmem:[#allocation3 + $0x90] sm:$0xff] }
 0x59a   : > { %v6730_v13 = vpop.f32.mrf.mxu2  ;;  %7245 = vst.msk [vmem:[#allocation3 + $0x98] sm:$0xff] %vm527_vm2, %v7209_v14  ;;  %v7586_v19 = vadd.f32 %v7550_v44, %v7476_v53  ;;  %v7647_v53 = vld [vmem:[#allocation2 + $0x56] sm:$0xff] }
 0x59b   : > { %v7109_v2 = vpop.f32.mrf.mxu3  ;;  %v6354_v31 = vpop.f32.mrf.mxu1 }
 0x59c   : > { %7622 = vst.msk [vmem:[#allocation3 + $0x88] sm:$0xff] %vm527_vm2, %v7586_v19  ;;  %v6454_v58 = vadd.f32 %v6418_v3, %v6354_v31  ;;  %9511 = vmatmul.msk.f32.gmra.mxu0 %vm527_vm2, %v7295_v32 }
 0x59d   : > { %v6796_v51 = vld [vmem:[#allocation3 + $0xa8] sm:$0xff] }
 0x59e   : > { %v6832_v60 = vadd.f32 %v6796_v51, %v6730_v13  ;;  %6490 = vst.msk [vmem:[#allocation3 + $0xb0] sm:$0xff] %vm527_vm2, %v6454_v58  ;;  %9517 = vmatmul.msk.f32.gmra.mxu1 %vm527_vm2, %v7643_v37 }
 0x59f   : > { %v7174_v17 = vld [vmem:[#allocation3 + $0xa0] sm:$0xff] }
 0x5a0   : > { %v7210_v56 = vadd.f32 %v7174_v17, %v7106_v54  ;;  %6868 = vst.msk [vmem:[#allocation3 + $0xa8] sm:$0xff] %vm527_vm2, %v6832_v60  ;;  %v6423_v60 = vld [vmem:[#allocation3 + $0xd8] sm:$0xff] }
 0x5a1   : > { %v7479_v48 = vpop.f32.mrf.mxu0  ;;  %v7552_v50 = vld [vmem:[#allocation3 + $0x98] sm:$0xff] }
 0x5a2   : > { %v6733_v23 = vpop.f32.mrf.mxu2  ;;  %7246 = vst.msk [vmem:[#allocation3 + $0xa0] sm:$0xff] %vm527_vm2, %v7210_v56  ;;  %v7587_v59 = vadd.f32 %v7551_v55, %v7479_v48 }
 0x5a3   : > { %v7112_v10 = vpop.f32.mrf.mxu3  ;;  %v6357_v35 = vpop.f32.mrf.mxu1 }
 0x5a4   : > { %7623 = vst.msk [vmem:[#allocation3 + $0x90] sm:$0xff] %vm527_vm2, %v7587_v59  ;;  %v6455_v41 = vadd.f32 %v6419_v15, %v6357_v35  ;;  %9512 = vmatmul.msk.f32.gmra.mxu0 %vm527_vm2, %v7296_v7 }
 0x5a5   : > { %v6797_v61 = vld [vmem:[#allocation3 + $0xb0] sm:$0xff] }
 0x5a6   : > { %v6833_v22 = vadd.f32 %v6797_v61, %v6733_v23  ;;  %6491 = vst.msk [vmem:[#allocation3 + $0xb8] sm:$0xff] %vm527_vm2, %v6455_v41  ;;  %9518 = vmatmul.msk.f32.gmra.mxu1 %vm527_vm2, %v7644_v45  ;;  %v7648_v23 = vld [vmem:[#allocation2 + $0x5e] sm:$0xff]  ;;  %v6424_v45 = vld [vmem:[#allocation3 + $0xe0] sm:$0xff] }
 0x5a7   : > { %v7175_v16 = vld [vmem:[#allocation3 + $0xa8] sm:$0xff] }
 0x5a8   : > { %v7211_v28 = vadd.f32 %v7175_v16, %v7109_v2  ;;  %6869 = vst.msk [vmem:[#allocation3 + $0xb0] sm:$0xff] %vm527_vm2, %v6833_v22 }
 0x5a9   : > { %v7482_v20 = vpop.f32.mrf.mxu0  ;;  %v7553_v11 = vld [vmem:[#allocation3 + $0xa0] sm:$0xff] }
 0x5aa   : > { %v6736_v1 = vpop.f32.mrf.mxu2  ;;  %7247 = vst.msk [vmem:[#allocation3 + $0xa8] sm:$0xff] %vm527_vm2, %v7211_v28  ;;  %v7588_v30 = vadd.f32 %v7552_v50, %v7482_v20  ;;  %v7649_v28 = vld [vmem:[#allocation2 + $0x66] sm:$0xff] }
 0x5ab   : > { %v7115_v9 = vpop.f32.mrf.mxu3  ;;  %v6360_v18 = vpop.f32.mrf.mxu1 }
 0x5ac   : > { %7624 = vst.msk [vmem:[#allocation3 + $0x98] sm:$0xff] %vm527_vm2, %v7588_v30  ;;  %v6456_v49 = vadd.f32 %v6420_v42, %v6360_v18  ;;  %9513 = vmatmul.msk.f32.gmra.mxu0 %vm527_vm2, %v7297_v36 }
 0x5ad   : > { %v6798_v25 = vld [vmem:[#allocation3 + $0xb8] sm:$0xff] }
 0x5ae   : > { %v6834_v5 = vadd.f32 %v6798_v25, %v6736_v1  ;;  %6492 = vst.msk [vmem:[#allocation3 + $0xc0] sm:$0xff] %vm527_vm2, %v6456_v49  ;;  %9519 = vmatmul.msk.f32.gmra.mxu1 %vm527_vm2, %v7645_v27  ;;  %v6425_v25 = vld [vmem:[#allocation3 + $0xe8] sm:$0xff] }
 0x5af   : > { %v7176_v24 = vld [vmem:[#allocation3 + $0xb0] sm:$0xff] }
 0x5b0   : > { %v7212_v33 = vadd.f32 %v7176_v24, %v7112_v10  ;;  %6870 = vst.msk [vmem:[#allocation3 + $0xb8] sm:$0xff] %vm527_vm2, %v6834_v5  ;;  %v7650_v24 = vld [vmem:[#allocation2 + $0x6e] sm:$0xff] }
 0x5b1   : > { %v7485_v34 = vpop.f32.mrf.mxu0  ;;  %v7554_v47 = vld [vmem:[#allocation3 + $0xa8] sm:$0xff] }
 0x5b2   : > { %v6739_v12 = vpop.f32.mrf.mxu2  ;;  %7248 = vst.msk [vmem:[#allocation3 + $0xb0] sm:$0xff] %vm527_vm2, %v7212_v33  ;;  %v7589_v6 = vadd.f32 %v7553_v11, %v7485_v34 }
 0x5b3   : > { %v7118_v0 = vpop.f32.mrf.mxu3  ;;  %v6363_v43 = vpop.f32.mrf.mxu1 }
 0x5b4   : > { %7625 = vst.msk [vmem:[#allocation3 + $0xa0] sm:$0xff] %vm527_vm2, %v7589_v6  ;;  %v6457_v57 = vadd.f32 %v6421_v38, %v6363_v43 }
 0x5b5   : > { %v6799_v62 = vld [vmem:[#allocation3 + $0xc0] sm:$0xff] }
 0x5b6   : > { %v6835_v54 = vadd.f32 %v6799_v62, %v6739_v12  ;;  %6493 = vst.msk [vmem:[#allocation3 + $0xc8] sm:$0xff] %vm527_vm2, %v6457_v57  ;;  %9520 = vmatmul.msk.f32.gmra.mxu1 %vm527_vm2, %v7646_v40  ;;  %v6426_v62 = vld [vmem:[#allocation3 + $0xf0] sm:$0xff] }
 0x5b7   : > { %v7177_v46 = vld [vmem:[#allocation3 + $0xb8] sm:$0xff] }
 0x5b8   : > { %v7213_v39 = vadd.f32 %v7177_v46, %v7115_v9  ;;  %6871 = vst.msk [vmem:[#allocation3 + $0xc0] sm:$0xff] %vm527_vm2, %v6835_v54  ;;  %v7651_v46 = vld [vmem:[#allocation2 + $0x76] sm:$0xff] }
 0x5b9   : > { %v7488_v52 = vpop.f32.mrf.mxu0  ;;  %v7555_v32 = vld [vmem:[#allocation3 + $0xb0] sm:$0xff] }
 0x5ba   : > { %v6742_v8 = vpop.f32.mrf.mxu2  ;;  %7249 = vst.msk [vmem:[#allocation3 + $0xb8] sm:$0xff] %vm527_vm2, %v7213_v39  ;;  %v7590_v63 = vadd.f32 %v7554_v47, %v7488_v52 }
 0x5bb   : > { %v7121_v4 = vpop.f32.mrf.mxu3  ;;  %v6366_v21 = vpop.f32.mrf.mxu1 }
 0x5bc   : > { %7626 = vst.msk [vmem:[#allocation3 + $0xa8] sm:$0xff] %vm527_vm2, %v7590_v63  ;;  %v6458_v14 = vadd.f32 %v6422_v26, %v6366_v21 }
 0x5bd   : > { %v6800_v13 = vld [vmem:[#allocation3 + $0xc8] sm:$0xff] }
 0x5be   : > { %v6836_v44 = vadd.f32 %v6800_v13, %v6742_v8  ;;  %6494 = vst.msk [vmem:[#allocation3 + $0xd0] sm:$0xff] %vm527_vm2, %v6458_v14  ;;  %9521 = vmatmul.msk.f32.gmra.mxu1 %vm527_vm2, %v7647_v53  ;;  %v6427_v14 = vld [vmem:[#allocation3 + $0xf8] sm:$0xff] }
 0x5bf   : > { %v7178_v2 = vld [vmem:[#allocation3 + $0xc0] sm:$0xff] }
 0x5c0   : > { %v7214_v19 = vadd.f32 %v7178_v2, %v7118_v0  ;;  %6872 = vst.msk [vmem:[#allocation3 + $0xc8] sm:$0xff] %vm527_vm2, %v6836_v44  ;;  %v7652_v2 = vld [vmem:[#allocation2 + $0x7e] sm:$0xff] }
 0x5c1   : > { %v7491_v3 = vpop.f32.mrf.mxu0  ;;  %v7556_v35 = vld [vmem:[#allocation3 + $0xb8] sm:$0xff] }
 0x5c2   : > { %v6745_v31 = vpop.f32.mrf.mxu2  ;;  %7250 = vst.msk [vmem:[#allocation3 + $0xc0] sm:$0xff] %vm527_vm2, %v7214_v19  ;;  %v7591_v51 = vadd.f32 %v7555_v32, %v7491_v3 }
 0x5c3   : > { %v7124_v58 = vpop.f32.mrf.mxu3  ;;  %v6369_v37 = vpop.f32.mrf.mxu1 }
 0x5c4   : > { %7627 = vst.msk [vmem:[#allocation3 + $0xb0] sm:$0xff] %vm527_vm2, %v7591_v51  ;;  %v6459_v17 = vadd.f32 %v6423_v60, %v6369_v37 }
 0x5c5   : > { %v6801_v56 = vld [vmem:[#allocation3 + $0xd0] sm:$0xff] }
 0x5c6   : > { %v6837_v48 = vadd.f32 %v6801_v56, %v6745_v31  ;;  %6495 = vst.msk [vmem:[#allocation3 + $0xd8] sm:$0xff] %vm527_vm2, %v6459_v17  ;;  %9522 = vmatmul.msk.f32.gmra.mxu1 %vm527_vm2, %v7648_v23  ;;  %v6428_v17 = vld [vmem:[#allocation3 + $0x100] sm:$0xff] }
 0x5c7   : > { %v7179_v55 = vld [vmem:[#allocation3 + $0xc8] sm:$0xff] }
 0x5c8   : > { %v7215_v7 = vadd.f32 %v7179_v55, %v7121_v4  ;;  %6873 = vst.msk [vmem:[#allocation3 + $0xd0] sm:$0xff] %vm527_vm2, %v6837_v48  ;;  %v7653_v48 = vld [vmem:[#allocation2 + $0x86] sm:$0xff] }
 0x5c9   : > { %v7494_v59 = vpop.f32.mrf.mxu0  ;;  %v7557_v30 = vld [vmem:[#allocation3 + $0xc0] sm:$0xff] }
 0x5ca   : > { %v6748_v10 = vpop.f32.mrf.mxu2  ;;  %7251 = vst.msk [vmem:[#allocation3 + $0xc8] sm:$0xff] %vm527_vm2, %v7215_v7  ;;  %v7592_v41 = vadd.f32 %v7556_v35, %v7494_v59 }
 0x5cb   : > { %v7127_v15 = vpop.f32.mrf.mxu3  ;;  %v6372_v61 = vpop.f32.mrf.mxu1 }
 0x5cc   : > { %7628 = vst.msk [vmem:[#allocation3 + $0xb8] sm:$0xff] %vm527_vm2, %v7592_v41  ;;  %v6460_v22 = vadd.f32 %v6424_v45, %v6372_v61 }
 0x5cd   : > { %v6802_v16 = vld [vmem:[#allocation3 + $0xd8] sm:$0xff] }
 0x5ce   : > { %v6838_v1 = vadd.f32 %v6802_v16, %v6748_v10  ;;  %6496 = vst.msk [vmem:[#allocation3 + $0xe0] sm:$0xff] %vm527_vm2, %v6460_v22  ;;  %9523 = vmatmul.msk.f32.gmra.mxu1 %vm527_vm2, %v7649_v28  ;;  %v6429_v22 = vld [vmem:[#allocation3 + $0x108] sm:$0xff] }
 0x5cf   : > { %v7180_v20 = vld [vmem:[#allocation3 + $0xd0] sm:$0xff] }
 0x5d0   : > { %v7216_v50 = vadd.f32 %v7180_v20, %v7124_v58  ;;  %6874 = vst.msk [vmem:[#allocation3 + $0xd8] sm:$0xff] %vm527_vm2, %v6838_v1  ;;  %v7654_v1 = vld [vmem:[#allocation2 + $0x8e] sm:$0xff] }
 0x5d1   : > { %v7497_v9 = vpop.f32.mrf.mxu0  ;;  %v7558_v6 = vld [vmem:[#allocation3 + $0xc8] sm:$0xff] }
 0x5d2   : > { %v6751_v36 = vpop.f32.mrf.mxu2  ;;  %7252 = vst.msk [vmem:[#allocation3 + $0xd0] sm:$0xff] %vm527_vm2, %v7216_v50  ;;  %v7593_v42 = vadd.f32 %v7557_v30, %v7497_v9 }
 0x5d3   : > { %v7130_v18 = vpop.f32.mrf.mxu3  ;;  %v6375_v49 = vpop.f32.mrf.mxu1 }
 0x5d4   : > { %7629 = vst.msk [vmem:[#allocation3 + $0xc0] sm:$0xff] %vm527_vm2, %v7593_v42  ;;  %v6461_v27 = vadd.f32 %v6425_v25, %v6375_v49 }
 0x5d5   : > { %v6803_v5 = vld [vmem:[#allocation3 + $0xe0] sm:$0xff] }
 0x5d6   : > { %v6839_v33 = vadd.f32 %v6803_v5, %v6751_v36  ;;  %6497 = vst.msk [vmem:[#allocation3 + $0xe8] sm:$0xff] %vm527_vm2, %v6461_v27  ;;  %9524 = vmatmul.msk.f32.gmra.mxu1 %vm527_vm2, %v7650_v24  ;;  %v6430_v27 = vld [vmem:[#allocation3 + $0x110] sm:$0xff] }
 0x5d7   : > { %v7181_v12 = vld [vmem:[#allocation3 + $0xd8] sm:$0xff] }
 0x5d8   : > { %v7217_v34 = vadd.f32 %v7181_v12, %v7127_v15  ;;  %6875 = vst.msk [vmem:[#allocation3 + $0xe0] sm:$0xff] %vm527_vm2, %v6839_v33  ;;  %v7655_v33 = vld [vmem:[#allocation2 + $0x96] sm:$0xff] }
 0x5d9   : > { %v7500_v0 = vpop.f32.mrf.mxu0  ;;  %v7559_v63 = vld [vmem:[#allocation3 + $0xd0] sm:$0xff] }
 0x5da   : > { %v6754_v11 = vpop.f32.mrf.mxu2  ;;  %7253 = vst.msk [vmem:[#allocation3 + $0xd8] sm:$0xff] %vm527_vm2, %v7217_v34  ;;  %v7594_v38 = vadd.f32 %v7558_v6, %v7500_v0 }
 0x5db   : > { %v7133_v43 = vpop.f32.mrf.mxu3  ;;  %v6378_v57 = vpop.f32.mrf.mxu1 }
 0x5dc   : > { %7630 = vst.msk [vmem:[#allocation3 + $0xc8] sm:$0xff] %vm527_vm2, %v7594_v38  ;;  %v6462_v40 = vadd.f32 %v6426_v62, %v6378_v57 }
 0x5dd   : > { %v6804_v54 = vld [vmem:[#allocation3 + $0xe8] sm:$0xff] }
 0x5de   : > { %v6840_v39 = vadd.f32 %v6804_v54, %v6754_v11  ;;  %6498 = vst.msk [vmem:[#allocation3 + $0xf0] sm:$0xff] %vm527_vm2, %v6462_v40  ;;  %9525 = vmatmul.msk.f32.gmra.mxu1 %vm527_vm2, %v7651_v46  ;;  %v6431_v40 = vld [vmem:[#allocation3 + $0x118] sm:$0xff] }
 0x5df   : > { %v7182_v8 = vld [vmem:[#allocation3 + $0xe0] sm:$0xff] }
 0x5e0   : > { %v7218_v52 = vadd.f32 %v7182_v8, %v7130_v18  ;;  %6876 = vst.msk [vmem:[#allocation3 + $0xe8] sm:$0xff] %vm527_vm2, %v6840_v39  ;;  %v7656_v39 = vld [vmem:[#allocation2 + $0x9e] sm:$0xff] }
 0x5e1   : > { %v7503_v4 = vpop.f32.mrf.mxu0  ;;  %v7560_v51 = vld [vmem:[#allocation3 + $0xd8] sm:$0xff] }
 0x5e2   : > { %v6757_v47 = vpop.f32.mrf.mxu2  ;;  %7254 = vst.msk [vmem:[#allocation3 + $0xe0] sm:$0xff] %vm527_vm2, %v7218_v52  ;;  %v7595_v21 = vadd.f32 %v7559_v63, %v7503_v4 }
 0x5e3   : > { %v6381_v26 = vpop.f32.mrf.mxu1  ;;  %v7136_v13 = vpop.f32.mrf.mxu3 }
 0x5e4   : > { %7631 = vst.msk [vmem:[#allocation3 + $0xd0] sm:$0xff] %vm527_vm2, %v7595_v21  ;;  %v6463_v53 = vadd.f32 %v6427_v14, %v6381_v26  ;;  %v7912_v14 = vld [vmem:[#allocation3] sm:$0xff] }
 0x5e5   : > { %v6805_v44 = vld [vmem:[#allocation3 + $0xf0] sm:$0xff] }
 0x5e6   : > { %v6841_v19 = vadd.f32 %v6805_v44, %v6757_v47  ;;  %6499 = vst.msk [vmem:[#allocation3 + $0xf8] sm:$0xff] %vm527_vm2, %v6463_v53  ;;  %9526 = vmatmul.msk.f32.gmra.mxu1 %vm527_vm2, %v7652_v2 }
 0x5e7   : > { %v7183_v31 = vld [vmem:[#allocation3 + $0xe8] sm:$0xff] }
 0x5e8   : > { %v7219_v3 = vadd.f32 %v7183_v31, %v7133_v43  ;;  %6877 = vst.msk [vmem:[#allocation3 + $0xf0] sm:$0xff] %vm527_vm2, %v6841_v19  ;;  %v7657_v19 = vld [vmem:[#allocation2 + $0xa6] sm:$0xff] }
 0x5e9   : > { %v7506_v58 = vpop.f32.mrf.mxu0  ;;  %v7561_v41 = vld [vmem:[#allocation3 + $0xe0] sm:$0xff] }
 0x5ea   : > { %v6760_v32 = vpop.f32.mrf.mxu2  ;;  %7255 = vst.msk [vmem:[#allocation3 + $0xe8] sm:$0xff] %vm527_vm2, %v7219_v3  ;;  %v7596_v37 = vadd.f32 %v7560_v51, %v7506_v58 }
 0x5eb   : > { %v6384_v60 = vpop.f32.mrf.mxu1  ;;  %v7139_v7 = vpop.f32.mrf.mxu3 }
 0x5ec   : > { %7632 = vst.msk [vmem:[#allocation3 + $0xd8] sm:$0xff] %vm527_vm2, %v7596_v37  ;;  %v6464_v56 = vadd.f32 %v6428_v17, %v6384_v60  ;;  %v12518_v60 = vld [vmem:[%s12973_s4] ss:$0 sm:$0xff] }
 0x5ed   : > { %v6806_v23 = vld [vmem:[#allocation3 + $0xf8] sm:$0xff] }
 0x5ee   : > { %v6842_v55 = vadd.f32 %v6806_v23, %v6760_v32  ;;  %6500 = vst.msk [vmem:[#allocation3 + $0x100] sm:$0xff] %vm527_vm2, %v6464_v56  ;;  %9527 = vmatmul.msk.f32.gmra.mxu1 %vm527_vm2, %v7653_v48  ;;  %v7913_v56 = vld [vmem:[#allocation3 + $0x8] sm:$0xff] }
 0x5ef   : > { %v7184_v10 = vld [vmem:[#allocation3 + $0xf0] sm:$0xff]  ;;  %v7658_v48 = vld [vmem:[#allocation2 + $0xae] sm:$0xff] }
 0x5f0   : > { %v7220_v59 = vadd.f32 %v7184_v10, %v7136_v13  ;;  %6878 = vst.msk [vmem:[#allocation3 + $0xf8] sm:$0xff] %vm527_vm2, %v6842_v55 }
 0x5f1   : > { %v7509_v15 = vpop.f32.mrf.mxu0  ;;  %v7562_v42 = vld [vmem:[#allocation3 + $0xe8] sm:$0xff] }
 0x5f2   : > { %v6763_v35 = vpop.f32.mrf.mxu2  ;;  %7256 = vst.msk [vmem:[#allocation3 + $0xf0] sm:$0xff] %vm527_vm2, %v7220_v59  ;;  %v7597_v61 = vadd.f32 %v7561_v41, %v7509_v15 }
 0x5f3   : > { %v6387_v45 = vpop.f32.mrf.mxu1  ;;  %v7142_v9 = vpop.f32.mrf.mxu3 }
 0x5f4   : > { %7633 = vst.msk [vmem:[#allocation3 + $0xe0] sm:$0xff] %vm527_vm2, %v7597_v61  ;;  %v6465_v16 = vadd.f32 %v6429_v22, %v6387_v45 }
 0x5f5   : > { %v6807_v28 = vld [vmem:[#allocation3 + $0x100] sm:$0xff] }
 0x5f6   : > { %v6843_v20 = vadd.f32 %v6807_v28, %v6763_v35  ;;  %6501 = vst.msk [vmem:[#allocation3 + $0x108] sm:$0xff] %vm527_vm2, %v6465_v16  ;;  %9528 = vmatmul.msk.f32.gmra.mxu1 %vm527_vm2, %v7654_v1  ;;  %v7914_v28 = vld [vmem:[#allocation3 + $0x10] sm:$0xff] }
 0x5f7   : > { %v7185_v50 = vld [vmem:[#allocation3 + $0xf8] sm:$0xff] }
 0x5f8   : > { %v7221_v36 = vadd.f32 %v7185_v50, %v7139_v7  ;;  %6879 = vst.msk [vmem:[#allocation3 + $0x100] sm:$0xff] %vm527_vm2, %v6843_v20  ;;  %v7659_v50 = vld [vmem:[#allocation2 + $0xb6] sm:$0xff] }
 0x5f9   : > { %v7512_v18 = vpop.f32.mrf.mxu0  ;;  %v7563_v6 = vld [vmem:[#allocation3 + $0xf0] sm:$0xff] }
 0x5fa   : > { %v6766_v30 = vpop.f32.mrf.mxu2  ;;  %7257 = vst.msk [vmem:[#allocation3 + $0xf8] sm:$0xff] %vm527_vm2, %v7221_v36  ;;  %v7598_v49 = vadd.f32 %v7562_v42, %v7512_v18 }
 0x5fb   : > { %v6390_v25 = vpop.f32.mrf.mxu1  ;;  %v7145_v43 = vpop.f32.mrf.mxu3 }
 0x5fc   : > { %7634 = vst.msk [vmem:[#allocation3 + $0xe8] sm:$0xff] %vm527_vm2, %v7598_v49  ;;  %v6466_v5 = vadd.f32 %v6430_v27, %v6390_v25 }
 0x5fd   : > { %v6808_v24 = vld [vmem:[#allocation3 + $0x108] sm:$0xff] }
 0x5fe   : > { %v6844_v12 = vadd.f32 %v6808_v24, %v6766_v30  ;;  %6502 = vst.msk [vmem:[#allocation3 + $0x110] sm:$0xff] %vm527_vm2, %v6466_v5  ;;  %9529 = vmatmul.msk.f32.gmra.mxu1 %vm527_vm2, %v7655_v33  ;;  %v7915_v24 = vld [vmem:[#allocation3 + $0x18] sm:$0xff] }
 0x5ff   : > { %v7186_v34 = vld [vmem:[#allocation3 + $0x100] sm:$0xff] }
 0x600   : > { %v7222_v11 = vadd.f32 %v7186_v34, %v7142_v9  ;;  %6880 = vst.msk [vmem:[#allocation3 + $0x108] sm:$0xff] %vm527_vm2, %v6844_v12  ;;  %v7660_v34 = vld [vmem:[#allocation2 + $0xbe] sm:$0xff] }
 0x601   : > { %v7515_v0 = vpop.f32.mrf.mxu0  ;;  %v7564_v63 = vld [vmem:[#allocation3 + $0xf8] sm:$0xff] }
 0x602   : > { %7258 = vst.msk [vmem:[#allocation3 + $0x100] sm:$0xff] %vm527_vm2, %v7222_v11  ;;  %v7599_v38 = vadd.f32 %v7563_v6, %v7515_v0  ;;  %v6769_v57 = vpop.f32.mrf.mxu2 }
 0x603   : > { %v6393_v62 = vpop.f32.mrf.mxu1  ;;  %v7148_v13 = vpop.f32.mrf.mxu3 }
 0x604   : > { %7635 = vst.msk [vmem:[#allocation3 + $0xf0] sm:$0xff] %vm527_vm2, %v7599_v38  ;;  %v6467_v54 = vadd.f32 %v6431_v40, %v6393_v62 }
 0x605   : > { %v6809_v46 = vld [vmem:[#allocation3 + $0x110] sm:$0xff] }
 0x606   : > { %v6845_v8 = vadd.f32 %v6809_v46, %v6769_v57  ;;  %6503 = vst.msk [vmem:[#allocation3 + $0x118] sm:$0xff] %vm527_vm2, %v6467_v54  ;;  %9530 = vmatmul.msk.f32.gmra.mxu1 %vm527_vm2, %v7656_v39  ;;  %v7916_v46 = vld [vmem:[#allocation3 + $0x20] sm:$0xff] }
 0x607   : > { %v7187_v52 = vld [vmem:[#allocation3 + $0x108] sm:$0xff] }
 0x608   : > { %v7223_v47 = vadd.f32 %v7187_v52, %v7145_v43  ;;  %6881 = vst.msk [vmem:[#allocation3 + $0x110] sm:$0xff] %vm527_vm2, %v6845_v8  ;;  %v7661_v52 = vld [vmem:[#allocation2 + $0xc6] sm:$0xff] }
 0x609   : > { %v7518_v4 = vpop.f32.mrf.mxu0  ;;  %v7565_v51 = vld [vmem:[#allocation3 + $0x100] sm:$0xff] }
 0x60a   : > { %7259 = vst.msk [vmem:[#allocation3 + $0x108] sm:$0xff] %vm527_vm2, %v7223_v47  ;;  %v7600_v21 = vadd.f32 %v7564_v63, %v7518_v4  ;;  %v6772_v44 = vpop.f32.mrf.mxu2 }
 0x60b   : > { %v7804_v26 = vpop.f32.mrf.mxu1  ;;  %v7151_v55 = vpop.f32.mrf.mxu3 }
 0x60c   : > { %7636 = vst.msk [vmem:[#allocation3 + $0xf8] sm:$0xff] %vm527_vm2, %v7600_v21  ;;  %v7948_v53 = vadd.f32 %v7912_v14, %v7804_v26 }
 0x60d   : > { %v6810_v2 = vld [vmem:[#allocation3 + $0x118] sm:$0xff] }
 0x60e   : > { %v6846_v31 = vadd.f32 %v6810_v2, %v6772_v44  ;;  %7984 = vst.msk [vmem:[#allocation3] sm:$0xff] %vm527_vm2, %v7948_v53  ;;  %9531 = vmatmul.msk.f32.gmra.mxu1 %vm527_vm2, %v7657_v19  ;;  %v7662_v2 = vld [vmem:[#allocation2 + $0xce] sm:$0xff] }
 0x60f   : > { %v7188_v3 = vld [vmem:[#allocation3 + $0x110] sm:$0xff] }
 0x610   : > { %6882 = vst.msk [vmem:[#allocation3 + $0x118] sm:$0xff] %vm527_vm2, %v6846_v31  ;;  %v7224_v32 = vadd.f32 %v7188_v3, %v7148_v13  ;;  %v7917_v13 = vld [vmem:[#allocation3 + $0x28] sm:$0xff] }
 0x611   : > { %v7521_v58 = vpop.f32.mrf.mxu0  ;;  %v7566_v61 = vld [vmem:[#allocation3 + $0x108] sm:$0xff] }
 0x612   : > { %7260 = vst.msk [vmem:[#allocation3 + $0x110] sm:$0xff] %vm527_vm2, %v7224_v32  ;;  %v7601_v37 = vadd.f32 %v7565_v51, %v7521_v58 }
 0x613   : > { %v7807_v17 = vpop.f32.mrf.mxu1 }
 0x614   : > { %7637 = vst.msk [vmem:[#allocation3 + $0x100] sm:$0xff] %vm527_vm2, %v7601_v37  ;;  %v7949_v23 = vadd.f32 %v7913_v56, %v7807_v17  ;;  %v7918_v37 = vld [vmem:[#allocation3 + $0x30] sm:$0xff] }
 0x615   : > { %v8020_v7 = vld [vmem:[#allocation3] sm:$0xff] }
 0x616   : > { %7985 = vst.msk [vmem:[#allocation3 + $0x8] sm:$0xff] %vm527_vm2, %v7949_v23  ;;  %9532 = vmatmul.msk.f32.gmra.mxu1 %vm527_vm2, %v7658_v48  ;;  %v8060_v10 = vadd.f32 %v12518_v60, %v8020_v7  ;;  %v7663_v23 = vld [vmem:[#allocation2 + $0xd6] sm:$0xff] }
 0x617   : > { %v7189_v59 = vld [vmem:[#allocation3 + $0x118] sm:$0xff] }
 0x618   : > { %v7225_v35 = vadd.f32 %v7189_v59, %v7151_v55  ;;  %v8096_v15 = vmul.f32 0.2, %v8060_v10 }
 0x619   : > { %v7524_v41 = vpop.f32.mrf.mxu0  ;;  %v7567_v49 = vld [vmem:[#allocation3 + $0x110] sm:$0xff] }
 0x61a   : > { %7261 = vst.msk [vmem:[#allocation3 + $0x118] sm:$0xff] %vm527_vm2, %v7225_v35  ;;  %v7602_v45 = vadd.f32 %v7566_v61, %v7524_v41  ;;  %v12525_v22 = vmax.f32 %v8060_v10, %v8096_v15  ;;  %v7919_v15 = vld [vmem:[#allocation3 + $0x38] sm:$0xff] }
 0x61b   : > { %v7810_v16 = vpop.f32.mrf.mxu1 }
 0x61c   : > { %7638 = vst.msk [vmem:[#allocation3 + $0x108] sm:$0xff] %vm527_vm2, %v7602_v45  ;;  %v7950_v1 = vadd.f32 %v7914_v28, %v7810_v16  ;;  %v8168_v20 = vmul.f32 %v12525_v22, %v12525_v22  ;;  %v7664_v45 = vld [vmem:[#allocation2 + $0xde] sm:$0xff] }
 0x61d   : > { %v8021_v36 = vld [vmem:[#allocation3 + $0x8] sm:$0xff] }
 0x61e   : > { %7986 = vst.msk [vmem:[#allocation3 + $0x10] sm:$0xff] %vm527_vm2, %v7950_v1  ;;  %9533 = vmatmul.msk.f32.gmra.mxu1 %vm527_vm2, %v7659_v50  ;;  %v8204_v9 = vsel %vm527_vm2, %v8168_v20, 0.0  ;;  %v8061_v30 = vadd.f32 %v12518_v60, %v8021_v36 }
 0x61f   : > { %8205 = vadd.xlane.f32.xlu2 %v8204_v9  ;;  %v7920_v9 = vld [vmem:[#allocation3 + $0x40] sm:$0xff] }
 0x620   : > { %v8097_v18 = vmul.f32 0.2, %v8061_v30 }
 0x621   : > { %v7527_v42 = vpop.f32.mrf.mxu0  ;;  %v7568_v57 = vld [vmem:[#allocation3 + $0x118] sm:$0xff] }
 0x622   : > { %v7603_v25 = vadd.f32 %v7567_v49, %v7527_v42  ;;  %v12534_v27 = vmax.f32 %v8061_v30, %v8097_v18  ;;  %v7665_v42 = vld [vmem:[#allocation2 + $0xe6] sm:$0xff] }
 0x623   : > { %v7813_v5 = vpop.f32.mrf.mxu1 }
 0x624   : > { %7639 = vst.msk [vmem:[#allocation3 + $0x110] sm:$0xff] %vm527_vm2, %v7603_v25  ;;  %v7951_v33 = vadd.f32 %v7915_v24, %v7813_v5  ;;  %v8169_v12 = vmul.f32 %v12534_v27, %v12534_v27 }
 0x625   : > { %v8022_v11 = vld [vmem:[#allocation3 + $0x10] sm:$0xff] }
 0x626   : > { %7987 = vst.msk [vmem:[#allocation3 + $0x18] sm:$0xff] %vm527_vm2, %v7951_v33  ;;  %9534 = vmatmul.msk.f32.gmra.mxu1 %vm527_vm2, %v7660_v34  ;;  %v8207_v0 = vsel %vm527_vm2, %v8169_v12, 0.0  ;;  %v8062_v6 = vadd.f32 %v12518_v60, %v8022_v11  ;;  %v7921_v34 = vld [vmem:[#allocation3 + $0x48] sm:$0xff] }
 0x627   : > { %8208 = vadd.xlane.f32.xlu0 %v8207_v0 }
 0x628   : > { %v8098_v43 = vmul.f32 0.2, %v8062_v6 }
 0x629   : > { %v7530_v38 = vpop.f32.mrf.mxu0 }
 0x62a   : > { %v7604_v62 = vadd.f32 %v7568_v57, %v7530_v38  ;;  %v12543_v40 = vmax.f32 %v8062_v6, %v8098_v43  ;;  %v7666_v6 = vld [vmem:[#allocation2 + $0xee] sm:$0xff] }
 0x62b   : > { %v7816_v54 = vpop.f32.mrf.mxu1 }
 0x62c   : > { %7640 = vst.msk [vmem:[#allocation3 + $0x118] sm:$0xff] %vm527_vm2, %v7604_v62  ;;  %v7952_v39 = vadd.f32 %v7916_v46, %v7816_v54  ;;  %v8170_v8 = vmul.f32 %v12543_v40, %v12543_v40 }
 0x62d   : > { %v8023_v47 = vld [vmem:[#allocation3 + $0x18] sm:$0xff] }
 0x62e   : > { %7988 = vst.msk [vmem:[#allocation3 + $0x20] sm:$0xff] %vm527_vm2, %v7952_v39  ;;  %9535 = vmatmul.msk.f32.gmra.mxu1 %vm527_vm2, %v7661_v52  ;;  %v8210_v4 = vsel %vm527_vm2, %v8170_v8, 0.0  ;;  %v8063_v63 = vadd.f32 %v12518_v60, %v8023_v47  ;;  %v7922_v39 = vld [vmem:[#allocation3 + $0x50] sm:$0xff] }
 0x62f   : > { %8211 = vadd.xlane.f32.xlu1 %v8210_v4  ;;  %v7667_v47 = vld [vmem:[#allocation2 + $0xf6] sm:$0xff] }
 0x630   : > { %v8099_v21 = vmul.f32 0.2, %v8063_v63 }
 0x632   : > { %v12552_v26 = vmax.f32 %v8063_v63, %v8099_v21 }
 0x633   : > { %v7819_v14 = vpop.f32.mrf.mxu1 }
 0x634   : > { %v7953_v53 = vadd.f32 %v7917_v13, %v7819_v14  ;;  %v8171_v44 = vmul.f32 %v12552_v26, %v12552_v26 }
 0x635   : > { %v8024_v19 = vld [vmem:[#allocation3 + $0x20] sm:$0xff] }
 0x636   : > { %7989 = vst.msk [vmem:[#allocation3 + $0x28] sm:$0xff] %vm527_vm2, %v7953_v53  ;;  %9536 = vmatmul.msk.f32.gmra.mxu1 %vm527_vm2, %v7662_v2  ;;  %v8213_v31 = vsel %vm527_vm2, %v8171_v44, 0.0  ;;  %v8064_v3 = vadd.f32 %v12518_v60, %v8024_v19  ;;  %v7923_v44 = vld [vmem:[#allocation3 + $0x58] sm:$0xff] }
 0x637   : > { %8214 = vadd.xlane.f32.xlu0 %v8213_v31  ;;  %v7668_v31 = vld [vmem:[#allocation2 + $0xfe] sm:$0xff] }
 0x638   : > { %v8100_v32 = vmul.f32 0.2, %v8064_v3 }
 0x63a   : > { %v12560_v58 = vmax.f32 %v8064_v3, %v8100_v32 }
 0x63b   : > { %v7822_v51 = vpop.f32.mrf.mxu1 }
 0x63c   : > { %v7954_v17 = vadd.f32 %v7918_v37, %v7822_v51  ;;  %v8172_v56 = vmul.f32 %v12560_v58, %v12560_v58 }
 0x63d   : > { %v8025_v48 = vld [vmem:[#allocation3 + $0x28] sm:$0xff] }
 0x63e   : > { %7990 = vst.msk [vmem:[#allocation3 + $0x30] sm:$0xff] %vm527_vm2, %v7954_v17  ;;  %9537 = vmatmul.msk.f32.gmra.mxu1 %vm527_vm2, %v7663_v23  ;;  %v8216_v55 = vsel %vm527_vm2, %v8172_v56, 0.0  ;;  %v8065_v7 = vadd.f32 %v12518_v60, %v8025_v48  ;;  %v7924_v23 = vld [vmem:[#allocation3 + $0x60] sm:$0xff] }
 0x63f   : > { %8217 = vadd.xlane.f32.xlu1 %v8216_v55 }
 0x640   : > { %v8101_v10 = vmul.f32 0.2, %v8065_v7 }
 0x642   : > { %v12568_v59 = vmax.f32 %v8065_v7, %v8101_v10  ;;  %v7669_v7 = vld [vmem:[#allocation2 + $0x106] sm:$0xff] }
 0x643   : > { %v7825_v35 = vpop.f32.mrf.mxu1 }
 0x644   : > { %v7955_v41 = vadd.f32 %v7919_v15, %v7825_v35  ;;  %v8173_v61 = vmul.f32 %v12568_v59, %v12568_v59 }
 0x645   : > { %v8026_v16 = vld [vmem:[#allocation3 + $0x30] sm:$0xff] }
 0x646   : > { %7991 = vst.msk [vmem:[#allocation3 + $0x38] sm:$0xff] %vm527_vm2, %v7955_v41  ;;  %9538 = vmatmul.msk.f32.gmra.mxu1 %vm527_vm2, %v7664_v45  ;;  %v8219_v28 = vsel %vm527_vm2, %v8173_v61, 0.0  ;;  %v8066_v1 = vadd.f32 %v12518_v60, %v8026_v16  ;;  %v7925_v16 = vld [vmem:[#allocation3 + $0x68] sm:$0xff] }
 0x647   : > { %8220 = vadd.xlane.f32.xlu0 %v8219_v28 }
 0x648   : > { %v8102_v20 = vmul.f32 0.2, %v8066_v1 }
 0x64a   : > { %v12576_v50 = vmax.f32 %v8066_v1, %v8102_v20  ;;  %v7670_v20 = vld [vmem:[#allocation2 + $0x10e] sm:$0xff] }
 0x64b   : > { %v7828_v36 = vpop.f32.mrf.mxu1 }
 0x64c   : > { %v7956_v30 = vadd.f32 %v7920_v9, %v7828_v36  ;;  %v8174_v18 = vmul.f32 %v12576_v50, %v12576_v50 }
 0x64d   : > { %v8027_v49 = vld [vmem:[#allocation3 + $0x38] sm:$0xff] }
 0x64e   : > { %7992 = vst.msk [vmem:[#allocation3 + $0x40] sm:$0xff] %vm527_vm2, %v7956_v30  ;;  %9539 = vmatmul.msk.f32.gmra.mxu1 %vm527_vm2, %v7665_v42  ;;  %v8222_v25 = vsel %vm527_vm2, %v8174_v18, 0.0  ;;  %v8067_v5 = vadd.f32 %v12518_v60, %v8027_v49 }
 0x64f   : > { %8223 = vadd.xlane.f32.xlu1 %v8222_v25  ;;  %v7926_v25 = vld [vmem:[#allocation3 + $0x70] sm:$0xff] }
 0x650   : > { %v8103_v24 = vmul.f32 0.2, %v8067_v5 }
 0x652   : > { %v12584_v33 = vmax.f32 %v8067_v5, %v8103_v24 }
 0x653   : > { %v7831_v12 = vpop.f32.mrf.mxu1 }
 0x654   : > { %v7957_v11 = vadd.f32 %v7921_v34, %v7831_v12  ;;  %v8175_v0 = vmul.f32 %v12584_v33, %v12584_v33  ;;  %v7671_v12 = vld [vmem:[#allocation2 + $0x116] sm:$0xff] }
 0x655   : > { %v8028_v43 = vld [vmem:[#allocation3 + $0x40] sm:$0xff] }
 0x656   : > { %7993 = vst.msk [vmem:[#allocation3 + $0x48] sm:$0xff] %vm527_vm2, %v7957_v11  ;;  %9540 = vmatmul.msk.f32.gmra.mxu1 %vm527_vm2, %v7666_v6  ;;  %v8225_v38 = vsel %vm527_vm2, %v8175_v0, 0.0  ;;  %v8068_v57 = vadd.f32 %v12518_v60, %v8028_v43 }
 0x657   : > { %8226 = vadd.xlane.f32.xlu2 %v8225_v38 }
 0x658   : > { %v8104_v62 = vmul.f32 0.2, %v8068_v57 }
 0x65a   : > { %v12592_v54 = vmax.f32 %v8068_v57, %v8104_v62  ;;  %v7927_v57 = vld [vmem:[#allocation3 + $0x78] sm:$0xff] }
 0x65b   : > { %v7834_v46 = vpop.f32.mrf.mxu1 }
 0x65c   : > { %v7958_v8 = vadd.f32 %v7922_v39, %v7834_v46  ;;  %v8176_v52 = vmul.f32 %v12592_v54, %v12592_v54  ;;  %v7672_v39 = vld [vmem:[#allocation2 + $0x11e] sm:$0xff] }
 0x65d   : > { %v8029_v4 = vld [vmem:[#allocation3 + $0x48] sm:$0xff] }
 0x65e   : > { %7994 = vst.msk [vmem:[#allocation3 + $0x50] sm:$0xff] %vm527_vm2, %v7958_v8  ;;  %9541 = vmatmul.msk.f32.gmra.mxu1 %vm527_vm2, %v7667_v47  ;;  %v8228_v63 = vsel %vm527_vm2, %v8176_v52, 0.0  ;;  %v8069_v21 = vadd.f32 %v12518_v60, %v8029_v4 }
 0x65f   : > { %8229 = vadd.xlane.f32.xlu0 %v8228_v63 }
 0x660   : > { %v8105_v14 = vmul.f32 0.2, %v8069_v21 }
 0x662   : > { %v12600_v13 = vmax.f32 %v8069_v21, %v8105_v14  ;;  %v7928_v14 = vld [vmem:[#allocation3 + $0x80] sm:$0xff] }
 0x663   : > { %v7837_v53 = vpop.f32.mrf.mxu1 }
 0x664   : > { %v7959_v2 = vadd.f32 %v7923_v44, %v7837_v53  ;;  %v8177_v19 = vmul.f32 %v12600_v13, %v12600_v13 }
 0x665   : > { %v8030_v3 = vld [vmem:[#allocation3 + $0x50] sm:$0xff] }
 0x666   : > { %7995 = vst.msk [vmem:[#allocation3 + $0x58] sm:$0xff] %vm527_vm2, %v7959_v2  ;;  %9542 = vmatmul.msk.f32.gmra.mxu1 %vm527_vm2, %v7668_v31  ;;  %v8231_v32 = vsel %vm527_vm2, %v8177_v19, 0.0  ;;  %v8070_v51 = vadd.f32 %v12518_v60, %v8030_v3  ;;  %v7673_v2 = vld [vmem:[#allocation2 + $0x126] sm:$0xff] }
 0x667   : > { %8232 = vadd.xlane.f32.xlu1 %v8231_v32 }
 0x668   : > { %v8106_v37 = vmul.f32 0.2, %v8070_v51 }
 0x66a   : > { %v12608_v17 = vmax.f32 %v8070_v51, %v8106_v37 }
 0x66b   : > { %v7840_v56 = vpop.f32.mrf.mxu1 }
 0x66c   : > { %v7960_v48 = vadd.f32 %v7924_v23, %v7840_v56  ;;  %v8178_v55 = vmul.f32 %v12608_v17, %v12608_v17 }
 0x66d   : > { %v8031_v10 = vld [vmem:[#allocation3 + $0x58] sm:$0xff] }
 0x66e   : > { %7996 = vst.msk [vmem:[#allocation3 + $0x60] sm:$0xff] %vm527_vm2, %v7960_v48  ;;  %9543 = vmatmul.msk.f32.gmra.mxu1 %vm527_vm2, %v7669_v7  ;;  %v8234_v35 = vsel %vm527_vm2, %v8178_v55, 0.0  ;;  %v8071_v15 = vadd.f32 %v12518_v60, %v8031_v10  ;;  %v7929_v48 = vld [vmem:[#allocation3 + $0x88] sm:$0xff] }
 0x66f   : > { %8235 = vadd.xlane.f32.xlu2 %v8234_v35  ;;  %v7674_v35 = vld [vmem:[#allocation2 + $0x12e] sm:$0xff] }
 0x670   : > { %v8107_v41 = vmul.f32 0.2, %v8071_v15 }
 0x672   : > { %v12616_v61 = vmax.f32 %v8071_v15, %v8107_v41 }
 0x673   : > { %v7843_v45 = vpop.f32.mrf.mxu1 }
 0x674   : > { %v7961_v28 = vadd.f32 %v7925_v16, %v7843_v45  ;;  %v8179_v1 = vmul.f32 %v12616_v61, %v12616_v61 }
 0x675   : > { %v8032_v36 = vld [vmem:[#allocation3 + $0x60] sm:$0xff] }
 0x676   : > { %7997 = vst.msk [vmem:[#allocation3 + $0x68] sm:$0xff] %vm527_vm2, %v7961_v28  ;;  %9544 = vmatmul.msk.f32.gmra.mxu1 %vm527_vm2, %v7670_v20  ;;  %v8237_v9 = vsel %vm527_vm2, %v8179_v1, 0.0  ;;  %v8072_v30 = vadd.f32 %v12518_v60, %v8032_v36 }
 0x677   : > { %8238 = vadd.xlane.f32.xlu0 %v8237_v9  ;;  %v7930_v9 = vld [vmem:[#allocation3 + $0x90] sm:$0xff] }
 0x678   : > { %v8108_v18 = vmul.f32 0.2, %v8072_v30 }
 0x67a   : > { %v12624_v42 = vmax.f32 %v8072_v30, %v8108_v18  ;;  %v7675_v30 = vld [vmem:[#allocation2 + $0x136] sm:$0xff] }
 0x67b   : > { %v7846_v49 = vpop.f32.mrf.mxu1 }
 0x67c   : > { %v7962_v5 = vadd.f32 %v7926_v25, %v7846_v49  ;;  %v8180_v24 = vmul.f32 %v12624_v42, %v12624_v42 }
 0x67d   : > { %v8033_v34 = vld [vmem:[#allocation3 + $0x68] sm:$0xff] }
 0x67e   : > { %7998 = vst.msk [vmem:[#allocation3 + $0x70] sm:$0xff] %vm527_vm2, %v7962_v5  ;;  %9545 = vmatmul.msk.f32.gmra.mxu1 %vm527_vm2, %v7671_v12  ;;  %v8240_v11 = vsel %vm527_vm2, %v8180_v24, 0.0  ;;  %v8073_v0 = vadd.f32 %v12518_v60, %v8033_v34 }
 0x67f   : > { %8241 = vadd.xlane.f32.xlu1 %v8240_v11 }
 0x680   : > { %v8109_v6 = vmul.f32 0.2, %v8073_v0 }
 0x682   : > { %v12632_v43 = vmax.f32 %v8073_v0, %v8109_v6 }
 0x683   : > { %v7849_v38 = vpop.f32.mrf.mxu1 }
 0x684   : > { %v7963_v62 = vadd.f32 %v7927_v57, %v7849_v38  ;;  %v8181_v46 = vmul.f32 %v12632_v43, %v12632_v43 }
 0x685   : > { %v8034_v8 = vld [vmem:[#allocation3 + $0x70] sm:$0xff] }
 0x686   : > { %7999 = vst.msk [vmem:[#allocation3 + $0x78] sm:$0xff] %vm527_vm2, %v7963_v62  ;;  %9546 = vmatmul.msk.f32.gmra.mxu1 %vm527_vm2, %v7672_v39  ;;  %v8243_v52 = vsel %vm527_vm2, %v8181_v46, 0.0  ;;  %v8074_v47 = vadd.f32 %v12518_v60, %v8034_v8  ;;  %v7931_v8 = vld [vmem:[#allocation3 + $0x98] sm:$0xff] }
 0x687   : > { %8244 = vadd.xlane.f32.xlu2 %v8243_v52  ;;  %v7676_v52 = vld [vmem:[#allocation2 + $0x13e] sm:$0xff] }
 0x688   : > { %v8110_v4 = vmul.f32 0.2, %v8074_v47 }
 0x68a   : > { %v12640_v63 = vmax.f32 %v8074_v47, %v8110_v4 }
 0x68b   : > { %v7852_v21 = vpop.f32.mrf.mxu1 }
 0x68c   : > { %v7964_v53 = vadd.f32 %v7928_v14, %v7852_v21  ;;  %v8182_v44 = vmul.f32 %v12640_v63, %v12640_v63 }
 0x68d   : > { %v8035_v19 = vld [vmem:[#allocation3 + $0x78] sm:$0xff] }
 0x68e   : > { %8000 = vst.msk [vmem:[#allocation3 + $0x80] sm:$0xff] %vm527_vm2, %v7964_v53  ;;  %9547 = vmatmul.msk.f32.gmra.mxu1 %vm527_vm2, %v7673_v2  ;;  %v8246_v31 = vsel %vm527_vm2, %v8182_v44, 0.0  ;;  %v8075_v3 = vadd.f32 %v12518_v60, %v8035_v19 }
 0x68f   : > { %8247 = vadd.xlane.f32.xlu0 %v8246_v31 }
 0x690   : > { %v8111_v32 = vmul.f32 0.2, %v8075_v3 }
 0x692   : > { %v8206_v51 = vpop.xlane.xlu2 %8205  ;;  %v12648_v37 = vmax.f32 %v8075_v3, %v8111_v32 }
 0x693   : > { %v8312_v56 = vmul.f32 %v8206_v51, %v11146_v29  ;;  %v7855_v23 = vpop.f32.mrf.mxu1 }
 0x694   : > { %v7965_v55 = vadd.f32 %v7929_v48, %v7855_v23  ;;  %v8183_v7 = vmul.f32 %v12648_v37, %v12648_v37 }
 0x695   : > { %v8348_v10 = vadd.f32 1e-08, %v8312_v56  ;;  %v8036_v15 = vld [vmem:[#allocation3 + $0x80] sm:$0xff] }
 0x696   : > { %8001 = vst.msk [vmem:[#allocation3 + $0x88] sm:$0xff] %vm527_vm2, %v7965_v55  ;;  %9548 = vmatmul.msk.f32.gmra.mxu1 %vm527_vm2, %v7674_v35  ;;  %v8249_v41 = vsel %vm527_vm2, %v8183_v7, 0.0  ;;  %v8076_v45 = vadd.f32 %v12518_v60, %v8036_v15  ;;  %v7932_v35 = vld [vmem:[#allocation3 + $0xa0] sm:$0xff] }
 0x697   : > { %9647 = vrsqrt.f32 %v8348_v10  ;;  %8250 = vadd.xlane.f32.xlu1 %v8249_v41  ;;  %vm8390_vm9 = vweird.f32 %v8348_v10 }
 0x698   : > { %v8112_v16 = vmul.f32 0.2, %v8076_v45 }
 0x69a   : > { %v8209_v28 = vpop.xlane.xlu0 %8208  ;;  %v12657_v1 = vmax.f32 %v8076_v45, %v8112_v16 }
 0x69b   : > { %v8313_v20 = vmul.f32 %v8209_v28, %v11146_v29  ;;  %v7858_v36 = vpop.f32.mrf.mxu1 }
 0x69c   : > { %v7966_v18 = vadd.f32 %v7930_v9, %v7858_v36  ;;  %v8184_v49 = vmul.f32 %v12657_v1, %v12657_v1 }
 0x69d   : > { %v9648_v25 = vpop.eup %9647  ;;  %v8349_v5 = vadd.f32 1e-08, %v8313_v20  ;;  %v8037_v24 = vld [vmem:[#allocation3 + $0x88] sm:$0xff] }
 0x69e   : > { %v8385_v12 = vmul.f32 %v9648_v25, %v8348_v10  ;;  %8002 = vst.msk [vmem:[#allocation3 + $0x90] sm:$0xff] %vm527_vm2, %v7966_v18  ;;  %9549 = vmatmul.msk.f32.gmra.mxu1 %vm527_vm2, %v7675_v30  ;;  %v8252_v34 = vsel %vm527_vm2, %v8184_v49, 0.0  ;;  %v8077_v11 = vadd.f32 %v12518_v60, %v8037_v24  ;;  %vm8391_vm8 = vweird.f32 %v9648_v25 }
 0x69f   : > { %9649 = vrsqrt.f32 %v8349_v5  ;;  %8253 = vadd.xlane.f32.xlu2 %v8252_v34  ;;  %vm8392_vm10 = vmor %vm8390_vm9, %vm8391_vm8  ;;  %vm8400_vm12 = vweird.f32 %v8349_v5 }
 0x6a0   : > { %v8386_v0 = vmul.f32 %v9648_v25, %v8385_v12  ;;  %v8113_v6 = vmul.f32 0.2, %v8077_v11 }
 0x6a2   : > { %v8387_v38 = vmul.f32 0.5, %v8386_v0  ;;  %v8212_v57 = vpop.xlane.xlu1 %8211  ;;  %v12666_v62 = vmax.f32 %v8077_v11, %v8113_v6 }
 0x6a3   : > { %v8314_v46 = vmul.f32 %v8212_v57, %v11146_v29  ;;  %v7861_v39 = vpop.f32.mrf.mxu1 }
 0x6a4   : > { %v8388_v47 = vsub.f32 1.5, %v8387_v38  ;;  %v7967_v4 = vadd.f32 %v7931_v8, %v7861_v39  ;;  %v8185_v21 = vmul.f32 %v12666_v62, %v12666_v62  ;;  %v7933_v38 = vld [vmem:[#allocation3 + $0xa8] sm:$0xff] }
 0x6a5   : > { %v9650_v14 = vpop.eup %9649  ;;  %v12672_v53 = vadd.f32 1e-08, %v8314_v46  ;;  %v8038_v44 = vld [vmem:[#allocation3 + $0x90] sm:$0xff] }
 0x6a6   : > { %v8389_v2 = vmul.f32 %v9648_v25, %v8388_v47  ;;  %v8395_v19 = vmul.f32 %v9650_v14, %v8349_v5  ;;  %8003 = vst.msk [vmem:[#allocation3 + $0x98] sm:$0xff] %vm527_vm2, %v7967_v4  ;;  %9550 = vmatmul.msk.f32.gmra.mxu1 %vm527_vm2, %v7676_v52  ;;  %v8255_v31 = vsel %vm527_vm2, %v8185_v21, 0.0  ;;  %v8078_v3 = vadd.f32 %v12518_v60, %v8038_v44 }
 0x6a7   : > { %9651 = vrsqrt.f32 %v12672_v53  ;;  %8256 = vadd.xlane.f32.xlu0 %v8255_v31  ;;  %vm8401_vm11 = vweird.f32 %v9650_v14  ;;  %vm8410_vm15 = vweird.f32 %v12672_v53 }
 0x6a8   : > { %v8393_v32 = vsel %vm8392_vm10, %v9648_v25, %v8389_v2  ;;  %v8396_v51 = vmul.f32 %v9650_v14, %v8395_v19  ;;  %v8114_v23 = vmul.f32 0.2, %v8078_v3  ;;  %vm8402_vm13 = vmor %vm8400_vm12, %vm8401_vm11 }
 0x6a9   : > { %v8744_v56 = vmul.f32 %v8393_v32, %v12525_v22 }
 0x6aa   : > { %v8397_v48 = vmul.f32 0.5, %v8396_v51  ;;  %v8215_v55 = vpop.xlane.xlu0 %8214  ;;  %v12688_v15 = vmax.f32 %v8078_v3, %v8114_v23 }
 0x6ab   : > { %8780 = vst.msk [vmem:[%s12682_s13] sm:$0xff] %vm527_vm2, %v8744_v56  ;;  %v8315_v7 = vmul.f32 %v8215_v55, %v11146_v29  ;;  %v7864_v10 = vpop.f32.mrf.mxu1  ;;  %v7934_v56 = vld [vmem:[#allocation3 + $0xb0] sm:$0xff] }
 0x6ac   : > { %v8398_v41 = vsub.f32 1.5, %v8397_v48  ;;  %v7968_v45 = vadd.f32 %v7932_v35, %v7864_v10  ;;  %v8186_v20 = vmul.f32 %v12688_v15, %v12688_v15 }
 0x6ad   : > { %v9652_v16 = vpop.eup %9651  ;;  %v8351_v28 = vadd.f32 1e-08, %v8315_v7  ;;  %v8039_v22 = vld [vmem:[#allocation3 + $0x98] sm:$0xff] }
 0x6ae   : > { %v8399_v36 = vmul.f32 %v9650_v14, %v8398_v41  ;;  %v8405_v9 = vmul.f32 %v9652_v16, %v12672_v53  ;;  %8004 = vst.msk [vmem:[#allocation3 + $0xa0] sm:$0xff] %vm527_vm2, %v7968_v45  ;;  %v8079_v30 = vadd.f32 %v12518_v60, %v8039_v22  ;;  %v8258_v18 = vsel %vm527_vm2, %v8186_v20, 0.0 }
 0x6af   : > { %9653 = vrsqrt.f32 %v8351_v28  ;;  %8259 = vadd.xlane.f32.xlu1 %v8258_v18  ;;  %vm8411_vm14 = vweird.f32 %v9652_v16  ;;  %vm8420_vm3 = vweird.f32 %v8351_v28 }
 0x6b0   : > { %v8403_v49 = vsel %vm8402_vm13, %v9650_v14, %v8399_v36  ;;  %v8406_v25 = vmul.f32 %v9652_v16, %v8405_v9  ;;  %v8115_v24 = vmul.f32 0.2, %v8079_v30  ;;  %vm8412_vm0 = vmor %vm8410_vm15, %vm8411_vm14 }
 0x6b1   : > { %v8745_v12 = vmul.f32 %v8403_v49, %v12534_v27 }
 0x6b2   : > { %v8407_v34 = vmul.f32 0.5, %v8406_v25  ;;  %v8218_v11 = vpop.xlane.xlu1 %8217  ;;  %v12697_v0 = vmax.f32 %v8079_v30, %v8115_v24 }
 0x6b3   : > { %8781 = vst.msk [vmem:[%s12682_s13 + $0x8] sm:$0xff] %vm527_vm2, %v8745_v12  ;;  %v8316_v5 = vmul.f32 %v8218_v11, %v11146_v29  ;;  %v7867_v6 = vpop.f32.mrf.mxu1  ;;  %v7935_v12 = vld [vmem:[#allocation3 + $0xb8] sm:$0xff] }
 0x6b4   : > { %v8408_v57 = vsub.f32 1.5, %v8407_v34  ;;  %v7969_v46 = vadd.f32 %v7933_v38, %v7867_v6  ;;  %v8187_v39 = vmul.f32 %v12697_v0, %v12697_v0 }
 0x6b5   : > { %v9654_v8 = vpop.eup %9653  ;;  %v8352_v52 = vadd.f32 1e-08, %v8316_v5  ;;  %v8040_v47 = vld [vmem:[#allocation3 + $0xa0] sm:$0xff] }
 0x6b6   : > { %v8409_v27 = vmul.f32 %v9652_v16, %v8408_v57  ;;  %v8415_v4 = vmul.f32 %v9654_v8, %v8351_v28  ;;  %8005 = vst.msk [vmem:[#allocation3 + $0xa8] sm:$0xff] %vm527_vm2, %v7969_v46  ;;  %v8261_v21 = vsel %vm527_vm2, %v8187_v39, 0.0  ;;  %v8080_v14 = vadd.f32 %v12518_v60, %v8040_v47 }
 0x6b7   : > { %9655 = vrsqrt.f32 %v8352_v52  ;;  %8262 = vadd.xlane.f32.xlu2 %v8261_v21  ;;  %vm8421_vm1 = vweird.f32 %v9654_v8  ;;  %vm8430_vm6 = vweird.f32 %v8352_v52 }
 0x6b8   : > { %v8413_v44 = vsel %vm8412_vm0, %v9652_v16, %v8409_v27  ;;  %v8416_v2 = vmul.f32 %v9654_v8, %v8415_v4  ;;  %v8116_v31 = vmul.f32 0.2, %v8080_v14  ;;  %vm8422_vm4 = vmor %vm8420_vm3, %vm8421_vm1 }
 0x6b9   : > { %v8746_v19 = vmul.f32 %v8413_v44, %v12543_v40 }
 0x6ba   : > { %v8417_v3 = vmul.f32 0.5, %v8416_v2  ;;  %v8221_v32 = vpop.xlane.xlu0 %8220  ;;  %v12712_v23 = vmax.f32 %v8080_v14, %v8116_v31 }
 0x6bb   : > { %8782 = vst.msk [vmem:[%s12682_s13 + $0x10] sm:$0xff] %vm527_vm2, %v8746_v19  ;;  %v8317_v53 = vmul.f32 %v8221_v32, %v11146_v29  ;;  %v7870_v51 = vpop.f32.mrf.mxu1  ;;  %v7936_v19 = vld [vmem:[#allocation3 + $0xc0] sm:$0xff] }
 0x6bc   : > { %v8418_v48 = vsub.f32 1.5, %v8417_v3  ;;  %v7970_v55 = vadd.f32 %v7934_v56, %v7870_v51  ;;  %v8188_v35 = vmul.f32 %v12712_v23, %v12712_v23 }
 0x6bd   : > { %v9656_v7 = vpop.eup %9655  ;;  %v8353_v10 = vadd.f32 1e-08, %v8317_v53  ;;  %v8041_v40 = vld [vmem:[#allocation3 + $0xa8] sm:$0xff] }
 0x6be   : > { %v8419_v41 = vmul.f32 %v9654_v8, %v8418_v48  ;;  %v8425_v45 = vmul.f32 %v9656_v7, %v8352_v52  ;;  %8006 = vst.msk [vmem:[#allocation3 + $0xb0] sm:$0xff] %vm527_vm2, %v7970_v55  ;;  %v8081_v16 = vadd.f32 %v12518_v60, %v8041_v40  ;;  %v8264_v20 = vsel %vm527_vm2, %v8188_v35, 0.0 }
 0x6bf   : > { %9657 = vrsqrt.f32 %v8353_v10  ;;  %8265 = vadd.xlane.f32.xlu0 %v8264_v20  ;;  %vm8431_vm5 = vweird.f32 %v9656_v7  ;;  %vm8440_vm9 = vweird.f32 %v8353_v10 }
 0x6c0   : > { %v8423_v22 = vsel %vm8422_vm4, %v9654_v8, %v8419_v41  ;;  %v8426_v36 = vmul.f32 %v9656_v7, %v8425_v45  ;;  %v8117_v9 = vmul.f32 0.2, %v8081_v16  ;;  %vm8432_vm7 = vmor %vm8430_vm6, %vm8431_vm5 }
 0x6c1   : > { %v8747_v30 = vmul.f32 %v8423_v22, %v12552_v26 }
 0x6c2   : > { %v8427_v18 = vmul.f32 0.5, %v8426_v36  ;;  %v8224_v49 = vpop.xlane.xlu1 %8223  ;;  %v12720_v25 = vmax.f32 %v8081_v16, %v8117_v9 }
 0x6c3   : > { %8783 = vst.msk [vmem:[%s12682_s13 + $0x18] sm:$0xff] %vm527_vm2, %v8747_v30  ;;  %v8318_v28 = vmul.f32 %v8224_v49, %v11146_v29  ;;  %v7873_v24 = vpop.f32.mrf.mxu1  ;;  %v7937_v30 = vld [vmem:[#allocation3 + $0xc8] sm:$0xff] }
 0x6c4   : > { %v8428_v34 = vsub.f32 1.5, %v8427_v18  ;;  %v7971_v11 = vadd.f32 %v7935_v12, %v7873_v24  ;;  %v8189_v5 = vmul.f32 %v12720_v25, %v12720_v25 }
 0x6c5   : > { %v9658_v6 = vpop.eup %9657  ;;  %v8354_v38 = vadd.f32 1e-08, %v8318_v28  ;;  %v8042_v57 = vld [vmem:[#allocation3 + $0xb0] sm:$0xff] }
 0x6c6   : > { %v8429_v26 = vmul.f32 %v9656_v7, %v8428_v34  ;;  %v8435_v46 = vmul.f32 %v9658_v6, %v8353_v10  ;;  %8007 = vst.msk [vmem:[#allocation3 + $0xb8] sm:$0xff] %vm527_vm2, %v7971_v11  ;;  %v8267_v39 = vsel %vm527_vm2, %v8189_v5, 0.0  ;;  %v8082_v8 = vadd.f32 %v12518_v60, %v8042_v57 }
 0x6c7   : > { %9659 = vrsqrt.f32 %v8354_v38  ;;  %8268 = vadd.xlane.f32.xlu1 %v8267_v39  ;;  %vm8441_vm8 = vweird.f32 %v9658_v6  ;;  %vm8450_vm12 = vweird.f32 %v8354_v38 }
 0x6c8   : > { %v8433_v47 = vsel %vm8432_vm7, %v9656_v7, %v8429_v26  ;;  %v8436_v27 = vmul.f32 %v9658_v6, %v8435_v46  ;;  %v8118_v21 = vmul.f32 0.2, %v8082_v8  ;;  %vm8442_vm10 = vmor %vm8440_vm9, %vm8441_vm8 }
 0x6c9   : > { %v8748_v4 = vmul.f32 %v8433_v47, %v12560_v58 }
 0x6ca   : > { %v8437_v14 = vmul.f32 0.5, %v8436_v27  ;;  %v8227_v44 = vpop.xlane.xlu2 %8226  ;;  %v12734_v31 = vmax.f32 %v8082_v8, %v8118_v21 }
 0x6cb   : > { %8784 = vst.msk [vmem:[%s12682_s13 + $0x20] sm:$0xff] %vm527_vm2, %v8748_v4  ;;  %v8319_v52 = vmul.f32 %v8227_v44, %v11146_v29  ;;  %v7876_v2 = vpop.f32.mrf.mxu1  ;;  %v7938_v4 = vld [vmem:[#allocation3 + $0xd0] sm:$0xff] }
 0x6cc   : > { %v8438_v3 = vsub.f32 1.5, %v8437_v14  ;;  %v7972_v32 = vadd.f32 %v7936_v19, %v7876_v2  ;;  %v8190_v56 = vmul.f32 %v12734_v31, %v12734_v31 }
 0x6cd   : > { %v9660_v53 = vpop.eup %9659  ;;  %v8355_v51 = vadd.f32 1e-08, %v8319_v52  ;;  %v8043_v58 = vld [vmem:[#allocation3 + $0xb8] sm:$0xff] }
 0x6ce   : > { %v8439_v48 = vmul.f32 %v9658_v6, %v8438_v3  ;;  %v8445_v55 = vmul.f32 %v9660_v53, %v8354_v38  ;;  %8008 = vst.msk [vmem:[#allocation3 + $0xc0] sm:$0xff] %vm527_vm2, %v7972_v32  ;;  %v8083_v7 = vadd.f32 %v12518_v60, %v8043_v58  ;;  %v8270_v35 = vsel %vm527_vm2, %v8190_v56, 0.0 }
 0x6cf   : > { %9661 = vrsqrt.f32 %v8355_v51  ;;  %8271 = vadd.xlane.f32.xlu2 %v8270_v35  ;;  %vm8451_vm11 = vweird.f32 %v9660_v53  ;;  %vm8460_vm15 = vweird.f32 %v8355_v51 }
 0x6d0   : > { %v8443_v40 = vsel %vm8442_vm10, %v9658_v6, %v8439_v48  ;;  %v8446_v41 = vmul.f32 %v9660_v53, %v8445_v55  ;;  %v8119_v45 = vmul.f32 0.2, %v8083_v7  ;;  %vm8452_vm13 = vmor %vm8450_vm12, %vm8451_vm11 }
 0x6d1   : > { %v8749_v16 = vmul.f32 %v8443_v40, %v12568_v59 }
 0x6d2   : > { %v8447_v20 = vmul.f32 0.5, %v8446_v41  ;;  %v8230_v22 = vpop.xlane.xlu0 %8229  ;;  %v12742_v36 = vmax.f32 %v8083_v7, %v8119_v45 }
 0x6d3   : > { %8785 = vst.msk [vmem:[%s12682_s13 + $0x28] sm:$0xff] %vm527_vm2, %v8749_v16  ;;  %v8320_v10 = vmul.f32 %v8230_v22, %v11146_v29  ;;  %v7879_v9 = vpop.f32.mrf.mxu1  ;;  %v7939_v16 = vld [vmem:[#allocation3 + $0xd8] sm:$0xff] }
 0x6d4   : > { %v8448_v18 = vsub.f32 1.5, %v8447_v20  ;;  %v7973_v49 = vadd.f32 %v7937_v30, %v7879_v9  ;;  %v8191_v28 = vmul.f32 %v12742_v36, %v12742_v36 }
 0x6d5   : > { %v9662_v24 = vpop.eup %9661  ;;  %v8356_v12 = vadd.f32 1e-08, %v8320_v10  ;;  %v8044_v34 = vld [vmem:[#allocation3 + $0xc0] sm:$0xff] }
 0x6d6   : > { %v8449_v59 = vmul.f32 %v9660_v53, %v8448_v18  ;;  %v8455_v11 = vmul.f32 %v9662_v24, %v8355_v51  ;;  %8009 = vst.msk [vmem:[#allocation3 + $0xc8] sm:$0xff] %vm527_vm2, %v7973_v49  ;;  %v8273_v5 = vsel %vm527_vm2, %v8191_v28, 0.0  ;;  %v8084_v6 = vadd.f32 %v12518_v60, %v8044_v34 }
 0x6d7   : > { %9663 = vrsqrt.f32 %v8356_v12  ;;  %8274 = vadd.xlane.f32.xlu0 %v8273_v5  ;;  %vm8461_vm14 = vweird.f32 %v9662_v24  ;;  %vm8470_vm3 = vweird.f32 %v8356_v12 }
 0x6d8   : > { %v8453_v57 = vsel %vm8452_vm13, %v9660_v53, %v8449_v59  ;;  %v8456_v26 = vmul.f32 %v9662_v24, %v8455_v11  ;;  %v8120_v39 = vmul.f32 0.2, %v8084_v6  ;;  %vm8462_vm0 = vmor %vm8460_vm15, %vm8461_vm14 }
 0x6d9   : > { %v8750_v46 = vmul.f32 %v8453_v57, %v12576_v50 }
 0x6da   : > { %v8457_v8 = vmul.f32 0.5, %v8456_v26  ;;  %v8233_v47 = vpop.xlane.xlu1 %8232  ;;  %v12756_v21 = vmax.f32 %v8084_v6, %v8120_v39 }
 0x6db   : > { %8786 = vst.msk [vmem:[%s12682_s13 + $0x30] sm:$0xff] %vm527_vm2, %v8750_v46  ;;  %v8321_v38 = vmul.f32 %v8233_v47, %v11146_v29  ;;  %v7882_v27 = vpop.f32.mrf.mxu1  ;;  %v7940_v46 = vld [vmem:[#allocation3 + $0xe0] sm:$0xff] }
 0x6dc   : > { %v8458_v14 = vsub.f32 1.5, %v8457_v8  ;;  %v7974_v44 = vadd.f32 %v7938_v4, %v7882_v27  ;;  %v8192_v50 = vmul.f32 %v12756_v21, %v12756_v21 }
 0x6dd   : > { %v9664_v52 = vpop.eup %9663  ;;  %v12758_v2 = vadd.f32 1e-08, %v8321_v38  ;;  %v8045_v19 = vld [vmem:[#allocation3 + $0xc8] sm:$0xff] }
 0x6de   : > { %v8459_v3 = vmul.f32 %v9662_v24, %v8458_v14  ;;  %v8465_v32 = vmul.f32 %v9664_v52, %v8356_v12  ;;  %8010 = vst.msk [vmem:[#allocation3 + $0xd0] sm:$0xff] %vm527_vm2, %v7974_v44  ;;  %v8085_v53 = vadd.f32 %v12518_v60, %v8045_v19  ;;  %v8276_v56 = vsel %vm527_vm2, %v8192_v50, 0.0  ;;  %v12793_v44 = vld [vmem:[%s12973_s4] ss:$0 sm:$0xff] }
 0x6df   : > { %9665 = vrsqrt.f32 %v12758_v2  ;;  %8277 = vadd.xlane.f32.xlu1 %v8276_v56  ;;  %vm8471_vm1 = vweird.f32 %v9664_v52  ;;  %vm8480_vm6 = vweird.f32 %v12758_v2 }
 0x6e0   : > { %v8463_v58 = vsel %vm8462_vm0, %v9662_v24, %v8459_v3  ;;  %v8466_v48 = vmul.f32 %v9664_v52, %v8465_v32  ;;  %v8121_v55 = vmul.f32 0.2, %v8085_v53  ;;  %vm8472_vm4 = vmor %vm8470_vm3, %vm8471_vm1 }
 0x6e1   : > { %v8751_v7 = vmul.f32 %v8463_v58, %v12584_v33 }
 0x6e2   : > { %v8467_v35 = vmul.f32 0.5, %v8466_v48  ;;  %v8236_v40 = vpop.xlane.xlu2 %8235  ;;  %v12767_v41 = vmax.f32 %v8085_v53, %v8121_v55 }
 0x6e3   : > { %8787 = vst.msk [vmem:[%s12682_s13 + $0x38] sm:$0xff] %vm527_vm2, %v8751_v7  ;;  %v8322_v51 = vmul.f32 %v8236_v40, %v11146_v29  ;;  %v7885_v45 = vpop.f32.mrf.mxu1  ;;  %v7941_v7 = vld [vmem:[#allocation3 + $0xe8] sm:$0xff] }
 0x6e4   : > { %v8468_v20 = vsub.f32 1.5, %v8467_v35  ;;  %v7975_v22 = vadd.f32 %v7939_v16, %v7885_v45  ;;  %v8193_v10 = vmul.f32 %v12767_v41, %v12767_v41 }
 0x6e5   : > { %v9666_v9 = vpop.eup %9665  ;;  %v8358_v30 = vadd.f32 1e-08, %v8322_v51  ;;  %v8046_v18 = vld [vmem:[#allocation3 + $0xd0] sm:$0xff] }
 0x6e6   : > { %v8469_v33 = vmul.f32 %v9664_v52, %v8468_v20  ;;  %v8475_v49 = vmul.f32 %v9666_v9, %v12758_v2  ;;  %8011 = vst.msk [vmem:[#allocation3 + $0xd8] sm:$0xff] %vm527_vm2, %v7975_v22  ;;  %v8279_v28 = vsel %vm527_vm2, %v8193_v10, 0.0  ;;  %v8086_v24 = vadd.f32 %v12518_v60, %v8046_v18 }
 0x6e7   : > { %9667 = vrsqrt.f32 %v8358_v30  ;;  %8280 = vadd.xlane.f32.xlu2 %v8279_v28  ;;  %vm8481_vm5 = vweird.f32 %v9666_v9  ;;  %vm8490_vm9 = vweird.f32 %v8358_v30 }
 0x6e8   : > { %v8473_v34 = vsel %vm8472_vm4, %v9664_v52, %v8469_v33  ;;  %v8476_v59 = vmul.f32 %v9666_v9, %v8475_v49  ;;  %v8122_v5 = vmul.f32 0.2, %v8086_v24  ;;  %vm8482_vm7 = vmor %vm8480_vm6, %vm8481_vm5 }
 0x6e9   : > { %v8752_v11 = vmul.f32 %v8473_v34, %v12592_v54 }
 0x6ea   : > { %v8477_v6 = vmul.f32 0.5, %v8476_v59  ;;  %v8239_v57 = vpop.xlane.xlu0 %8238  ;;  %v12782_v39 = vmax.f32 %v8086_v24, %v8122_v5 }
 0x6eb   : > { %8788 = vst.msk [vmem:[%s12682_s13 + $0x40] sm:$0xff] %vm527_vm2, %v8752_v11  ;;  %v8323_v12 = vmul.f32 %v8239_v57, %v11146_v29  ;;  %v7888_v26 = vpop.f32.mrf.mxu1  ;;  %v7942_v11 = vld [vmem:[#allocation3 + $0xf0] sm:$0xff] }
 0x6ec   : > { %v8478_v8 = vsub.f32 1.5, %v8477_v6  ;;  %v7976_v47 = vadd.f32 %v7940_v46, %v7888_v26  ;;  %v8194_v54 = vmul.f32 %v12782_v39, %v12782_v39 }
 0x6ed   : > { %v9668_v38 = vpop.eup %9667  ;;  %v12784_v60 = vadd.f32 1e-08, %v8323_v12  ;;  %v8047_v27 = vld [vmem:[#allocation3 + $0xd8] sm:$0xff] }
 0x6ee   : > { %v8479_v4 = vmul.f32 %v9666_v9, %v8478_v8  ;;  %v8485_v14 = vmul.f32 %v9668_v38, %v8358_v30  ;;  %8012 = vst.msk [vmem:[#allocation3 + $0xe0] sm:$0xff] %vm527_vm2, %v7976_v47  ;;  %v8087_v52 = vadd.f32 %v12793_v44, %v8047_v27  ;;  %v8282_v50 = vsel %vm527_vm2, %v8194_v54, 0.0 }
 0x6ef   : > { %9669 = vrsqrt.f32 %v12784_v60  ;;  %8283 = vadd.xlane.f32.xlu0 %v8282_v50  ;;  %vm8491_vm8 = vweird.f32 %v9668_v38  ;;  %vm8500_vm12 = vweird.f32 %v12784_v60 }
 0x6f0   : > { %v8483_v19 = vsel %vm8482_vm7, %v9666_v9, %v8479_v4  ;;  %v8486_v3 = vmul.f32 %v9668_v38, %v8485_v14  ;;  %v8123_v2 = vmul.f32 0.2, %v8087_v52  ;;  %vm8492_vm10 = vmor %vm8490_vm9, %vm8491_vm8 }
 0x6f1   : > { %v8753_v32 = vmul.f32 %v8483_v19, %v12600_v13 }
 0x6f2   : > { %v8487_v53 = vmul.f32 0.5, %v8486_v3  ;;  %v8242_v56 = vpop.xlane.xlu1 %8241  ;;  %v12799_v58 = vmax.f32 %v8087_v52, %v8123_v2 }
 0x6f3   : > { %8789 = vst.msk [vmem:[%s12682_s13 + $0x48] sm:$0xff] %vm527_vm2, %v8753_v32  ;;  %v8324_v48 = vmul.f32 %v8242_v56, %v11146_v29  ;;  %v7891_v55 = vpop.f32.mrf.mxu1  ;;  %v7943_v32 = vld [vmem:[#allocation3 + $0xf8] sm:$0xff] }
 0x6f4   : > { %v8488_v35 = vsub.f32 1.5, %v8487_v53  ;;  %v7977_v40 = vadd.f32 %v7941_v7, %v7891_v55  ;;  %v8195_v51 = vmul.f32 %v12799_v58, %v12799_v58 }
 0x6f5   : > { %v9670_v45 = vpop.eup %9669  ;;  %v8360_v16 = vadd.f32 1e-08, %v8324_v48  ;;  %v8048_v20 = vld [vmem:[#allocation3 + $0xe0] sm:$0xff] }
 0x6f6   : > { %v8489_v13 = vmul.f32 %v9668_v38, %v8488_v35  ;;  %v8495_v22 = vmul.f32 %v9670_v45, %v12784_v60  ;;  %8013 = vst.msk [vmem:[#allocation3 + $0xe8] sm:$0xff] %vm527_vm2, %v7977_v40  ;;  %v8285_v10 = vsel %vm527_vm2, %v8195_v51, 0.0  ;;  %v8088_v9 = vadd.f32 %v12793_v44, %v8048_v20 }
 0x6f7   : > { %9671 = vrsqrt.f32 %v8360_v16  ;;  %8286 = vadd.xlane.f32.xlu1 %v8285_v10  ;;  %vm8501_vm11 = vweird.f32 %v9670_v45  ;;  %vm8510_vm15 = vweird.f32 %v8360_v16 }
 0x6f8   : > { %v8493_v18 = vsel %vm8492_vm10, %v9668_v38, %v8489_v13  ;;  %v8496_v33 = vmul.f32 %v9670_v45, %v8495_v22  ;;  %v8124_v28 = vmul.f32 0.2, %v8088_v9  ;;  %vm8502_vm13 = vmor %vm8500_vm12, %vm8501_vm11 }
 0x6f9   : > { %v8754_v49 = vmul.f32 %v8493_v18, %v12608_v17 }
 0x6fa   : > { %v8497_v24 = vmul.f32 0.5, %v8496_v33  ;;  %v8245_v34 = vpop.xlane.xlu2 %8244  ;;  %v12814_v5 = vmax.f32 %v8088_v9, %v8124_v28 }
 0x6fb   : > { %8790 = vst.msk [vmem:[%s12682_s13 + $0x50] sm:$0xff] %vm527_vm2, %v8754_v49  ;;  %v8325_v30 = vmul.f32 %v8245_v34, %v11146_v29  ;;  %v7894_v59 = vpop.f32.mrf.mxu1  ;;  %v7944_v49 = vld [vmem:[#allocation3 + $0x100] sm:$0xff] }
 0x6fc   : > { %v8498_v6 = vsub.f32 1.5, %v8497_v24  ;;  %v7978_v57 = vadd.f32 %v7942_v11, %v7894_v59  ;;  %v8196_v46 = vmul.f32 %v12814_v5, %v12814_v5 }
 0x6fd   : > { %v9672_v12 = vpop.eup %9671  ;;  %v8361_v26 = vadd.f32 1e-08, %v8325_v30  ;;  %v8049_v17 = vld [vmem:[#allocation3 + $0xe8] sm:$0xff] }
 0x6fe   : > { %v8499_v8 = vmul.f32 %v9670_v45, %v8498_v6  ;;  %v8505_v47 = vmul.f32 %v9672_v12, %v8360_v16  ;;  %8014 = vst.msk [vmem:[#allocation3 + $0xf0] sm:$0xff] %vm527_vm2, %v7978_v57  ;;  %v8089_v38 = vadd.f32 %v12793_v44, %v8049_v17  ;;  %v8288_v54 = vsel %vm527_vm2, %v8196_v46, 0.0 }
 0x6ff   : > { %9673 = vrsqrt.f32 %v8361_v26  ;;  %8289 = vadd.xlane.f32.xlu2 %v8288_v54  ;;  %vm8511_vm14 = vweird.f32 %v9672_v12  ;;  %vm8520_vm3 = vweird.f32 %v8361_v26 }
 0x700   : > { %v8503_v27 = vsel %vm8502_vm13, %v9670_v45, %v8499_v8  ;;  %v8506_v4 = vmul.f32 %v9672_v12, %v8505_v47  ;;  %v8125_v14 = vmul.f32 0.2, %v8089_v38  ;;  %vm8512_vm0 = vmor %vm8510_vm15, %vm8511_vm14 }
 0x701   : > { %v8755_v52 = vmul.f32 %v8503_v27, %v12616_v61 }
 0x702   : > { %v8507_v50 = vmul.f32 0.5, %v8506_v4  ;;  %v8248_v19 = vpop.xlane.xlu0 %8247  ;;  %v12823_v3 = vmax.f32 %v8089_v38, %v8125_v14 }
 0x703   : > { %8791 = vst.msk [vmem:[%s12682_s13 + $0x58] sm:$0xff] %vm527_vm2, %v8755_v52  ;;  %v8326_v60 = vmul.f32 %v8248_v19, %v11146_v29  ;;  %v7897_v2 = vpop.f32.mrf.mxu1  ;;  %v7945_v52 = vld [vmem:[#allocation3 + $0x108] sm:$0xff] }
 0x704   : > { %v8508_v53 = vsub.f32 1.5, %v8507_v50  ;;  %v7979_v56 = vadd.f32 %v7943_v32, %v7897_v2  ;;  %v8197_v48 = vmul.f32 %v12823_v3, %v12823_v3 }
 0x705   : > { %v9674_v55 = vpop.eup %9673  ;;  %v8362_v7 = vadd.f32 1e-08, %v8326_v60  ;;  %v8050_v35 = vld [vmem:[#allocation3 + $0xf0] sm:$0xff] }
 0x706   : > { %v8509_v61 = vmul.f32 %v9672_v12, %v8508_v53  ;;  %v8515_v40 = vmul.f32 %v9674_v55, %v8361_v26  ;;  %8015 = vst.msk [vmem:[#allocation3 + $0xf8] sm:$0xff] %vm527_vm2, %v7979_v56  ;;  %v8291_v51 = vsel %vm527_vm2, %v8197_v48, 0.0  ;;  %v8090_v45 = vadd.f32 %v12793_v44, %v8050_v35 }
 0x707   : > { %9675 = vrsqrt.f32 %v8362_v7  ;;  %8292 = vadd.xlane.f32.xlu0 %v8291_v51  ;;  %vm8521_vm1 = vweird.f32 %v9674_v55  ;;  %vm8530_vm6 = vweird.f32 %v8362_v7 }
 0x708   : > { %v8513_v20 = vsel %vm8512_vm0, %v9672_v12, %v8509_v61  ;;  %v8516_v13 = vmul.f32 %v9674_v55, %v8515_v40  ;;  %v8126_v10 = vmul.f32 0.2, %v8090_v45  ;;  %vm8522_vm4 = vmor %vm8520_vm3, %vm8521_vm1 }
 0x709   : > { %v8756_v22 = vmul.f32 %v8513_v20, %v12624_v42 }
 0x70a   : > { %v8517_v9 = vmul.f32 0.5, %v8516_v13  ;;  %v8251_v18 = vpop.xlane.xlu1 %8250  ;;  %v12837_v28 = vmax.f32 %v8090_v45, %v8126_v10 }
 0x70b   : > { %8792 = vst.msk [vmem:[%s12682_s13 + $0x60] sm:$0xff] %vm527_vm2, %v8756_v22  ;;  %v8327_v16 = vmul.f32 %v8251_v18, %v11146_v29  ;;  %v7900_v33 = vpop.f32.mrf.mxu1  ;;  %v7946_v22 = vld [vmem:[#allocation3 + $0x110] sm:$0xff] }
 0x70c   : > { %v8518_v24 = vsub.f32 1.5, %v8517_v9  ;;  %v7980_v34 = vadd.f32 %v7944_v49, %v7900_v33  ;;  %v8198_v11 = vmul.f32 %v12837_v28, %v12837_v28 }
 0x70d   : > { %v9676_v30 = vpop.eup %9675  ;;  %v8363_v59 = vadd.f32 1e-08, %v8327_v16  ;;  %v8051_v42 = vld [vmem:[#allocation3 + $0xf8] sm:$0xff] }
 0x70e   : > { %v8519_v6 = vmul.f32 %v9674_v55, %v8518_v24  ;;  %v8525_v57 = vmul.f32 %v9676_v30, %v8362_v7  ;;  %8016 = vst.msk [vmem:[#allocation3 + $0x100] sm:$0xff] %vm527_vm2, %v7980_v34  ;;  %v8091_v12 = vadd.f32 %v12793_v44, %v8051_v42  ;;  %v8294_v46 = vsel %vm527_vm2, %v8198_v11, 0.0 }
 0x70f   : > { %9677 = vrsqrt.f32 %v8363_v59  ;;  %8295 = vadd.xlane.f32.xlu1 %v8294_v46  ;;  %vm8531_vm5 = vweird.f32 %v9676_v30  ;;  %vm8540_vm9 = vweird.f32 %v8363_v59 }
 0x710   : > { %v8523_v17 = vsel %vm8522_vm4, %v9674_v55, %v8519_v6  ;;  %v8526_v8 = vmul.f32 %v9676_v30, %v8525_v57  ;;  %v8127_v47 = vmul.f32 0.2, %v8091_v12  ;;  %vm8532_vm7 = vmor %vm8530_vm6, %vm8531_vm5 }
 0x711   : > { %v8757_v38 = vmul.f32 %v8523_v17, %v12632_v43 }
 0x712   : > { %v8527_v54 = vmul.f32 0.5, %v8526_v8  ;;  %v8254_v27 = vpop.xlane.xlu2 %8253  ;;  %v12845_v4 = vmax.f32 %v8091_v12, %v8127_v47  ;;  %v7947_v47 = vld [vmem:[#allocation3 + $0x118] sm:$0xff] }
 0x713   : > { %8793 = vst.msk [vmem:[%s12682_s13 + $0x68] sm:$0xff] %vm527_vm2, %v8757_v38  ;;  %v8328_v26 = vmul.f32 %v8254_v27, %v11146_v29  ;;  %v7903_v14 = vpop.f32.mrf.mxu1 }
 0x714   : > { %v8528_v50 = vsub.f32 1.5, %v8527_v54  ;;  %v7981_v19 = vadd.f32 %v7945_v52, %v7903_v14  ;;  %v8199_v60 = vmul.f32 %v12845_v4, %v12845_v4 }
 0x715   : > { %v9678_v2 = vpop.eup %9677  ;;  %v8364_v32 = vadd.f32 1e-08, %v8328_v26  ;;  %v8052_v53 = vld [vmem:[#allocation3 + $0x100] sm:$0xff] }
 0x716   : > { %v8529_v43 = vmul.f32 %v9676_v30, %v8528_v50  ;;  %v8535_v56 = vmul.f32 %v9678_v2, %v8363_v59  ;;  %8017 = vst.msk [vmem:[#allocation3 + $0x108] sm:$0xff] %vm527_vm2, %v7981_v19  ;;  %v8297_v48 = vsel %vm527_vm2, %v8199_v60, 0.0  ;;  %v8092_v55 = vadd.f32 %v12793_v44, %v8052_v53 }
 0x717   : > { %9679 = vrsqrt.f32 %v8364_v32  ;;  %8298 = vadd.xlane.f32.xlu2 %v8297_v48  ;;  %vm8541_vm8 = vweird.f32 %v9678_v2  ;;  %vm8550_vm12 = vweird.f32 %v8364_v32 }
 0x718   : > { %v8533_v35 = vsel %vm8532_vm7, %v9676_v30, %v8529_v43  ;;  %v8536_v61 = vmul.f32 %v9678_v2, %v8535_v56  ;;  %v8128_v51 = vmul.f32 0.2, %v8092_v55  ;;  %vm8542_vm10 = vmor %vm8540_vm9, %vm8541_vm8 }
 0x719   : > { %v8758_v40 = vmul.f32 %v8533_v35, %v12640_v63 }
 0x71a   : > { %v8537_v45 = vmul.f32 0.5, %v8536_v61  ;;  %v8257_v20 = vpop.xlane.xlu0 %8256  ;;  %v12859_v10 = vmax.f32 %v8092_v55, %v8128_v51 }
 0x71b   : > { %8794 = vst.msk [vmem:[%s12682_s13 + $0x70] sm:$0xff] %vm527_vm2, %v8758_v40  ;;  %v8329_v7 = vmul.f32 %v8257_v20, %v11146_v29  ;;  %v7906_v13 = vpop.f32.mrf.mxu1 }
 0x71c   : > { %v8538_v9 = vsub.f32 1.5, %v8537_v45  ;;  %v7982_v18 = vadd.f32 %v7946_v22, %v7906_v13  ;;  %v8200_v49 = vmul.f32 %v12859_v10, %v12859_v10 }
 0x71d   : > { %v9680_v16 = vpop.eup %9679  ;;  %v8365_v33 = vadd.f32 1e-08, %v8329_v7  ;;  %v8053_v63 = vld [vmem:[#allocation3 + $0x108] sm:$0xff] }
 0x71e   : > { %v8539_v24 = vmul.f32 %v9678_v2, %v8538_v9  ;;  %v8545_v34 = vmul.f32 %v9680_v16, %v8364_v32  ;;  %8018 = vst.msk [vmem:[#allocation3 + $0x110] sm:$0xff] %vm527_vm2, %v7982_v18  ;;  %v8093_v30 = vadd.f32 %v12793_v44, %v8053_v63  ;;  %v8300_v11 = vsel %vm527_vm2, %v8200_v49, 0.0 }
 0x71f   : > { %9681 = vrsqrt.f32 %v8365_v33  ;;  %8301 = vadd.xlane.f32.xlu0 %v8300_v11  ;;  %vm8551_vm11 = vweird.f32 %v9680_v16  ;;  %vm8560_vm15 = vweird.f32 %v8365_v33 }
 0x720   : > { %v8543_v42 = vsel %vm8542_vm10, %v9678_v2, %v8539_v24  ;;  %v8546_v6 = vmul.f32 %v9680_v16, %v8545_v34  ;;  %v8129_v57 = vmul.f32 0.2, %v8093_v30  ;;  %vm8552_vm13 = vmor %vm8550_vm12, %vm8551_vm11 }
 0x721   : > { %v8759_v12 = vmul.f32 %v8543_v42, %v12648_v37 }
 0x722   : > { %v8547_v46 = vmul.f32 0.5, %v8546_v6  ;;  %v12867_v17 = vmax.f32 %v8093_v30, %v8129_v57  ;;  %v8260_v59 = vpop.xlane.xlu1 %8259 }
 0x723   : > { %8795 = vst.msk [vmem:[%s12682_s13 + $0x78] sm:$0xff] %vm527_vm2, %v8759_v12  ;;  %v7909_v8 = vpop.f32.mrf.mxu1  ;;  %v8330_v54 = vmul.f32 %v8260_v59, %v11146_v29 }
 0x724   : > { %v8548_v38 = vsub.f32 1.5, %v8547_v46  ;;  %v7983_v27 = vadd.f32 %v7947_v47, %v7909_v8  ;;  %v8201_v26 = vmul.f32 %v12867_v17, %v12867_v17 }
 0x725   : > { %v9682_v14 = vpop.eup %9681  ;;  %v8054_v52 = vld [vmem:[#allocation3 + $0x110] sm:$0xff]  ;;  %v8366_v19 = vadd.f32 1e-08, %v8330_v54 }
 0x726   : > { %v8549_v50 = vmul.f32 %v9680_v16, %v8548_v38  ;;  %v8555_v37 = vmul.f32 %v9682_v14, %v8365_v33  ;;  %8019 = vst.msk [vmem:[#allocation3 + $0x118] sm:$0xff] %vm527_vm2, %v7983_v27  ;;  %v8303_v60 = vsel %vm527_vm2, %v8201_v26, 0.0  ;;  %v8094_v2 = vadd.f32 %v12793_v44, %v8054_v52 }
 0x727   : > { %9683 = vrsqrt.f32 %v8366_v19  ;;  %8304 = vadd.xlane.f32.xlu1 %v8303_v60  ;;  %vm8561_vm14 = vweird.f32 %v9682_v14  ;;  %vm8570_vm3 = vweird.f32 %v8366_v19 }
 0x728   : > { %v8553_v53 = vsel %vm8552_vm13, %v9680_v16, %v8549_v50  ;;  %v8556_v43 = vmul.f32 %v9682_v14, %v8555_v37  ;;  %v8130_v48 = vmul.f32 0.2, %v8094_v2  ;;  %vm8562_vm0 = vmor %vm8560_vm15, %vm8561_vm14 }
 0x729   : > { %v8760_v56 = vmul.f32 %v8553_v53, %v12657_v1 }
 0x72a   : > { %v8557_v55 = vmul.f32 0.5, %v8556_v43  ;;  %v8263_v35 = vpop.xlane.xlu2 %8262  ;;  %v12882_v61 = vmax.f32 %v8094_v2, %v8130_v48 }
 0x72b   : > { %8796 = vst.msk [vmem:[%s12682_s13 + $0x80] sm:$0xff] %vm527_vm2, %v8760_v56  ;;  %v8331_v32 = vmul.f32 %v8263_v35, %v11146_v29 }
 0x72c   : > { %v8558_v40 = vsub.f32 1.5, %v8557_v55  ;;  %v8202_v45 = vmul.f32 %v12882_v61, %v12882_v61 }
 0x72d   : > { %v8367_v51 = vadd.f32 1e-08, %v8331_v32  ;;  %v8055_v20 = vld [vmem:[#allocation3 + $0x118] sm:$0xff]  ;;  %v9684_v7 = vpop.eup %9683 }
 0x72e   : > { %v8559_v13 = vmul.f32 %v9682_v14, %v8558_v40  ;;  %v8095_v1 = vadd.f32 %v12793_v44, %v8055_v20  ;;  %v8565_v22 = vmul.f32 %v9684_v7, %v8366_v19  ;;  %v8306_v18 = vsel %vm527_vm2, %v8202_v45, 0.0 }
 0x72f   : > { %9685 = vrsqrt.f32 %v8367_v51  ;;  %8307 = vadd.xlane.f32.xlu2 %v8306_v18  ;;  %vm8571_vm1 = vweird.f32 %v9684_v7  ;;  %vm8580_vm6 = vweird.f32 %v8367_v51 }
 0x730   : > { %v8563_v9 = vsel %vm8562_vm0, %v9682_v14, %v8559_v13  ;;  %v8131_v16 = vmul.f32 0.2, %v8095_v1  ;;  %v8566_v63 = vmul.f32 %v9684_v7, %v8565_v22  ;;  %vm8572_vm4 = vmor %vm8570_vm3, %vm8571_vm1 }
 0x731   : > { %v8761_v49 = vmul.f32 %v8563_v9, %v12666_v62 }
 0x732   : > { %v12889_v24 = vmax.f32 %v8095_v1, %v8131_v16  ;;  %v8567_v34 = vmul.f32 0.5, %v8566_v63  ;;  %v8266_v30 = vpop.xlane.xlu0 %8265 }
 0x733   : > { %8797 = vst.msk [vmem:[%s12682_s13 + $0x88] sm:$0xff] %vm527_vm2, %v8761_v49  ;;  %v8332_v33 = vmul.f32 %v8266_v30, %v11146_v29 }
 0x734   : > { %v8203_v44 = vmul.f32 %v12889_v24, %v12889_v24  ;;  %v8568_v42 = vsub.f32 1.5, %v8567_v34 }
 0x735   : > { %v9686_v11 = vpop.eup %9685  ;;  %v8368_v57 = vadd.f32 1e-08, %v8332_v33 }
 0x736   : > { %v8575_v6 = vmul.f32 %v9686_v11, %v8367_v51  ;;  %v8309_v62 = vsel %vm527_vm2, %v8203_v44, 0.0  ;;  %v8569_v12 = vmul.f32 %v9684_v7, %v8568_v42  ;;  %vm8581_vm5 = vweird.f32 %v9686_v11 }
 0x737   : > { %8310 = vadd.xlane.f32.xlu0 %v8309_v62  ;;  %9687 = vrsqrt.f32 %v8368_v57  ;;  %vm8582_vm7 = vmor %vm8580_vm6, %vm8581_vm5  ;;  %vm8590_vm9 = vweird.f32 %v8368_v57 }
 0x738   : > { %v8576_v46 = vmul.f32 %v9686_v11, %v8575_v6  ;;  %v8573_v59 = vsel %vm8572_vm4, %v9684_v7, %v8569_v12 }
 0x739   : > { %v8762_v8 = vmul.f32 %v8573_v59, %v12688_v15 }
 0x73a   : > { %v8577_v47 = vmul.f32 0.5, %v8576_v46  ;;  %v8269_v38 = vpop.xlane.xlu1 %8268 }
 0x73b   : > { %v8333_v54 = vmul.f32 %v8269_v38, %v11146_v29  ;;  %8798 = vst.msk [vmem:[%s12682_s13 + $0x90] sm:$0xff] %vm527_vm2, %v8762_v8 }
 0x73c   : > { %v8578_v27 = vsub.f32 1.5, %v8577_v47 }
 0x73d   : > { %v8369_v26 = vadd.f32 1e-08, %v8333_v54  ;;  %v9688_v14 = vpop.eup %9687 }
 0x73e   : > { %v8579_v52 = vmul.f32 %v9686_v11, %v8578_v27  ;;  %v8585_v50 = vmul.f32 %v9688_v14, %v8368_v57  ;;  %vm8591_vm8 = vweird.f32 %v9688_v14 }
 0x73f   : > { %9689 = vrsqrt.f32 %v8369_v26  ;;  %vm8592_vm10 = vmor %vm8590_vm9, %vm8591_vm8  ;;  %vm8600_vm12 = vweird.f32 %v8369_v26 }
 0x740   : > { %v8583_v37 = vsel %vm8582_vm7, %v9686_v11, %v8579_v52  ;;  %v8586_v15 = vmul.f32 %v9688_v14, %v8585_v50 }
 0x741   : > { %v8763_v19 = vmul.f32 %v8583_v37, %v12697_v0 }
 0x742   : > { %v8587_v60 = vmul.f32 0.5, %v8586_v15  ;;  %v8272_v2 = vpop.xlane.xlu2 %8271 }
 0x743   : > { %8799 = vst.msk [vmem:[%s12682_s13 + $0x98] sm:$0xff] %vm527_vm2, %v8763_v19  ;;  %v8334_v53 = vmul.f32 %v8272_v2, %v11146_v29 }
 0x744   : > { %v8588_v56 = vsub.f32 1.5, %v8587_v60 }
 0x745   : > { %v9690_v43 = vpop.eup %9689  ;;  %v8370_v55 = vadd.f32 1e-08, %v8334_v53 }
 0x746   : > { %v8595_v48 = vmul.f32 %v9690_v43, %v8369_v26  ;;  %v8589_v35 = vmul.f32 %v9688_v14, %v8588_v56  ;;  %vm8601_vm11 = vweird.f32 %v9690_v43 }
 0x747   : > { %9691 = vrsqrt.f32 %v8370_v55  ;;  %vm8602_vm13 = vmor %vm8600_vm12, %vm8601_vm11  ;;  %vm8610_vm15 = vweird.f32 %v8370_v55 }
 0x748   : > { %v8596_v32 = vmul.f32 %v9690_v43, %v8595_v48  ;;  %v8593_v40 = vsel %vm8592_vm10, %v9688_v14, %v8589_v35 }
 0x749   : > { %v8764_v0 = vmul.f32 %v8593_v40, %v12712_v23 }
 0x74a   : > { %v8597_v51 = vmul.f32 0.5, %v8596_v32  ;;  %v8275_v45 = vpop.xlane.xlu0 %8274 }
 0x74b   : > { %v8335_v20 = vmul.f32 %v8275_v45, %v11146_v29  ;;  %8800 = vst.msk [vmem:[%s12682_s13 + $0xa0] sm:$0xff] %vm527_vm2, %v8764_v0 }
 0x74c   : > { %v8598_v7 = vsub.f32 1.5, %v8597_v51 }
 0x74d   : > { %v8371_v13 = vadd.f32 1e-08, %v8335_v20  ;;  %v9692_v1 = vpop.eup %9691 }
 0x74e   : > { %v8599_v22 = vmul.f32 %v9690_v43, %v8598_v7  ;;  %v8605_v9 = vmul.f32 %v9692_v1, %v8370_v55  ;;  %vm8611_vm14 = vweird.f32 %v9692_v1 }
 0x74f   : > { %9693 = vrsqrt.f32 %v8371_v13  ;;  %vm8612_vm0 = vmor %vm8610_vm15, %vm8611_vm14  ;;  %vm8620_vm3 = vweird.f32 %v8371_v13 }
 0x750   : > { %v8603_v18 = vsel %vm8602_vm13, %v9690_v43, %v8599_v22  ;;  %v8606_v23 = vmul.f32 %v9692_v1, %v8605_v9 }
 0x751   : > { %v8765_v16 = vmul.f32 %v8603_v18, %v12720_v25 }
 0x752   : > { %v8607_v49 = vmul.f32 0.5, %v8606_v23  ;;  %v8278_v63 = vpop.xlane.xlu1 %8277 }
 0x753   : > { %8801 = vst.msk [vmem:[%s12682_s13 + $0xa8] sm:$0xff] %vm527_vm2, %v8765_v16  ;;  %v8336_v34 = vmul.f32 %v8278_v63, %v11146_v29 }
 0x754   : > { %v8608_v33 = vsub.f32 1.5, %v8607_v49 }
 0x755   : > { %v9694_v30 = vpop.eup %9693  ;;  %v8372_v11 = vadd.f32 1e-08, %v8336_v34 }
 0x756   : > { %v8615_v44 = vmul.f32 %v9694_v30, %v8371_v13  ;;  %v8609_v42 = vmul.f32 %v9692_v1, %v8608_v33  ;;  %vm8621_vm1 = vweird.f32 %v9694_v30 }
 0x757   : > { %9695 = vrsqrt.f32 %v8372_v11  ;;  %vm8622_vm4 = vmor %vm8620_vm3, %vm8621_vm1  ;;  %vm8630_vm6 = vweird.f32 %v8372_v11 }
 0x758   : > { %v8616_v6 = vmul.f32 %v9694_v30, %v8615_v44  ;;  %v8613_v57 = vsel %vm8612_vm0, %v9692_v1, %v8609_v42 }
 0x759   : > { %v8766_v25 = vmul.f32 %v8613_v57, %v12734_v31 }
 0x75a   : > { %v8617_v62 = vmul.f32 0.5, %v8616_v6  ;;  %v8281_v12 = vpop.xlane.xlu2 %8280 }
 0x75b   : > { %v8337_v46 = vmul.f32 %v8281_v12, %v11146_v29  ;;  %8802 = vst.msk [vmem:[%s12682_s13 + $0xb0] sm:$0xff] %vm527_vm2, %v8766_v25 }
 0x75c   : > { %v8618_v59 = vsub.f32 1.5, %v8617_v62 }
 0x75d   : > { %v8373_v8 = vadd.f32 1e-08, %v8337_v46  ;;  %v9696_v47 = vpop.eup %9695 }
 0x75e   : > { %v8619_v38 = vmul.f32 %v9694_v30, %v8618_v59  ;;  %v8625_v54 = vmul.f32 %v9696_v47, %v8372_v11  ;;  %vm8631_vm5 = vweird.f32 %v9696_v47 }
 0x75f   : > { %9697 = vrsqrt.f32 %v8373_v8  ;;  %vm8632_vm7 = vmor %vm8630_vm6, %vm8631_vm5  ;;  %vm8640_vm9 = vweird.f32 %v8373_v8 }
 0x760   : > { %v8623_v27 = vsel %vm8622_vm4, %v9694_v30, %v8619_v38  ;;  %v8626_v31 = vmul.f32 %v9696_v47, %v8625_v54 }
 0x761   : > { %v8767_v26 = vmul.f32 %v8623_v27, %v12742_v36 }
 0x762   : > { %v8627_v14 = vmul.f32 0.5, %v8626_v31  ;;  %v8284_v52 = vpop.xlane.xlu0 %8283 }
 0x763   : > { %8803 = vst.msk [vmem:[%s12682_s13 + $0xb8] sm:$0xff] %vm527_vm2, %v8767_v26  ;;  %v8338_v50 = vmul.f32 %v8284_v52, %v11146_v29 }
 0x764   : > { %v8628_v19 = vsub.f32 1.5, %v8627_v14 }
 0x765   : > { %v9698_v37 = vpop.eup %9697  ;;  %v8374_v60 = vadd.f32 1e-08, %v8338_v50 }
 0x766   : > { %v8635_v15 = vmul.f32 %v9698_v37, %v8373_v8  ;;  %v8629_v2 = vmul.f32 %v9696_v47, %v8628_v19  ;;  %vm8641_vm8 = vweird.f32 %v9698_v37 }
 0x767   : > { %9699 = vrsqrt.f32 %v8374_v60  ;;  %vm8642_vm10 = vmor %vm8640_vm9, %vm8641_vm8  ;;  %vm8650_vm12 = vweird.f32 %v8374_v60 }
 0x768   : > { %v8636_v53 = vmul.f32 %v9698_v37, %v8635_v15  ;;  %v8633_v43 = vsel %vm8632_vm7, %v9696_v47, %v8629_v2 }
 0x769   : > { %v8768_v36 = vmul.f32 %v8633_v43, %v12756_v21 }
 0x76a   : > { %v8637_v56 = vmul.f32 0.5, %v8636_v53  ;;  %v8287_v48 = vpop.xlane.xlu1 %8286 }
 0x76b   : > { %v8339_v55 = vmul.f32 %v8287_v48, %v11146_v29  ;;  %8804 = vst.msk [vmem:[%s12682_s13 + $0xc0] sm:$0xff] %vm527_vm2, %v8768_v36 }
 0x76c   : > { %v8638_v35 = vsub.f32 1.5, %v8637_v56 }
 0x76d   : > { %v8375_v32 = vadd.f32 1e-08, %v8339_v55  ;;  %v9700_v40 = vpop.eup %9699 }
 0x76e   : > { %v8639_v0 = vmul.f32 %v9698_v37, %v8638_v35  ;;  %v8645_v51 = vmul.f32 %v9700_v40, %v8374_v60  ;;  %vm8651_vm11 = vweird.f32 %v9700_v40 }
 0x76f   : > { %9701 = vrsqrt.f32 %v8375_v32  ;;  %vm8652_vm13 = vmor %vm8650_vm12, %vm8651_vm11  ;;  %vm8660_vm15 = vweird.f32 %v8375_v32 }
 0x770   : > { %v8643_v45 = vsel %vm8642_vm10, %v9698_v37, %v8639_v0  ;;  %v8646_v21 = vmul.f32 %v9700_v40, %v8645_v51 }
 0x771   : > { %v8769_v20 = vmul.f32 %v8643_v45, %v12767_v41 }
 0x772   : > { %v8647_v7 = vmul.f32 0.5, %v8646_v21  ;;  %v8290_v13 = vpop.xlane.xlu2 %8289 }
 0x773   : > { %8805 = vst.msk [vmem:[%s12682_s13 + $0xc8] sm:$0xff] %vm527_vm2, %v8769_v20  ;;  %v8340_v1 = vmul.f32 %v8290_v13, %v11146_v29 }
 0x774   : > { %v8648_v9 = vsub.f32 1.5, %v8647_v7 }
 0x775   : > { %v9702_v22 = vpop.eup %9701  ;;  %v8376_v16 = vadd.f32 1e-08, %v8340_v1 }
 0x776   : > { %v8655_v18 = vmul.f32 %v9702_v22, %v8375_v32  ;;  %v8649_v23 = vmul.f32 %v9700_v40, %v8648_v9  ;;  %vm8661_vm14 = vweird.f32 %v9702_v22 }
 0x777   : > { %9703 = vrsqrt.f32 %v8376_v16  ;;  %vm8662_vm0 = vmor %vm8660_vm15, %vm8661_vm14  ;;  %vm8670_vm3 = vweird.f32 %v8376_v16 }
 0x778   : > { %v8656_v49 = vmul.f32 %v9702_v22, %v8655_v18  ;;  %v8653_v63 = vsel %vm8652_vm13, %v9700_v40, %v8649_v23 }
 0x779   : > { %v8770_v41 = vmul.f32 %v8653_v63, %v12782_v39 }
 0x77a   : > { %v8657_v34 = vmul.f32 0.5, %v8656_v49  ;;  %v8293_v30 = vpop.xlane.xlu0 %8292 }
 0x77b   : > { %v8341_v33 = vmul.f32 %v8293_v30, %v11146_v29  ;;  %8806 = vst.msk [vmem:[%s12682_s13 + $0xd0] sm:$0xff] %vm527_vm2, %v8770_v41 }
 0x77c   : > { %v8658_v44 = vsub.f32 1.5, %v8657_v34 }
 0x77d   : > { %v8377_v11 = vadd.f32 1e-08, %v8341_v33  ;;  %v9704_v42 = vpop.eup %9703 }
 0x77e   : > { %v8659_v6 = vmul.f32 %v9702_v22, %v8658_v44  ;;  %v8665_v57 = vmul.f32 %v9704_v42, %v8376_v16  ;;  %vm8671_vm1 = vweird.f32 %v9704_v42 }
 0x77f   : > { %9705 = vrsqrt.f32 %v8377_v11  ;;  %vm8672_vm4 = vmor %vm8670_vm3, %vm8671_vm1  ;;  %vm8680_vm6 = vweird.f32 %v8377_v11 }
 0x780   : > { %v8663_v25 = vsel %vm8662_vm0, %v9702_v22, %v8659_v6  ;;  %v8666_v39 = vmul.f32 %v9704_v42, %v8665_v57 }
 0x781   : > { %v8771_v62 = vmul.f32 %v8663_v25, %v12799_v58 }
 0x782   : > { %v8667_v12 = vmul.f32 0.5, %v8666_v39  ;;  %v8296_v46 = vpop.xlane.xlu1 %8295 }
 0x783   : > { %8807 = vst.msk [vmem:[%s12682_s13 + $0xd8] sm:$0xff] %vm527_vm2, %v8771_v62  ;;  %v8342_v59 = vmul.f32 %v8296_v46, %v11146_v29 }
 0x784   : > { %v8668_v47 = vsub.f32 1.5, %v8667_v12 }
 0x785   : > { %v9706_v8 = vpop.eup %9705  ;;  %v8378_v54 = vadd.f32 1e-08, %v8342_v59 }
 0x786   : > { %v8675_v38 = vmul.f32 %v9706_v8, %v8377_v11  ;;  %v8669_v27 = vmul.f32 %v9704_v42, %v8668_v47  ;;  %vm8681_vm5 = vweird.f32 %v9706_v8 }
 0x787   : > { %9707 = vrsqrt.f32 %v8378_v54  ;;  %vm8682_vm7 = vmor %vm8680_vm6, %vm8681_vm5  ;;  %vm8690_vm9 = vweird.f32 %v8378_v54 }
 0x788   : > { %v8676_v26 = vmul.f32 %v9706_v8, %v8675_v38  ;;  %v8673_v31 = vsel %vm8672_vm4, %v9704_v42, %v8669_v27 }
 0x789   : > { %v8772_v58 = vmul.f32 %v8673_v31, %v12814_v5 }
 0x78a   : > { %v8677_v14 = vmul.f32 0.5, %v8676_v26  ;;  %v8299_v52 = vpop.xlane.xlu2 %8298 }
 0x78b   : > { %v8343_v50 = vmul.f32 %v8299_v52, %v11146_v29  ;;  %8808 = vst.msk [vmem:[%s12682_s13 + $0xe0] sm:$0xff] %vm527_vm2, %v8772_v58 }
 0x78c   : > { %v8678_v37 = vsub.f32 1.5, %v8677_v14 }
 0x78d   : > { %v8379_v19 = vadd.f32 1e-08, %v8343_v50  ;;  %v9708_v15 = vpop.eup %9707 }
 0x78e   : > { %v8679_v60 = vmul.f32 %v9706_v8, %v8678_v37  ;;  %v8685_v2 = vmul.f32 %v9708_v15, %v8378_v54  ;;  %vm8691_vm8 = vweird.f32 %v9708_v15 }
 0x78f   : > { %9709 = vrsqrt.f32 %v8379_v19  ;;  %vm8692_vm10 = vmor %vm8690_vm9, %vm8691_vm8  ;;  %vm8700_vm12 = vweird.f32 %v8379_v19 }
 0x790   : > { %v8683_v53 = vsel %vm8682_vm7, %v9706_v8, %v8679_v60  ;;  %v8686_v5 = vmul.f32 %v9708_v15, %v8685_v2 }
 0x791   : > { %v8773_v43 = vmul.f32 %v8683_v53, %v12823_v3 }
 0x792   : > { %v8687_v36 = vmul.f32 0.5, %v8686_v5  ;;  %v8302_v56 = vpop.xlane.xlu0 %8301 }
 0x793   : > { %8809 = vst.msk [vmem:[%s12682_s13 + $0xe8] sm:$0xff] %vm527_vm2, %v8773_v43  ;;  %v8344_v48 = vmul.f32 %v8302_v56, %v11146_v29 }
 0x794   : > { %v8688_v35 = vsub.f32 1.5, %v8687_v36 }
 0x795   : > { %v9710_v55 = vpop.eup %9709  ;;  %v8380_v40 = vadd.f32 1e-08, %v8344_v48 }
 0x796   : > { %v8695_v32 = vmul.f32 %v9710_v55, %v8379_v19  ;;  %v8689_v0 = vmul.f32 %v9708_v15, %v8688_v35  ;;  %vm8701_vm11 = vweird.f32 %v9710_v55 }
 0x797   : > { %9711 = vrsqrt.f32 %v8380_v40  ;;  %vm8702_vm13 = vmor %vm8700_vm12, %vm8701_vm11  ;;  %vm8710_vm15 = vweird.f32 %v8380_v40 }
 0x798   : > { %v8696_v51 = vmul.f32 %v9710_v55, %v8695_v32  ;;  %v8693_v45 = vsel %vm8692_vm10, %v9708_v15, %v8689_v0 }
 0x799   : > { %v8774_v3 = vmul.f32 %v8693_v45, %v12837_v28 }
 0x79a   : > { %v8697_v20 = vmul.f32 0.5, %v8696_v51  ;;  %v8305_v21 = vpop.xlane.xlu1 %8304 }
 0x79b   : > { %8810 = vst.msk [vmem:[%s12682_s13 + $0xf0] sm:$0xff] %vm527_vm2, %v8774_v3  ;;  %v8345_v13 = vmul.f32 %v8305_v21, %v11146_v29 }
 0x79c   : > { %v8698_v7 = vsub.f32 1.5, %v8697_v20 }
 0x79d   : > { %v9712_v1 = vpop.eup %9711  ;;  %v8381_v9 = vadd.f32 1e-08, %v8345_v13 }
 0x79e   : > { %v8699_v22 = vmul.f32 %v9710_v55, %v8698_v7  ;;  %v8705_v18 = vmul.f32 %v9712_v1, %v8380_v40  ;;  %vm8711_vm14 = vweird.f32 %v9712_v1 }
 0x79f   : > { %9713 = vrsqrt.f32 %v8381_v9  ;;  %vm8712_vm0 = vmor %vm8710_vm15, %vm8711_vm14  ;;  %vm8720_vm3 = vweird.f32 %v8381_v9 }
 0x7a0   : > { %v8703_v16 = vsel %vm8702_vm13, %v9710_v55, %v8699_v22  ;;  %v8706_v28 = vmul.f32 %v9712_v1, %v8705_v18 }
 0x7a1   : > { %v8775_v23 = vmul.f32 %v8703_v16, %v12845_v4 }
 0x7a2   : > { %v8707_v49 = vmul.f32 0.5, %v8706_v28  ;;  %v8308_v63 = vpop.xlane.xlu2 %8307 }
 0x7a3   : > { %8811 = vst.msk [vmem:[%s12682_s13 + $0xf8] sm:$0xff] %vm527_vm2, %v8775_v23  ;;  %v8346_v34 = vmul.f32 %v8308_v63, %v11146_v29 }
 0x7a4   : > { %v8708_v41 = vsub.f32 1.5, %v8707_v49 }
 0x7a5   : > { %v9714_v30 = vpop.eup %9713  ;;  %v8382_v11 = vadd.f32 1e-08, %v8346_v34 }
 0x7a6   : > { %v8709_v33 = vmul.f32 %v9712_v1, %v8708_v41  ;;  %v8715_v44 = vmul.f32 %v9714_v30, %v8381_v9  ;;  %vm8721_vm1 = vweird.f32 %v9714_v30 }
 0x7a7   : > { %9715 = vrsqrt.f32 %v8382_v11  ;;  %vm8722_vm4 = vmor %vm8720_vm3, %vm8721_vm1  ;;  %vm8730_vm6 = vweird.f32 %v8382_v11 }
 0x7a8   : > { %v8713_v42 = vsel %vm8712_vm0, %v9712_v1, %v8709_v33  ;;  %v8716_v6 = vmul.f32 %v9714_v30, %v8715_v44 }
 0x7a9   : > { %v8776_v4 = vmul.f32 %v8713_v42, %v12859_v10 }
 0x7aa   : > { %v8311_v57 = vpop.xlane.xlu0 %8310  ;;  %v8717_v25 = vmul.f32 0.5, %v8716_v6 }
 0x7ab   : > { %v8347_v62 = vmul.f32 %v8311_v57, %v11146_v29  ;;  %8812 = vst.msk [vmem:[%s12682_s13 + $0x100] sm:$0xff] %vm527_vm2, %v8776_v4 }
 0x7ac   : > { %v8718_v39 = vsub.f32 1.5, %v8717_v25 }
 0x7ad   : > { %v8383_v12 = vadd.f32 1e-08, %v8347_v62  ;;  %v9716_v46 = vpop.eup %9715 }
 0x7ae   : > { %v8719_v59 = vmul.f32 %v9714_v30, %v8718_v39  ;;  %v8725_v8 = vmul.f32 %v9716_v46, %v8382_v11  ;;  %vm8731_vm5 = vweird.f32 %v9716_v46 }
 0x7af   : > { %9717 = vrsqrt.f32 %v8383_v12  ;;  %vm8732_vm7 = vmor %vm8730_vm6, %vm8731_vm5  ;;  %vm8740_vm9 = vweird.f32 %v8383_v12 }
 0x7b0   : > { %v8723_v47 = vsel %vm8722_vm4, %v9714_v30, %v8719_v59  ;;  %v8726_v10 = vmul.f32 %v9716_v46, %v8725_v8 }
 0x7b1   : > { %v8777_v38 = vmul.f32 %v8723_v47, %v12867_v17 }
 0x7b2   : > { %v8727_v54 = vmul.f32 0.5, %v8726_v10 }
 0x7b3   : > { %8813 = vst.msk [vmem:[%s12682_s13 + $0x108] sm:$0xff] %vm527_vm2, %v8777_v38 }
 0x7b4   : > { %v8728_v27 = vsub.f32 1.5, %v8727_v54 }
 0x7b5   : > { %v9718_v29 = vpop.eup %9717 }
 0x7b6   : > { %v8735_v26 = vmul.f32 %v9718_v29, %v8383_v12  ;;  %v8729_v31 = vmul.f32 %v9716_v46, %v8728_v27  ;;  %vm8741_vm8 = vweird.f32 %v9718_v29 }
 0x7b7   : > { %vm8742_vm10 = vmor %vm8740_vm9, %vm8741_vm8 }
 0x7b8   : > { %v8736_v58 = vmul.f32 %v9718_v29, %v8735_v26  ;;  %v8733_v14 = vsel %vm8732_vm7, %v9716_v46, %v8729_v31 }
 0x7b9   : > { %v8778_v50 = vmul.f32 %v8733_v14, %v12882_v61 }
 0x7ba   : > { %v8737_v52 = vmul.f32 0.5, %v8736_v58 }
 0x7bb   : > { %8814 = vst.msk [vmem:[%s12682_s13 + $0x110] sm:$0xff] %vm527_vm2, %v8778_v50 }
 0x7bc   : > { %v8738_v37 = vsub.f32 1.5, %v8737_v52 }
 0x7be   : > { %v8739_v17 = vmul.f32 %v9718_v29, %v8738_v37 }
 0x7c0   : > { %v8743_v19 = vsel %vm8742_vm10, %v9718_v29, %v8739_v17 }
 0x7c1   : > { %v8779_v15 = vmul.f32 %v8743_v19, %v12889_v24 }
 0x7c3   : > { %8815 = vst.msk [vmem:[%s12682_s13 + $0x118] sm:$0xff] %vm527_vm2, %v8779_v15 }
 0x7c4 PF: > { %s16_s21 = sadd.s32 1, %s9728_s21  }
 0x7c5   : > { %p13_p4 = scmp.ge.s32.totalorder %s16_s21, 4  }
 0x7c7   :  { %15 = sbr.rel (!%p13_p4) target bundleno = 1 (0x1), region = 90 }

</bundles_post_ra>
